<compile_context>
chip_gen: v6e
topology: v6e:2x2x1
jax: 0.10.0
libtpu: 0.0.40
codegen_flags: <defaults>
</compile_context>

<pallas_src>
import functools
import math

import jax
import jax.numpy as jnp
from jax.experimental import pallas as pl
from jax.experimental.pallas import tpu as pltpu


# ----------------------------------------------------------------------------
# Single fused kernel: one grid step == one batch sample.
# ----------------------------------------------------------------------------
def _inception_kernel(x_ref, wa_ref, sha_ref, wbig_ref, shbig_ref,
                      o_ref, xpad_ref, ypad_ref):
    Tp, Hp, Wp, Cin = xpad_ref.shape
    T, H, W = Tp - 2, Hp - 2, Wp - 2
    THW = T * H * W
    Cy = wa_ref.shape[1]              # o1 + o3 channels of fused 1x1x1 stage
    mxu_dtype = wa_ref.dtype          # f32, or bf16 on v6e / v7x

    xf = x_ref[0]                                     # (THW, Cin), f32
    x4 = xf.reshape(T, H, W, Cin)

    # --- Stage A: fused 1x1x1 convs b1a | b2a (BN scale folded into wa) ------
    y1 = jnp.dot(xf.astype(mxu_dtype), wa_ref[...],
                 preferred_element_type=jnp.float32)
    y1 = jnp.maximum(y1 + sha_ref[...], 0.0)          # (THW, Cy), f32

    # --- TF-SAME zero padding in VMEM scratch (memset + interior copy) -------
    xpad_ref[...] = jnp.zeros_like(xpad_ref)
    ypad_ref[...] = jnp.zeros_like(ypad_ref)
    xpad_ref[1:T + 1, 1:H + 1, 1:W + 1, :] = x4
    ypad_ref[1:T + 1, 1:H + 1, 1:W + 1, :] = y1.reshape(T, H, W, Cy)

    # --- Branch 3 pool: separable 3x3x3 zero-padded max (9 slices, 6 maxes) --
    xp = xpad_ref[...]
    mw = jnp.maximum(jnp.maximum(xp[:, :, 0:W, :], xp[:, :, 1:W + 1, :]),
                     xp[:, :, 2:W + 2, :])
    mh = jnp.maximum(jnp.maximum(mw[:, 0:H, :, :], mw[:, 1:H + 1, :, :]),
                     mw[:, 2:H + 2, :, :])
    mt = jnp.maximum(jnp.maximum(mh[0:T], mh[1:T + 1]), mh[2:T + 2])
    pooled = mt.reshape(THW, Cin)

    # --- im2col (shared by both 3x3x3 convs) + block-diagonal fused matmul ---
    # Columns: [ x | 27 shifted (b1a|b2a) windows | pooled x ]  -> K = Cin+27*Cy+Cin
    yp = ypad_ref[...]
    cols = [xf.astype(mxu_dtype)]
    for dt in range(3):
        for dh in range(3):
            for dw in range(3):
                win = yp[dt:dt + T, dh:dh + H, dw:dw + W, :]
                cols.append(win.reshape(THW, Cy).astype(mxu_dtype))
    cols.append(pooled.astype(mxu_dtype))
    a_big = jnp.concatenate(cols, axis=-1)            # (THW, K_big)

    # One MXU pass produces every output channel (b0|b1|b2|b3, zero-padded to
    # 128 lanes) -> lane-dense epilogue + single lane-dense store.
    out = jnp.dot(a_big, wbig_ref[...], preferred_element_type=jnp.float32)
    o_ref[0] = jnp.maximum(out + shbig_ref[...], 0.0)


# ----------------------------------------------------------------------------
# Forward wrapper
# ----------------------------------------------------------------------------
def inception_forward(params, x, out_channels, *, mxu_dtype=jnp.float32):
    """x: (N, Cin, T, H, W) float32 (PyTorch NCDHW layout).  Returns NCDHW."""
    o0, o1, o2, o3, o4, o5 = out_channels
    N, Cin, T, H, W = x.shape
    THW = T * H * W
    Cy = o1 + o3
    cout = o0 + o2 + o4 + o5
    cout_pad = max(128, ((cout + 127) // 128) * 128)   # lane-dense output slab
    k_big = Cin + 27 * Cy + Cin
    eps = 1e-3                                         # BatchNorm3d(eps=0.001)

    def fold(w, bnp):                   # fold BN scale into weights, keep shift
        g, b, m, v = bnp
        s = g / jnp.sqrt(v + eps)
        return w * s, (b - m * s)

    # ---- weight preparation (trace-time, tiny) -------------------------------
    w0, sh0 = fold(params["b0_w"], params["b0_bn"])        # (Cin, o0)
    w1a, sh1a = fold(params["b1a_w"], params["b1a_bn"])    # (Cin, o1)
    w2a, sh2a = fold(params["b2a_w"], params["b2a_bn"])    # (Cin, o3)
    w1b, sh1b = fold(params["b1b_w"], params["b1b_bn"])    # (3,3,3,o1,o2)
    w2b, sh2b = fold(params["b2b_w"], params["b2b_bn"])    # (3,3,3,o3,o4)
    w3b, sh3b = fold(params["b3b_w"], params["b3b_bn"])    # (Cin, o5)

    wa = jnp.concatenate([w1a, w2a], axis=1)               # (Cin, Cy)
    sha = jnp.concatenate([sh1a, sh2a])[None, :]           # (1, Cy)

    # Per-tap block-diagonal blocks for the two 3x3x3 convs: (27*Cy, o2+o4)
    w1b = w1b.reshape(27, o1, o2)
    w2b = w2b.reshape(27, o3, o4)
    top = jnp.concatenate([w1b, jnp.zeros((27, o1, o4), jnp.float32)], axis=2)
    bot = jnp.concatenate([jnp.zeros((27, o3, o2), jnp.float32), w2b], axis=2)
    w_taps = jnp.concatenate([top, bot], axis=1).reshape(27 * Cy, o2 + o4)

    # Big block-diagonal weight: rows = [x | 27*(b1a|b2a) windows | pooled x]
    #                            cols = [b0 | b1 | b2 | b3 | zero pad to 128]
    wbig = jnp.zeros((k_big, cout_pad), jnp.float32)
    wbig = wbig.at[0:Cin, 0:o0].set(w0)
    wbig = wbig.at[Cin:Cin + 27 * Cy, o0:o0 + o2 + o4].set(w_taps)
    wbig = wbig.at[Cin + 27 * Cy:, o0 + o2 + o4:cout].set(w3b)
    shbig = jnp.zeros((1, cout_pad), jnp.float32)
    shbig = shbig.at[0, :cout].set(jnp.concatenate([sh0, sh1b, sh2b, sh3b]))

    wa = wa.astype(mxu_dtype)
    wbig = wbig.astype(mxu_dtype)

    # ---- layout plumbing (XLA): NCDHW -> NDHWC, flatten per-sample rows ------
    xc = jnp.transpose(x, (0, 2, 3, 4, 1)).astype(jnp.float32)   # (N,T,H,W,Cin)
    x_r = xc.reshape(N, THW, Cin)

    itemsize = jnp.dtype(mxu_dtype).itemsize
    flops = N * 2 * THW * (Cin * Cy + k_big * cout_pad)
    bytes_accessed = int(4 * N * THW * Cin + 4 * N * THW * cout_pad
                         + itemsize * (Cin * Cy + k_big * cout_pad)
                         + 4 * (Cy + cout_pad))

    out = pl.pallas_call(
        _inception_kernel,
        out_shape=jax.ShapeDtypeStruct((N, THW, cout_pad), jnp.float32),
        grid_spec=pltpu.PrefetchScalarGridSpec(
            num_scalar_prefetch=0,
            grid=(N,),
            in_specs=[
                pl.BlockSpec((1, THW, Cin), lambda n: (n, 0, 0)),
                pl.BlockSpec((Cin, Cy), lambda n: (0, 0)),
                pl.BlockSpec((1, Cy), lambda n: (0, 0)),
                pl.BlockSpec((k_big, cout_pad), lambda n: (0, 0)),
                pl.BlockSpec((1, cout_pad), lambda n: (0, 0)),
            ],
            out_specs=pl.BlockSpec((1, THW, cout_pad), lambda n: (n, 0, 0)),
            scratch_shapes=[
                pltpu.VMEM((T + 2, H + 2, W + 2, Cin), jnp.float32),  # padded x
                pltpu.VMEM((T + 2, H + 2, W + 2, Cy), jnp.float32),   # padded b1a|b2a
            ],
        ),
        compiler_params=pltpu.CompilerParams(
            dimension_semantics=("parallel",)),
        cost_estimate=pl.CostEstimate(flops=flops, transcendentals=0,
                                      bytes_accessed=bytes_accessed),
    )(x_r, wa, sha, wbig, shbig)

    # back to PyTorch NCDHW layout (slice away the lane padding)
    out = out[:, :, :cout].reshape(N, T, H, W, cout)
    return jnp.transpose(out, (0, 4, 1, 2, 3))


# ----------------------------------------------------------------------------
# Parameters (deterministic synthetic init; weights stored channels-last)
# ----------------------------------------------------------------------------
def init_params(key, in_channels, out_channels):
    o0, o1, o2, o3, o4, o5 = out_channels
    ki = iter(jax.random.split(key, 30))

    def conv(shape, fan_in):
        return jax.random.normal(next(ki), shape, jnp.float32) / math.sqrt(fan_in)

    def bn(c):  # gamma, beta, running_mean, running_var
        g = 1.0 + 0.1 * jax.random.normal(next(ki), (c,), jnp.float32)
        b = 0.1 * jax.random.normal(next(ki), (c,), jnp.float32)
        m = 0.1 * jax.random.normal(next(ki), (c,), jnp.float32)
        v = jax.random.uniform(next(ki), (c,), jnp.float32, minval=0.5, maxval=1.5)
        return (g, b, m, v)

    return {
        "b0_w": conv((in_channels, o0), in_channels), "b0_bn": bn(o0),
        "b1a_w": conv((in_channels, o1), in_channels), "b1a_bn": bn(o1),
        "b1b_w": conv((3, 3, 3, o1, o2), 27 * o1), "b1b_bn": bn(o2),
        "b2a_w": conv((in_channels, o3), in_channels), "b2a_bn": bn(o3),
        "b2b_w": conv((3, 3, 3, o3, o4), 27 * o3), "b2b_bn": bn(o4),
        "b3b_w": conv((in_channels, o5), in_channels), "b3b_bn": bn(o5),
    }


# ----------------------------------------------------------------------------
# Pure-JAX reference (XLA convs / reduce_window) for correctness checking
# ----------------------------------------------------------------------------
def inception_reference(params, x, out_channels):
    eps = 1e-3
    xc = jnp.transpose(x, (0, 2, 3, 4, 1)).astype(jnp.float32)

    def bn_relu(y, bnp):
        g, b, m, v = bnp
        s = g / jnp.sqrt(v + eps)
        return jnp.maximum(y * s + (b - m * s), 0.0)

    def unit1(inp, w, bnp):
        y = jnp.einsum("nthwc,cd->nthwd", inp, w,
                       precision=jax.lax.Precision.HIGHEST)
        return bn_relu(y, bnp)

    def unit3(inp, w, bnp):
        y = jax.lax.conv_general_dilated(
            inp, w, window_strides=(1, 1, 1),
            padding=((1, 1), (1, 1), (1, 1)),
            dimension_numbers=("NDHWC", "DHWIO", "NDHWC"),
            precision=jax.lax.Precision.HIGHEST)
        return bn_relu(y, bnp)

    b0 = unit1(xc, params["b0_w"], params["b0_bn"])
    b1 = unit3(unit1(xc, params["b1a_w"], params["b1a_bn"]),
               params["b1b_w"], params["b1b_bn"])
    b2 = unit3(unit1(xc, params["b2a_w"], params["b2a_bn"]),
               params["b2b_w"], params["b2b_bn"])
    xp = jnp.pad(xc, ((0, 0), (1, 1), (1, 1), (1, 1), (0, 0)))   # zero pad
    pooled = jax.lax.reduce_window(xp, -jnp.inf, jax.lax.max,
                                   (1, 3, 3, 3, 1), (1, 1, 1, 1, 1), "VALID")
    b3 = unit1(pooled, params["b3b_w"], params["b3b_bn"])
    out = jnp.concatenate([b0, b1, b2, b3], axis=-1)
    return jnp.transpose(out, (0, 4, 1, 2, 3))


# ----------------------------------------------------------------------------
if __name__ == "__main__":
    IN_CHANNELS = 16
    OUT_CHANNELS = (8, 8, 16, 4, 8, 8)   # (b0, b1a, b1b, b2a, b2b, b3b)
    N, T, H, W = 2, 4, 8, 8

    key = jax.random.PRNGKey(0)
    kp, kx = jax.random.split(key)
    params = init_params(kp, IN_CHANNELS, OUT_CHANNELS)
    x = jax.random.normal(kx, (N, IN_CHANNELS, T, H, W), jnp.float32)

    cout = OUT_CHANNELS[0] + OUT_CHANNELS[2] + OUT_CHANNELS[4] + OUT_CHANNELS[5]
    ref = jax.block_until_ready(inception_reference(params, x, OUT_CHANNELS))

    # --- f32 MXU path: strict correctness check -------------------------------
    fwd32 = jax.jit(functools.partial(inception_forward,
                                      out_channels=OUT_CHANNELS,
                                      mxu_dtype=jnp.float32))
    out32 = jax.block_until_ready(fwd32(params, x))
    assert out32.shape == (N, cout, T, H, W), out32.shape
    assert bool(jnp.all(jnp.isfinite(out32)))
    err32 = float(jnp.max(jnp.abs(out32 - ref)))
    assert err32 < 2e-3, f"f32 path max abs error vs reference: {err32}"

    # --- bf16 MXU-input path (v6e/v7x-friendly), f32 accumulation & epilogue ---
    fwd16 = jax.jit(functools.partial(inception_forward,
                                      out_channels=OUT_CHANNELS,
                                      mxu_dtype=jnp.bfloat16))
    out16 = jax.block_until_ready(fwd16(params, x))
    assert out16.shape == (N, cout, T, H, W), out16.shape
    assert bool(jnp.all(jnp.isfinite(out16)))
    err16 = float(jnp.max(jnp.abs(out16 - ref)))
    assert err16 < 1e-1, f"bf16 path max abs error vs reference: {err16}"

    print("KERNEL_OK")
</pallas_src>

<mosaic_0001>
module attributes {stable_mosaic.version = 11 : i64} {
  func.func @_inception_kernel(%arg0: i32, %arg1: memref<1x256x16xf32, #tpu.memory_space<vmem>>, %arg2: memref<16x12xf32, #tpu.memory_space<vmem>>, %arg3: memref<1x12xf32, #tpu.memory_space<vmem>>, %arg4: memref<356x128xf32, #tpu.memory_space<vmem>>, %arg5: memref<1x128xf32, #tpu.memory_space<vmem>>, %arg6: memref<1x256x128xf32, #tpu.memory_space<vmem>>, %arg7: memref<6x10x10x16xf32, #tpu.memory_space<vmem>>, %arg8: memref<6x10x10x12xf32, #tpu.memory_space<vmem>>) attributes {dimension_semantics = [#tpu.dimension_semantics<parallel>], iteration_bounds = array<i64: 2>, scalar_prefetch = 0 : i64, scratch_operands = 2 : i64, tpu.core_type = #tpu.core_type<tc>, window_params = [{transform_indices = @transform_0, window_bounds = array<i64: 1, 256, 16>}, {pipeline_mode = #tpu.pipeline_mode<synchronous>, transform_indices = @transform_1, window_bounds = array<i64: 16, 12>}, {pipeline_mode = #tpu.pipeline_mode<synchronous>, transform_indices = @transform_2, window_bounds = array<i64: 1, 12>}, {pipeline_mode = #tpu.pipeline_mode<synchronous>, transform_indices = @transform_3, window_bounds = array<i64: 356, 128>}, {pipeline_mode = #tpu.pipeline_mode<synchronous>, transform_indices = @transform_4, window_bounds = array<i64: 1, 128>}, {transform_indices = @transform_5, window_bounds = array<i64: 1, 256, 128>}]} {
    %c0 = arith.constant 0 : index
    %c0_0 = arith.constant 0 : index
    %c0_1 = arith.constant 0 : index
    %0 = vector.load %arg1[%c0, %c0_0, %c0_1] : memref<1x256x16xf32, #tpu.memory_space<vmem>>, vector<1x256x16xf32>
    %1 = vector.shape_cast %0 : vector<1x256x16xf32> to vector<256x16xf32>
    %2 = vector.shape_cast %1 : vector<256x16xf32> to vector<4x8x8x16xf32>
    %c0_2 = arith.constant 0 : index
    %c0_3 = arith.constant 0 : index
    %3 = vector.load %arg2[%c0_2, %c0_3] : memref<16x12xf32, #tpu.memory_space<vmem>>, vector<16x12xf32>
    %cst = arith.constant dense<0.000000e+00> : vector<256x12xf32>
    %4 = tpu.matmul %1, %3, %cst {dimension_numbers = #tpu.dot_dimension_numbers<[1], [0], [0], [1], [0, 0, 1, 1], [], []>} : vector<256x16xf32>, vector<16x12xf32>, vector<256x12xf32> -> vector<256x12xf32>
    %c0_4 = arith.constant 0 : index
    %c0_5 = arith.constant 0 : index
    %5 = vector.load %arg3[%c0_4, %c0_5] : memref<1x12xf32, #tpu.memory_space<vmem>>, vector<1x12xf32>
    %6 = vector.broadcast %5 : vector<1x12xf32> to vector<256x12xf32>
    %7 = arith.addf %4, %6 : vector<256x12xf32>
    %cst_6 = arith.constant 0.000000e+00 : f32
    %8 = vector.broadcast %cst_6 : f32 to vector<256x12xf32>
    %9 = arith.maximumf %7, %8 : vector<256x12xf32>
    %cst_7 = arith.constant 0.000000e+00 : f32
    %10 = vector.broadcast %cst_7 : f32 to vector<6x10x10x16xf32>
    %c0_8 = arith.constant 0 : index
    %c0_9 = arith.constant 0 : index
    %c0_10 = arith.constant 0 : index
    %c0_11 = arith.constant 0 : index
    %11 = vector.load %arg7[%c0_8, %c0_9, %c0_10, %c0_11] : memref<6x10x10x16xf32, #tpu.memory_space<vmem>>, vector<6x10x10x16xf32>
    tpu.vector_store %arg7[%c0_8, %c0_9, %c0_10, %c0_11], %10 {strides = array<i32>} : memref<6x10x10x16xf32, #tpu.memory_space<vmem>>, vector<6x10x10x16xf32>,
    %cst_12 = arith.constant 0.000000e+00 : f32
    %12 = vector.broadcast %cst_12 : f32 to vector<6x10x10x12xf32>
    %c0_13 = arith.constant 0 : index
    %c0_14 = arith.constant 0 : index
    %c0_15 = arith.constant 0 : index
    %c0_16 = arith.constant 0 : index
    %13 = vector.load %arg8[%c0_13, %c0_14, %c0_15, %c0_16] : memref<6x10x10x12xf32, #tpu.memory_space<vmem>>, vector<6x10x10x12xf32>
    tpu.vector_store %arg8[%c0_13, %c0_14, %c0_15, %c0_16], %12 {strides = array<i32>} : memref<6x10x10x12xf32, #tpu.memory_space<vmem>>, vector<6x10x10x12xf32>,
    %c1 = arith.constant 1 : index
    %c1_17 = arith.constant 1 : index
    %c1_18 = arith.constant 1 : index
    %c0_19 = arith.constant 0 : index
    %14 = vector.load %arg7[%c1, %c1_17, %c1_18, %c0_19] : memref<6x10x10x16xf32, #tpu.memory_space<vmem>>, vector<4x8x8x16xf32>
    tpu.vector_store %arg7[%c1, %c1_17, %c1_18, %c0_19], %2 {strides = array<i32>} : memref<6x10x10x16xf32, #tpu.memory_space<vmem>>, vector<4x8x8x16xf32>,
    %15 = vector.shape_cast %9 : vector<256x12xf32> to vector<4x8x8x12xf32>
    %c1_20 = arith.constant 1 : index
    %c1_21 = arith.constant 1 : index
    %c1_22 = arith.constant 1 : index
    %c0_23 = arith.constant 0 : index
    %16 = vector.load %arg8[%c1_20, %c1_21, %c1_22, %c0_23] : memref<6x10x10x12xf32, #tpu.memory_space<vmem>>, vector<4x8x8x12xf32>
    tpu.vector_store %arg8[%c1_20, %c1_21, %c1_22, %c0_23], %15 {strides = array<i32>} : memref<6x10x10x12xf32, #tpu.memory_space<vmem>>, vector<4x8x8x12xf32>,
    %c0_24 = arith.constant 0 : index
    %c0_25 = arith.constant 0 : index
    %c0_26 = arith.constant 0 : index
    %c0_27 = arith.constant 0 : index
    %17 = vector.load %arg7[%c0_24, %c0_25, %c0_26, %c0_27] : memref<6x10x10x16xf32, #tpu.memory_space<vmem>>, vector<6x10x10x16xf32>
    %18 = vector.extract_strided_slice %17 {offsets = [0, 0, 0, 0], sizes = [6, 10, 8, 16], strides = [1, 1, 1, 1]} : vector<6x10x10x16xf32> to vector<6x10x8x16xf32>
    %19 = vector.extract_strided_slice %17 {offsets = [0, 0, 1, 0], sizes = [6, 10, 8, 16], strides = [1, 1, 1, 1]} : vector<6x10x10x16xf32> to vector<6x10x8x16xf32>
    %20 = arith.maximumf %18, %19 : vector<6x10x8x16xf32>
    %21 = vector.extract_strided_slice %17 {offsets = [0, 0, 2, 0], sizes = [6, 10, 8, 16], strides = [1, 1, 1, 1]} : vector<6x10x10x16xf32> to vector<6x10x8x16xf32>
    %22 = arith.maximumf %20, %21 : vector<6x10x8x16xf32>
    %23 = vector.extract_strided_slice %22 {offsets = [0, 0, 0, 0], sizes = [6, 8, 8, 16], strides = [1, 1, 1, 1]} : vector<6x10x8x16xf32> to vector<6x8x8x16xf32>
    %24 = vector.extract_strided_slice %22 {offsets = [0, 1, 0, 0], sizes = [6, 8, 8, 16], strides = [1, 1, 1, 1]} : vector<6x10x8x16xf32> to vector<6x8x8x16xf32>
    %25 = arith.maximumf %23, %24 : vector<6x8x8x16xf32>
    %26 = vector.extract_strided_slice %22 {offsets = [0, 2, 0, 0], sizes = [6, 8, 8, 16], strides = [1, 1, 1, 1]} : vector<6x10x8x16xf32> to vector<6x8x8x16xf32>
    %27 = arith.maximumf %25, %26 : vector<6x8x8x16xf32>
    %28 = vector.extract_strided_slice %27 {offsets = [0, 0, 0, 0], sizes = [4, 8, 8, 16], strides = [1, 1, 1, 1]} : vector<6x8x8x16xf32> to vector<4x8x8x16xf32>
    %29 = vector.extract_strided_slice %27 {offsets = [1, 0, 0, 0], sizes = [4, 8, 8, 16], strides = [1, 1, 1, 1]} : vector<6x8x8x16xf32> to vector<4x8x8x16xf32>
    %30 = arith.maximumf %28, %29 : vector<4x8x8x16xf32>
    %31 = vector.extract_strided_slice %27 {offsets = [2, 0, 0, 0], sizes = [4, 8, 8, 16], strides = [1, 1, 1, 1]} : vector<6x8x8x16xf32> to vector<4x8x8x16xf32>
    %32 = arith.maximumf %30, %31 : vector<4x8x8x16xf32>
    %33 = vector.shape_cast %32 : vector<4x8x8x16xf32> to vector<256x16xf32>
    %c0_28 = arith.constant 0 : index
    %c0_29 = arith.constant 0 : index
    %c0_30 = arith.constant 0 : index
    %c0_31 = arith.constant 0 : index
    %34 = vector.load %arg8[%c0_28, %c0_29, %c0_30, %c0_31] : memref<6x10x10x12xf32, #tpu.memory_space<vmem>>, vector<6x10x10x12xf32>
    %35 = vector.extract_strided_slice %34 {offsets = [0, 0, 0, 0], sizes = [4, 8, 8, 12], strides = [1, 1, 1, 1]} : vector<6x10x10x12xf32> to vector<4x8x8x12xf32>
    %36 = vector.shape_cast %35 : vector<4x8x8x12xf32> to vector<256x12xf32>
    %37 = vector.extract_strided_slice %34 {offsets = [0, 0, 1, 0], sizes = [4, 8, 8, 12], strides = [1, 1, 1, 1]} : vector<6x10x10x12xf32> to vector<4x8x8x12xf32>
    %38 = vector.shape_cast %37 : vector<4x8x8x12xf32> to vector<256x12xf32>
    %39 = vector.extract_strided_slice %34 {offsets = [0, 0, 2, 0], sizes = [4, 8, 8, 12], strides = [1, 1, 1, 1]} : vector<6x10x10x12xf32> to vector<4x8x8x12xf32>
    %40 = vector.shape_cast %39 : vector<4x8x8x12xf32> to vector<256x12xf32>
    %41 = vector.extract_strided_slice %34 {offsets = [0, 1, 0, 0], sizes = [4, 8, 8, 12], strides = [1, 1, 1, 1]} : vector<6x10x10x12xf32> to vector<4x8x8x12xf32>
    %42 = vector.shape_cast %41 : vector<4x8x8x12xf32> to vector<256x12xf32>
    %43 = vector.extract_strided_slice %34 {offsets = [0, 1, 1, 0], sizes = [4, 8, 8, 12], strides = [1, 1, 1, 1]} : vector<6x10x10x12xf32> to vector<4x8x8x12xf32>
    %44 = vector.shape_cast %43 : vector<4x8x8x12xf32> to vector<256x12xf32>
    %45 = vector.extract_strided_slice %34 {offsets = [0, 1, 2, 0], sizes = [4, 8, 8, 12], strides = [1, 1, 1, 1]} : vector<6x10x10x12xf32> to vector<4x8x8x12xf32>
    %46 = vector.shape_cast %45 : vector<4x8x8x12xf32> to vector<256x12xf32>
    %47 = vector.extract_strided_slice %34 {offsets = [0, 2, 0, 0], sizes = [4, 8, 8, 12], strides = [1, 1, 1, 1]} : vector<6x10x10x12xf32> to vector<4x8x8x12xf32>
    %48 = vector.shape_cast %47 : vector<4x8x8x12xf32> to vector<256x12xf32>
    %49 = vector.extract_strided_slice %34 {offsets = [0, 2, 1, 0], sizes = [4, 8, 8, 12], strides = [1, 1, 1, 1]} : vector<6x10x10x12xf32> to vector<4x8x8x12xf32>
    %50 = vector.shape_cast %49 : vector<4x8x8x12xf32> to vector<256x12xf32>
    %51 = vector.extract_strided_slice %34 {offsets = [0, 2, 2, 0], sizes = [4, 8, 8, 12], strides = [1, 1, 1, 1]} : vector<6x10x10x12xf32> to vector<4x8x8x12xf32>
    %52 = vector.shape_cast %51 : vector<4x8x8x12xf32> to vector<256x12xf32>
    %53 = vector.extract_strided_slice %34 {offsets = [1, 0, 0, 0], sizes = [4, 8, 8, 12], strides = [1, 1, 1, 1]} : vector<6x10x10x12xf32> to vector<4x8x8x12xf32>
    %54 = vector.shape_cast %53 : vector<4x8x8x12xf32> to vector<256x12xf32>
    %55 = vector.extract_strided_slice %34 {offsets = [1, 0, 1, 0], sizes = [4, 8, 8, 12], strides = [1, 1, 1, 1]} : vector<6x10x10x12xf32> to vector<4x8x8x12xf32>
    %56 = vector.shape_cast %55 : vector<4x8x8x12xf32> to vector<256x12xf32>
    %57 = vector.extract_strided_slice %34 {offsets = [1, 0, 2, 0], sizes = [4, 8, 8, 12], strides = [1, 1, 1, 1]} : vector<6x10x10x12xf32> to vector<4x8x8x12xf32>
    %58 = vector.shape_cast %57 : vector<4x8x8x12xf32> to vector<256x12xf32>
    %59 = vector.extract_strided_slice %34 {offsets = [1, 1, 0, 0], sizes = [4, 8, 8, 12], strides = [1, 1, 1, 1]} : vector<6x10x10x12xf32> to vector<4x8x8x12xf32>
    %60 = vector.shape_cast %59 : vector<4x8x8x12xf32> to vector<256x12xf32>
    %61 = vector.extract_strided_slice %34 {offsets = [1, 1, 1, 0], sizes = [4, 8, 8, 12], strides = [1, 1, 1, 1]} : vector<6x10x10x12xf32> to vector<4x8x8x12xf32>
    %62 = vector.shape_cast %61 : vector<4x8x8x12xf32> to vector<256x12xf32>
    %63 = vector.extract_strided_slice %34 {offsets = [1, 1, 2, 0], sizes = [4, 8, 8, 12], strides = [1, 1, 1, 1]} : vector<6x10x10x12xf32> to vector<4x8x8x12xf32>
    %64 = vector.shape_cast %63 : vector<4x8x8x12xf32> to vector<256x12xf32>
    %65 = vector.extract_strided_slice %34 {offsets = [1, 2, 0, 0], sizes = [4, 8, 8, 12], strides = [1, 1, 1, 1]} : vector<6x10x10x12xf32> to vector<4x8x8x12xf32>
    %66 = vector.shape_cast %65 : vector<4x8x8x12xf32> to vector<256x12xf32>
    %67 = vector.extract_strided_slice %34 {offsets = [1, 2, 1, 0], sizes = [4, 8, 8, 12], strides = [1, 1, 1, 1]} : vector<6x10x10x12xf32> to vector<4x8x8x12xf32>
    %68 = vector.shape_cast %67 : vector<4x8x8x12xf32> to vector<256x12xf32>
    %69 = vector.extract_strided_slice %34 {offsets = [1, 2, 2, 0], sizes = [4, 8, 8, 12], strides = [1, 1, 1, 1]} : vector<6x10x10x12xf32> to vector<4x8x8x12xf32>
    %70 = vector.shape_cast %69 : vector<4x8x8x12xf32> to vector<256x12xf32>
    %71 = vector.extract_strided_slice %34 {offsets = [2, 0, 0, 0], sizes = [4, 8, 8, 12], strides = [1, 1, 1, 1]} : vector<6x10x10x12xf32> to vector<4x8x8x12xf32>
    %72 = vector.shape_cast %71 : vector<4x8x8x12xf32> to vector<256x12xf32>
    %73 = vector.extract_strided_slice %34 {offsets = [2, 0, 1, 0], sizes = [4, 8, 8, 12], strides = [1, 1, 1, 1]} : vector<6x10x10x12xf32> to vector<4x8x8x12xf32>
    %74 = vector.shape_cast %73 : vector<4x8x8x12xf32> to vector<256x12xf32>
    %75 = vector.extract_strided_slice %34 {offsets = [2, 0, 2, 0], sizes = [4, 8, 8, 12], strides = [1, 1, 1, 1]} : vector<6x10x10x12xf32> to vector<4x8x8x12xf32>
    %76 = vector.shape_cast %75 : vector<4x8x8x12xf32> to vector<256x12xf32>
    %77 = vector.extract_strided_slice %34 {offsets = [2, 1, 0, 0], sizes = [4, 8, 8, 12], strides = [1, 1, 1, 1]} : vector<6x10x10x12xf32> to vector<4x8x8x12xf32>
    %78 = vector.shape_cast %77 : vector<4x8x8x12xf32> to vector<256x12xf32>
    %79 = vector.extract_strided_slice %34 {offsets = [2, 1, 1, 0], sizes = [4, 8, 8, 12], strides = [1, 1, 1, 1]} : vector<6x10x10x12xf32> to vector<4x8x8x12xf32>
    %80 = vector.shape_cast %79 : vector<4x8x8x12xf32> to vector<256x12xf32>
    %81 = vector.extract_strided_slice %34 {offsets = [2, 1, 2, 0], sizes = [4, 8, 8, 12], strides = [1, 1, 1, 1]} : vector<6x10x10x12xf32> to vector<4x8x8x12xf32>
    %82 = vector.shape_cast %81 : vector<4x8x8x12xf32> to vector<256x12xf32>
    %83 = vector.extract_strided_slice %34 {offsets = [2, 2, 0, 0], sizes = [4, 8, 8, 12], strides = [1, 1, 1, 1]} : vector<6x10x10x12xf32> to vector<4x8x8x12xf32>
    %84 = vector.shape_cast %83 : vector<4x8x8x12xf32> to vector<256x12xf32>
    %85 = vector.extract_strided_slice %34 {offsets = [2, 2, 1, 0], sizes = [4, 8, 8, 12], strides = [1, 1, 1, 1]} : vector<6x10x10x12xf32> to vector<4x8x8x12xf32>
    %86 = vector.shape_cast %85 : vector<4x8x8x12xf32> to vector<256x12xf32>
    %87 = vector.extract_strided_slice %34 {offsets = [2, 2, 2, 0], sizes = [4, 8, 8, 12], strides = [1, 1, 1, 1]} : vector<6x10x10x12xf32> to vector<4x8x8x12xf32>
    %88 = vector.shape_cast %87 : vector<4x8x8x12xf32> to vector<256x12xf32>
    %89 = tpu.concatenate %1, %36, %38, %40, %42, %44, %46, %48, %50, %52, %54, %56, %58, %60, %62, %64 in 1 : vector<256x16xf32>, vector<256x12xf32>, vector<256x12xf32>, vector<256x12xf32>, vector<256x12xf32>, vector<256x12xf32>, vector<256x12xf32>, vector<256x12xf32>, vector<256x12xf32>, vector<256x12xf32>, vector<256x12xf32>, vector<256x12xf32>, vector<256x12xf32>, vector<256x12xf32>, vector<256x12xf32>, vector<256x12xf32> -> vector<256x196xf32>
    %90 = tpu.concatenate %66, %68, %70, %72, %74, %76, %78, %80, %82, %84, %86, %88, %33 in 1 : vector<256x12xf32>, vector<256x12xf32>, vector<256x12xf32>, vector<256x12xf32>, vector<256x12xf32>, vector<256x12xf32>, vector<256x12xf32>, vector<256x12xf32>, vector<256x12xf32>, vector<256x12xf32>, vector<256x12xf32>, vector<256x12xf32>, vector<256x16xf32> -> vector<256x160xf32>
    %91 = tpu.concatenate %89, %90 in 1 : vector<256x196xf32>, vector<256x160xf32> -> vector<256x356xf32>
    %c0_32 = arith.constant 0 : index
    %c0_33 = arith.constant 0 : index
    %92 = vector.load %arg4[%c0_32, %c0_33] : memref<356x128xf32, #tpu.memory_space<vmem>>, vector<356x128xf32>
    %cst_34 = arith.constant dense<0.000000e+00> : vector<256x128xf32>
    %93 = tpu.matmul %91, %92, %cst_34 {dimension_numbers = #tpu.dot_dimension_numbers<[1], [0], [0], [1], [0, 0, 1, 1], [], []>} : vector<256x356xf32>, vector<356x128xf32>, vector<256x128xf32> -> vector<256x128xf32>
    %c0_35 = arith.constant 0 : index
    %c0_36 = arith.constant 0 : index
    %94 = vector.load %arg5[%c0_35, %c0_36] : memref<1x128xf32, #tpu.memory_space<vmem>>, vector<1x128xf32>
    %95 = vector.broadcast %94 : vector<1x128xf32> to vector<256x128xf32>
    %96 = arith.addf %93, %95 : vector<256x128xf32>
    %cst_37 = arith.constant 0.000000e+00 : f32
    %97 = vector.broadcast %cst_37 : f32 to vector<256x128xf32>
    %98 = arith.maximumf %96, %97 : vector<256x128xf32>
    %c0_38 = arith.constant 0 : index
    %c0_39 = arith.constant 0 : index
    %c0_40 = arith.constant 0 : index
    %99 = vector.load %arg6[%c0_38, %c0_39, %c0_40] : memref<1x256x128xf32, #tpu.memory_space<vmem>>, vector<1x256x128xf32>
    %100 = vector.shape_cast %99 : vector<1x256x128xf32> to vector<256x128xf32>
    %101 = vector.shape_cast %98 : vector<256x128xf32> to vector<1x256x128xf32>
    tpu.vector_store %arg6[%c0_38, %c0_39, %c0_40], %101 {strides = array<i32>} : memref<1x256x128xf32, #tpu.memory_space<vmem>>, vector<1x256x128xf32>,
    return
  }
  func.func @transform_0(%arg0: i32) -> (i32, i32, i32) {
    %c0_i32 = arith.constant 0 : i32
    %c0_i32_0 = arith.constant 0 : i32
    %c0_i32_1 = arith.constant 0 : i32
    return %arg0, %c0_i32, %c0_i32_0 : i32, i32, i32
  }
  func.func @transform_1(%arg0: i32) -> (i32, i32) {
    %c0_i32 = arith.constant 0 : i32
    %c0_i32_0 = arith.constant 0 : i32
    %c0_i32_1 = arith.constant 0 : i32
    return %c0_i32, %c0_i32_0 : i32, i32
  }
  func.func @transform_2(%arg0: i32) -> (i32, i32) {
    %c0_i32 = arith.constant 0 : i32
    %c0_i32_0 = arith.constant 0 : i32
    %c0_i32_1 = arith.constant 0 : i32
    return %c0_i32, %c0_i32_0 : i32, i32
  }
  func.func @transform_3(%arg0: i32) -> (i32, i32) {
    %c0_i32 = arith.constant 0 : i32
    %c0_i32_0 = arith.constant 0 : i32
    %c0_i32_1 = arith.constant 0 : i32
    return %c0_i32, %c0_i32_0 : i32, i32
  }
  func.func @transform_4(%arg0: i32) -> (i32, i32) {
    %c0_i32 = arith.constant 0 : i32
    %c0_i32_0 = arith.constant 0 : i32
    %c0_i32_1 = arith.constant 0 : i32
    return %c0_i32, %c0_i32_0 : i32, i32
  }
  func.func @transform_5(%arg0: i32) -> (i32, i32, i32) {
    %c0_i32 = arith.constant 0 : i32
    %c0_i32_0 = arith.constant 0 : i32
    %c0_i32_1 = arith.constant 0 : i32
    return %arg0, %c0_i32, %c0_i32_0 : i32, i32, i32
  }
}

</mosaic_0001>

<bundles_post_ra>
// kernel: inception_forward.1
= control target key start
LH: loop header
LB: loop body
LE: loop exit
PB: predicated region body
PF: predicated region fallthrough
CT: control target
= control target key end

     0   :  { %10 = vsyncpa [#allocation5], 0  ;;  %s16830_s0 = inlined_call_operand.vmem [shape: f32[2,256,16], index: 0, kind: input, shape index: {}]   ;;  %s16831_s1 = inlined_call_operand.vmem [shape: f32[16,12], index: 1, kind: input, shape index: {}]   ;;  %s16832_s2 = inlined_call_operand.vmem [shape: f32[1,12], index: 2, kind: input, shape index: {}]   ;;  %s16833_s3 = inlined_call_operand.vmem [shape: f32[356,128], index: 3, kind: input, shape index: {}]   ;;  %s16834_s4 = inlined_call_operand.vmem [shape: f32[1,128], index: 4, kind: input, shape index: {}]   ;;  %s16835_s5 = inlined_call_operand.hbm [shape: f32[2,256,128], index: 5, kind: output, shape index: {}]  }
   0x1   :  { %12 = vsyncpa [#allocation5 + $0x1], 0  ;;  %s8868_s18 = smov 0   ;;  %s8870_s19 = smov 0  }
   0x2   :  { %s8872_s20 = smov 0   ;;  %s8874_s21 = smov 0  }
   0x3 LB: > { %s8889_s22 = sadd.s32 4294967295, %s8806_s21   ;;  %s7040_s23 = sadd.s32 4294967294, %s8806_s21   ;;  %s8806_s21 = sphi %s8874_s21, %s18859_s21   ;;  %s8802_s20 = sphi %s8872_s20, %s18858_s20   ;;  %s8798_s19 = sphi %s8870_s19, %s18857_s19   ;;  %s8794_s18 = sphi %s8868_s18, %s18856_s18  }
   0x4   : > { %s8893_s24 = sadd.s32 1, %s8806_s21   ;;  %s135_s25 = sadd.s32 1, %s8802_s20 }
   0x5   : > { %s132_s26 = ssub.s32 %s8806_s21, %s8893_s24  ;;  %p145_p0 = scmp.ne.s32.totalorder %s8802_s20, %s8798_s19 }
   0x6   : > { %p133_p1 = scmp.eq.s32.totalorder %s132_s26, 0  ;;  %p146_p2 = scmp.eq.s32.totalorder %s8889_s22, 1 }
   0x7   : > { %p151_p3 = scmp.ne.s32.totalorder %s8798_s19, %s8794_s18  ;;  %p152_p4 = scmp.eq.s32.totalorder %s7040_s23, 1 }
   0x8   : > { %s8904_s27 = scalar_select %p133_p1, %s8802_s20, %s135_s25  }
   0x9   : > { %p8906_p5 = por %p146_p2, %p145_p0  ;;  %p8910_p6 = por %p152_p4, %p151_p3 }
   0xa   : > { %p7043_p7 = scmp.ge.s32.totalorder %s8806_s21, 1  ;;  %p190_p8 = scmp.lt.s32.totalorder %s8806_s21, 3 }
   0xc   : > { %p191_p9 = pnand %p7043_p7, %p190_p8 }
   0xe   : > { %194 = sbr.rel (%p191_p9) target bundleno = 1948 (0x79c), region = 40 }
  0x13   : > { %v8919_v0 = vld [vmem:[%s16831_s1 + $0x8] sm:$0xff]  ;;  %v8924_v1 = vld [vmem:[%s16831_s1] sm:$0xff]  ;;  %p218_p10 = scmp.lt.s32.totalorder %s8889_s22, 1  ;;  %vm264_vm0 = vcmask 130048   ;;  %vm619_vm1 = vcmask 123904   ;;  %v16836_v2 = vmov 0.0  }
  0x14   : > { %7200 = vmatprep.subr.mxu0 %v8919_v0  ;;  %641 = vst.msk [vmem:[#allocation2 + $0xb0] sm:$0xff] %vm264_vm0, %v16836_v2  ;;  %618 = vst.msk [vmem:[#allocation2] sm:$0xff] %vm264_vm0, %v16836_v2  ;;  %vm739_vm2 = vcmask 97280   ;;  %vm741_vm3 = vcmask 91136   ;;  %7326 = vmatprep.subr.mxu1 %v16836_v2  ;;  %vm1167_vm4 = vcmask 1046528   ;;  %vm1468_vm5 = vcmask 1045504  }
  0x15   : > { %642 = vst.msk [vmem:[#allocation2 + $0xb8] sm:$0x3] %vm619_vm1, %v16836_v2  ;;  %620 = vst.msk [vmem:[#allocation2 + $0x8] sm:$0x3] %vm619_vm1, %v16836_v2  ;;  %7201 = vmatpush3.msra.mxu0 %v8919_v0  ;;  %s9173_s9 = scalar_select %p218_p10, %s8889_s22, 1  ;;  %vm4298_vm6 = vcmask 64512  }
  0x16   : > { %621 = vst.msk [vmem:[#allocation2 + $0x10] sm:$0xff] %vm264_vm0, %v16836_v2  ;;  %623 = vst.msk [vmem:[#allocation2 + $0x20] sm:$0xff] %vm264_vm0, %v16836_v2  ;;  %7202 = vmatprep.subr.mxu0 %v8924_v1  ;;  %s8809_s14 = smov 16   ;;  %s8810_s15 = smov 28   ;;  %vm17322_vm7 = vcmask 162816   ;;  %vm17338_vm8 = vcmask 261120  }
  0x17   : > { %622 = vst.msk [vmem:[#allocation2 + $0x18] sm:$0x3] %vm619_vm1, %v16836_v2  ;;  %624 = vst.msk [vmem:[#allocation2 + $0x28] sm:$0x3] %vm619_vm1, %v16836_v2  ;;  %7203 = vmatpush3.msra.mxu0 %v8924_v1  ;;  %s7119_s10 = sshll.u32 %s9173_s9, 8  ;;  %s8811_s16 = smov 40  }
  0x18   : > { %625 = vst.msk [vmem:[#allocation2 + $0x30] sm:$0xff] %vm264_vm0, %v16836_v2  ;;  %627 = vst.msk [vmem:[#allocation2 + $0x40] sm:$0xff] %vm264_vm0, %v16836_v2  ;;  %s9421_s13 = scalar_lea.vmem %s16830_s0, %s7119_s10  ;;  %6450 = vmatprep.subr.mxu0 %v16836_v2  ;;  %s8812_s17 = smov 52   ;;  %vm17301_vm9 = vcmask 359424   ;;  %vm17300_vm10 = vcmask 457728   ;;  %vm5679_vm11 = vcmask 195584  }
  0x19   : > { %626 = vst.msk [vmem:[#allocation2 + $0x38] sm:$0x3] %vm619_vm1, %v16836_v2  ;;  %628 = vst.msk [vmem:[#allocation2 + $0x48] sm:$0x3] %vm619_vm1, %v16836_v2  ;;  %v9425_v3 = vld [vmem:[%s9421_s13] sm:$0xff]  ;;  %v9428_v4 = vld [vmem:[%s9421_s13 + $0x8] sm:$0xff] }
  0x1a   : > { %629 = vst.msk [vmem:[#allocation2 + $0x50] sm:$0xff] %vm264_vm0, %v16836_v2  ;;  %631 = vst.msk [vmem:[#allocation2 + $0x60] sm:$0xff] %vm264_vm0, %v16836_v2  ;;  %v9431_v5 = vld [vmem:[%s9421_s13 + $0x10] sm:$0xff]  ;;  %7204 = vmatprep.mubr.msk.f32.mxu0 %vm264_vm0, %v9425_v3  ;;  %v9442_v6 = vld [vmem:[%s9421_s13 + $0x18] sm:$0xff]  ;;  %s8813_s23 = smov 64   ;;  %s8814_s25 = smov 76  }
  0x1b   : > { %630 = vst.msk [vmem:[#allocation2 + $0x58] sm:$0x3] %vm619_vm1, %v16836_v2  ;;  %632 = vst.msk [vmem:[#allocation2 + $0x68] sm:$0x3] %vm619_vm1, %v16836_v2  ;;  %v9445_v7 = vld [vmem:[%s9421_s13 + $0x20] sm:$0xff]  ;;  %v9448_v8 = vld [vmem:[%s9421_s13 + $0x28] sm:$0xff]  ;;  %7205 = vmatmul.mubr.msk.f32.vlgmr.msra.gmra.mxu0 %vm264_vm0, %v9428_v4 }
  0x1c   : > { %633 = vst.msk [vmem:[#allocation2 + $0x70] sm:$0xff] %vm264_vm0, %v16836_v2  ;;  %635 = vst.msk [vmem:[#allocation2 + $0x80] sm:$0xff] %vm264_vm0, %v16836_v2  ;;  %v9459_v9 = vld [vmem:[%s9421_s13 + $0x30] sm:$0xff]  ;;  %v9462_v10 = vld [vmem:[%s9421_s13 + $0x38] sm:$0xff]  ;;  %7207 = vmatprep.mubr.msk.f32.mxu0 %vm264_vm0, %v9431_v5  ;;  %s8815_s26 = smov 88   ;;  %s8816_s30 = smov 100  }
  0x1d   : > { %634 = vst.msk [vmem:[#allocation2 + $0x78] sm:$0x3] %vm619_vm1, %v16836_v2  ;;  %636 = vst.msk [vmem:[#allocation2 + $0x88] sm:$0x3] %vm619_vm1, %v16836_v2  ;;  %v9465_v11 = vld [vmem:[%s9421_s13 + $0x40] sm:$0xff]  ;;  %v9476_v12 = vld [vmem:[%s9421_s13 + $0x48] sm:$0xff] }
  0x1e   : > { %637 = vst.msk [vmem:[#allocation2 + $0x90] sm:$0xff] %vm264_vm0, %v16836_v2  ;;  %639 = vst.msk [vmem:[#allocation2 + $0xa0] sm:$0xff] %vm264_vm0, %v16836_v2  ;;  %v9479_v13 = vld [vmem:[%s9421_s13 + $0x50] sm:$0xff]  ;;  %v9482_v14 = vld [vmem:[%s9421_s13 + $0x58] sm:$0xff]  ;;  %s8817_s6 = smov 112   ;;  %s8818_s9 = smov 124  }
  0x1f   : > { %638 = vst.msk [vmem:[#allocation2 + $0x98] sm:$0x3] %vm619_vm1, %v16836_v2  ;;  %640 = vst.msk [vmem:[#allocation2 + $0xa8] sm:$0x3] %vm619_vm1, %v16836_v2  ;;  %v9491_v15 = vld [vmem:[%s9421_s13 + $0x60] sm:$0xff]  ;;  %v9494_v16 = vld [vmem:[%s9421_s13 + $0x68] sm:$0xff]  ;;  %7208 = vmatmul.mubr.msk.f32.gmra.mxu0 %vm264_vm0, %v9442_v6 }
  0x20   : > { %643 = vst.msk [vmem:[#allocation2 + $0xc0] sm:$0xff] %vm264_vm0, %v16836_v2  ;;  %645 = vst.msk [vmem:[#allocation2 + $0xd0] sm:$0xff] %vm264_vm0, %v16836_v2  ;;  %7210 = vmatprep.mubr.msk.f32.mxu0 %vm264_vm0, %v9445_v7  ;;  %v9549_v38 = vld [vmem:[%s9421_s13 + $0x70] sm:$0xff]  ;;  %v9573_v50 = vld [vmem:[%s9421_s13 + $0x78] sm:$0xff]  ;;  %s8819_s10 = smov 8   ;;  %s8820_s11 = smov 20  }
  0x21   : > { %644 = vst.msk [vmem:[#allocation2 + $0xc8] sm:$0x3] %vm619_vm1, %v16836_v2  ;;  %646 = vst.msk [vmem:[#allocation2 + $0xd8] sm:$0x3] %vm619_vm1, %v16836_v2  ;;  %v9602_v61 = vld [vmem:[%s9421_s13 + $0x80] sm:$0xff]  ;;  %v9605_v62 = vld [vmem:[%s9421_s13 + $0x88] sm:$0xff] }
  0x22   : > { %647 = vst.msk [vmem:[#allocation2 + $0xe0] sm:$0xff] %vm264_vm0, %v16836_v2  ;;  %649 = vst.msk [vmem:[#allocation2 + $0xf0] sm:$0xff] %vm264_vm0, %v16836_v2  ;;  %s8821_s12 = smov 32   ;;  %vm5712_vm12 = vcmask 293888   ;;  %vm5745_vm13 = vcmask 392192   ;;  %vm5778_vm14 = vcmask 490496  }
  0x23   : > { %648 = vst.msk [vmem:[#allocation2 + $0xe8] sm:$0x3] %vm619_vm1, %v16836_v2  ;;  %650 = vst.msk [vmem:[#allocation2 + $0xf8] sm:$0x3] %vm619_vm1, %v16836_v2  ;;  %7211 = vmatmul.mubr.msk.f32.gmra.mxu0 %vm264_vm0, %v9448_v8  ;;  %vm5811_vm15 = vcmask 588800   ;;  %s8831_s7 = smov 96  }
  0x24   : > { %651 = vst.msk [vmem:[#allocation2 + $0x100] sm:$0xff] %vm264_vm0, %v16836_v2  ;;  %653 = vst.msk [vmem:[#allocation2 + $0x110] sm:$0xff] %vm264_vm0, %v16836_v2  ;;  %7213 = vmatprep.mubr.msk.f32.mxu0 %vm264_vm0, %v9459_v9  ;;  %s8832_s8 = smov 108  }
  0x25   : > { %652 = vst.msk [vmem:[#allocation2 + $0x108] sm:$0x3] %vm619_vm1, %v16836_v2  ;;  %654 = vst.msk [vmem:[#allocation2 + $0x118] sm:$0x3] %vm619_vm1, %v16836_v2 }
  0x26   : > { %655 = vst.msk [vmem:[#allocation2 + $0x120] sm:$0xff] %vm264_vm0, %v16836_v2  ;;  %657 = vst.msk [vmem:[#allocation2 + $0x130] sm:$0xff] %vm264_vm0, %v16836_v2 }
  0x27   : > { %656 = vst.msk [vmem:[#allocation2 + $0x128] sm:$0x3] %vm619_vm1, %v16836_v2  ;;  %658 = vst.msk [vmem:[#allocation2 + $0x138] sm:$0x3] %vm619_vm1, %v16836_v2  ;;  %7214 = vmatmul.mubr.msk.f32.gmra.mxu0 %vm264_vm0, %v9462_v10 }
  0x28   : > { %659 = vst.msk [vmem:[#allocation2 + $0x140] sm:$0xff] %vm264_vm0, %v16836_v2  ;;  %661 = vst.msk [vmem:[#allocation2 + $0x150] sm:$0xff] %vm264_vm0, %v16836_v2  ;;  %7216 = vmatprep.mubr.msk.f32.mxu0 %vm264_vm0, %v9465_v11 }
  0x29   : > { %660 = vst.msk [vmem:[#allocation2 + $0x148] sm:$0x3] %vm619_vm1, %v16836_v2  ;;  %662 = vst.msk [vmem:[#allocation2 + $0x158] sm:$0x3] %vm619_vm1, %v16836_v2 }
  0x2a   : > { %663 = vst.msk [vmem:[#allocation2 + $0x160] sm:$0xff] %vm264_vm0, %v16836_v2  ;;  %665 = vst.msk [vmem:[#allocation2 + $0x170] sm:$0xff] %vm264_vm0, %v16836_v2 }
  0x2b   : > { %664 = vst.msk [vmem:[#allocation2 + $0x168] sm:$0x3] %vm619_vm1, %v16836_v2  ;;  %666 = vst.msk [vmem:[#allocation2 + $0x178] sm:$0x3] %vm619_vm1, %v16836_v2  ;;  %7217 = vmatmul.mubr.msk.f32.gmra.mxu0 %vm264_vm0, %v9476_v12 }
  0x2c   : > { %667 = vst.msk [vmem:[#allocation2 + $0x180] sm:$0xff] %vm264_vm0, %v16836_v2  ;;  %669 = vst.msk [vmem:[#allocation2 + $0x190] sm:$0xff] %vm264_vm0, %v16836_v2  ;;  %7219 = vmatprep.mubr.msk.f32.mxu0 %vm264_vm0, %v9479_v13 }
  0x2d   : > { %668 = vst.msk [vmem:[#allocation2 + $0x188] sm:$0x3] %vm619_vm1, %v16836_v2  ;;  %670 = vst.msk [vmem:[#allocation2 + $0x198] sm:$0x3] %vm619_vm1, %v16836_v2 }
  0x2e   : > { %671 = vst.msk [vmem:[#allocation2 + $0x1a0] sm:$0xff] %vm264_vm0, %v16836_v2  ;;  %673 = vst.msk [vmem:[#allocation2 + $0x1b0] sm:$0xff] %vm264_vm0, %v16836_v2 }
  0x2f   : > { %672 = vst.msk [vmem:[#allocation2 + $0x1a8] sm:$0x3] %vm619_vm1, %v16836_v2  ;;  %674 = vst.msk [vmem:[#allocation2 + $0x1b8] sm:$0x3] %vm619_vm1, %v16836_v2  ;;  %7220 = vmatmul.mubr.msk.f32.gmra.mxu0 %vm264_vm0, %v9482_v14 }
  0x30   : > { %675 = vst.msk [vmem:[#allocation2 + $0x1c0] sm:$0xff] %vm264_vm0, %v16836_v2  ;;  %677 = vst.msk [vmem:[#allocation2 + $0x1d0] sm:$0xff] %vm264_vm0, %v16836_v2  ;;  %7222 = vmatprep.mubr.msk.f32.mxu0 %vm264_vm0, %v9491_v15 }
  0x31   : > { %676 = vst.msk [vmem:[#allocation2 + $0x1c8] sm:$0x3] %vm619_vm1, %v16836_v2  ;;  %678 = vst.msk [vmem:[#allocation2 + $0x1d8] sm:$0x3] %vm619_vm1, %v16836_v2 }
  0x32   : > { %679 = vst.msk [vmem:[#allocation2 + $0x1e0] sm:$0xff] %vm264_vm0, %v16836_v2  ;;  %681 = vst.msk [vmem:[#allocation2 + $0x1f0] sm:$0xff] %vm264_vm0, %v16836_v2 }
  0x33   : > { %680 = vst.msk [vmem:[#allocation2 + $0x1e8] sm:$0x3] %vm619_vm1, %v16836_v2  ;;  %682 = vst.msk [vmem:[#allocation2 + $0x1f8] sm:$0x3] %vm619_vm1, %v16836_v2  ;;  %7223 = vmatmul.mubr.msk.f32.gmra.mxu0 %vm264_vm0, %v9494_v16 }
  0x34   : > { %683 = vst.msk [vmem:[#allocation2 + $0x200] sm:$0xff] %vm264_vm0, %v16836_v2  ;;  %685 = vst.msk [vmem:[#allocation2 + $0x210] sm:$0xff] %vm264_vm0, %v16836_v2  ;;  %7225 = vmatprep.mubr.msk.f32.mxu0 %vm264_vm0, %v9549_v38 }
  0x35   : > { %684 = vst.msk [vmem:[#allocation2 + $0x208] sm:$0x3] %vm619_vm1, %v16836_v2  ;;  %686 = vst.msk [vmem:[#allocation2 + $0x218] sm:$0x3] %vm619_vm1, %v16836_v2 }
  0x36   : > { %687 = vst.msk [vmem:[#allocation2 + $0x220] sm:$0xff] %vm264_vm0, %v16836_v2  ;;  %689 = vst.msk [vmem:[#allocation2 + $0x230] sm:$0xff] %vm264_vm0, %v16836_v2 }
  0x37   : > { %688 = vst.msk [vmem:[#allocation2 + $0x228] sm:$0x3] %vm619_vm1, %v16836_v2  ;;  %690 = vst.msk [vmem:[#allocation2 + $0x238] sm:$0x3] %vm619_vm1, %v16836_v2  ;;  %7226 = vmatmul.mubr.msk.f32.gmra.mxu0 %vm264_vm0, %v9573_v50 }
  0x38   : > { %691 = vst.msk [vmem:[#allocation2 + $0x240] sm:$0xff] %vm264_vm0, %v16836_v2  ;;  %693 = vst.msk [vmem:[#allocation2 + $0x250] sm:$0xff] %vm264_vm0, %v16836_v2  ;;  %7228 = vmatprep.mubr.msk.f32.mxu0 %vm264_vm0, %v9602_v61 }
  0x39   : > { %692 = vst.msk [vmem:[#allocation2 + $0x248] sm:$0x3] %vm619_vm1, %v16836_v2  ;;  %694 = vst.msk [vmem:[#allocation2 + $0x258] sm:$0x3] %vm619_vm1, %v16836_v2 }
  0x3a   : > { %695 = vst.msk [vmem:[#allocation2 + $0x260] sm:$0xff] %vm264_vm0, %v16836_v2  ;;  %697 = vst.msk [vmem:[#allocation2 + $0x270] sm:$0xff] %vm264_vm0, %v16836_v2 }
  0x3b   : > { %696 = vst.msk [vmem:[#allocation2 + $0x268] sm:$0x3] %vm619_vm1, %v16836_v2  ;;  %698 = vst.msk [vmem:[#allocation2 + $0x278] sm:$0x3] %vm619_vm1, %v16836_v2  ;;  %7229 = vmatmul.mubr.msk.f32.gmra.mxu0 %vm264_vm0, %v9605_v62 }
  0x3c   : > { %699 = vst.msk [vmem:[#allocation2 + $0x280] sm:$0xff] %vm264_vm0, %v16836_v2  ;;  %701 = vst.msk [vmem:[#allocation2 + $0x290] sm:$0xff] %vm264_vm0, %v16836_v2 }
  0x3d   : > { %700 = vst.msk [vmem:[#allocation2 + $0x288] sm:$0x3] %vm619_vm1, %v16836_v2  ;;  %702 = vst.msk [vmem:[#allocation2 + $0x298] sm:$0x3] %vm619_vm1, %v16836_v2 }
  0x3e   : > { %703 = vst.msk [vmem:[#allocation2 + $0x2a0] sm:$0xff] %vm264_vm0, %v16836_v2  ;;  %705 = vst.msk [vmem:[#allocation2 + $0x2b0] sm:$0xff] %vm264_vm0, %v16836_v2 }
  0x3f   : > { %704 = vst.msk [vmem:[#allocation2 + $0x2a8] sm:$0x3] %vm619_vm1, %v16836_v2  ;;  %706 = vst.msk [vmem:[#allocation2 + $0x2b8] sm:$0x3] %vm619_vm1, %v16836_v2 }
  0x40   : > { %707 = vst.msk [vmem:[#allocation2 + $0x2c0] sm:$0xff] %vm264_vm0, %v16836_v2  ;;  %709 = vst.msk [vmem:[#allocation2 + $0x2d0] sm:$0xff] %vm264_vm0, %v16836_v2 }
  0x41   : > { %708 = vst.msk [vmem:[#allocation2 + $0x2c8] sm:$0x3] %vm619_vm1, %v16836_v2  ;;  %710 = vst.msk [vmem:[#allocation2 + $0x2d8] sm:$0x3] %vm619_vm1, %v16836_v2 }
  0x42   : > { %711 = vst.msk [vmem:[#allocation2 + $0x2e0] sm:$0xff] %vm264_vm0, %v16836_v2  ;;  %713 = vst.msk [vmem:[#allocation2 + $0x2f0] sm:$0xff] %vm264_vm0, %v16836_v2 }
  0x43   : > { %712 = vst.msk [vmem:[#allocation2 + $0x2e8] sm:$0x3] %vm619_vm1, %v16836_v2  ;;  %714 = vst.msk [vmem:[#allocation2 + $0x2f8] sm:$0x3] %vm619_vm1, %v16836_v2 }
  0x44   : > { %715 = vst.msk [vmem:[#allocation2 + $0x300] sm:$0xff] %vm264_vm0, %v16836_v2  ;;  %717 = vst.msk [vmem:[#allocation2 + $0x310] sm:$0xff] %vm264_vm0, %v16836_v2 }
  0x45   : > { %716 = vst.msk [vmem:[#allocation2 + $0x308] sm:$0x3] %vm619_vm1, %v16836_v2  ;;  %718 = vst.msk [vmem:[#allocation2 + $0x318] sm:$0x3] %vm619_vm1, %v16836_v2 }
  0x46   : > { %719 = vst.msk [vmem:[#allocation2 + $0x320] sm:$0xff] %vm264_vm0, %v16836_v2  ;;  %721 = vst.msk [vmem:[#allocation2 + $0x330] sm:$0xff] %vm264_vm0, %v16836_v2 }
  0x47   : > { %720 = vst.msk [vmem:[#allocation2 + $0x328] sm:$0x3] %vm619_vm1, %v16836_v2  ;;  %722 = vst.msk [vmem:[#allocation2 + $0x338] sm:$0x3] %vm619_vm1, %v16836_v2 }
  0x48   : > { %723 = vst.msk [vmem:[#allocation2 + $0x340] sm:$0xff] %vm264_vm0, %v16836_v2  ;;  %725 = vst.msk [vmem:[#allocation2 + $0x350] sm:$0xff] %vm264_vm0, %v16836_v2 }
  0x49   : > { %724 = vst.msk [vmem:[#allocation2 + $0x348] sm:$0x3] %vm619_vm1, %v16836_v2  ;;  %726 = vst.msk [vmem:[#allocation2 + $0x358] sm:$0x3] %vm619_vm1, %v16836_v2 }
  0x4a   : > { %727 = vst.msk [vmem:[#allocation2 + $0x360] sm:$0xff] %vm264_vm0, %v16836_v2  ;;  %729 = vst.msk [vmem:[#allocation2 + $0x370] sm:$0xff] %vm264_vm0, %v16836_v2 }
  0x4b   : > { %728 = vst.msk [vmem:[#allocation2 + $0x368] sm:$0x3] %vm619_vm1, %v16836_v2  ;;  %730 = vst.msk [vmem:[#allocation2 + $0x378] sm:$0x3] %vm619_vm1, %v16836_v2 }
  0x4c   : > { %731 = vst.msk [vmem:[#allocation2 + $0x380] sm:$0xff] %vm264_vm0, %v16836_v2  ;;  %733 = vst.msk [vmem:[#allocation2 + $0x390] sm:$0xff] %vm264_vm0, %v16836_v2 }
  0x4d   : > { %732 = vst.msk [vmem:[#allocation2 + $0x388] sm:$0x3] %vm619_vm1, %v16836_v2  ;;  %734 = vst.msk [vmem:[#allocation2 + $0x398] sm:$0x3] %vm619_vm1, %v16836_v2 }
  0x4e   : > { %735 = vst.msk [vmem:[#allocation2 + $0x3a0] sm:$0xff] %vm264_vm0, %v16836_v2  ;;  %737 = vst.msk [vmem:[#allocation2 + $0x3b0] sm:$0xff] %vm264_vm0, %v16836_v2 }
  0x4f   : > { %736 = vst.msk [vmem:[#allocation2 + $0x3a8] sm:$0x3] %vm619_vm1, %v16836_v2  ;;  %738 = vst.msk [vmem:[#allocation2 + $0x3b8] sm:$0x3] %vm619_vm1, %v16836_v2  ;;  %vm5844_vm1 = vcmask 687104  }
  0x50   : > { %740 = vst.msk [vmem:[#allocation3] sm:$0xff] %vm739_vm2, %v16836_v2  ;;  %743 = vst.msk [vmem:[#allocation3 + $0x10] sm:$0xff] %vm739_vm2, %v16836_v2 }
  0x51   : > { %745 = vst.msk [vmem:[#allocation3 + $0x20] sm:$0xff] %vm739_vm2, %v16836_v2  ;;  %747 = vst.msk [vmem:[#allocation3 + $0x30] sm:$0xff] %vm739_vm2, %v16836_v2 }
  0x52   : > { %749 = vst.msk [vmem:[#allocation3 + $0x40] sm:$0xff] %vm739_vm2, %v16836_v2  ;;  %751 = vst.msk [vmem:[#allocation3 + $0x50] sm:$0xff] %vm739_vm2, %v16836_v2 }
  0x53   : > { %753 = vst.msk [vmem:[#allocation3 + $0x60] sm:$0xff] %vm739_vm2, %v16836_v2  ;;  %755 = vst.msk [vmem:[#allocation3 + $0x70] sm:$0xff] %vm739_vm2, %v16836_v2 }
  0x54   : > { %757 = vst.msk [vmem:[#allocation3 + $0x80] sm:$0xff] %vm739_vm2, %v16836_v2  ;;  %759 = vst.msk [vmem:[#allocation3 + $0x90] sm:$0xff] %vm739_vm2, %v16836_v2 }
  0x55   : > { %761 = vst.msk [vmem:[#allocation3 + $0xa0] sm:$0xff] %vm739_vm2, %v16836_v2  ;;  %763 = vst.msk [vmem:[#allocation3 + $0xb0] sm:$0xff] %vm739_vm2, %v16836_v2 }
  0x56   : > { %765 = vst.msk [vmem:[#allocation3 + $0xc0] sm:$0xff] %vm739_vm2, %v16836_v2  ;;  %767 = vst.msk [vmem:[#allocation3 + $0xd0] sm:$0xff] %vm739_vm2, %v16836_v2 }
  0x57   : > { %769 = vst.msk [vmem:[#allocation3 + $0xe0] sm:$0xff] %vm739_vm2, %v16836_v2  ;;  %771 = vst.msk [vmem:[#allocation3 + $0xf0] sm:$0xff] %vm739_vm2, %v16836_v2  ;;  %v9496_v17 = vld [vmem:[#allocation3] sm:$0xff]  ;;  %v9502_v18 = vld [vmem:[#allocation3 + $0x10] sm:$0xff] }
  0x58   : > { %773 = vst.msk [vmem:[#allocation3 + $0x100] sm:$0xff] %vm739_vm2, %v16836_v2  ;;  %775 = vst.msk [vmem:[#allocation3 + $0x110] sm:$0xff] %vm739_vm2, %v16836_v2  ;;  %v2113_v19 = vrot.slane %v9496_v17, 1  ;;  %v2209_v20 = vrot.slane %v9496_v17, 2  ;;  %v7458_v23 = vpack.i.bf16 %v9502_v18, %v9496_v17  ;;  %v9518_v25 = vld [vmem:[#allocation3 + $0x20] sm:$0xff]  ;;  %v9520_v26 = vld [vmem:[#allocation3 + $0x30] sm:$0xff] }
  0x59   : > { %777 = vst.msk [vmem:[#allocation3 + $0x120] sm:$0xff] %vm739_vm2, %v16836_v2  ;;  %779 = vst.msk [vmem:[#allocation3 + $0x130] sm:$0xff] %vm739_vm2, %v16836_v2  ;;  %v9506_v21 = vld [vmem:[#allocation3 + $0x40] sm:$0xff]  ;;  %v9508_v22 = vld [vmem:[#allocation3 + $0x50] sm:$0xff]  ;;  %v2116_v28 = vrot.slane %v9502_v18, 1  ;;  %v9530_v30 = vpack.i.bf16 %v9520_v26, %v9518_v25  ;;  %v2119_v34 = vrot.slane %v9518_v25, 1 }
  0x5a   : > { %781 = vst.msk [vmem:[#allocation3 + $0x140] sm:$0xff] %vm739_vm2, %v16836_v2  ;;  %783 = vst.msk [vmem:[#allocation3 + $0x150] sm:$0xff] %vm739_vm2, %v16836_v2  ;;  %v9516_v24 = vpack.i.bf16 %v9508_v22, %v9506_v21  ;;  %v9522_v27 = vld [vmem:[#allocation3 + $0x60] sm:$0xff]  ;;  %v2125_v29 = vrot.slane %v9506_v21, 1  ;;  %v9532_v31 = vld [vmem:[#allocation3 + $0x70] sm:$0xff]  ;;  %7459 = vrot.lane.b32.xlu0 %v7458_v23, %s8809_s14  ;;  %v2122_v40 = vrot.slane %v9520_v26, 1 }
  0x5b   : > { %785 = vst.msk [vmem:[#allocation3 + $0x160] sm:$0xff] %vm739_vm2, %v16836_v2  ;;  %787 = vst.msk [vmem:[#allocation3 + $0x170] sm:$0xff] %vm739_vm2, %v16836_v2  ;;  %v9544_v35 = vpack.i.bf16 %v9532_v31, %v9522_v27  ;;  %v2128_v44 = vrot.slane %v9508_v22, 1  ;;  %v2131_v56 = vrot.slane %v9522_v27, 1  ;;  %v2134_v60 = vrot.slane %v9532_v31, 1  ;;  %v9621_v23 = vld [vmem:[%s9421_s13 + $0x90] sm:$0xff] }
  0x5c   : > { %789 = vst.msk [vmem:[#allocation3 + $0x180] sm:$0xff] %vm739_vm2, %v16836_v2  ;;  %791 = vst.msk [vmem:[#allocation3 + $0x190] sm:$0xff] %vm739_vm2, %v16836_v2  ;;  %7469 = vrot.lane.b32.xlu1 %v9516_v24, %s8809_s14  ;;  %v2221_v17 = vrot.slane %v9506_v21, 2  ;;  %7231 = vmatprep.mubr.msk.f32.mxu0 %vm264_vm0, %v9621_v23 }
  0x5d   : > { %793 = vst.msk [vmem:[#allocation3 + $0x1a0] sm:$0xff] %vm739_vm2, %v16836_v2  ;;  %795 = vst.msk [vmem:[#allocation3 + $0x1b0] sm:$0xff] %vm739_vm2, %v16836_v2 }
  0x5e   : > { %797 = vst.msk [vmem:[#allocation3 + $0x1c0] sm:$0xff] %vm739_vm2, %v16836_v2  ;;  %799 = vst.msk [vmem:[#allocation3 + $0x1d0] sm:$0xff] %vm739_vm2, %v16836_v2  ;;  %7464 = vrot.lane.b32.xlu0 %v9530_v30, %s8809_s14 }
  0x5f   : > { %801 = vst.msk [vmem:[#allocation3 + $0x1e0] sm:$0xff] %vm739_vm2, %v16836_v2  ;;  %803 = vst.msk [vmem:[#allocation3 + $0x1f0] sm:$0xff] %vm739_vm2, %v16836_v2 }
  0x60   : > { %805 = vst.msk [vmem:[#allocation3 + $0x200] sm:$0xff] %vm739_vm2, %v16836_v2  ;;  %807 = vst.msk [vmem:[#allocation3 + $0x210] sm:$0xff] %vm739_vm2, %v16836_v2  ;;  %7474 = vrot.lane.b32.xlu1 %v9544_v35, %s8809_s14 }
  0x61   : > { %809 = vst.msk [vmem:[#allocation3 + $0x220] sm:$0xff] %vm739_vm2, %v16836_v2  ;;  %811 = vst.msk [vmem:[#allocation3 + $0x230] sm:$0xff] %vm739_vm2, %v16836_v2 }
  0x62   : > { %813 = vst.msk [vmem:[#allocation3 + $0x240] sm:$0xff] %vm739_vm2, %v16836_v2  ;;  %815 = vst.msk [vmem:[#allocation3 + $0x250] sm:$0xff] %vm739_vm2, %v16836_v2 }
  0x63   : > { %817 = vst.msk [vmem:[#allocation3 + $0x260] sm:$0xff] %vm739_vm2, %v16836_v2  ;;  %819 = vst.msk [vmem:[#allocation3 + $0x270] sm:$0xff] %vm739_vm2, %v16836_v2 }
  0x64   : > { %821 = vst.msk [vmem:[#allocation3 + $0x280] sm:$0xff] %vm739_vm2, %v16836_v2  ;;  %823 = vst.msk [vmem:[#allocation3 + $0x290] sm:$0xff] %vm739_vm2, %v16836_v2 }
  0x65   : > { %825 = vst.msk [vmem:[#allocation3 + $0x2a0] sm:$0xff] %vm739_vm2, %v16836_v2  ;;  %827 = vst.msk [vmem:[#allocation3 + $0x2b0] sm:$0xff] %vm739_vm2, %v16836_v2 }
  0x66   : > { %829 = vst.msk [vmem:[#allocation3 + $0x2c0] sm:$0xff] %vm739_vm2, %v16836_v2  ;;  %831 = vst.msk [vmem:[#allocation3 + $0x2d0] sm:$0xff] %vm739_vm2, %v16836_v2 }
  0x67   : > { %833 = vst.msk [vmem:[#allocation3 + $0x2e0] sm:$0xff] %vm739_vm2, %v16836_v2  ;;  %835 = vst.msk [vmem:[#allocation3 + $0x2f0] sm:$0xff] %vm739_vm2, %v16836_v2 }
  0x68   : > { %837 = vst.msk [vmem:[#allocation3 + $0x300] sm:$0xff] %vm739_vm2, %v16836_v2  ;;  %839 = vst.msk [vmem:[#allocation3 + $0x310] sm:$0xff] %vm739_vm2, %v16836_v2 }
  0x69   : > { %841 = vst.msk [vmem:[#allocation3 + $0x320] sm:$0xff] %vm739_vm2, %v16836_v2  ;;  %843 = vst.msk [vmem:[#allocation3 + $0x330] sm:$0xff] %vm739_vm2, %v16836_v2 }
  0x6a   : > { %845 = vst.msk [vmem:[#allocation3 + $0x340] sm:$0xff] %vm739_vm2, %v16836_v2  ;;  %847 = vst.msk [vmem:[#allocation3 + $0x350] sm:$0xff] %vm739_vm2, %v16836_v2 }
  0x6b   : > { %849 = vst.msk [vmem:[#allocation3 + $0x360] sm:$0xff] %vm739_vm2, %v16836_v2  ;;  %851 = vst.msk [vmem:[#allocation3 + $0x370] sm:$0xff] %vm739_vm2, %v16836_v2 }
  0x6c   : > { %853 = vst.msk [vmem:[#allocation3 + $0x380] sm:$0xff] %vm739_vm2, %v16836_v2  ;;  %855 = vst.msk [vmem:[#allocation3 + $0x390] sm:$0xff] %vm739_vm2, %v16836_v2 }
  0x6d   : > { %857 = vst.msk [vmem:[#allocation3 + $0x3a0] sm:$0xff] %vm739_vm2, %v16836_v2  ;;  %859 = vst.msk [vmem:[#allocation3 + $0x3b0] sm:$0xff] %vm739_vm2, %v16836_v2 }
  0x6e   : > { %742 = vst.msk [vmem:[#allocation3 + $0x8] sm:$0x3] %vm741_vm3, %v16836_v2  ;;  %744 = vst.msk [vmem:[#allocation3 + $0x18] sm:$0x3] %vm741_vm3, %v16836_v2 }
  0x6f   : > { %746 = vst.msk [vmem:[#allocation3 + $0x28] sm:$0x3] %vm741_vm3, %v16836_v2  ;;  %748 = vst.msk [vmem:[#allocation3 + $0x38] sm:$0x3] %vm741_vm3, %v16836_v2 }
  0x70   : > { %750 = vst.msk [vmem:[#allocation3 + $0x48] sm:$0x3] %vm741_vm3, %v16836_v2  ;;  %752 = vst.msk [vmem:[#allocation3 + $0x58] sm:$0x3] %vm741_vm3, %v16836_v2 }
  0x71   : > { %754 = vst.msk [vmem:[#allocation3 + $0x68] sm:$0x3] %vm741_vm3, %v16836_v2  ;;  %756 = vst.msk [vmem:[#allocation3 + $0x78] sm:$0x3] %vm741_vm3, %v16836_v2 }
  0x72   : > { %758 = vst.msk [vmem:[#allocation3 + $0x88] sm:$0x3] %vm741_vm3, %v16836_v2  ;;  %760 = vst.msk [vmem:[#allocation3 + $0x98] sm:$0x3] %vm741_vm3, %v16836_v2 }
  0x73   : > { %762 = vst.msk [vmem:[#allocation3 + $0xa8] sm:$0x3] %vm741_vm3, %v16836_v2  ;;  %764 = vst.msk [vmem:[#allocation3 + $0xb8] sm:$0x3] %vm741_vm3, %v16836_v2 }
  0x74   : > { %766 = vst.msk [vmem:[#allocation3 + $0xc8] sm:$0x3] %vm741_vm3, %v16836_v2  ;;  %768 = vst.msk [vmem:[#allocation3 + $0xd8] sm:$0x3] %vm741_vm3, %v16836_v2 }
  0x75   : > { %770 = vst.msk [vmem:[#allocation3 + $0xe8] sm:$0x3] %vm741_vm3, %v16836_v2  ;;  %772 = vst.msk [vmem:[#allocation3 + $0xf8] sm:$0x3] %vm741_vm3, %v16836_v2  ;;  %v9534_v32 = vld [vmem:[#allocation3 + $0x8] sm:$0x3] }
  0x76   : > { %774 = vst.msk [vmem:[#allocation3 + $0x108] sm:$0x3] %vm741_vm3, %v16836_v2  ;;  %776 = vst.msk [vmem:[#allocation3 + $0x118] sm:$0x3] %vm741_vm3, %v16836_v2  ;;  %v9536_v33 = vld [vmem:[#allocation3 + $0x18] sm:$0x3] }
  0x77   : > { %778 = vst.msk [vmem:[#allocation3 + $0x128] sm:$0x3] %vm741_vm3, %v16836_v2  ;;  %780 = vst.msk [vmem:[#allocation3 + $0x138] sm:$0x3] %vm741_vm3, %v16836_v2  ;;  %v2114_v36 = vrot.slane %v9534_v32, 1  ;;  %v2117_v37 = vrot.slane %v9536_v33, 1 }
  0x78   : > { %782 = vst.msk [vmem:[#allocation3 + $0x148] sm:$0x3] %vm741_vm3, %v16836_v2  ;;  %784 = vst.msk [vmem:[#allocation3 + $0x158] sm:$0x3] %vm741_vm3, %v16836_v2  ;;  %v9551_v39 = vld [vmem:[#allocation3 + $0x28] sm:$0x3] }
  0x79   : > { %786 = vst.msk [vmem:[#allocation3 + $0x168] sm:$0x3] %vm741_vm3, %v16836_v2  ;;  %788 = vst.msk [vmem:[#allocation3 + $0x178] sm:$0x3] %vm741_vm3, %v16836_v2  ;;  %v9556_v41 = vld [vmem:[#allocation3 + $0x38] sm:$0x3]  ;;  %v2115_v45 = vsel %vm1167_vm4, %v2113_v19, %v2114_v36  ;;  %v9566_v46 = vsel %vm1167_vm4, %v2116_v28, %v2117_v37 }
  0x7a   : > { %790 = vst.msk [vmem:[#allocation3 + $0x188] sm:$0x3] %vm741_vm3, %v16836_v2  ;;  %792 = vst.msk [vmem:[#allocation3 + $0x198] sm:$0x3] %vm741_vm3, %v16836_v2  ;;  %v2120_v42 = vrot.slane %v9551_v39, 1  ;;  %v2123_v47 = vrot.slane %v9556_v41, 1  ;;  %v7478_v51 = vpack.i.bf16 %v9566_v46, %v2115_v45 }
  0x7b   : > { %794 = vst.msk [vmem:[#allocation3 + $0x1a8] sm:$0x3] %vm741_vm3, %v16836_v2  ;;  %796 = vst.msk [vmem:[#allocation3 + $0x1b8] sm:$0x3] %vm741_vm3, %v16836_v2  ;;  %v9559_v43 = vld [vmem:[#allocation3 + $0x48] sm:$0x3] }
  0x7c   : > { %798 = vst.msk [vmem:[#allocation3 + $0x1c8] sm:$0x3] %vm741_vm3, %v16836_v2  ;;  %800 = vst.msk [vmem:[#allocation3 + $0x1d8] sm:$0x3] %vm741_vm3, %v16836_v2  ;;  %v9569_v48 = vld [vmem:[#allocation3 + $0x58] sm:$0x3]  ;;  %v9579_v52 = vsel %vm1167_vm4, %v2119_v34, %v2120_v42  ;;  %v9594_v57 = vsel %vm1167_vm4, %v2122_v40, %v2123_v47  ;;  %7479 = vrot.lane.b32.xlu0 %v7478_v51, %s8810_s15 }
  0x7d   : > { %802 = vst.msk [vmem:[#allocation3 + $0x1e8] sm:$0x3] %vm741_vm3, %v16836_v2  ;;  %804 = vst.msk [vmem:[#allocation3 + $0x1f8] sm:$0x3] %vm741_vm3, %v16836_v2  ;;  %v2126_v49 = vrot.slane %v9559_v43, 1  ;;  %v2129_v53 = vrot.slane %v9569_v48, 1  ;;  %v9609_v63 = vpack.i.bf16 %v9594_v57, %v9579_v52 }
  0x7e   : > { %806 = vst.msk [vmem:[#allocation3 + $0x208] sm:$0x3] %vm741_vm3, %v16836_v2  ;;  %808 = vst.msk [vmem:[#allocation3 + $0x218] sm:$0x3] %vm741_vm3, %v16836_v2  ;;  %v9584_v54 = vld [vmem:[#allocation3 + $0x68] sm:$0x3] }
  0x7f   : > { %810 = vst.msk [vmem:[#allocation3 + $0x228] sm:$0x3] %vm741_vm3, %v16836_v2  ;;  %812 = vst.msk [vmem:[#allocation3 + $0x238] sm:$0x3] %vm741_vm3, %v16836_v2  ;;  %v9586_v55 = vld [vmem:[#allocation3 + $0x78] sm:$0x3]  ;;  %v9597_v58 = vsel %vm1167_vm4, %v2125_v29, %v2126_v49  ;;  %v9612_v0 = vsel %vm1167_vm4, %v2128_v44, %v2129_v53  ;;  %7484 = vrot.lane.b32.xlu1 %v9609_v63, %s8810_s15 }
  0x80   : > { %814 = vst.msk [vmem:[#allocation3 + $0x248] sm:$0x3] %vm741_vm3, %v16836_v2  ;;  %816 = vst.msk [vmem:[#allocation3 + $0x258] sm:$0x3] %vm741_vm3, %v16836_v2  ;;  %v2132_v59 = vrot.slane %v9584_v54, 1  ;;  %v2135_v1 = vrot.slane %v9586_v55, 1  ;;  %v9649_v40 = vpack.i.bf16 %v9612_v0, %v9597_v58 }
  0x81   : > { %818 = vst.msk [vmem:[#allocation3 + $0x268] sm:$0x3] %vm741_vm3, %v16836_v2  ;;  %820 = vst.msk [vmem:[#allocation3 + $0x278] sm:$0x3] %vm741_vm3, %v16836_v2  ;;  %v2210_v19 = vrot.slane %v9534_v32, 2  ;;  %v9624_v28 = vld [vmem:[%s9421_s13 + $0x98] sm:$0xff] }
  0x82   : > { %822 = vst.msk [vmem:[#allocation3 + $0x288] sm:$0x3] %vm741_vm3, %v16836_v2  ;;  %824 = vst.msk [vmem:[#allocation3 + $0x298] sm:$0x3] %vm741_vm3, %v16836_v2  ;;  %v9627_v29 = vld [vmem:[%s9421_s13 + $0xa0] sm:$0xff]  ;;  %v9632_v34 = vsel %vm1167_vm4, %v2131_v56, %v2132_v59  ;;  %v2212_v32 = vrot.slane %v9502_v18, 2  ;;  %7489 = vrot.lane.b32.xlu0 %v9649_v40, %s8810_s15  ;;  %7232 = vmatmul.mubr.msk.f32.gmra.mxu0 %vm264_vm0, %v9624_v28 }
  0x83   : > { %826 = vst.msk [vmem:[#allocation3 + $0x2a8] sm:$0x3] %vm741_vm3, %v16836_v2  ;;  %828 = vst.msk [vmem:[#allocation3 + $0x2b8] sm:$0x3] %vm741_vm3, %v16836_v2  ;;  %v2213_v36 = vrot.slane %v9536_v33, 2  ;;  %v9643_v37 = vld [vmem:[%s9421_s13 + $0xa8] sm:$0xff]  ;;  %v9652_v33 = vsel %vm1167_vm4, %v2134_v60, %v2135_v1  ;;  %7234 = vmatprep.mubr.msk.f32.mxu0 %vm264_vm0, %v9627_v29 }
  0x84   : > { %830 = vst.msk [vmem:[#allocation3 + $0x2c8] sm:$0x3] %vm741_vm3, %v16836_v2  ;;  %832 = vst.msk [vmem:[#allocation3 + $0x2d8] sm:$0x3] %vm741_vm3, %v16836_v2  ;;  %v2215_v42 = vrot.slane %v9518_v25, 2  ;;  %v2216_v44 = vrot.slane %v9551_v39, 2  ;;  %v9669_v49 = vpack.i.bf16 %v9652_v33, %v9632_v34  ;;  %v2211_v39 = vsel %vm1468_vm5, %v2209_v20, %v2210_v19 }
  0x85   : > { %834 = vst.msk [vmem:[#allocation3 + $0x2e8] sm:$0x3] %vm741_vm3, %v16836_v2  ;;  %836 = vst.msk [vmem:[#allocation3 + $0x2f8] sm:$0x3] %vm741_vm3, %v16836_v2  ;;  %v9659_v45 = vld [vmem:[%s9421_s13 + $0xb0] sm:$0xff]  ;;  %v9662_v47 = vld [vmem:[%s9421_s13 + $0xb8] sm:$0xff]  ;;  %v9681_v51 = vsel %vm1468_vm5, %v2212_v32, %v2213_v36 }
  0x86   : > { %838 = vst.msk [vmem:[#allocation3 + $0x308] sm:$0x3] %vm741_vm3, %v16836_v2  ;;  %840 = vst.msk [vmem:[#allocation3 + $0x318] sm:$0x3] %vm741_vm3, %v16836_v2  ;;  %v2218_v53 = vrot.slane %v9520_v26, 2  ;;  %v2219_v56 = vrot.slane %v9556_v41, 2  ;;  %v9684_v59 = vsel %vm1468_vm5, %v2215_v42, %v2216_v44  ;;  %7494 = vrot.lane.b32.xlu1 %v9669_v49, %s8810_s15  ;;  %7235 = vmatmul.mubr.msk.f32.gmra.mxu0 %vm264_vm0, %v9643_v37 }
  0x87   : > { %842 = vst.msk [vmem:[#allocation3 + $0x328] sm:$0x3] %vm741_vm3, %v16836_v2  ;;  %844 = vst.msk [vmem:[#allocation3 + $0x338] sm:$0x3] %vm741_vm3, %v16836_v2  ;;  %v2222_v20 = vrot.slane %v9559_v43, 2  ;;  %v2224_v60 = vrot.slane %v9508_v22, 2  ;;  %v7498_v43 = vpack.i.bf16 %v9681_v51, %v2211_v39  ;;  %7237 = vmatprep.mubr.msk.f32.mxu0 %vm264_vm0, %v9659_v45 }
  0x88   : > { %846 = vst.msk [vmem:[#allocation3 + $0x348] sm:$0x3] %vm741_vm3, %v16836_v2  ;;  %848 = vst.msk [vmem:[#allocation3 + $0x358] sm:$0x3] %vm741_vm3, %v16836_v2  ;;  %v9691_v41 = vsel %vm1468_vm5, %v2218_v53, %v2219_v56  ;;  %v2225_v1 = vrot.slane %v9569_v48, 2  ;;  %v2227_v19 = vrot.slane %v9522_v27, 2 }
  0x89   : > { %850 = vst.msk [vmem:[#allocation3 + $0x368] sm:$0x3] %vm741_vm3, %v16836_v2  ;;  %852 = vst.msk [vmem:[#allocation3 + $0x378] sm:$0x3] %vm741_vm3, %v16836_v2  ;;  %v2228_v32 = vrot.slane %v9584_v54, 2  ;;  %v2230_v36 = vrot.slane %v9532_v31, 2  ;;  %v9707_v48 = vpack.i.bf16 %v9691_v41, %v9684_v59  ;;  %v2223_v44 = vsel %vm1468_vm5, %v2221_v17, %v2222_v20  ;;  %7499 = vrot.lane.b32.xlu0 %v7498_v43, %s8811_s16 }
  0x8a   : > { %854 = vst.msk [vmem:[#allocation3 + $0x388] sm:$0x3] %vm741_vm3, %v16836_v2  ;;  %856 = vst.msk [vmem:[#allocation3 + $0x398] sm:$0x3] %vm741_vm3, %v16836_v2  ;;  %v2231_v42 = vrot.slane %v9586_v55, 2  ;;  %v2226_v54 = vsel %vm1468_vm5, %v2224_v60, %v2225_v1  ;;  %v7518_v17 = vpack.i.bf16 %v9518_v25, %v9502_v18  ;;  %v7523_v20 = vpack.i.bf16 %v9506_v21, %v9520_v26  ;;  %v1945_v60 = vld [vmem:[#allocation3 + $0x80] sm:$0xff] }
  0x8b   : > { %858 = vst.msk [vmem:[#allocation3 + $0x3a8] sm:$0x3] %vm741_vm3, %v16836_v2  ;;  %860 = vst.msk [vmem:[#allocation3 + $0x3b8] sm:$0x3] %vm741_vm3, %v16836_v2  ;;  %v2229_v53 = vsel %vm1468_vm5, %v2227_v19, %v2228_v32  ;;  %7504 = vrot.lane.b32.xlu1 %v9707_v48, %s8811_s16  ;;  %v9721_v55 = vpack.i.bf16 %v2226_v54, %v2223_v44  ;;  %v1946_v1 = vld [vmem:[#allocation3 + $0x88] sm:$0x3]  ;;  %v7528_v19 = vpack.i.bf16 %v9522_v27, %v9508_v22 }
  0x8c   : > { %17350 = vst [vmem:[#allocation7_spill] sm:$0xff] %v9425_v3  ;;  %17351 = vst [vmem:[#allocation8_spill] sm:$0xff] %v9428_v4  ;;  %v2232_v56 = vsel %vm1468_vm5, %v2230_v36, %v2231_v42  ;;  %v7533_v18 = vpack.i.bf16 %v1945_v60, %v9532_v31  ;;  %v2313_v25 = vrot.slane %v1945_v60, 1  ;;  %v2314_v21 = vrot.slane %v1946_v1, 1  ;;  %7238 = vmatmul.mubr.msk.f32.gmra.mxu0 %vm264_vm0, %v9662_v47  ;;  %v1947_v36 = vld [vmem:[#allocation3 + $0x90] sm:$0xff] }
  0x8d   : > { %17352 = vst [vmem:[#allocation9_spill] sm:$0xff] %v9431_v5  ;;  %862 = vst.msk [vmem:[#allocation2 + $0xb1] sm:$0xff] %vm264_vm0, %v9425_v3  ;;  %v9723_v39 = vpack.i.bf16 %v2232_v56, %v2229_v53  ;;  %7509 = vrot.lane.b32.xlu0 %v9721_v55, %s8811_s16  ;;  %v7538_v26 = vpack.i.bf16 %v9579_v52, %v9566_v46  ;;  %v7543_v22 = vpack.i.bf16 %v9597_v58, %v9594_v57  ;;  %vm5877_vm3 = vcmask 785408  }
  0x8e   : > { %863 = vst.msk [vmem:[#allocation2 + $0xc1] sm:$0xff] %vm264_vm0, %v9428_v4  ;;  %864 = vst.msk [vmem:[#allocation2 + $0xd1] sm:$0xff] %vm264_vm0, %v9431_v5  ;;  %v2315_v27 = vsel %vm1167_vm4, %v2313_v25, %v2314_v21  ;;  %v7548_v31 = vpack.i.bf16 %v9632_v34, %v9612_v0  ;;  %v2325_v52 = vrot.slane %v1945_v60, 2  ;;  %v2326_v57 = vrot.slane %v1946_v1, 2 }
  0x8f   : > { %17353 = vst [vmem:[#allocation10_spill] sm:$0xff] %v9442_v6  ;;  %17354 = vst [vmem:[#allocation11_spill] sm:$0xff] %v9445_v7  ;;  %7514 = vrot.lane.b32.xlu1 %v9723_v39, %s8811_s16  ;;  %v7553_v46 = vpack.i.bf16 %v2315_v27, %v9652_v33  ;;  %v7558_v58 = vpack.i.bf16 %v9684_v59, %v9681_v51  ;;  %v7563_v32 = vpack.i.bf16 %v2223_v44, %v9691_v41  ;;  %v1948_v51 = vld [vmem:[#allocation3 + $0x98] sm:$0x3] }
  0x90   : > { %17355 = vst [vmem:[#allocation12_spill] sm:$0xff] %v9448_v8  ;;  %865 = vst.msk [vmem:[#allocation2 + $0xe1] sm:$0xff] %vm264_vm0, %v9442_v6  ;;  %v2327_v0 = vsel %vm1468_vm5, %v2325_v52, %v2326_v57  ;;  %v7568_v34 = vpack.i.bf16 %v2229_v53, %v2226_v54  ;;  %v7593_v59 = vpack.i.bf16 %v1947_v36, %v1945_v60  ;;  %v2345_v41 = vrot.slane %v1947_v36, 1  ;;  %v9827_v54 = vld [vmem:[%s9421_s13 + $0xd8] sm:$0xff]  ;;  %v9830_v53 = vld [vmem:[%s9421_s13 + $0xe0] sm:$0xff] }
  0x91   : > { %866 = vst.msk [vmem:[#allocation2 + $0xf1] sm:$0xff] %vm264_vm0, %v9445_v7  ;;  %867 = vst.msk [vmem:[#allocation2 + $0x101] sm:$0xff] %vm264_vm0, %v9448_v8  ;;  %7519 = vrot.lane.b32.xlu0 %v7518_v17, %s8812_s17  ;;  %v7573_v33 = vpack.i.bf16 %v2327_v0, %v2232_v56  ;;  %v2346_v43 = vrot.slane %v1948_v51, 1  ;;  %v2358_v44 = vrot.slane %v1948_v51, 2  ;;  %v9841_v56 = vld [vmem:[%s9421_s13 + $0xe8] sm:$0xff] }
  0x92   : > { %17356 = vst [vmem:[#allocation13_spill] sm:$0xff] %v9459_v9  ;;  %17357 = vst [vmem:[#allocation14_spill] sm:$0xff] %v9462_v10  ;;  %v9864_v17 = vld [vmem:[%s16832_s2] ss:$0 sm:$0xff] }
  0x93   : > { %17358 = vst [vmem:[#allocation15_spill] sm:$0xff] %v9465_v11  ;;  %868 = vst.msk [vmem:[#allocation2 + $0x111] sm:$0xff] %vm264_vm0, %v9459_v9  ;;  %7524 = vrot.lane.b32.xlu1 %v7523_v20, %s8812_s17  ;;  %v2347_v42 = vsel %vm1167_vm4, %v2345_v41, %v2346_v43 }
  0x94   : > { %869 = vst.msk [vmem:[#allocation2 + $0x121] sm:$0xff] %vm264_vm0, %v9462_v10  ;;  %870 = vst.msk [vmem:[#allocation2 + $0x151] sm:$0xff] %vm264_vm0, %v9465_v11 }
  0x95   : > { %17359 = vst [vmem:[#allocation16_spill] sm:$0xff] %v9476_v12  ;;  %17360 = vst [vmem:[#allocation17_spill] sm:$0xff] %v9479_v13  ;;  %7529 = vrot.lane.b32.xlu0 %v7528_v19, %s8812_s17 }
  0x96   : > { %17361 = vst [vmem:[#allocation18_spill] sm:$0xff] %v9482_v14  ;;  %871 = vst.msk [vmem:[#allocation2 + $0x161] sm:$0xff] %vm264_vm0, %v9476_v12 }
  0x97   : > { %872 = vst.msk [vmem:[#allocation2 + $0x171] sm:$0xff] %vm264_vm0, %v9479_v13  ;;  %873 = vst.msk [vmem:[#allocation2 + $0x181] sm:$0xff] %vm264_vm0, %v9482_v14  ;;  %7534 = vrot.lane.b32.xlu1 %v7533_v18, %s8812_s17 }
  0x98   : > { %17362 = vst [vmem:[#allocation19_spill] sm:$0xff] %v9491_v15  ;;  %17363 = vst [vmem:[#allocation20_spill] sm:$0xff] %v9494_v16 }
  0x99   : > { %874 = vst.msk [vmem:[#allocation2 + $0x191] sm:$0xff] %vm264_vm0, %v9491_v15  ;;  %875 = vst.msk [vmem:[#allocation2 + $0x1a1] sm:$0xff] %vm264_vm0, %v9494_v16  ;;  %7539 = vrot.lane.b32.xlu0 %v7538_v26, %s8813_s23 }
  0x9a   : > { %17364 = vst [vmem:[#allocation21_spill] sm:$0xff] %v9549_v38  ;;  %876 = vst.msk [vmem:[#allocation2 + $0x1b1] sm:$0xff] %vm264_vm0, %v9549_v38 }
  0x9b   : > { %17365 = vst [vmem:[#allocation22_spill] sm:$0xff] %v9573_v50  ;;  %877 = vst.msk [vmem:[#allocation2 + $0x1c1] sm:$0xff] %vm264_vm0, %v9573_v50  ;;  %7544 = vrot.lane.b32.xlu1 %v7543_v22, %s8813_s23 }
  0x9c   : > { %17366 = vst [vmem:[#allocation23_spill] sm:$0xff] %v9602_v61  ;;  %17367 = vst [vmem:[#allocation24_spill] sm:$0xff] %v9605_v62 }
  0x9d   : > { %878 = vst.msk [vmem:[#allocation2 + $0x1f1] sm:$0xff] %vm264_vm0, %v9602_v61  ;;  %879 = vst.msk [vmem:[#allocation2 + $0x201] sm:$0xff] %vm264_vm0, %v9605_v62  ;;  %7549 = vrot.lane.b32.xlu0 %v7548_v31, %s8813_s23 }
  0x9e   : > { %17368 = vst [vmem:[#allocation25_spill] sm:$0xff] %v9621_v23  ;;  %17369 = vst [vmem:[#allocation26_spill] sm:$0xff] %v9624_v28 }
  0x9f   : > { %17370 = vst [vmem:[#allocation27_spill] sm:$0xff] %v9627_v29  ;;  %880 = vst.msk [vmem:[#allocation2 + $0x211] sm:$0xff] %vm264_vm0, %v9621_v23  ;;  %7554 = vrot.lane.b32.xlu1 %v7553_v46, %s8813_s23 }
  0xa0   : > { %881 = vst.msk [vmem:[#allocation2 + $0x221] sm:$0xff] %vm264_vm0, %v9624_v28  ;;  %882 = vst.msk [vmem:[#allocation2 + $0x231] sm:$0xff] %vm264_vm0, %v9627_v29 }
  0xa1   : > { %17371 = vst [vmem:[#allocation28_spill] sm:$0xff] %v9643_v37  ;;  %883 = vst.msk [vmem:[#allocation2 + $0x241] sm:$0xff] %vm264_vm0, %v9643_v37  ;;  %7559 = vrot.lane.b32.xlu0 %v7558_v58, %s8814_s25 }
  0xa2   : > { %17372 = vst [vmem:[#allocation29_spill] sm:$0xff] %v9659_v45  ;;  %17373 = vst [vmem:[#allocation30_spill] sm:$0xff] %v9662_v47 }
  0xa3   : > { %884 = vst.msk [vmem:[#allocation2 + $0x251] sm:$0xff] %vm264_vm0, %v9659_v45  ;;  %885 = vst.msk [vmem:[#allocation2 + $0x261] sm:$0xff] %vm264_vm0, %v9662_v47  ;;  %7564 = vrot.lane.b32.xlu1 %v7563_v32, %s8814_s25 }
  0xa4   : > { %17377 = vst [vmem:[#allocation34_spill] sm:$0xff] %v9827_v54  ;;  %17378 = vst [vmem:[#allocation35_spill] sm:$0xff] %v9830_v53 }
  0xa5   : > { %7569 = vrot.lane.b32.xlu0 %v7568_v34, %s8814_s25  ;;  %889 = vst.msk [vmem:[#allocation2 + $0x2c1] sm:$0xff] %vm264_vm0, %v9827_v54  ;;  %890 = vst.msk [vmem:[#allocation2 + $0x2d1] sm:$0xff] %vm264_vm0, %v9830_v53  ;;  %v1949_v34 = vld [vmem:[#allocation3 + $0xa0] sm:$0xff] }
  0xa6   : > { %17379 = vst [vmem:[#allocation36_spill] sm:$0xff] %v9841_v56  ;;  %891 = vst.msk [vmem:[#allocation2 + $0x2e1] sm:$0xff] %vm264_vm0, %v9841_v56 }
  0xa7   : > { %7574 = vrot.lane.b32.xlu1 %v7573_v33, %s8814_s25  ;;  %v1950_v33 = vld [vmem:[#allocation3 + $0xa8] sm:$0x3] }
  0xa9   : > { %7579 = vrot.lane.b32.xlu0 %v9530_v30, %s8815_s26  ;;  %v2357_v30 = vrot.slane %v1947_v36, 2 }
  0xab   : > { %7584 = vrot.lane.b32.xlu1 %v9516_v24, %s8815_s26  ;;  %v7613_v24 = vpack.i.bf16 %v2347_v42, %v2315_v27  ;;  %v2137_v42 = vrot.slane %v1949_v34, 1 }
  0xad   : > { %7589 = vrot.lane.b32.xlu0 %v9544_v35, %s8815_s26  ;;  %v2359_v35 = vsel %vm1468_vm5, %v2357_v30, %v2358_v44 }
  0xaf   : > { %7594 = vrot.lane.b32.xlu1 %v7593_v59, %s8815_s26 }
  0xb1   : > { %7599 = vrot.lane.b32.xlu0 %v9609_v63, %s8816_s30  ;;  %v7633_v63 = vpack.i.bf16 %v2359_v35, %v2327_v0 }
  0xb3   : > { %7604 = vrot.lane.b32.xlu1 %v9649_v40, %s8816_s30  ;;  %v9806_v40 = vld [vmem:[%s9421_s13 + $0xc0] sm:$0xff] }
  0xb4   : > { %17374 = vst [vmem:[#allocation31_spill] sm:$0xff] %v9806_v40  ;;  %7240 = vmatprep.mubr.msk.f32.mxu0 %vm264_vm0, %v9806_v40  ;;  %886 = vst.msk [vmem:[#allocation2 + $0x291] sm:$0xff] %vm264_vm0, %v9806_v40 }
  0xb5   : > { %7609 = vrot.lane.b32.xlu0 %v9669_v49, %s8816_s30  ;;  %v9813_v49 = vld [vmem:[%s9421_s13 + $0xc8] sm:$0xff] }
  0xb6   : > { %17375 = vst [vmem:[#allocation32_spill] sm:$0xff] %v9813_v49  ;;  %7241 = vmatmul.mubr.msk.f32.gmra.mxu0 %vm264_vm0, %v9813_v49  ;;  %887 = vst.msk [vmem:[#allocation2 + $0x2a1] sm:$0xff] %vm264_vm0, %v9813_v49 }
  0xb7   : > { %7614 = vrot.lane.b32.xlu1 %v7613_v24, %s8816_s30  ;;  %v2138_v24 = vrot.slane %v1950_v33, 1 }
  0xb9   : > { %7619 = vrot.lane.b32.xlu0 %v9707_v48, %s8817_s6  ;;  %v9816_v48 = vld [vmem:[%s9421_s13 + $0xd0] sm:$0xff] }
  0xba   : > { %17376 = vst [vmem:[#allocation33_spill] sm:$0xff] %v9816_v48  ;;  %888 = vst.msk [vmem:[#allocation2 + $0x2b1] sm:$0xff] %vm264_vm0, %v9816_v48  ;;  %7243 = vmatprep.mubr.msk.f32.mxu0 %vm264_vm0, %v9816_v48 }
  0xbb   : > { %7624 = vrot.lane.b32.xlu1 %v9721_v55, %s8817_s6  ;;  %7244 = vmatmul.mubr.msk.f32.gmra.mxu0 %vm264_vm0, %v9827_v54  ;;  %v9844_v55 = vld [vmem:[%s9421_s13 + $0xf0] sm:$0xff] }
  0xbc   : > { %7246 = vmatprep.mubr.msk.f32.mxu0 %vm264_vm0, %v9830_v53  ;;  %17380 = vst [vmem:[#allocation37_spill] sm:$0xff] %v9844_v55  ;;  %892 = vst.msk [vmem:[#allocation2 + $0x2f1] sm:$0xff] %vm264_vm0, %v9844_v55 }
  0xbd   : > { %7629 = vrot.lane.b32.xlu0 %v9723_v39, %s8817_s6  ;;  %v9855_v39 = vld [vmem:[%s9421_s13 + $0xf8] sm:$0xff]  ;;  %s8822_s13 = smov 44  }
  0xbe   : > { %17381 = vst [vmem:[#allocation38_spill] sm:$0xff] %v9855_v39  ;;  %893 = vst.msk [vmem:[#allocation2 + $0x301] sm:$0xff] %vm264_vm0, %v9855_v39 }
  0xbf   : > { %7634 = vrot.lane.b32.xlu1 %v7633_v63, %s8817_s6  ;;  %7247 = vmatmul.mubr.msk.f32.gmra.mxu0 %vm264_vm0, %v9841_v56 }
  0xc0   : > { %7249 = vmatprep.mubr.msk.f32.mxu0 %vm264_vm0, %v9844_v55 }
  0xc3   : > { %7250 = vmatmul.mubr.msk.f32.gmra.mxu0 %vm264_vm0, %v9855_v39 }
  0xdb   : > { %v7206_v20 = vpop.f32.mrf.mxu0 }
  0xdc   : > { %v433_v60 = vadd.f32 %v7206_v20, %v9864_v17 }
  0xdd   : > { %v427_v1 = vpop.f32.mrf.mxu0 }
  0xde   : > { %v587_v19 = vmax.f32 %v433_v60, 0.0  ;;  %v428_v18 = vadd.f32 %v9864_v17, %v427_v1 }
  0xdf   : > { %v7209_v25 = vpop.f32.mrf.mxu0 }
  0xe0   : > { %896 = vst.msk [vmem:[#allocation3 + $0xc1] sm:$0xff] %vm739_vm2, %v587_v19  ;;  %v586_v21 = vmax.f32 %v428_v18, 0.0  ;;  %v443_v26 = vadd.f32 %v7209_v25, %v9864_v17  ;;  %v2139_v25 = vsel %vm1167_vm4, %v2137_v42, %v2138_v24 }
  0xe1   : > { %v437_v22 = vpop.f32.mrf.mxu0 }
  0xe2   : > { %895 = vst.msk [vmem:[#allocation3 + $0xb1] sm:$0xff] %vm739_vm2, %v586_v21  ;;  %v589_v27 = vmax.f32 %v443_v26, 0.0  ;;  %v438_v31 = vadd.f32 %v9864_v17, %v437_v22  ;;  %v2233_v26 = vrot.slane %v1949_v34, 2  ;;  %v2234_v22 = vrot.slane %v1950_v33, 2 }
  0xe3   : > { %v7212_v46 = vpop.f32.mrf.mxu0 }
  0xe4   : > { %898 = vst.msk [vmem:[#allocation3 + $0xe1] sm:$0xff] %vm739_vm2, %v589_v27  ;;  %v588_v52 = vmax.f32 %v438_v31, 0.0  ;;  %v453_v57 = vadd.f32 %v7212_v46, %v9864_v17 }
  0xe5   : > { %v447_v58 = vpop.f32.mrf.mxu0 }
  0xe6   : > { %897 = vst.msk [vmem:[#allocation3 + $0xd1] sm:$0xff] %vm739_vm2, %v588_v52  ;;  %v591_v32 = vmax.f32 %v453_v57, 0.0  ;;  %v448_v0 = vadd.f32 %v9864_v17, %v447_v58 }
  0xe7   : > { %v7215_v36 = vpop.f32.mrf.mxu0  ;;  %v1953_v19 = vld [vmem:[#allocation3 + $0xc0] sm:$0xff]  ;;  %v1954_v52 = vld [vmem:[#allocation3 + $0xc8] sm:$0x3] }
  0xe8   : > { %900 = vst.msk [vmem:[#allocation3 + $0x101] sm:$0xff] %vm739_vm2, %v591_v32  ;;  %v590_v51 = vmax.f32 %v448_v0, 0.0  ;;  %v463_v59 = vadd.f32 %v7215_v36, %v9864_v17  ;;  %v2144_v33 = vrot.slane %v1954_v52, 1 }
  0xe9   : > { %v1951_v41 = vld [vmem:[#allocation3 + $0xb0] sm:$0xff]  ;;  %v1952_v43 = vld [vmem:[#allocation3 + $0xb8] sm:$0x3]  ;;  %v457_v30 = vpop.f32.mrf.mxu0 }
  0xea   : > { %899 = vst.msk [vmem:[#allocation3 + $0xf1] sm:$0xff] %vm739_vm2, %v590_v51  ;;  %v7638_v44 = vpack.i.bf16 %v1951_v41, %v1949_v34  ;;  %v2140_v35 = vrot.slane %v1951_v41, 1  ;;  %v2141_v63 = vrot.slane %v1952_v43, 1  ;;  %v593_v20 = vmax.f32 %v463_v59, 0.0 }
  0xeb   : > { %v7218_v60 = vpop.f32.mrf.mxu0  ;;  %v458_v1 = vadd.f32 %v9864_v17, %v457_v30  ;;  %v7643_v46 = vpack.i.bf16 %v1953_v19, %v1951_v41  ;;  %v2236_v57 = vrot.slane %v1951_v41, 2  ;;  %v2237_v58 = vrot.slane %v1952_v43, 2  ;;  %v9885_v32 = vld [vmem:[#allocation3 + $0xe0] sm:$0xff]  ;;  %v1958_v2 = vld [vmem:[#allocation3 + $0xe8] sm:$0x3] }
  0xec   : > { %7639 = vrot.lane.b32.xlu0 %v7638_v44, %s8809_s14  ;;  %902 = vst.msk [vmem:[#allocation3 + $0x121] sm:$0xff] %vm739_vm2, %v593_v20  ;;  %v2142_v0 = vsel %vm1167_vm4, %v2140_v35, %v2141_v63  ;;  %v2143_v34 = vrot.slane %v1953_v19, 1  ;;  %v2235_v30 = vsel %vm1468_vm5, %v2233_v26, %v2234_v22  ;;  %v2149_v26 = vrot.slane %v9885_v32, 1 }
  0xed   : > { %v1955_v18 = vld [vmem:[#allocation3 + $0xd0] sm:$0xff]  ;;  %v1956_v21 = vld [vmem:[#allocation3 + $0xd8] sm:$0x3]  ;;  %v467_v27 = vpop.f32.mrf.mxu0  ;;  %v592_v59 = vmax.f32 %v458_v1, 0.0  ;;  %v9893_v43 = vpack.i.bf16 %v2142_v0, %v2139_v25  ;;  %v2238_v35 = vsel %vm1468_vm5, %v2236_v57, %v2237_v58  ;;  %v473_v22 = vadd.f32 %v7218_v60, %v9864_v17 }
  0xee   : > { %v9883_v31 = vpack.i.bf16 %v1955_v18, %v1953_v19  ;;  %v2146_v36 = vrot.slane %v1955_v18, 1  ;;  %v2147_v51 = vrot.slane %v1956_v21, 1  ;;  %v7673_v41 = vpack.i.bf16 %v9885_v32, %v1955_v18 }
  0xef   : > { %v7221_v42 = vpop.f32.mrf.mxu0  ;;  %901 = vst.msk [vmem:[#allocation3 + $0x111] sm:$0xff] %vm739_vm2, %v592_v59  ;;  %v2242_v63 = vrot.slane %v1955_v18, 2  ;;  %v2243_v20 = vrot.slane %v1956_v21, 2  ;;  %v2240_v59 = vrot.slane %v1954_v52, 2  ;;  %v9904_v25 = vsel %vm1167_vm4, %v2143_v34, %v2144_v33  ;;  %v9909_v18 = vpop.permute.xlu0 %7459  ;;  %v1962_v28 = vld [vmem:[#allocation3 + $0x108] sm:$0x3] }
  0xf0   : > { %7669 = vrot.lane.b32.xlu1 %v9883_v31, %s8809_s14  ;;  %7644 = vrot.lane.b32.xlu0 %v7643_v46, %s8812_s17  ;;  %v9897_v44 = vsel %vm1167_vm4, %v2146_v36, %v2147_v51  ;;  %v2239_v46 = vrot.slane %v1953_v19, 2  ;;  %17383 = vst [vmem:[#allocation40_spill] sm:$0xff] %v9904_v25  ;;  %v468_v57 = vadd.f32 %v9864_v17, %v467_v27  ;;  %17384 = vst [vmem:[#allocation41_spill] sm:$0xff] %v9909_v18 }
  0xf1   : > { %v477_v24 = vpop.f32.mrf.mxu0  ;;  %17382 = vst [vmem:[#allocation39_spill] sm:$0xff] %v9897_v44  ;;  %v9913_v21 = vpack.i.bf16 %v9897_v44, %v9904_v25  ;;  %v9915_v58 = vpack.i.bf16 %v2238_v35, %v2235_v30  ;;  %v483_v19 = vadd.f32 %v7221_v42, %v9864_v17  ;;  %v9920_v36 = vsel %vm1468_vm5, %v2242_v63, %v2243_v20 }
  0xf2   : > { %v478_v52 = vadd.f32 %v9864_v17, %v477_v24  ;;  %17385 = vst [vmem:[#allocation42_spill] sm:$0xff] %v9920_v36  ;;  %v2150_v51 = vrot.slane %v1958_v2, 1  ;;  %v595_v34 = vmax.f32 %v473_v22, 0.0  ;;  %v594_v60 = vmax.f32 %v468_v57, 0.0  ;;  %v9931_v24 = vpop.permute.xlu1 %7469 }
  0xf3   : > { %v7224_v1 = vpop.f32.mrf.mxu0  ;;  %v597_v27 = vmax.f32 %v483_v19, 0.0  ;;  %v9927_v30 = vsel %vm1468_vm5, %v2239_v46, %v2240_v59  ;;  %17387 = vst [vmem:[#allocation44_spill] sm:$0xff] %v9931_v24  ;;  %v9938_v20 = vpack.i.bf16 %v9904_v25, %v2142_v0  ;;  %v2245_v22 = vrot.slane %v9885_v32, 2  ;;  %v9947_v19 = vpop.permute.xlu0 %7464 }
  0xf4   : > { %7674 = vrot.lane.b32.xlu1 %v7673_v41, %s8812_s17  ;;  %7649 = vrot.lane.b32.xlu0 %v9893_v43, %s8810_s15  ;;  %v596_v41 = vmax.f32 %v478_v52, 0.0  ;;  %17386 = vst [vmem:[#allocation43_spill] sm:$0xff] %v9927_v30  ;;  %904 = vst.msk [vmem:[#allocation3 + $0x161] sm:$0xff] %vm739_vm2, %v595_v34  ;;  %v9935_v63 = vpack.i.bf16 %v9920_v36, %v9927_v30  ;;  %v493_v46 = vadd.f32 %v7224_v1, %v9864_v17 }
  0xf5   : > { %v487_v33 = vpop.f32.mrf.mxu0  ;;  %903 = vst.msk [vmem:[#allocation3 + $0x151] sm:$0xff] %vm739_vm2, %v594_v60  ;;  %17388 = vst [vmem:[#allocation45_spill] sm:$0xff] %v9938_v20  ;;  %v9944_v59 = vsel %vm1167_vm4, %v2149_v26, %v2150_v51  ;;  %v2246_v57 = vrot.slane %v1958_v2, 2  ;;  %v9959_v26 = vpack.i.bf16 %v9927_v30, %v2238_v35 }
  0xf6   : > { %906 = vst.msk [vmem:[#allocation3 + $0x181] sm:$0xff] %vm739_vm2, %v597_v27  ;;  %905 = vst.msk [vmem:[#allocation3 + $0x171] sm:$0xff] %vm739_vm2, %v596_v41  ;;  %v599_v0 = vmax.f32 %v493_v46, 0.0  ;;  %v488_v52 = vadd.f32 %v9864_v17, %v487_v33  ;;  %v9956_v1 = vpack.i.bf16 %v9944_v59, %v9897_v44  ;;  %v9965_v27 = vpop.permute.xlu1 %7474  ;;  %v1964_v9 = vld [vmem:[#allocation3 + $0x118] sm:$0x3] }
  0xf7   : > { %v7227_v42 = vpop.f32.mrf.mxu0  ;;  %17389 = vst [vmem:[#allocation46_spill] sm:$0xff] %v9944_v59  ;;  %17390 = vst [vmem:[#allocation47_spill] sm:$0xff] %v9947_v19  ;;  %v9963_v51 = vsel %vm1468_vm5, %v2245_v22, %v2246_v57  ;;  %v9974_v41 = vpop.permute.xlu0 %7479  ;;  %v1959_v22 = vld [vmem:[#allocation3 + $0xf0] sm:$0xff] }
  0xf8   : > { %7684 = vrot.lane.b32.xlu1 %v9913_v21, %s8810_s15  ;;  %7654 = vrot.lane.b32.xlu0 %v9915_v58, %s8811_s16  ;;  %17391 = vst [vmem:[#allocation48_spill] sm:$0xff] %v9956_v1  ;;  %17392 = vst [vmem:[#allocation49_spill] sm:$0xff] %v9959_v26  ;;  %v598_v2 = vmax.f32 %v488_v52, 0.0  ;;  %v503_v35 = vadd.f32 %v7227_v42, %v9864_v17  ;;  %v9978_v46 = vpack.i.bf16 %v9963_v51, %v9920_v36  ;;  %v1960_v52 = vld [vmem:[#allocation3 + $0xf8] sm:$0x3]  ;;  %v9986_v42 = vld [vmem:[#allocation3 + $0x130] sm:$0xff] }
  0xf9   : > { %v497_v34 = vpop.f32.mrf.mxu0  ;;  %908 = vst.msk [vmem:[#allocation3 + $0x1a1] sm:$0xff] %vm739_vm2, %v599_v0  ;;  %17393 = vst [vmem:[#allocation50_spill] sm:$0xff] %v9963_v51  ;;  %v7718_v55 = vpack.i.bf16 %v1959_v22, %v9885_v32  ;;  %v2153_v56 = vrot.slane %v1960_v52, 1  ;;  %v2249_v37 = vrot.slane %v1960_v52, 2 }
  0xfa   : > { %17394 = vst [vmem:[#allocation51_spill] sm:$0xff] %v9965_v27  ;;  %907 = vst.msk [vmem:[#allocation3 + $0x191] sm:$0xff] %vm739_vm2, %v598_v2  ;;  %v498_v33 = vadd.f32 %v9864_v17, %v497_v34  ;;  %v601_v57 = vmax.f32 %v503_v35, 0.0  ;;  %v9984_v2 = vld [vmem:[#allocation3 + $0x120] sm:$0xff]  ;;  %v9989_v39 = vpop.permute.xlu1 %7484  ;;  %v2152_v35 = vrot.slane %v1959_v22, 1 }
  0xfb   : > { %v7230_v60 = vpop.f32.mrf.mxu0  ;;  %17395 = vst [vmem:[#allocation52_spill] sm:$0xff] %v9974_v41  ;;  %17396 = vst [vmem:[#allocation53_spill] sm:$0xff] %v9978_v46  ;;  %v9993_v54 = vpop.permute.xlu0 %7489  ;;  %v1974_v12 = vld [vmem:[#allocation3 + $0x168] sm:$0x3] }
  0xfc   : > { %7689 = vrot.lane.b32.xlu1 %v9935_v63, %s8811_s16  ;;  %7659 = vrot.lane.b32.xlu0 %v9938_v20, %s8813_s23  ;;  %910 = vst.msk [vmem:[#allocation3 + $0x1c1] sm:$0xff] %vm739_vm2, %v601_v57  ;;  %v600_v34 = vmax.f32 %v498_v33, 0.0  ;;  %17397 = vst [vmem:[#allocation54_spill] sm:$0xff] %v9989_v39  ;;  %v10001_v33 = vsel %vm1167_vm4, %v2152_v35, %v2153_v56  ;;  %v10003_v57 = vld [vmem:[#allocation3 + $0x100] sm:$0xff]  ;;  %v10018_v35 = vld [vmem:[#allocation3 + $0x138] sm:$0x3] }
  0xfd   : > { %v507_v0 = vpop.f32.mrf.mxu0  ;;  %17398 = vst [vmem:[#allocation55_spill] sm:$0xff] %v9993_v54  ;;  %17399 = vst [vmem:[#allocation56_spill] sm:$0xff] %v10001_v33  ;;  %v10015_v45 = vpack.i.bf16 %v10001_v33, %v9944_v59  ;;  %v7713_v56 = vpack.i.bf16 %v10003_v57, %v1959_v22  ;;  %v1976_v11 = vld [vmem:[#allocation3 + $0x178] sm:$0x3]  ;;  %v10157_v5 = vld [vmem:[#allocation3 + $0x180] sm:$0xff] }
  0xfe   : > { %909 = vst.msk [vmem:[#allocation3 + $0x1b1] sm:$0xff] %vm739_vm2, %v600_v34  ;;  %v10005_v48 = vpop.permute.xlu1 %7494  ;;  %v513_v34 = vadd.f32 %v7230_v60, %v9864_v17  ;;  %v508_v49 = vadd.f32 %v9864_v17, %v507_v0  ;;  %v2248_v60 = vrot.slane %v1959_v22, 2  ;;  %v10024_v0 = vld [vmem:[#allocation3 + $0x128] sm:$0x3]  ;;  %v2171_v19 = vrot.slane %v1976_v11, 1 }
  0xff   : > { %17400 = vst [vmem:[#allocation57_spill] sm:$0xff] %v10005_v48  ;;  %v10011_v40 = vpop.permute.xlu0 %7499  ;;  %v2317_v38 = vrot.slane %v10024_v0, 1 }
 0x100   : > { %7694 = vrot.lane.b32.xlu1 %v9956_v1, %s8813_s23  ;;  %7664 = vrot.lane.b32.xlu0 %v9959_v26, %s8814_s25  ;;  %17401 = vst [vmem:[#allocation58_spill] sm:$0xff] %v10011_v40  ;;  %v603_v23 = vmax.f32 %v513_v34, 0.0  ;;  %v602_v62 = vmax.f32 %v508_v49, 0.0  ;;  %v2316_v34 = vrot.slane %v9984_v2, 1  ;;  %v1982_v30 = vld [vmem:[#allocation3 + $0x1a8] sm:$0x3] }
 0x102   : > { %912 = vst.msk [vmem:[#allocation3 + $0x201] sm:$0xff] %vm739_vm2, %v603_v23  ;;  %v10032_v22 = vpop.permute.xlu1 %7504  ;;  %911 = vst.msk [vmem:[#allocation3 + $0x1f1] sm:$0xff] %vm739_vm2, %v602_v62  ;;  %v2155_v23 = vrot.slane %v10003_v57, 1 }
 0x103   : > { %17402 = vst [vmem:[#allocation59_spill] sm:$0xff] %v10032_v22  ;;  %v10046_v16 = vpop.permute.xlu0 %7509  ;;  %v10266_v18 = vld [vmem:[#allocation3 + $0x1c0] sm:$0xff] }
 0x104   : > { %7699 = vrot.lane.b32.xlu1 %v9978_v46, %s8814_s25  ;;  %7679 = vrot.lane.b32.xlu0 %v9883_v31, %s8815_s26  ;;  %v7723_v31 = vpack.i.bf16 %v9986_v42, %v9984_v2  ;;  %17404 = vst [vmem:[#allocation61_spill] sm:$0xff] %v10046_v16  ;;  %v2159_v16 = vrot.slane %v1964_v9, 1 }
 0x106   : > { %v10070_v7 = vpop.permute.xlu1 %7514 }
 0x107   : > { %17408 = vst [vmem:[#allocation65_spill] sm:$0xff] %v10070_v7  ;;  %v2168_v7 = vrot.slane %v1974_v12, 1 }
 0x108   : > { %7719 = vrot.lane.b32.xlu1 %v7718_v55, %s8815_s26  ;;  %7704 = vrot.lane.b32.xlu0 %v9913_v21, %s8816_s30 }
 0x10c   : > { %7724 = vrot.lane.b32.xlu1 %v7723_v31, %s8815_s26  ;;  %7709 = vrot.lane.b32.xlu0 %v7718_v55, %s8809_s14  ;;  %v10022_v55 = vld [vmem:[#allocation3 + $0x110] sm:$0xff] }
 0x10d   : > { %v7753_v52 = vpack.i.bf16 %v10022_v55, %v10003_v57  ;;  %v7758_v62 = vpack.i.bf16 %v9984_v2, %v10022_v55  ;;  %v2158_v8 = vrot.slane %v10022_v55, 1 }
 0x110   : > { %7749 = vrot.lane.b32.xlu1 %v10015_v45, %s8816_s30  ;;  %7714 = vrot.lane.b32.xlu0 %v7713_v56, %s8812_s17  ;;  %v10042_v56 = vsel %vm1468_vm5, %v2248_v60, %v2249_v37 }
 0x111   : > { %17403 = vst [vmem:[#allocation60_spill] sm:$0xff] %v10042_v56  ;;  %v10059_v60 = vpack.i.bf16 %v10042_v56, %v9963_v51 }
 0x114   : > { %7754 = vrot.lane.b32.xlu1 %v7753_v52, %s8809_s14  ;;  %7729 = vrot.lane.b32.xlu0 %v10015_v45, %s8810_s15 }
 0x118   : > { %7759 = vrot.lane.b32.xlu1 %v7758_v62, %s8812_s17  ;;  %7734 = vrot.lane.b32.xlu0 %v10059_v60, %s8811_s16 }
 0x142   : > { %v7233_v53 = vpop.f32.mrf.mxu0 }
 0x143   : > { %v523_v47 = vadd.f32 %v7233_v53, %v9864_v17  ;;  %v2348_v53 = vrot.slane %v9986_v42, 1 }
 0x144   : > { %v517_v32 = vpop.f32.mrf.mxu0 }
 0x145   : > { %v518_v31 = vadd.f32 %v9864_v17, %v517_v32  ;;  %v605_v61 = vmax.f32 %v523_v47, 0.0  ;;  %v2349_v32 = vrot.slane %v10018_v35, 1 }
 0x146   : > { %v7236_v29 = vpop.f32.mrf.mxu0 }
 0x147   : > { %v604_v50 = vmax.f32 %v518_v31, 0.0  ;;  %914 = vst.msk [vmem:[#allocation3 + $0x221] sm:$0xff] %vm739_vm2, %v605_v61  ;;  %v533_v47 = vadd.f32 %v7236_v29, %v9864_v17  ;;  %v2156_v31 = vrot.slane %v1962_v28, 1  ;;  %v10054_v29 = vsel %vm1167_vm4, %v2348_v53, %v2349_v32 }
 0x148   : > { %v527_v49 = vpop.f32.mrf.mxu0  ;;  %17405 = vst [vmem:[#allocation62_spill] sm:$0xff] %v10054_v29  ;;  %v2251_v53 = vrot.slane %v10003_v57, 2  ;;  %v2252_v32 = vrot.slane %v1962_v28, 2  ;;  %v10086_v57 = vsel %vm1167_vm4, %v2158_v8, %v2159_v16 }
 0x149   : > { %913 = vst.msk [vmem:[#allocation3 + $0x211] sm:$0xff] %vm739_vm2, %v604_v50  ;;  %v607_v61 = vmax.f32 %v533_v47, 0.0  ;;  %v528_v37 = vadd.f32 %v9864_v17, %v527_v49  ;;  %v10062_v50 = vsel %vm1167_vm4, %v2316_v34, %v2317_v38  ;;  %v10067_v47 = vsel %vm1167_vm4, %v2155_v23, %v2156_v31  ;;  %v10077_v34 = vpop.permute.xlu0 %7519  ;;  %17411 = vst [vmem:[#allocation68_spill] sm:$0xff] %v10086_v57 }
 0x14a   : > { %17406 = vst [vmem:[#allocation63_spill] sm:$0xff] %v10062_v50  ;;  %17407 = vst [vmem:[#allocation64_spill] sm:$0xff] %v10067_v47  ;;  %v7768_v23 = vpack.i.bf16 %v10054_v29, %v10062_v50  ;;  %v10083_v28 = vpack.i.bf16 %v10067_v47, %v10001_v33  ;;  %v10089_v31 = vsel %vm1468_vm5, %v2251_v53, %v2252_v32 }
 0x14b   : > { %916 = vst.msk [vmem:[#allocation3 + $0x241] sm:$0xff] %vm739_vm2, %v607_v61  ;;  %v606_v54 = vmax.f32 %v528_v37, 0.0  ;;  %17409 = vst [vmem:[#allocation66_spill] sm:$0xff] %v10077_v34  ;;  %v2254_v61 = vrot.slane %v10022_v55, 2  ;;  %v10099_v15 = vpack.i.bf16 %v10086_v57, %v10067_v47  ;;  %v10103_v8 = vpack.i.bf16 %v10089_v31, %v10042_v56 }
 0x14c   : > { %v7239_v49 = vpop.f32.mrf.mxu0  ;;  %17410 = vst [vmem:[#allocation67_spill] sm:$0xff] %v10083_v28  ;;  %17412 = vst [vmem:[#allocation69_spill] sm:$0xff] %v10089_v31  ;;  %7769 = vrot.lane.b32.xlu1 %v7768_v23, %s8816_s30  ;;  %7739 = vrot.lane.b32.xlu0 %v10083_v28, %s8813_s23  ;;  %v2329_v23 = vrot.slane %v10024_v0, 2  ;;  %v1972_v0 = vld [vmem:[#allocation3 + $0x158] sm:$0x3] }
 0x14d   : > { %915 = vst.msk [vmem:[#allocation3 + $0x231] sm:$0xff] %vm739_vm2, %v606_v54  ;;  %v543_v38 = vadd.f32 %v7239_v49, %v9864_v17  ;;  %v2255_v54 = vrot.slane %v1964_v9, 2  ;;  %v10095_v49 = vpop.permute.xlu1 %7524  ;;  %17414 = vst [vmem:[#allocation71_spill] sm:$0xff] %v10103_v8  ;;  %v10110_v55 = vpop.permute.xlu0 %7529  ;;  %v2165_v13 = vrot.slane %v1972_v0, 1  ;;  %v2261_v4 = vrot.slane %v1972_v0, 2 }
 0x14e   : > { %v537_v62 = vpop.f32.mrf.mxu0  ;;  %17413 = vst [vmem:[#allocation70_spill] sm:$0xff] %v10095_v49  ;;  %17416 = vst [vmem:[#allocation73_spill] sm:$0xff] %v10110_v55  ;;  %v10457_v59 = vld [vmem:[#allocation3 + $0x220] sm:$0xff] }
 0x14f   : > { %v609_v37 = vmax.f32 %v543_v38, 0.0  ;;  %v538_v9 = vadd.f32 %v9864_v17, %v537_v62  ;;  %v10108_v16 = vsel %vm1468_vm5, %v2254_v61, %v2255_v54  ;;  %v2328_v38 = vrot.slane %v9984_v2, 2  ;;  %v1971_v2 = vld [vmem:[#allocation3 + $0x150] sm:$0xff] }
 0x150   : > { %17415 = vst [vmem:[#allocation72_spill] sm:$0xff] %v10108_v16  ;;  %7774 = vrot.lane.b32.xlu1 %v10099_v15, %s8810_s15  ;;  %7744 = vrot.lane.b32.xlu0 %v10103_v8, %s8814_s25  ;;  %v10118_v32 = vpack.i.bf16 %v10108_v16, %v10089_v31  ;;  %v10132_v62 = vpack.i.bf16 %v10062_v50, %v10086_v57  ;;  %v2164_v49 = vrot.slane %v1971_v2, 1  ;;  %v2260_v10 = vrot.slane %v1971_v2, 2  ;;  %v1984_v50 = vld [vmem:[#allocation3 + $0x1b8] sm:$0x3] }
 0x151   : > { %918 = vst.msk [vmem:[#allocation3 + $0x261] sm:$0xff] %vm739_vm2, %v609_v37  ;;  %v608_v53 = vmax.f32 %v538_v9, 0.0  ;;  %v10123_v61 = vpop.permute.xlu1 %7534  ;;  %v10128_v54 = vpop.permute.xlu0 %7539  ;;  %v10135_v37 = vsel %vm1468_vm5, %v2328_v38, %v2329_v23  ;;  %v1969_v9 = vld [vmem:[#allocation3 + $0x140] sm:$0xff]  ;;  %v1975_v23 = vld [vmem:[#allocation3 + $0x170] sm:$0xff] }
 0x152   : > { %17417 = vst [vmem:[#allocation74_spill] sm:$0xff] %v10123_v61  ;;  %17418 = vst [vmem:[#allocation75_spill] sm:$0xff] %v10128_v54  ;;  %v10145_v55 = vpack.i.bf16 %v10135_v37, %v10108_v16  ;;  %v10147_v24 = vpack.i.bf16 %v1971_v2, %v1969_v9  ;;  %v1973_v38 = vld [vmem:[#allocation3 + $0x160] sm:$0xff]  ;;  %v2161_v14 = vrot.slane %v1969_v9, 1  ;;  %v2257_v54 = vrot.slane %v1969_v9, 2 }
 0x153   : > { %917 = vst.msk [vmem:[#allocation3 + $0x251] sm:$0xff] %vm739_vm2, %v608_v53  ;;  %17419 = vst [vmem:[#allocation76_spill] sm:$0xff] %v10132_v62  ;;  %v1970_v53 = vld [vmem:[#allocation3 + $0x148] sm:$0x3]  ;;  %v7803_v39 = vpack.i.bf16 %v1973_v38, %v1971_v2  ;;  %v2167_v34 = vrot.slane %v1973_v38, 1  ;;  %v2170_v40 = vrot.slane %v1975_v23, 1  ;;  %v7833_v9 = vpack.i.bf16 %v10157_v5, %v1975_v23 }
 0x154   : > { %7779 = vrot.lane.b32.xlu1 %v10118_v32, %s8811_s16  ;;  %7764 = vrot.lane.b32.xlu0 %v7753_v52, %s8815_s26  ;;  %17420 = vst [vmem:[#allocation77_spill] sm:$0xff] %v10135_v37  ;;  %17422 = vst [vmem:[#allocation79_spill] sm:$0xff] %v10145_v55  ;;  %v2162_v6 = vrot.slane %v1970_v53, 1  ;;  %v2258_v61 = vrot.slane %v1970_v53, 2  ;;  %v2264_v2 = vrot.slane %v1974_v12, 2  ;;  %v2266_v0 = vrot.slane %v1975_v23, 2 }
 0x155   : > { %v10141_v52 = vpop.permute.xlu1 %7544  ;;  %v10149_v22 = vpop.permute.xlu0 %7549  ;;  %v2002_v46 = vld [vmem:[#allocation3 + $0x248] sm:$0x3] }
 0x156   : > { %17421 = vst [vmem:[#allocation78_spill] sm:$0xff] %v10141_v52  ;;  %17423 = vst [vmem:[#allocation80_spill] sm:$0xff] %v10149_v22  ;;  %v10155_v52 = vpack.i.bf16 %v1975_v23, %v1973_v38  ;;  %v10160_v48 = vsel %vm1167_vm4, %v2161_v14, %v2162_v6  ;;  %v10163_v22 = vsel %vm1167_vm4, %v2164_v49, %v2165_v13  ;;  %v2263_v49 = vrot.slane %v1973_v38, 2 }
 0x157   : > { %17424 = vst [vmem:[#allocation81_spill] sm:$0xff] %v10160_v48  ;;  %17425 = vst [vmem:[#allocation82_spill] sm:$0xff] %v10163_v22  ;;  %v10172_v53 = vsel %vm1468_vm5, %v2257_v54, %v2258_v61  ;;  %v10178_v6 = vpack.i.bf16 %v10163_v22, %v10160_v48  ;;  %v10181_v13 = vsel %vm1167_vm4, %v2167_v34, %v2168_v7  ;;  %v2267_v61 = vrot.slane %v1976_v11, 2  ;;  %v1978_v54 = vld [vmem:[#allocation3 + $0x188] sm:$0x3] }
 0x158   : > { %7784 = vrot.lane.b32.xlu1 %v10132_v62, %s8813_s23  ;;  %7794 = vrot.lane.b32.xlu0 %v10099_v15, %s8816_s30  ;;  %17427 = vst [vmem:[#allocation84_spill] sm:$0xff] %v10172_v53  ;;  %17429 = vst [vmem:[#allocation86_spill] sm:$0xff] %v10181_v13  ;;  %v10184_v14 = vsel %vm1167_vm4, %v2170_v40, %v2171_v19  ;;  %v2173_v11 = vrot.slane %v10157_v5, 1  ;;  %v2174_v12 = vrot.slane %v1978_v54, 1  ;;  %v2300_v20 = vrot.slane %v2002_v46, 2 }
 0x159   : > { %v10165_v41 = vpop.permute.xlu1 %7554  ;;  %v10174_v3 = vpop.permute.xlu0 %7559  ;;  %17430 = vst [vmem:[#allocation87_spill] sm:$0xff] %v10184_v14  ;;  %v10196_v7 = vpack.i.bf16 %v10184_v14, %v10181_v13  ;;  %v10221_v38 = vpack.i.bf16 %v10181_v13, %v10163_v22  ;;  %v2180_v13 = vrot.slane %v1982_v30, 1 }
 0x15a   : > { %17426 = vst [vmem:[#allocation83_spill] sm:$0xff] %v10165_v41  ;;  %17428 = vst [vmem:[#allocation85_spill] sm:$0xff] %v10174_v3  ;;  %v10224_v23 = vsel %vm1167_vm4, %v2173_v11, %v2174_v12 }
 0x15b   : > { %17436 = vst [vmem:[#allocation93_spill] sm:$0xff] %v10221_v38  ;;  %17437 = vst [vmem:[#allocation94_spill] sm:$0xff] %v10224_v23 }
 0x15c   : > { %7789 = vrot.lane.b32.xlu1 %v10145_v55, %s8814_s25  ;;  %7799 = vrot.lane.b32.xlu0 %v10147_v24, %s8809_s14 }
 0x15d   : > { %v10192_v3 = vpop.permute.xlu1 %7564  ;;  %v10209_v19 = vpop.permute.xlu0 %7569 }
 0x15e   : > { %17432 = vst [vmem:[#allocation89_spill] sm:$0xff] %v10192_v3  ;;  %17435 = vst [vmem:[#allocation92_spill] sm:$0xff] %v10209_v19 }
 0x160   : > { %7829 = vrot.lane.b32.xlu1 %v10155_v52, %s8809_s14  ;;  %7804 = vrot.lane.b32.xlu0 %v7803_v39, %s8812_s17  ;;  %v10187_v39 = vsel %vm1468_vm5, %v2260_v10, %v2261_v4  ;;  %v10203_v4 = vsel %vm1468_vm5, %v2263_v49, %v2264_v2  ;;  %v10206_v10 = vsel %vm1468_vm5, %v2266_v0, %v2267_v61  ;;  %v2270_v49 = vrot.slane %v1978_v54, 2 }
 0x161   : > { %17431 = vst [vmem:[#allocation88_spill] sm:$0xff] %v10187_v39  ;;  %v10200_v40 = vpack.i.bf16 %v10187_v39, %v10172_v53  ;;  %17433 = vst [vmem:[#allocation90_spill] sm:$0xff] %v10203_v4  ;;  %v10217_v34 = vpack.i.bf16 %v10206_v10, %v10203_v4  ;;  %v10227_v2 = vpop.permute.xlu1 %7574  ;;  %v10233_v0 = vpop.permute.xlu0 %7579  ;;  %v10237_v61 = vpack.i.bf16 %v10224_v23, %v10184_v14 }
 0x162   : > { %17434 = vst [vmem:[#allocation91_spill] sm:$0xff] %v10206_v10  ;;  %17438 = vst [vmem:[#allocation95_spill] sm:$0xff] %v10227_v2  ;;  %v10241_v11 = vpack.i.bf16 %v10203_v4, %v10187_v39  ;;  %v10257_v2 = vld [vmem:[#allocation3 + $0x190] sm:$0xff]  ;;  %v10293_v4 = vld [vmem:[#allocation3 + $0x1a0] sm:$0xff] }
 0x163   : > { %17439 = vst [vmem:[#allocation96_spill] sm:$0xff] %v10233_v0  ;;  %17440 = vst [vmem:[#allocation97_spill] sm:$0xff] %v10237_v61  ;;  %v10268_v39 = vld [vmem:[#allocation3 + $0x1d0] sm:$0xff]  ;;  %v10272_v53 = vpack.i.bf16 %v10257_v2, %v10157_v5  ;;  %v2176_v48 = vrot.slane %v10257_v2, 1 }
 0x164   : > { %7834 = vrot.lane.b32.xlu1 %v7833_v9, %s8812_s17  ;;  %7809 = vrot.lane.b32.xlu0 %v10178_v6, %s8810_s15  ;;  %v2269_v9 = vrot.slane %v10157_v5, 2  ;;  %17441 = vst [vmem:[#allocation98_spill] sm:$0xff] %v10241_v11  ;;  %v7883_v5 = vpack.i.bf16 %v10268_v39, %v10266_v18 }
 0x165   : > { %v10250_v19 = vpop.permute.xlu1 %7584 }
 0x166   : > { %v10244_v54 = vsel %vm1468_vm5, %v2269_v9, %v2270_v49  ;;  %17443 = vst [vmem:[#allocation100_spill] sm:$0xff] %v10250_v19  ;;  %v10259_v9 = vpop.permute.xlu0 %7589  ;;  %v1980_v49 = vld [vmem:[#allocation3 + $0x198] sm:$0x3] }
 0x167   : > { %17442 = vst [vmem:[#allocation99_spill] sm:$0xff] %v10244_v54  ;;  %v10254_v3 = vpack.i.bf16 %v10244_v54, %v10206_v10  ;;  %17445 = vst [vmem:[#allocation102_spill] sm:$0xff] %v10259_v9  ;;  %v2177_v10 = vrot.slane %v1980_v49, 1  ;;  %v2273_v56 = vrot.slane %v1980_v49, 2 }
 0x168   : > { %7844 = vrot.lane.b32.xlu1 %v10196_v7, %s8810_s15  ;;  %7814 = vrot.lane.b32.xlu0 %v10200_v40, %s8811_s16 }
 0x169   : > { %17444 = vst [vmem:[#allocation101_spill] sm:$0xff] %v10254_v3 }
 0x16c   : > { %7849 = vrot.lane.b32.xlu1 %v10217_v34, %s8811_s16  ;;  %7819 = vrot.lane.b32.xlu0 %v10221_v38, %s8813_s23 }
 0x170   : > { %7854 = vrot.lane.b32.xlu1 %v10237_v61, %s8813_s23  ;;  %7824 = vrot.lane.b32.xlu0 %v10241_v11, %s8814_s25  ;;  %v2004_v61 = vld [vmem:[#allocation3 + $0x258] sm:$0x3] }
 0x174   : > { %7859 = vrot.lane.b32.xlu1 %v10254_v3, %s8814_s25  ;;  %7839 = vrot.lane.b32.xlu0 %v10155_v52, %s8815_s26 }
 0x176   : > { %v7242_v12 = vpop.f32.mrf.mxu0 }
 0x177   : > { %v553_v0 = vadd.f32 %v7242_v12, %v9864_v17 }
 0x178   : > { %v547_v41 = vpop.f32.mrf.mxu0  ;;  %7879 = vrot.lane.b32.xlu1 %v10272_v53, %s8815_s26  ;;  %7864 = vrot.lane.b32.xlu0 %v10196_v7, %s8816_s30 }
 0x179   : > { %v611_v27 = vmax.f32 %v553_v0, 0.0  ;;  %v548_v19 = vadd.f32 %v9864_v17, %v547_v41  ;;  %v10277_v0 = vpop.permute.xlu1 %7594 }
 0x17a   : > { %17446 = vst [vmem:[#allocation103_spill] sm:$0xff] %v10277_v0  ;;  %v10291_v0 = vsel %vm1167_vm4, %v2176_v48, %v2177_v10  ;;  %v7873_v48 = vpack.i.bf16 %v10293_v4, %v10257_v2  ;;  %v10307_v10 = vld [vmem:[#allocation3 + $0x1b0] sm:$0xff] }
 0x17b   : > { %v7245_v12 = vpop.f32.mrf.mxu0  ;;  %920 = vst.msk [vmem:[#allocation3 + $0x2a1] sm:$0xff] %vm739_vm2, %v611_v27  ;;  %v610_v9 = vmax.f32 %v548_v19, 0.0  ;;  %v10286_v19 = vpop.permute.xlu0 %7599  ;;  %17448 = vst [vmem:[#allocation105_spill] sm:$0xff] %v10291_v0 }
 0x17c   : > { %v563_v22 = vadd.f32 %v7245_v12, %v9864_v17  ;;  %17447 = vst [vmem:[#allocation104_spill] sm:$0xff] %v10286_v19  ;;  %7884 = vrot.lane.b32.xlu1 %v7883_v5, %s8815_s26  ;;  %7869 = vrot.lane.b32.xlu0 %v10272_v53, %s8809_s14 }
 0x17d   : > { %919 = vst.msk [vmem:[#allocation3 + $0x291] sm:$0xff] %vm739_vm2, %v610_v9  ;;  %v557_v41 = vpop.f32.mrf.mxu0  ;;  %v10299_v19 = vpop.permute.xlu1 %7604 }
 0x17e   : > { %v613_v27 = vmax.f32 %v563_v22, 0.0  ;;  %v558_v12 = vadd.f32 %v9864_v17, %v557_v41  ;;  %17449 = vst [vmem:[#allocation106_spill] sm:$0xff] %v10299_v19  ;;  %v10309_v41 = vld [vmem:[#allocation3 + $0x1d8] sm:$0x3]  ;;  %v10314_v19 = vld [vmem:[#allocation3 + $0x1c8] sm:$0x3] }
 0x17f   : > { %v7248_v16 = vpop.f32.mrf.mxu0  ;;  %v10316_v36 = vpop.permute.xlu0 %7609  ;;  %v2352_v49 = vrot.slane %v10309_v41, 1  ;;  %v2320_v14 = vrot.slane %v10314_v19, 1 }
 0x180   : > { %922 = vst.msk [vmem:[#allocation3 + $0x2c1] sm:$0xff] %vm739_vm2, %v613_v27  ;;  %v612_v9 = vmax.f32 %v558_v12, 0.0  ;;  %v573_v22 = vadd.f32 %v7248_v16, %v9864_v17  ;;  %v10303_v27 = vpack.i.bf16 %v10291_v0, %v10224_v23  ;;  %v2272_v16 = vrot.slane %v10257_v2, 2  ;;  %17450 = vst [vmem:[#allocation107_spill] sm:$0xff] %v10316_v36  ;;  %7874 = vrot.lane.b32.xlu0 %v7873_v48, %s8812_s17 }
 0x181   : > { %v567_v31 = vpop.f32.mrf.mxu0  ;;  %v2351_v2 = vrot.slane %v10268_v39, 1  ;;  %v2319_v23 = vrot.slane %v10266_v18, 1  ;;  %v10337_v29 = vpop.permute.xlu1 %7614 }
 0x182   : > { %921 = vst.msk [vmem:[#allocation3 + $0x2b1] sm:$0xff] %vm739_vm2, %v612_v9  ;;  %v615_v5 = vmax.f32 %v573_v22, 0.0  ;;  %v568_v12 = vadd.f32 %v9864_v17, %v567_v31  ;;  %7909 = vrot.lane.b32.xlu1 %v10303_v27, %s8816_s30  ;;  %v10325_v31 = vpack.i.bf16 %v10307_v10, %v10293_v4  ;;  %17452 = vst [vmem:[#allocation109_spill] sm:$0xff] %v10337_v29  ;;  %v2182_v29 = vrot.slane %v10307_v10, 1 }
 0x183   : > { %v7251_v51 = vpop.f32.mrf.mxu0 }
 0x184   : > { %924 = vst.msk [vmem:[#allocation3 + $0x2e1] sm:$0xff] %vm739_vm2, %v615_v5  ;;  %v614_v9 = vmax.f32 %v568_v12, 0.0  ;;  %v583_v22 = vadd.f32 %v7251_v51, %v9864_v17  ;;  %v10334_v51 = vsel %vm1468_vm5, %v2272_v16, %v2273_v56  ;;  %v2179_v12 = vrot.slane %v10293_v4, 1  ;;  %7889 = vrot.lane.b32.xlu0 %v10303_v27, %s8810_s15 }
 0x185   : > { %v577_v36 = vpop.f32.mrf.mxu0  ;;  %17451 = vst [vmem:[#allocation108_spill] sm:$0xff] %v10334_v51  ;;  %v7918_v56 = vpack.i.bf16 %v10266_v18, %v10307_v10  ;;  %v10353_v16 = vpack.i.bf16 %v10334_v51, %v10244_v54  ;;  %v1994_v54 = vld [vmem:[#allocation3 + $0x208] sm:$0x3] }
 0x186   : > { %923 = vst.msk [vmem:[#allocation3 + $0x2d1] sm:$0xff] %vm739_vm2, %v614_v9  ;;  %v617_v48 = vmax.f32 %v583_v22, 0.0  ;;  %v578_v5 = vadd.f32 %v9864_v17, %v577_v36  ;;  %7914 = vrot.lane.b32.xlu1 %v10325_v31, %s8809_s14  ;;  %v10345_v17 = vsel %vm1167_vm4, %v2351_v2, %v2352_v49  ;;  %v10347_v36 = vpop.permute.xlu0 %7619  ;;  %v10356_v22 = vsel %vm1167_vm4, %v2319_v23, %v2320_v14 }
 0x187   : > { %17453 = vst [vmem:[#allocation110_spill] sm:$0xff] %v10345_v17  ;;  %17454 = vst [vmem:[#allocation111_spill] sm:$0xff] %v10347_v36  ;;  %v2183_v2 = vrot.slane %v1984_v50, 1  ;;  %v2275_v49 = vrot.slane %v10293_v4, 2  ;;  %v10367_v36 = vpop.permute.xlu1 %7624  ;;  %v7928_v23 = vpack.i.bf16 %v10345_v17, %v10356_v22  ;;  %v2278_v4 = vrot.slane %v10307_v10, 2 }
 0x188   : > { %926 = vst.msk [vmem:[#allocation3 + $0x301] sm:$0xff] %vm739_vm2, %v617_v48  ;;  %v616_v9 = vmax.f32 %v578_v5, 0.0  ;;  %17455 = vst [vmem:[#allocation112_spill] sm:$0xff] %v10356_v22  ;;  %v10361_v48 = vsel %vm1167_vm4, %v2179_v12, %v2180_v13  ;;  %v2276_v5 = vrot.slane %v1982_v30, 2  ;;  %7894 = vrot.lane.b32.xlu0 %v10353_v16, %s8811_s16  ;;  %v2192_v57 = vrot.slane %v1994_v54, 1 }
 0x189   : > { %17456 = vst [vmem:[#allocation113_spill] sm:$0xff] %v10361_v48  ;;  %17457 = vst [vmem:[#allocation114_spill] sm:$0xff] %v10367_v36  ;;  %v10375_v13 = vpack.i.bf16 %v10361_v48, %v10291_v0  ;;  %v10378_v12 = vsel %vm1167_vm4, %v2182_v29, %v2183_v2  ;;  %v1996_v0 = vld [vmem:[#allocation3 + $0x218] sm:$0x3] }
 0x18a   : > { %925 = vst.msk [vmem:[#allocation3 + $0x2f1] sm:$0xff] %vm739_vm2, %v616_v9  ;;  %7919 = vrot.lane.b32.xlu1 %v7918_v56, %s8812_s17  ;;  %v10369_v14 = vpop.permute.xlu0 %7629  ;;  %17460 = vst [vmem:[#allocation117_spill] sm:$0xff] %v10378_v12  ;;  %v10381_v30 = vsel %vm1468_vm5, %v2275_v49, %v2276_v5  ;;  %v2279_v9 = vrot.slane %v1984_v50, 2  ;;  %v10393_v36 = vpack.i.bf16 %v10378_v12, %v10361_v48  ;;  %v2332_v5 = vrot.slane %v10314_v19, 2  ;;  %v1989_v19 = vld [vmem:[#allocation3 + $0x1e0] sm:$0xff] }
 0x18b   : > { %17458 = vst [vmem:[#allocation115_spill] sm:$0xff] %v10369_v14  ;;  %17459 = vst [vmem:[#allocation116_spill] sm:$0xff] %v10375_v13  ;;  %v10387_v56 = vpop.permute.xlu1 %7634  ;;  %v10397_v29 = vpack.i.bf16 %v10381_v30, %v10334_v51  ;;  %v1995_v51 = vld [vmem:[#allocation3 + $0x210] sm:$0xff]  ;;  %v2185_v17 = vrot.slane %v1989_v19, 1  ;;  %v2195_v25 = vrot.slane %v1996_v0, 1 }
 0x18c   : > { %17461 = vst [vmem:[#allocation118_spill] sm:$0xff] %v10381_v30  ;;  %7899 = vrot.lane.b32.xlu0 %v10375_v13, %s8813_s23  ;;  %17462 = vst [vmem:[#allocation119_spill] sm:$0xff] %v10387_v56  ;;  %v10400_v10 = vsel %vm1468_vm5, %v2278_v4, %v2279_v9  ;;  %v1992_v56 = vld [vmem:[#allocation3 + $0x1f8] sm:$0x3]  ;;  %v2194_v44 = vrot.slane %v1995_v51, 1 }
 0x18d   : > { %17464 = vst [vmem:[#allocation121_spill] sm:$0xff] %v10397_v29  ;;  %17465 = vst [vmem:[#allocation122_spill] sm:$0xff] %v10400_v10  ;;  %v10412_v49 = vpack.i.bf16 %v10400_v10, %v10381_v30  ;;  %v2189_v48 = vrot.slane %v1992_v56, 1  ;;  %v2285_v8 = vrot.slane %v1992_v56, 2 }
 0x18e   : > { %7929 = vrot.lane.b32.xlu1 %v7928_v23, %s8816_s30  ;;  %v10389_v14 = vpop.permute.xlu0 %7639  ;;  %v2331_v23 = vrot.slane %v10266_v18, 2  ;;  %v1990_v18 = vld [vmem:[#allocation3 + $0x1e8] sm:$0x3] }
 0x18f   : > { %17463 = vst [vmem:[#allocation120_spill] sm:$0xff] %v10389_v14  ;;  %v10406_v50 = vpop.permute.xlu1 %7669  ;;  %v1991_v14 = vld [vmem:[#allocation3 + $0x1f0] sm:$0xff]  ;;  %v2282_v3 = vrot.slane %v1990_v18, 2 }
 0x190   : > { %7904 = vrot.lane.b32.xlu0 %v10397_v29, %s8814_s25  ;;  %17466 = vst [vmem:[#allocation123_spill] sm:$0xff] %v10406_v50  ;;  %v10426_v50 = vpack.i.bf16 %v10356_v22, %v10378_v12  ;;  %v2186_v22 = vrot.slane %v1990_v18, 1  ;;  %v2188_v12 = vrot.slane %v1991_v14, 1  ;;  %v2281_v29 = vrot.slane %v1989_v19, 2 }
 0x191   : > { %v2284_v55 = vrot.slane %v1991_v14, 2 }
 0x192   : > { %7934 = vrot.lane.b32.xlu1 %v10393_v36, %s8810_s15  ;;  %v10408_v2 = vpop.permute.xlu0 %7644  ;;  %17470 = vst [vmem:[#allocation127_spill] sm:$0xff] %v10426_v50  ;;  %v10463_v11 = vsel %vm1167_vm4, %v2188_v12, %v2189_v48  ;;  %v10484_v48 = vsel %vm1167_vm4, %v2194_v44, %v2195_v25 }
 0x193   : > { %17467 = vst [vmem:[#allocation124_spill] sm:$0xff] %v10408_v2  ;;  %v10420_v4 = vpop.permute.xlu1 %7674  ;;  %v10429_v2 = vsel %vm1468_vm5, %v2331_v23, %v2332_v5  ;;  %v10443_v5 = vpack.i.bf16 %v1991_v14, %v1989_v19  ;;  %v1993_v23 = vld [vmem:[#allocation3 + $0x200] sm:$0xff]  ;;  %17478 = vst [vmem:[#allocation135_spill] sm:$0xff] %v10463_v11  ;;  %v10490_v56 = vsel %vm1468_vm5, %v2284_v55, %v2285_v8 }
 0x194   : > { %7924 = vrot.lane.b32.xlu0 %v10325_v31, %s8815_s26  ;;  %17468 = vst [vmem:[#allocation125_spill] sm:$0xff] %v10420_v4  ;;  %17471 = vst [vmem:[#allocation128_spill] sm:$0xff] %v10429_v2  ;;  %v10441_v30 = vpack.i.bf16 %v10429_v2, %v10400_v10  ;;  %v2191_v10 = vrot.slane %v1993_v23, 1  ;;  %v2287_v12 = vrot.slane %v1993_v23, 2 }
 0x195   : > { %17482 = vst [vmem:[#allocation139_spill] sm:$0xff] %v10484_v48  ;;  %17484 = vst [vmem:[#allocation141_spill] sm:$0xff] %v10490_v56 }
 0x196   : > { %7939 = vrot.lane.b32.xlu1 %v10412_v49, %s8811_s16  ;;  %v10422_v9 = vpop.permute.xlu0 %7649  ;;  %17474 = vst [vmem:[#allocation131_spill] sm:$0xff] %v10441_v30  ;;  %v10473_v19 = vsel %vm1167_vm4, %v2191_v10, %v2192_v57  ;;  %v2288_v57 = vrot.slane %v1994_v54, 2  ;;  %v2290_v10 = vrot.slane %v1995_v51, 2  ;;  %v2197_v54 = vrot.slane %v10457_v59, 1 }
 0x197   : > { %17469 = vst [vmem:[#allocation126_spill] sm:$0xff] %v10422_v9  ;;  %v10435_v4 = vpop.permute.xlu1 %7684  ;;  %17479 = vst [vmem:[#allocation136_spill] sm:$0xff] %v10473_v19 }
 0x198   : > { %7954 = vrot.lane.b32.xlu0 %v10393_v36, %s8816_s30  ;;  %17472 = vst [vmem:[#allocation129_spill] sm:$0xff] %v10435_v4  ;;  %v10449_v4 = vpack.i.bf16 %v1995_v51, %v1993_v23  ;;  %v10509_v8 = vsel %vm1468_vm5, %v2287_v12, %v2288_v57  ;;  %v2293_v57 = vrot.slane %v10457_v59, 2 }
 0x199   : > { %17487 = vst [vmem:[#allocation144_spill] sm:$0xff] %v10509_v8 }
 0x19a   : > { %7944 = vrot.lane.b32.xlu1 %v10426_v50, %s8813_s23  ;;  %v10437_v9 = vpop.permute.xlu0 %7654  ;;  %v2204_v50 = vrot.slane %v2002_v46, 1 }
 0x19b   : > { %17473 = vst [vmem:[#allocation130_spill] sm:$0xff] %v10437_v9  ;;  %v10451_v9 = vpack.i.bf16 %v1993_v23, %v1991_v14  ;;  %v10453_v47 = vpop.permute.xlu1 %7689  ;;  %v10487_v14 = vsel %vm1468_vm5, %v2281_v29, %v2282_v3  ;;  %v10502_v3 = vpack.i.bf16 %v10484_v48, %v10473_v19 }
 0x19c   : > { %7959 = vrot.lane.b32.xlu0 %v10443_v5, %s8809_s14  ;;  %17475 = vst [vmem:[#allocation132_spill] sm:$0xff] %v10453_v47  ;;  %v10470_v47 = vpack.i.bf16 %v10457_v59, %v1995_v51  ;;  %17483 = vst [vmem:[#allocation140_spill] sm:$0xff] %v10487_v14  ;;  %v10506_v25 = vpack.i.bf16 %v10490_v56, %v10487_v14 }
 0x19e   : > { %7949 = vrot.lane.b32.xlu1 %v10441_v30, %s8814_s25  ;;  %v10455_v33 = vpop.permute.xlu0 %7659  ;;  %v10460_v30 = vsel %vm1167_vm4, %v2185_v17, %v2186_v22 }
 0x19f   : > { %17476 = vst [vmem:[#allocation133_spill] sm:$0xff] %v10455_v33  ;;  %17477 = vst [vmem:[#allocation134_spill] sm:$0xff] %v10460_v30  ;;  %v10475_v18 = vpop.permute.xlu1 %7694  ;;  %v10481_v22 = vpack.i.bf16 %v10463_v11, %v10460_v30  ;;  %v2291_v33 = vrot.slane %v1996_v0, 2 }
 0x1a0   : > { %7964 = vrot.lane.b32.xlu0 %v10451_v9, %s8812_s17  ;;  %17480 = vst [vmem:[#allocation137_spill] sm:$0xff] %v10475_v18  ;;  %v1998_v18 = vld [vmem:[#allocation3 + $0x228] sm:$0x3] }
 0x1a1   : > { %v10512_v55 = vsel %vm1468_vm5, %v2290_v10, %v2291_v33  ;;  %v2198_v0 = vrot.slane %v1998_v18, 1  ;;  %v10529_v33 = vpack.i.bf16 %v10473_v19, %v10463_v11  ;;  %v2294_v10 = vrot.slane %v1998_v18, 2 }
 0x1a2   : > { %7989 = vrot.lane.b32.xlu1 %v10449_v4, %s8809_s14  ;;  %v10477_v17 = vpop.permute.xlu0 %7664  ;;  %17488 = vst [vmem:[#allocation145_spill] sm:$0xff] %v10512_v55  ;;  %v10525_v23 = vpack.i.bf16 %v10512_v55, %v10509_v8 }
 0x1a3   : > { %17481 = vst [vmem:[#allocation138_spill] sm:$0xff] %v10477_v17  ;;  %v10496_v17 = vpop.permute.xlu1 %7699  ;;  %17491 = vst [vmem:[#allocation148_spill] sm:$0xff] %v10529_v33  ;;  %v10532_v12 = vsel %vm1167_vm4, %v2197_v54, %v2198_v0  ;;  %v10549_v54 = vpack.i.bf16 %v10509_v8, %v10490_v56  ;;  %v10552_v18 = vsel %vm1468_vm5, %v2293_v57, %v2294_v10  ;;  %v2000_v57 = vld [vmem:[#allocation3 + $0x238] sm:$0x3]  ;;  %v10570_v10 = vld [vmem:[#allocation3 + $0x260] sm:$0xff] }
 0x1a4   : > { %7969 = vrot.lane.b32.xlu0 %v10481_v22, %s8810_s15  ;;  %17485 = vst [vmem:[#allocation142_spill] sm:$0xff] %v10496_v17  ;;  %17492 = vst [vmem:[#allocation149_spill] sm:$0xff] %v10532_v12  ;;  %v10572_v56 = vld [vmem:[#allocation3 + $0x270] sm:$0xff]  ;;  %v2201_v30 = vrot.slane %v2000_v57, 1 }
 0x1a5   : > { %17496 = vst [vmem:[#allocation153_spill] sm:$0xff] %v10549_v54  ;;  %17497 = vst [vmem:[#allocation154_spill] sm:$0xff] %v10552_v18 }
 0x1a6   : > { %7994 = vrot.lane.b32.xlu1 %v10470_v47, %s8812_s17  ;;  %v10498_v44 = vpop.permute.xlu0 %7679 }
 0x1a7   : > { %17486 = vst [vmem:[#allocation143_spill] sm:$0xff] %v10498_v44  ;;  %v10519_v51 = vpop.permute.xlu1 %7719  ;;  %v1999_v44 = vld [vmem:[#allocation3 + $0x230] sm:$0xff] }
 0x1a8   : > { %7974 = vrot.lane.b32.xlu0 %v10506_v25, %s8811_s16  ;;  %17489 = vst [vmem:[#allocation146_spill] sm:$0xff] %v10519_v51  ;;  %v2200_v11 = vrot.slane %v1999_v44, 1 }
 0x1aa   : > { %8004 = vrot.lane.b32.xlu1 %v10502_v3, %s8810_s15  ;;  %v10521_v29 = vpop.permute.xlu0 %7704 }
 0x1ab   : > { %17490 = vst [vmem:[#allocation147_spill] sm:$0xff] %v10521_v29  ;;  %v10539_v51 = vpop.permute.xlu1 %7724  ;;  %v10545_v29 = vpack.i.bf16 %v10532_v12, %v10484_v48 }
 0x1ac   : > { %7979 = vrot.lane.b32.xlu0 %v10529_v33, %s8813_s23  ;;  %17493 = vst [vmem:[#allocation150_spill] sm:$0xff] %v10539_v51 }
 0x1ad   : > { %17495 = vst [vmem:[#allocation152_spill] sm:$0xff] %v10545_v29 }
 0x1ae   : > { %8009 = vrot.lane.b32.xlu1 %v10525_v23, %s8811_s16  ;;  %v10541_v17 = vpop.permute.xlu0 %7709 }
 0x1af   : > { %17494 = vst [vmem:[#allocation151_spill] sm:$0xff] %v10541_v17  ;;  %v10558_v0 = vpop.permute.xlu1 %7749  ;;  %v10564_v17 = vpack.i.bf16 %v10552_v18, %v10512_v55  ;;  %v8043_v55 = vpack.i.bf16 %v10572_v56, %v10570_v10 }
 0x1b0   : > { %7984 = vrot.lane.b32.xlu0 %v10549_v54, %s8814_s25  ;;  %17498 = vst [vmem:[#allocation155_spill] sm:$0xff] %v10558_v0  ;;  %v2296_v54 = vrot.slane %v1999_v44, 2 }
 0x1b1   : > { %17500 = vst [vmem:[#allocation157_spill] sm:$0xff] %v10564_v17 }
 0x1b2   : > { %8014 = vrot.lane.b32.xlu1 %v10545_v29, %s8813_s23  ;;  %v10560_v51 = vpop.permute.xlu0 %7714 }
 0x1b3   : > { %17499 = vst [vmem:[#allocation156_spill] sm:$0xff] %v10560_v51  ;;  %v10574_v14 = vpop.permute.xlu1 %7754  ;;  %v10579_v51 = vpack.i.bf16 %v1999_v44, %v10457_v59  ;;  %v2001_v59 = vld [vmem:[#allocation3 + $0x240] sm:$0xff] }
 0x1b4   : > { %7999 = vrot.lane.b32.xlu0 %v10449_v4, %s8815_s26  ;;  %17501 = vst [vmem:[#allocation158_spill] sm:$0xff] %v10574_v14  ;;  %v10592_v14 = vsel %vm1167_vm4, %v2200_v11, %v2201_v30  ;;  %v10609_v11 = vld [vmem:[#allocation3 + $0x278] sm:$0x3]  ;;  %v2003_v30 = vld [vmem:[#allocation3 + $0x250] sm:$0xff] }
 0x1b5   : > { %17505 = vst [vmem:[#allocation162_spill] sm:$0xff] %v10592_v14  ;;  %v10622_v33 = vpack.i.bf16 %v2003_v30, %v2001_v59  ;;  %v10640_v62 = vpack.i.bf16 %v10570_v10, %v2003_v30  ;;  %v2206_v1 = vrot.slane %v2003_v30, 1 }
 0x1b6   : > { %8019 = vrot.lane.b32.xlu1 %v10564_v17, %s8814_s25  ;;  %v10576_v0 = vpop.permute.xlu0 %7729  ;;  %v10603_v17 = vpack.i.bf16 %v10592_v14, %v10532_v12  ;;  %v2354_v12 = vrot.slane %v10572_v56, 1 }
 0x1b7   : > { %17502 = vst [vmem:[#allocation159_spill] sm:$0xff] %v10576_v0  ;;  %v10587_v8 = vpop.permute.xlu1 %7759 }
 0x1b8   : > { %8024 = vrot.lane.b32.xlu0 %v10502_v3, %s8816_s30  ;;  %17503 = vst [vmem:[#allocation160_spill] sm:$0xff] %v10587_v8  ;;  %v10605_v8 = vpack.i.bf16 %v2001_v59, %v1999_v44  ;;  %v2355_v44 = vrot.slane %v10609_v11, 1 }
 0x1ba   : > { %8039 = vrot.lane.b32.xlu1 %v10579_v51, %s8815_s26  ;;  %v10589_v48 = vpop.permute.xlu0 %7734 }
 0x1bb   : > { %17504 = vst [vmem:[#allocation161_spill] sm:$0xff] %v10589_v48  ;;  %v10607_v48 = vld [vmem:[#allocation3 + $0x268] sm:$0x3] }
 0x1bc   : > { %8029 = vrot.lane.b32.xlu0 %v10579_v51, %s8809_s14 }
 0x1be   : > { %8044 = vrot.lane.b32.xlu1 %v8043_v55, %s8815_s26  ;;  %v10597_v0 = vpop.permute.xlu1 %7769  ;;  %v10599_v19 = vpop.permute.xlu0 %7739  ;;  %v2297_v55 = vrot.slane %v2000_v57, 2  ;;  %v2203_v57 = vrot.slane %v2001_v59, 1 }
 0x1bf   : > { %17506 = vst [vmem:[#allocation163_spill] sm:$0xff] %v10597_v0  ;;  %17507 = vst [vmem:[#allocation164_spill] sm:$0xff] %v10599_v19  ;;  %v2322_v0 = vrot.slane %v10570_v10, 1  ;;  %v2323_v19 = vrot.slane %v10607_v48, 1 }
 0x1c0   : > { %8034 = vrot.lane.b32.xlu0 %v10605_v8, %s8812_s17  ;;  %v10626_v13 = vsel %vm1468_vm5, %v2296_v54, %v2297_v55  ;;  %v10647_v55 = vsel %vm1167_vm4, %v2354_v12, %v2355_v44  ;;  %v10650_v28 = vsel %vm1167_vm4, %v2203_v57, %v2204_v50  ;;  %v2302_v44 = vrot.slane %v2003_v30, 2 }
 0x1c1   : > { %17510 = vst [vmem:[#allocation167_spill] sm:$0xff] %v10626_v13  ;;  %v10644_v54 = vpack.i.bf16 %v10626_v13, %v10552_v18  ;;  %17514 = vst [vmem:[#allocation171_spill] sm:$0xff] %v10647_v55  ;;  %v10664_v50 = vpack.i.bf16 %v10650_v28, %v10592_v14  ;;  %v2303_v57 = vrot.slane %v2004_v61, 2 }
 0x1c2   : > { %8069 = vrot.lane.b32.xlu1 %v10603_v17, %s8816_s30  ;;  %v10618_v26 = vpop.permute.xlu1 %7774  ;;  %v10620_v29 = vpop.permute.xlu0 %7744  ;;  %17515 = vst [vmem:[#allocation172_spill] sm:$0xff] %v10650_v28 }
 0x1c3   : > { %17508 = vst [vmem:[#allocation165_spill] sm:$0xff] %v10618_v26  ;;  %17509 = vst [vmem:[#allocation166_spill] sm:$0xff] %v10620_v29  ;;  %v10633_v26 = vsel %vm1167_vm4, %v2322_v0, %v2323_v19  ;;  %v2207_v19 = vrot.slane %v2004_v61, 1  ;;  %v2299_v0 = vrot.slane %v2001_v59, 2 }
 0x1c4   : > { %8049 = vrot.lane.b32.xlu0 %v10603_v17, %s8810_s15  ;;  %17511 = vst [vmem:[#allocation168_spill] sm:$0xff] %v10633_v26  ;;  %v8088_v12 = vpack.i.bf16 %v10647_v55, %v10633_v26 }
 0x1c5   : > { %v10667_v59 = vsel %vm1167_vm4, %v2206_v1, %v2207_v19  ;;  %v10670_v46 = vsel %vm1468_vm5, %v2299_v0, %v2300_v20  ;;  %v10688_v20 = vsel %vm1468_vm5, %v2302_v44, %v2303_v57  ;;  %v2334_v0 = vrot.slane %v10570_v10, 2 }
 0x1c6   : > { %8074 = vrot.lane.b32.xlu1 %v10622_v33, %s8809_s14  ;;  %v10635_v29 = vpop.permute.xlu1 %7779  ;;  %v10637_v38 = vpop.permute.xlu0 %7764  ;;  %17518 = vst [vmem:[#allocation175_spill] sm:$0xff] %v10667_v59  ;;  %17519 = vst [vmem:[#allocation176_spill] sm:$0xff] %v10670_v46  ;;  %v10681_v18 = vpack.i.bf16 %v10667_v59, %v10650_v28  ;;  %v10685_v1 = vpack.i.bf16 %v10670_v46, %v10626_v13  ;;  %v10700_v19 = vpack.i.bf16 %v10688_v20, %v10670_v46 }
 0x1c7   : > { %17512 = vst [vmem:[#allocation169_spill] sm:$0xff] %v10635_v29  ;;  %17513 = vst [vmem:[#allocation170_spill] sm:$0xff] %v10637_v38 }
 0x1c8   : > { %8054 = vrot.lane.b32.xlu0 %v10644_v54, %s8811_s16  ;;  %17522 = vst [vmem:[#allocation179_spill] sm:$0xff] %v10688_v20 }
 0x1ca   : > { %8079 = vrot.lane.b32.xlu1 %v10640_v62, %s8812_s17  ;;  %v10656_v29 = vpop.permute.xlu1 %7784  ;;  %v10658_v38 = vpop.permute.xlu0 %7794  ;;  %s8825_s17 = smov 24  }
 0x1cb   : > { %17516 = vst [vmem:[#allocation173_spill] sm:$0xff] %v10656_v29  ;;  %17517 = vst [vmem:[#allocation174_spill] sm:$0xff] %v10658_v38 }
 0x1cc   : > { %8059 = vrot.lane.b32.xlu0 %v10664_v50, %s8813_s23 }
 0x1ce   : > { %8089 = vrot.lane.b32.xlu1 %v8088_v12, %s8816_s30  ;;  %v10675_v29 = vpop.permute.xlu1 %7789  ;;  %v10677_v38 = vpop.permute.xlu0 %7799  ;;  %v2335_v12 = vrot.slane %v10607_v48, 2 }
 0x1cf   : > { %17520 = vst [vmem:[#allocation177_spill] sm:$0xff] %v10675_v29  ;;  %17521 = vst [vmem:[#allocation178_spill] sm:$0xff] %v10677_v38  ;;  %v2361_v38 = vrot.slane %v10018_v35, 2  ;;  %v10813_v29 = vld [vmem:[#allocation3 + $0xe0] sm:$0xff] }
 0x1d0   : > { %8064 = vrot.lane.b32.xlu0 %v10685_v1, %s8814_s25 }
 0x1d2   : > { %8094 = vrot.lane.b32.xlu1 %v10681_v18, %s8810_s15  ;;  %v10694_v61 = vpop.permute.xlu1 %7829  ;;  %v10696_v30 = vpop.permute.xlu0 %7804  ;;  %s8823_s15 = smov 56  }
 0x1d3   : > { %17523 = vst [vmem:[#allocation180_spill] sm:$0xff] %v10694_v61  ;;  %17524 = vst [vmem:[#allocation181_spill] sm:$0xff] %v10696_v30  ;;  %v10714_v61 = vpack.i.bf16 %v10633_v26, %v10667_v59  ;;  %v10717_v30 = vsel %vm1468_vm5, %v2334_v0, %v2335_v12 }
 0x1d4   : > { %8084 = vrot.lane.b32.xlu0 %v10622_v33, %s8815_s26  ;;  %17527 = vst [vmem:[#allocation184_spill] sm:$0xff] %v10717_v30  ;;  %s8828_s26 = smov 60  }
 0x1d6   : > { %8099 = vrot.lane.b32.xlu1 %v10700_v19, %s8811_s16  ;;  %v10708_v44 = vpop.permute.xlu1 %7834  ;;  %v10710_v57 = vpop.permute.xlu0 %7809  ;;  %s8824_s16 = smov 12  }
 0x1d7   : > { %17525 = vst [vmem:[#allocation182_spill] sm:$0xff] %v10708_v44  ;;  %17526 = vst [vmem:[#allocation183_spill] sm:$0xff] %v10710_v57  ;;  %v10729_v44 = vpack.i.bf16 %v10717_v30, %v10688_v20  ;;  %v2360_v57 = vrot.slane %v9986_v42, 2 }
 0x1d8   : > { %8114 = vrot.lane.b32.xlu0 %v10681_v18, %s8816_s30  ;;  %s8829_s30 = smov 72  }
 0x1da   : > { %8104 = vrot.lane.b32.xlu1 %v10714_v61, %s8813_s23  ;;  %v10723_v48 = vpop.permute.xlu1 %7844  ;;  %v10725_v10 = vpop.permute.xlu0 %7814  ;;  %s8826_s23 = smov 36  }
 0x1db   : > { %17528 = vst [vmem:[#allocation185_spill] sm:$0xff] %v10723_v48  ;;  %17529 = vst [vmem:[#allocation186_spill] sm:$0xff] %v10725_v10  ;;  %v10742_v48 = vsel %vm1468_vm5, %v2360_v57, %v2361_v38 }
 0x1dc   : > { %8119 = vrot.lane.b32.xlu0 %v9935_v63, %s8817_s6  ;;  %17532 = vst [vmem:[#allocation189_spill] sm:$0xff] %v10742_v48  ;;  %v8133_v10 = vpack.i.bf16 %v10742_v48, %v10135_v37 }
 0x1de   : > { %8109 = vrot.lane.b32.xlu1 %v10729_v44, %s8814_s25  ;;  %v10737_v0 = vpop.permute.xlu1 %7849  ;;  %v10739_v12 = vpop.permute.xlu0 %7819  ;;  %s8827_s25 = smov 48  }
 0x1df   : > { %17530 = vst [vmem:[#allocation187_spill] sm:$0xff] %v10737_v0  ;;  %17531 = vst [vmem:[#allocation188_spill] sm:$0xff] %v10739_v12  ;;  %v2364_v0 = vrot.slane %v10309_v41, 2  ;;  %v2363_v12 = vrot.slane %v10268_v39, 2 }
 0x1e0   : > { %8129 = vrot.lane.b32.xlu0 %v10118_v32, %s8817_s6 }
 0x1e2   : > { %8124 = vrot.lane.b32.xlu1 %v10059_v60, %s8817_s6  ;;  %v10748_v42 = vpop.permute.xlu1 %7854  ;;  %v10750_v35 = vpop.permute.xlu0 %7824 }
 0x1e3   : > { %17533 = vst [vmem:[#allocation190_spill] sm:$0xff] %v10748_v42  ;;  %17534 = vst [vmem:[#allocation191_spill] sm:$0xff] %v10750_v35  ;;  %v10764_v42 = vsel %vm1468_vm5, %v2363_v12, %v2364_v0 }
 0x1e4   : > { %8139 = vrot.lane.b32.xlu0 %v10217_v34, %s8817_s6  ;;  %17537 = vst [vmem:[#allocation194_spill] sm:$0xff] %v10764_v42 }
 0x1e6   : > { %8134 = vrot.lane.b32.xlu1 %v8133_v10, %s8817_s6  ;;  %v10759_v38 = vpop.permute.xlu1 %7859  ;;  %v10761_v57 = vpop.permute.xlu0 %7839  ;;  %v8153_v10 = vpack.i.bf16 %v10764_v42, %v10429_v2 }
 0x1e7   : > { %17535 = vst [vmem:[#allocation192_spill] sm:$0xff] %v10759_v38  ;;  %17536 = vst [vmem:[#allocation193_spill] sm:$0xff] %v10761_v57  ;;  %v2366_v38 = vrot.slane %v10572_v56, 2  ;;  %v2367_v57 = vrot.slane %v10609_v11, 2 }
 0x1e8   : > { %8149 = vrot.lane.b32.xlu0 %v10412_v49, %s8817_s6 }
 0x1ea   : > { %8144 = vrot.lane.b32.xlu1 %v10353_v16, %s8817_s6  ;;  %v10770_v41 = vpop.permute.xlu1 %7879  ;;  %v10772_v39 = vpop.permute.xlu0 %7864 }
 0x1eb   : > { %17538 = vst [vmem:[#allocation195_spill] sm:$0xff] %v10770_v41  ;;  %17539 = vst [vmem:[#allocation196_spill] sm:$0xff] %v10772_v39  ;;  %v10786_v41 = vsel %vm1468_vm5, %v2366_v38, %v2367_v57  ;;  %v8658_v39 = vld [vmem:[#allocation3 + $0xa0] sm:$0xff] }
 0x1ec   : > { %8159 = vrot.lane.b32.xlu0 %v10525_v23, %s8817_s6  ;;  %17542 = vst [vmem:[#allocation199_spill] sm:$0xff] %v10786_v41 }
 0x1ee   : > { %8154 = vrot.lane.b32.xlu1 %v8153_v10, %s8817_s6  ;;  %v10781_v0 = vpop.permute.xlu1 %7884  ;;  %v10783_v12 = vpop.permute.xlu0 %7869  ;;  %v8173_v10 = vpack.i.bf16 %v10786_v41, %v10717_v30  ;;  %v10815_v41 = vld [vmem:[#allocation3 + $0xf0] sm:$0xff] }
 0x1ef   : > { %17540 = vst [vmem:[#allocation197_spill] sm:$0xff] %v10781_v0  ;;  %17541 = vst [vmem:[#allocation198_spill] sm:$0xff] %v10783_v12  ;;  %v10798_v0 = vld [vmem:[#allocation3 + $0xb0] sm:$0xff] }
 0x1f0   : > { %8169 = vrot.lane.b32.xlu0 %v10700_v19, %s8817_s6  ;;  %v8178_v12 = vpack.i.bf16 %v10798_v0, %v8658_v39  ;;  %v8188_v39 = vpack.i.bf16 %v10815_v41, %v10813_v29 }
 0x1f2   : > { %8164 = vrot.lane.b32.xlu1 %v10644_v54, %s8817_s6  ;;  %v10794_v11 = vpop.permute.xlu0 %7874 }
 0x1f3   : > { %17544 = vst [vmem:[#allocation201_spill] sm:$0xff] %v10794_v11  ;;  %v10809_v11 = vld [vmem:[#allocation3 + $0xd0] sm:$0xff] }
 0x1f4   : > { %v10792_v56 = vpop.permute.xlu1 %7909  ;;  %8179 = vrot.lane.b32.xlu0 %v8178_v12, %s8818_s9 }
 0x1f5   : > { %17543 = vst [vmem:[#allocation200_spill] sm:$0xff] %v10792_v56  ;;  %v10807_v56 = vld [vmem:[#allocation3 + $0xc0] sm:$0xff] }
 0x1f6   : > { %8174 = vrot.lane.b32.xlu1 %v8173_v10, %s8817_s6  ;;  %v10805_v57 = vpop.permute.xlu0 %7889  ;;  %v8183_v35 = vpack.i.bf16 %v10809_v11, %v10807_v56  ;;  %s8830_s6 = smov 84  }
 0x1f7   : > { %17546 = vst [vmem:[#allocation203_spill] sm:$0xff] %v10805_v57  ;;  %v10827_v57 = vld [vmem:[#allocation3 + $0x110] sm:$0xff] }
 0x1f8   : > { %v10803_v38 = vpop.permute.xlu1 %7914  ;;  %8189 = vrot.lane.b32.xlu0 %v8188_v39, %s8818_s9 }
 0x1f9   : > { %17545 = vst [vmem:[#allocation202_spill] sm:$0xff] %v10803_v38  ;;  %v10825_v38 = vld [vmem:[#allocation3 + $0x100] sm:$0xff] }
 0x1fa   : > { %8184 = vrot.lane.b32.xlu1 %v8183_v35, %s8818_s9  ;;  %v10823_v10 = vpop.permute.xlu0 %7894  ;;  %v8193_v30 = vpack.i.bf16 %v10827_v57, %v10825_v38 }
 0x1fb   : > { %17548 = vst [vmem:[#allocation205_spill] sm:$0xff] %v10823_v10  ;;  %v10889_v10 = vld [vmem:[#allocation3 + $0x2f0] sm:$0xff] }
 0x1fc   : > { %v10821_v12 = vpop.permute.xlu1 %7919  ;;  %8199 = vrot.lane.b32.xlu0 %v10147_v24, %s8818_s9 }
 0x1fd   : > { %17547 = vst [vmem:[#allocation204_spill] sm:$0xff] %v10821_v12 }
 0x1fe   : > { %8194 = vrot.lane.b32.xlu1 %v8193_v30, %s8818_s9  ;;  %v10836_v35 = vpop.permute.xlu0 %7899 }
 0x1ff   : > { %17550 = vst [vmem:[#allocation207_spill] sm:$0xff] %v10836_v35  ;;  %v10887_v35 = vld [vmem:[#allocation3 + $0x2e0] sm:$0xff] }
 0x200   : > { %v10834_v20 = vpop.permute.xlu1 %7929  ;;  %8209 = vrot.lane.b32.xlu0 %v10272_v53, %s8818_s9 }
 0x201   : > { %17549 = vst [vmem:[#allocation206_spill] sm:$0xff] %v10834_v20  ;;  %v10854_v20 = vld [vmem:[#allocation3 + $0x280] sm:$0xff] }
 0x202   : > { %8204 = vrot.lane.b32.xlu1 %v10155_v52, %s8818_s9  ;;  %v10844_v12 = vpop.permute.xlu0 %7904  ;;  %v10856_v52 = vld [vmem:[#allocation3 + $0x290] sm:$0xff] }
 0x203   : > { %17552 = vst [vmem:[#allocation209_spill] sm:$0xff] %v10844_v12  ;;  %v10874_v12 = vld [vmem:[#allocation3 + $0x2d0] sm:$0xff] }
 0x204   : > { %v10842_v39 = vpop.permute.xlu1 %7934  ;;  %8219 = vrot.lane.b32.xlu0 %v10443_v5, %s8818_s9  ;;  %v8238_v5 = vpack.i.bf16 %v10856_v52, %v10854_v20 }
 0x205   : > { %17551 = vst [vmem:[#allocation208_spill] sm:$0xff] %v10842_v39  ;;  %v10872_v39 = vld [vmem:[#allocation3 + $0x2c0] sm:$0xff] }
 0x206   : > { %8214 = vrot.lane.b32.xlu1 %v10325_v31, %s8818_s9  ;;  %v10852_v30 = vpop.permute.xlu0 %7924  ;;  %v2397_v2 = vrot.slane %v10872_v39, 1 }
 0x207   : > { %17554 = vst [vmem:[#allocation211_spill] sm:$0xff] %v10852_v30  ;;  %v10870_v30 = vld [vmem:[#allocation3 + $0x2b0] sm:$0xff] }
 0x208   : > { %v10850_v24 = vpop.permute.xlu1 %7939  ;;  %8229 = vrot.lane.b32.xlu0 %v10579_v51, %s8818_s9 }
 0x209   : > { %17553 = vst [vmem:[#allocation210_spill] sm:$0xff] %v10850_v24  ;;  %v10868_v24 = vld [vmem:[#allocation3 + $0x2a0] sm:$0xff] }
 0x20a   : > { %8224 = vrot.lane.b32.xlu1 %v10449_v4, %s8818_s9  ;;  %v10864_v31 = vpop.permute.xlu0 %7954  ;;  %v2391_v13 = vrot.slane %v10868_v24, 1 }
 0x20b   : > { %17556 = vst [vmem:[#allocation213_spill] sm:$0xff] %v10864_v31  ;;  %v8248_v31 = vpack.i.bf16 %v10874_v12, %v10872_v39 }
 0x20c   : > { %v10862_v53 = vpop.permute.xlu1 %7944  ;;  %8239 = vrot.lane.b32.xlu0 %v8238_v5, %s8818_s9 }
 0x20d   : > { %17555 = vst [vmem:[#allocation212_spill] sm:$0xff] %v10862_v53  ;;  %v8243_v53 = vpack.i.bf16 %v10870_v30, %v10868_v24 }
 0x20e   : > { %8234 = vrot.lane.b32.xlu1 %v10622_v33, %s8818_s9  ;;  %v10881_v51 = vpop.permute.xlu0 %7959 }
 0x20f   : > { %17558 = vst [vmem:[#allocation215_spill] sm:$0xff] %v10881_v51  ;;  %v8253_v51 = vpack.i.bf16 %v10889_v10, %v10887_v35 }
 0x210   : > { %v10879_v4 = vpop.permute.xlu1 %7949  ;;  %8249 = vrot.lane.b32.xlu0 %v8248_v31, %s8818_s9 }
 0x211   : > { %17557 = vst [vmem:[#allocation214_spill] sm:$0xff] %v10879_v4 }
 0x212   : > { %8244 = vrot.lane.b32.xlu1 %v8243_v53, %s8818_s9  ;;  %v10895_v5 = vpop.permute.xlu0 %7964 }
 0x213   : > { %17560 = vst [vmem:[#allocation217_spill] sm:$0xff] %v10895_v5  ;;  %v10938_v5 = vld [vmem:[#allocation3 + $0x2a8] sm:$0x3] }
 0x214   : > { %v10893_v33 = vpop.permute.xlu1 %7989  ;;  %8259 = vrot.lane.b32.xlu0 %v9893_v43, %s8819_s10 }
 0x215   : > { %17559 = vst [vmem:[#allocation216_spill] sm:$0xff] %v10893_v33 }
 0x216   : > { %8254 = vrot.lane.b32.xlu1 %v8253_v51, %s8818_s9  ;;  %v10904_v46 = vpop.permute.xlu0 %7969  ;;  %s8833_s9 = smov 120  }
 0x217   : > { %17562 = vst [vmem:[#allocation219_spill] sm:$0xff] %v10904_v46 }
 0x218   : > { %v10902_v4 = vpop.permute.xlu1 %7994  ;;  %8269 = vrot.lane.b32.xlu0 %v10015_v45, %s8819_s10  ;;  %v2385_v45 = vrot.slane %v10854_v20, 1 }
 0x219   : > { %17561 = vst [vmem:[#allocation218_spill] sm:$0xff] %v10902_v4  ;;  %v10922_v4 = vld [vmem:[#allocation3 + $0x288] sm:$0x3] }
 0x21a   : > { %8264 = vrot.lane.b32.xlu1 %v9913_v21, %s8819_s10  ;;  %v10912_v31 = vpop.permute.xlu0 %7974  ;;  %v10924_v21 = vld [vmem:[#allocation3 + $0x298] sm:$0x3] }
 0x21b   : > { %17564 = vst [vmem:[#allocation221_spill] sm:$0xff] %v10912_v31 }
 0x21c   : > { %v10910_v53 = vpop.permute.xlu1 %8004  ;;  %8279 = vrot.lane.b32.xlu0 %v10178_v6, %s8819_s10  ;;  %v2388_v6 = vrot.slane %v10856_v52, 1 }
 0x21d   : > { %17563 = vst [vmem:[#allocation220_spill] sm:$0xff] %v10910_v53 }
 0x21e   : > { %8274 = vrot.lane.b32.xlu1 %v10099_v15, %s8819_s10  ;;  %v10920_v51 = vpop.permute.xlu0 %7979  ;;  %v2386_v15 = vrot.slane %v10922_v4, 1 }
 0x21f   : > { %17566 = vst [vmem:[#allocation223_spill] sm:$0xff] %v10920_v51  ;;  %v10940_v51 = vld [vmem:[#allocation3 + $0x2b8] sm:$0x3] }
 0x220   : > { %v10918_v43 = vpop.permute.xlu1 %8009  ;;  %8289 = vrot.lane.b32.xlu0 %v10303_v27, %s8819_s10  ;;  %v10948_v27 = vld [vmem:[#allocation3 + $0x2d8] sm:$0x3]  ;;  %v10951_v31 = vsel %vm1167_vm4, %v2385_v45, %v2386_v15  ;;  %v2395_v42 = vrot.slane %v10940_v51, 1  ;;  %v2400_v15 = vrot.slane %v10874_v12, 1 }
 0x221   : > { %17565 = vst [vmem:[#allocation222_spill] sm:$0xff] %v10918_v43  ;;  %v2389_v43 = vrot.slane %v10924_v21, 1  ;;  %17569 = vst [vmem:[#allocation226_spill] sm:$0xff] %v10951_v31 }
 0x222   : > { %8284 = vrot.lane.b32.xlu1 %v10196_v7, %s8819_s10  ;;  %v10936_v33 = vpop.permute.xlu0 %7984  ;;  %v10946_v7 = vld [vmem:[#allocation3 + $0x2c8] sm:$0x3] }
 0x223   : > { %17568 = vst [vmem:[#allocation225_spill] sm:$0xff] %v10936_v33  ;;  %v2398_v45 = vrot.slane %v10946_v7, 1 }
 0x224   : > { %v10934_v53 = vpop.permute.xlu1 %8014  ;;  %8299 = vrot.lane.b32.xlu0 %v10481_v22, %s8819_s10  ;;  %v2394_v22 = vrot.slane %v10870_v30, 1 }
 0x225   : > { %17567 = vst [vmem:[#allocation224_spill] sm:$0xff] %v10934_v53  ;;  %v10954_v53 = vsel %vm1167_vm4, %v2388_v6, %v2389_v43  ;;  %v2401_v43 = vrot.slane %v10948_v27, 1  ;;  %v10968_v6 = vld [vmem:[#allocation3 + $0x2e8] sm:$0x3] }
 0x226   : > { %8294 = vrot.lane.b32.xlu1 %v10393_v36, %s8819_s10  ;;  %17570 = vst [vmem:[#allocation227_spill] sm:$0xff] %v10954_v53  ;;  %v10958_v46 = vpop.permute.xlu0 %7999  ;;  %v2392_v36 = vrot.slane %v10938_v5, 1  ;;  %v10986_v26 = vsel %vm1167_vm4, %v2394_v22, %v2395_v42  ;;  %v2404_v59 = vrot.slane %v10968_v6, 1 }
 0x227   : > { %17572 = vst [vmem:[#allocation229_spill] sm:$0xff] %v10958_v46  ;;  %v8318_v46 = vpack.i.bf16 %v10954_v53, %v10951_v31  ;;  %17576 = vst [vmem:[#allocation233_spill] sm:$0xff] %v10986_v26  ;;  %v10994_v28 = vsel %vm1167_vm4, %v2400_v15, %v2401_v43 }
 0x228   : > { %v10956_v33 = vpop.permute.xlu1 %8019  ;;  %8309 = vrot.lane.b32.xlu0 %v10603_v17, %s8819_s10  ;;  %v10983_v55 = vsel %vm1167_vm4, %v2391_v13, %v2392_v36  ;;  %v10991_v17 = vsel %vm1167_vm4, %v2397_v2, %v2398_v45  ;;  %17578 = vst [vmem:[#allocation235_spill] sm:$0xff] %v10994_v28 }
 0x229   : > { %17571 = vst [vmem:[#allocation228_spill] sm:$0xff] %v10956_v33  ;;  %v10974_v33 = vld [vmem:[#allocation3 + $0x2f8] sm:$0x3]  ;;  %17575 = vst [vmem:[#allocation232_spill] sm:$0xff] %v10983_v55  ;;  %v8323_v2 = vpack.i.bf16 %v10986_v26, %v10983_v55  ;;  %v8328_v36 = vpack.i.bf16 %v10994_v28, %v10991_v17 }
 0x22a   : > { %8304 = vrot.lane.b32.xlu1 %v10502_v3, %s8819_s10  ;;  %v10980_v37 = vpop.permute.xlu0 %8024  ;;  %v2403_v3 = vrot.slane %v10887_v35, 1  ;;  %17577 = vst [vmem:[#allocation234_spill] sm:$0xff] %v10991_v17 }
 0x22b   : > { %17574 = vst [vmem:[#allocation231_spill] sm:$0xff] %v10980_v37  ;;  %v2407_v37 = vrot.slane %v10974_v33, 1 }
 0x22c   : > { %v10978_v48 = vpop.permute.xlu1 %8039  ;;  %8319 = vrot.lane.b32.xlu0 %v8318_v46, %s8819_s10  ;;  %v11010_v22 = vsel %vm1167_vm4, %v2403_v3, %v2404_v59 }
 0x22d   : > { %17573 = vst [vmem:[#allocation230_spill] sm:$0xff] %v10978_v48  ;;  %v2406_v48 = vrot.slane %v10889_v10, 1  ;;  %17581 = vst [vmem:[#allocation238_spill] sm:$0xff] %v11010_v22 }
 0x22e   : > { %8314 = vrot.lane.b32.xlu1 %v10681_v18, %s8819_s10  ;;  %v11003_v42 = vpop.permute.xlu0 %8029 }
 0x22f   : > { %17580 = vst [vmem:[#allocation237_spill] sm:$0xff] %v11003_v42  ;;  %v11013_v45 = vsel %vm1167_vm4, %v2406_v48, %v2407_v37 }
 0x230   : > { %v11001_v13 = vpop.permute.xlu1 %8044  ;;  %17582 = vst [vmem:[#allocation239_spill] sm:$0xff] %v11013_v45  ;;  %8329 = vrot.lane.b32.xlu0 %v8328_v36, %s8819_s10  ;;  %v8333_v15 = vpack.i.bf16 %v11013_v45, %v11010_v22  ;;  %v2413_v36 = vrot.slane %v10924_v21, 2  ;;  %v2421_v21 = vrot.slane %v10872_v39, 2 }
 0x231   : > { %17579 = vst [vmem:[#allocation236_spill] sm:$0xff] %v11001_v13  ;;  %v2422_v13 = vrot.slane %v10946_v7, 2 }
 0x232   : > { %8324 = vrot.lane.b32.xlu1 %v8323_v2, %s8819_s10  ;;  %v11019_v46 = vpop.permute.xlu0 %8034  ;;  %v2409_v2 = vrot.slane %v10854_v20, 2  ;;  %v2418_v20 = vrot.slane %v10870_v30, 2 }
 0x233   : > { %17584 = vst [vmem:[#allocation241_spill] sm:$0xff] %v11019_v46 }
 0x234   : > { %v11017_v18 = vpop.permute.xlu1 %8069  ;;  %8339 = vrot.lane.b32.xlu0 %v9915_v58, %s8820_s11 }
 0x235   : > { %17583 = vst [vmem:[#allocation240_spill] sm:$0xff] %v11017_v18 }
 0x236   : > { %8334 = vrot.lane.b32.xlu1 %v8333_v15, %s8819_s10  ;;  %v11028_v37 = vpop.permute.xlu0 %8049 }
 0x237   : > { %17586 = vst [vmem:[#allocation243_spill] sm:$0xff] %v11028_v37 }
 0x238   : > { %v11026_v59 = vpop.permute.xlu1 %8074  ;;  %8349 = vrot.lane.b32.xlu0 %v10059_v60, %s8820_s11 }
 0x239   : > { %17585 = vst [vmem:[#allocation242_spill] sm:$0xff] %v11026_v59  ;;  %v17644_v59 = vld [vmem:[#allocation152_spill] sm:$0xff] }
 0x23a   : > { %8344 = vrot.lane.b32.xlu1 %v9935_v63, %s8820_s11  ;;  %v11036_v43 = vpop.permute.xlu0 %8054 }
 0x23b   : > { %17588 = vst [vmem:[#allocation245_spill] sm:$0xff] %v11036_v43  ;;  %v17649_v43 = vld [vmem:[#allocation49_spill] sm:$0xff] }
 0x23c   : > { %v11034_v48 = vpop.permute.xlu1 %8079  ;;  %8359 = vrot.lane.b32.xlu0 %v10200_v40, %s8820_s11  ;;  %v2412_v40 = vrot.slane %v10856_v52, 2 }
 0x23d   : > { %17587 = vst [vmem:[#allocation244_spill] sm:$0xff] %v11034_v48  ;;  %v2425_v48 = vrot.slane %v10948_v27, 2  ;;  %v11097_v27 = vsel %vm1468_vm5, %v2421_v21, %v2422_v13 }
 0x23e   : > { %8354 = vrot.lane.b32.xlu1 %v10118_v32, %s8820_s11  ;;  %v11044_v3 = vpop.permute.xlu0 %8059  ;;  %v2410_v32 = vrot.slane %v10922_v4, 2  ;;  %v2419_v4 = vrot.slane %v10940_v51, 2  ;;  %17601 = vst [vmem:[#allocation258_spill] sm:$0xff] %v11097_v27 }
 0x23f   : > { %17590 = vst [vmem:[#allocation247_spill] sm:$0xff] %v11044_v3 }
 0x240   : > { %v11042_v58 = vpop.permute.xlu1 %8089  ;;  %8369 = vrot.lane.b32.xlu0 %v10353_v16, %s8820_s11  ;;  %v2416_v16 = vrot.slane %v10938_v5, 2  ;;  %v2424_v5 = vrot.slane %v10874_v12, 2 }
 0x241   : > { %17589 = vst [vmem:[#allocation246_spill] sm:$0xff] %v11042_v58 }
 0x242   : > { %8364 = vrot.lane.b32.xlu1 %v10217_v34, %s8820_s11  ;;  %v11052_v60 = vpop.permute.xlu0 %8064  ;;  %v2415_v34 = vrot.slane %v10868_v24, 2 }
 0x243   : > { %17592 = vst [vmem:[#allocation249_spill] sm:$0xff] %v11052_v60  ;;  %v8568_v60 = vpack.i.bf16 %v11010_v22, %v10994_v28 }
 0x244   : > { %v11050_v63 = vpop.permute.xlu1 %8094  ;;  %8379 = vrot.lane.b32.xlu0 %v10506_v25, %s8820_s11  ;;  %v11076_v25 = vsel %vm1468_vm5, %v2412_v40, %v2413_v36  ;;  %v11085_v51 = vsel %vm1468_vm5, %v2415_v34, %v2416_v16  ;;  %v11094_v40 = vsel %vm1468_vm5, %v2418_v20, %v2419_v4  ;;  %v2428_v36 = vrot.slane %v10968_v6, 2 }
 0x245   : > { %17591 = vst [vmem:[#allocation248_spill] sm:$0xff] %v11050_v63  ;;  %17596 = vst [vmem:[#allocation253_spill] sm:$0xff] %v11076_v25  ;;  %v2430_v34 = vrot.slane %v10889_v10, 2  ;;  %v2431_v16 = vrot.slane %v10974_v33, 2  ;;  %v8403_v4 = vpack.i.bf16 %v11094_v40, %v11085_v51 }
 0x246   : > { %8374 = vrot.lane.b32.xlu1 %v10412_v49, %s8820_s11  ;;  %v11066_v58 = vpop.permute.xlu0 %8084  ;;  %v11073_v49 = vsel %vm1468_vm5, %v2409_v2, %v2410_v32  ;;  %17597 = vst [vmem:[#allocation254_spill] sm:$0xff] %v11085_v51  ;;  %17600 = vst [vmem:[#allocation257_spill] sm:$0xff] %v11094_v40 }
 0x247   : > { %17594 = vst [vmem:[#allocation251_spill] sm:$0xff] %v11066_v58  ;;  %17595 = vst [vmem:[#allocation252_spill] sm:$0xff] %v11073_v49  ;;  %v8398_v32 = vpack.i.bf16 %v11076_v25, %v11073_v49  ;;  %v11121_v33 = vsel %vm1468_vm5, %v2430_v34, %v2431_v16  ;;  %v8423_v34 = vpack.i.bf16 %v10813_v29, %v10809_v11  ;;  %v8669_v11 = vld [vmem:[#allocation3 + $0x170] sm:$0xff] }
 0x248   : > { %v11064_v15 = vpop.permute.xlu1 %8099  ;;  %8389 = vrot.lane.b32.xlu0 %v10644_v54, %s8820_s11  ;;  %v11101_v54 = vsel %vm1468_vm5, %v2424_v5, %v2425_v48  ;;  %17606 = vst [vmem:[#allocation263_spill] sm:$0xff] %v11121_v33  ;;  %v8428_v16 = vpack.i.bf16 %v10825_v38, %v10815_v41  ;;  %v8670_v38 = vld [vmem:[#allocation3 + $0x180] sm:$0xff] }
 0x249   : > { %17593 = vst [vmem:[#allocation250_spill] sm:$0xff] %v11064_v15  ;;  %17602 = vst [vmem:[#allocation259_spill] sm:$0xff] %v11101_v54  ;;  %v8408_v48 = vpack.i.bf16 %v11101_v54, %v11097_v27 }
 0x24a   : > { %8384 = vrot.lane.b32.xlu1 %v10525_v23, %s8820_s11  ;;  %v11089_v2 = vpop.permute.xlu0 %8114  ;;  %v2427_v23 = vrot.slane %v10887_v35, 2 }
 0x24b   : > { %17599 = vst [vmem:[#allocation256_spill] sm:$0xff] %v11089_v2 }
 0x24c   : > { %v11087_v7 = vpop.permute.xlu1 %8104  ;;  %8399 = vrot.lane.b32.xlu0 %v8398_v32, %s8820_s11  ;;  %v11118_v6 = vsel %vm1468_vm5, %v2427_v23, %v2428_v36  ;;  %v8418_v32 = vpack.i.bf16 %v10807_v56, %v10798_v0 }
 0x24d   : > { %17598 = vst [vmem:[#allocation255_spill] sm:$0xff] %v11087_v7  ;;  %17605 = vst [vmem:[#allocation262_spill] sm:$0xff] %v11118_v6  ;;  %v8413_v5 = vpack.i.bf16 %v11121_v33, %v11118_v6  ;;  %v8672_v7 = vld [vmem:[#allocation3 + $0x1a0] sm:$0xff] }
 0x24e   : > { %8394 = vrot.lane.b32.xlu1 %v10700_v19, %s8820_s11  ;;  %v11111_v13 = vpop.permute.xlu0 %8119 }
 0x24f   : > { %17604 = vst [vmem:[#allocation261_spill] sm:$0xff] %v11111_v13 }
 0x250   : > { %v11109_v20 = vpop.permute.xlu1 %8109  ;;  %8409 = vrot.lane.b32.xlu0 %v8408_v48, %s8820_s11 }
 0x251   : > { %17603 = vst [vmem:[#allocation260_spill] sm:$0xff] %v11109_v20 }
 0x252   : > { %8404 = vrot.lane.b32.xlu1 %v8403_v4, %s8820_s11  ;;  %v11127_v21 = vpop.permute.xlu0 %8129  ;;  %v8666_v4 = vld [vmem:[#allocation3 + $0x120] sm:$0xff] }
 0x253   : > { %17608 = vst [vmem:[#allocation265_spill] sm:$0xff] %v11127_v21  ;;  %v8433_v48 = vpack.i.bf16 %v8666_v4, %v10827_v57 }
 0x254   : > { %v11125_v19 = vpop.permute.xlu1 %8124  ;;  %8419 = vrot.lane.b32.xlu0 %v8418_v32, %s8821_s12  ;;  %v8668_v32 = vld [vmem:[#allocation3 + $0x160] sm:$0xff] }
 0x255   : > { %17607 = vst [vmem:[#allocation264_spill] sm:$0xff] %v11125_v19 }
 0x256   : > { %8414 = vrot.lane.b32.xlu1 %v8413_v5, %s8820_s11  ;;  %v11137_v36 = vpop.permute.xlu0 %8139  ;;  %v8667_v5 = vld [vmem:[#allocation3 + $0x150] sm:$0xff]  ;;  %s8834_s11 = smov 4  }
 0x257   : > { %17610 = vst [vmem:[#allocation267_spill] sm:$0xff] %v11137_v36  ;;  %v8438_v20 = vpack.i.bf16 %v8668_v32, %v8667_v5 }
 0x258   : > { %v11135_v23 = vpop.permute.xlu1 %8134  ;;  %8429 = vrot.lane.b32.xlu0 %v8428_v16, %s8821_s12  ;;  %v8671_v16 = vld [vmem:[#allocation3 + $0x190] sm:$0xff] }
 0x259   : > { %17609 = vst [vmem:[#allocation266_spill] sm:$0xff] %v11135_v23  ;;  %v8448_v15 = vpack.i.bf16 %v8672_v7, %v8671_v16  ;;  %v11190_v16 = vld [vmem:[#allocation3 + $0x300] sm:$0xff] }
 0x25a   : > { %8424 = vrot.lane.b32.xlu1 %v8423_v34, %s8821_s12  ;;  %v11147_v56 = vpop.permute.xlu0 %8149  ;;  %v8443_v34 = vpack.i.bf16 %v8670_v38, %v8669_v11  ;;  %v8478_v38 = vpack.i.bf16 %v10868_v24, %v10856_v52  ;;  %v8493_v52 = vpack.i.bf16 %v11190_v16, %v10889_v10  ;;  %v17632_v10 = vld [vmem:[#allocation76_spill] sm:$0xff] }
 0x25b   : > { %17612 = vst [vmem:[#allocation269_spill] sm:$0xff] %v11147_v56 }
 0x25c   : > { %v11145_v0 = vpop.permute.xlu1 %8144  ;;  %8439 = vrot.lane.b32.xlu0 %v8438_v20, %s8821_s12  ;;  %v8674_v20 = vld [vmem:[#allocation3 + $0x1b0] sm:$0xff] }
 0x25d   : > { %17611 = vst [vmem:[#allocation268_spill] sm:$0xff] %v11145_v0 }
 0x25e   : > { %8434 = vrot.lane.b32.xlu1 %v8433_v48, %s8821_s12  ;;  %v11154_v41 = vpop.permute.xlu0 %8159  ;;  %v8673_v48 = vld [vmem:[#allocation3 + $0x1c0] sm:$0xff] }
 0x25f   : > { %17614 = vst [vmem:[#allocation271_spill] sm:$0xff] %v11154_v41  ;;  %v8453_v5 = vpack.i.bf16 %v8673_v48, %v8674_v20  ;;  %v17629_v48 = vld [vmem:[#allocation67_spill] sm:$0xff]  ;;  %v17654_v41 = vld [vmem:[#allocation101_spill] sm:$0xff] }
 0x260   : > { %v11152_v29 = vpop.permute.xlu1 %8154  ;;  %8449 = vrot.lane.b32.xlu0 %v8448_v15, %s8821_s12 }
 0x261   : > { %17613 = vst [vmem:[#allocation270_spill] sm:$0xff] %v11152_v29 }
 0x262   : > { %8444 = vrot.lane.b32.xlu1 %v8443_v34, %s8821_s12  ;;  %v11160_v4 = vpop.permute.xlu0 %8169 }
 0x263   : > { %17616 = vst [vmem:[#allocation273_spill] sm:$0xff] %v11160_v4 }
 0x264   : > { %v11158_v57 = vpop.permute.xlu1 %8164  ;;  %8459 = vrot.lane.b32.xlu0 %v10451_v9, %s8821_s12 }
 0x265   : > { %17615 = vst [vmem:[#allocation272_spill] sm:$0xff] %v11158_v57  ;;  %v17653_v57 = vld [vmem:[#allocation98_spill] sm:$0xff] }
 0x266   : > { %8454 = vrot.lane.b32.xlu1 %v8453_v5, %s8821_s12  ;;  %v11167_v11 = vpop.permute.xlu0 %8179 }
 0x267   : > { %17618 = vst [vmem:[#allocation275_spill] sm:$0xff] %v11167_v11  ;;  %v17660_v11 = vld [vmem:[#allocation157_spill] sm:$0xff] }
 0x268   : > { %v11165_v32 = vpop.permute.xlu1 %8174  ;;  %8469 = vrot.lane.b32.xlu0 %v10605_v8, %s8821_s12  ;;  %v8488_v8 = vpack.i.bf16 %v10887_v35, %v10874_v12 }
 0x269   : > { %17617 = vst [vmem:[#allocation274_spill] sm:$0xff] %v11165_v32  ;;  %v17640_v32 = vld [vmem:[#allocation127_spill] sm:$0xff] }
 0x26a   : > { %8464 = vrot.lane.b32.xlu1 %v10470_v47, %s8821_s12  ;;  %v11175_v7 = vpop.permute.xlu0 %8189  ;;  %v8483_v47 = vpack.i.bf16 %v10872_v39, %v10870_v30  ;;  %v17625_v39 = vld [vmem:[#allocation45_spill] sm:$0xff]  ;;  %v17628_v30 = vld [vmem:[#allocation48_spill] sm:$0xff] }
 0x26b   : > { %17620 = vst [vmem:[#allocation277_spill] sm:$0xff] %v11175_v7 }
 0x26c   : > { %v11173_v15 = vpop.permute.xlu1 %8184  ;;  %8479 = vrot.lane.b32.xlu0 %v8478_v38, %s8821_s12  ;;  %v17633_v38 = vld [vmem:[#allocation93_spill] sm:$0xff] }
 0x26d   : > { %17619 = vst [vmem:[#allocation276_spill] sm:$0xff] %v11173_v15 }
 0x26e   : > { %8474 = vrot.lane.b32.xlu1 %v10640_v62, %s8821_s12  ;;  %v11184_v34 = vpop.permute.xlu0 %8199 }
 0x26f   : > { %17622 = vst [vmem:[#allocation279_spill] sm:$0xff] %v11184_v34  ;;  %v17661_v34 = vunpack.i.l.bf16 %v11173_v15 }
 0x270   : > { %v11182_v9 = vpop.permute.xlu1 %8194  ;;  %8489 = vrot.lane.b32.xlu0 %v8488_v8, %s8821_s12 }
 0x271   : > { %17621 = vst [vmem:[#allocation278_spill] sm:$0xff] %v11182_v9 }
 0x272   : > { %8484 = vrot.lane.b32.xlu1 %v8483_v47, %s8821_s12  ;;  %v11196_v62 = vpop.permute.xlu0 %8209 }
 0x273   : > { %17624 = vst [vmem:[#allocation281_spill] sm:$0xff] %v11196_v62 }
 0x274   : > { %v11194_v24 = vpop.permute.xlu1 %8204  ;;  %8499 = vrot.lane.b32.xlu0 %v17625_v39, %s8822_s13  ;;  %v17637_v39 = vld [vmem:[#allocation116_spill] sm:$0xff] }
 0x275   : > { %17623 = vst [vmem:[#allocation280_spill] sm:$0xff] %v11194_v24 }
 0x276   : > { %8494 = vrot.lane.b32.xlu1 %v8493_v52, %s8821_s12  ;;  %v11205_v35 = vpop.permute.xlu0 %8219  ;;  %v17636_v52 = vld [vmem:[#allocation97_spill] sm:$0xff] }
 0x277   : > { %17627 = vst [vmem:[#allocation282_spill] sm:$0xff] %v11205_v35 }
 0x278   : > { %v11203_v12 = vpop.permute.xlu1 %8214  ;;  %8509 = vrot.lane.b32.xlu0 %v17629_v48, %s8822_s13 }
 0x279   : > { %17626 = vst [vmem:[#allocation45_spill] sm:$0xff] %v11203_v12 }
 0x27a   : > { %8504 = vrot.lane.b32.xlu1 %v17628_v30, %s8822_s13  ;;  %v11213_v5 = vpop.permute.xlu0 %8229 }
 0x27b   : > { %17631 = vst [vmem:[#allocation67_spill] sm:$0xff] %v11213_v5 }
 0x27c   : > { %v11211_v20 = vpop.permute.xlu1 %8224  ;;  %8519 = vrot.lane.b32.xlu0 %v17633_v38, %s8822_s13 }
 0x27d   : > { %17630 = vst [vmem:[#allocation48_spill] sm:$0xff] %v11211_v20 }
 0x27e   : > { %8514 = vrot.lane.b32.xlu1 %v17632_v10, %s8822_s13  ;;  %v11221_v8 = vpop.permute.xlu0 %8239  ;;  %v17641_v10 = vld [vmem:[#allocation148_spill] sm:$0xff] }
 0x27f   : > { %17635 = vst [vmem:[#allocation93_spill] sm:$0xff] %v11221_v8 }
 0x280   : > { %v11219_v47 = vpop.permute.xlu1 %8234  ;;  %8529 = vrot.lane.b32.xlu0 %v17637_v39, %s8822_s13 }
 0x281   : > { %17634 = vst [vmem:[#allocation76_spill] sm:$0xff] %v11219_v47 }
 0x282   : > { %8524 = vrot.lane.b32.xlu1 %v17636_v52, %s8822_s13  ;;  %v11229_v48 = vpop.permute.xlu0 %8249  ;;  %v2026_v52 = vld [vmem:[#allocation3 + $0x308] sm:$0x3] }
 0x283   : > { %17639 = vst [vmem:[#allocation116_spill] sm:$0xff] %v11229_v48  ;;  %v2436_v2 = vrot.slane %v2026_v52, 1  ;;  %v2439_v29 = vrot.slane %v2026_v52, 2  ;;  %v8643_v52 = vpack.i.bf16 %v11097_v27, %v11094_v40 }
 0x284   : > { %v11227_v30 = vpop.permute.xlu1 %8244  ;;  %8539 = vrot.lane.b32.xlu0 %v17641_v10, %s8822_s13  ;;  %v2435_v10 = vrot.slane %v11190_v16, 1 }
 0x285   : > { %17638 = vst [vmem:[#allocation97_spill] sm:$0xff] %v11227_v30 }
 0x286   : > { %8534 = vrot.lane.b32.xlu1 %v17640_v32, %s8822_s13  ;;  %v11237_v63 = vpop.permute.xlu0 %8259  ;;  %v8558_v32 = vpack.i.bf16 %v10983_v55, %v10954_v53  ;;  %v11262_v46 = vsel %vm1167_vm4, %v2435_v10, %v2436_v2  ;;  %v17650_v10 = vld [vmem:[#allocation53_spill] sm:$0xff] }
 0x287   : > { %17643 = vst [vmem:[#allocation148_spill] sm:$0xff] %v11237_v63  ;;  %17647 = vst [vmem:[#allocation284_spill] sm:$0xff] %v11262_v46  ;;  %v8573_v3 = vpack.i.bf16 %v11262_v46, %v11013_v45 }
 0x288   : > { %v11235_v38 = vpop.permute.xlu1 %8254  ;;  %8549 = vrot.lane.b32.xlu0 %v10664_v50, %s8822_s13  ;;  %v8563_v50 = vpack.i.bf16 %v10991_v17, %v10986_v26 }
 0x289   : > { %17642 = vst [vmem:[#allocation127_spill] sm:$0xff] %v11235_v38 }
 0x28a   : > { %8544 = vrot.lane.b32.xlu1 %v17644_v59, %s8822_s13  ;;  %v11245_v4 = vpop.permute.xlu0 %8269 }
 0x28b   : > { %v8272_v19 = vunpack.i.h.bf16 %v11245_v4 }
 0x28c   : > { %v11243_v39 = vpop.permute.xlu1 %8264  ;;  %8559 = vrot.lane.b32.xlu0 %v8558_v32, %s8822_s13 }
 0x28d   : > { %v8267_v21 = vunpack.i.h.bf16 %v11243_v39 }
 0x28e   : > { %8554 = vrot.lane.b32.xlu1 %v10714_v61, %s8822_s13  ;;  %v11255_v58 = vpop.permute.xlu0 %8279 }
 0x28f   : > { %17646 = vst [vmem:[#allocation283_spill] sm:$0xff] %v11255_v58 }
 0x290   : > { %v11253_v59 = vpop.permute.xlu1 %8274  ;;  %8569 = vrot.lane.b32.xlu0 %v8568_v60, %s8822_s13  ;;  %v17651_v60 = vld [vmem:[#allocation71_spill] sm:$0xff] }
 0x291   : > { %17645 = vst [vmem:[#allocation152_spill] sm:$0xff] %v11253_v59 }
 0x292   : > { %8564 = vrot.lane.b32.xlu1 %v8563_v50, %s8822_s13  ;;  %v11268_v32 = vpop.permute.xlu0 %8289 }
 0x294   : > { %v11266_v61 = vpop.permute.xlu1 %8284  ;;  %8579 = vrot.lane.b32.xlu0 %v17649_v43, %s8823_s15 }
 0x295   : > { %17648 = vst [vmem:[#allocation285_spill] sm:$0xff] %v11266_v61 }
 0x296   : > { %8574 = vrot.lane.b32.xlu1 %v8573_v3, %s8822_s13  ;;  %v11277_v2 = vpop.permute.xlu0 %8299  ;;  %v17652_v3 = vld [vmem:[#allocation79_spill] sm:$0xff] }
 0x298   : > { %v11275_v37 = vpop.permute.xlu1 %8294  ;;  %8589 = vrot.lane.b32.xlu0 %v17651_v60, %s8823_s15  ;;  %v2438_v60 = vrot.slane %v11190_v16, 2  ;;  %v8638_v16 = vpack.i.bf16 %v11085_v51, %v11076_v25 }
 0x29a   : > { %8584 = vrot.lane.b32.xlu1 %v17650_v10, %s8823_s15  ;;  %v11285_v42 = vpop.permute.xlu0 %8309  ;;  %v17655_v10 = vld [vmem:[#allocation121_spill] sm:$0xff]  ;;  %v11309_v36 = vsel %vm1468_vm5, %v2438_v60, %v2439_v29  ;;  %v17662_v29 = vunpack.i.h.bf16 %v11173_v15 }
 0x29b   : > { %17658 = vst [vmem:[#allocation49_spill] sm:$0xff] %v11309_v36 }
 0x29c   : > { %v11283_v50 = vpop.permute.xlu1 %8304  ;;  %8599 = vrot.lane.b32.xlu0 %v17653_v57, %s8823_s15  ;;  %v17657_v57 = vld [vmem:[#allocation153_spill] sm:$0xff]  ;;  %v4302_v60 = vsel %vm4298_vm6, %v17662_v29, %v8267_v21 }
 0x29e   : > { %8594 = vrot.lane.b32.xlu1 %v17652_v3, %s8823_s15  ;;  %v11293_v18 = vpop.permute.xlu0 %8319  ;;  %v17656_v3 = vld [vmem:[#allocation131_spill] sm:$0xff] }
 0x2a0   : > { %v11291_v43 = vpop.permute.xlu1 %8314  ;;  %8609 = vrot.lane.b32.xlu0 %v17655_v10, %s8823_s15 }
 0x2a2   : > { %8604 = vrot.lane.b32.xlu1 %v17654_v41, %s8823_s15  ;;  %v11302_v0 = vpop.permute.xlu0 %8329  ;;  %v8266_v41 = vunpack.i.l.bf16 %v11243_v39  ;;  %v17663_v39 = vunpack.i.l.bf16 %v11175_v7 }
 0x2a4   : > { %v11300_v56 = vpop.permute.xlu1 %8324  ;;  %8619 = vrot.lane.b32.xlu0 %v17657_v57, %s8823_s15 }
 0x2a6   : > { %8614 = vrot.lane.b32.xlu1 %v17656_v3, %s8823_s15  ;;  %v11314_v10 = vpop.permute.xlu0 %8339  ;;  %v8648_v3 = vpack.i.bf16 %v11118_v6, %v11101_v54 }
 0x2a7   : > { %17659 = vst [vmem:[#allocation53_spill] sm:$0xff] %v11314_v10  ;;  %v8271_v10 = vunpack.i.l.bf16 %v11245_v4  ;;  %v17664_v4 = vunpack.i.h.bf16 %v11175_v7  ;;  %v8301_v7 = vunpack.i.l.bf16 %v11277_v2 }
 0x2a8   : > { %v11312_v23 = vpop.permute.xlu1 %8334  ;;  %8629 = vrot.lane.b32.xlu0 %v10685_v1, %s8823_s15 }
 0x2a9   : > { %v4303_v13 = vsel %vm4298_vm6, %v17663_v39, %v8271_v10  ;;  %v4304_v53 = vsel %vm4298_vm6, %v17664_v4, %v8272_v19 }
 0x2aa   : > { %8624 = vrot.lane.b32.xlu1 %v17660_v11, %s8823_s15  ;;  %v4301_v11 = vsel %vm4298_vm6, %v17661_v34, %v8266_v41  ;;  %v8350_v1 = vpop.permute.xlu0 %8349  ;;  %v8276_v34 = vunpack.i.l.bf16 %v11253_v59  ;;  %v17708_v59 = vld [vmem:[#allocation139_spill] sm:$0xff] }
 0x2ab   : > { %v8352_v49 = vunpack.i.h.bf16 %v8350_v1  ;;  %v8351_v63 = vunpack.i.l.bf16 %v8350_v1  ;;  %v8291_v1 = vunpack.i.l.bf16 %v11268_v32 }
 0x2ac   : > { %v8345_v58 = vpop.permute.xlu1 %8344  ;;  %8639 = vrot.lane.b32.xlu0 %v8638_v16, %s8823_s15 }
 0x2ad   : > { %v8347_v25 = vunpack.i.h.bf16 %v8345_v58  ;;  %v8346_v57 = vunpack.i.l.bf16 %v8345_v58  ;;  %v11363_v41 = vsel %vm17322_vm7, %v4303_v13, %v8351_v63  ;;  %v11366_v10 = vsel %vm17322_vm7, %v4304_v53, %v8352_v49 }
 0x2ae   : > { %8634 = vrot.lane.b32.xlu1 %v10729_v44, %s8823_s15  ;;  %v8287_v13 = vunpack.i.h.bf16 %v11266_v61  ;;  %v17669_v63 = vunpack.i.h.bf16 %v11194_v24  ;;  %v17706_v61 = vld [vmem:[#allocation110_spill] sm:$0xff] }
 0x2af   : > { %v11357_v58 = vsel %vm17322_vm7, %v4301_v11, %v8346_v57  ;;  %v11360_v21 = vsel %vm17322_vm7, %v4302_v60, %v8347_v25  ;;  %v11374_v57 = vpop.permute.xlu0 %8359  ;;  %v17667_v60 = vunpack.i.l.bf16 %v11182_v9  ;;  %v8292_v11 = vunpack.i.h.bf16 %v11268_v32 }
 0x2b0   : > { %v11372_v39 = vpop.permute.xlu1 %8354  ;;  %17666 = vst [vmem:[#allocation79_spill] sm:$0xff] %v11374_v57  ;;  %8649 = vrot.lane.b32.xlu0 %v8648_v3, %s8823_s15  ;;  %v8296_v32 = vunpack.i.l.bf16 %v11275_v37  ;;  %v4310_v16 = vsel %vm4298_vm6, %v17669_v63, %v8287_v13  ;;  %v17672_v63 = vpack.i.bf16 %v11309_v36, %v11121_v33  ;;  %v17673_v13 = vld [vmem:[#allocation40_spill] sm:$0xff] }
 0x2b1   : > { %17665 = vst [vmem:[#allocation71_spill] sm:$0xff] %v11372_v39  ;;  %v8356_v53 = vunpack.i.l.bf16 %v11372_v39  ;;  %v4305_v4 = vsel %vm4298_vm6, %v17667_v60, %v8276_v34  ;;  %v8297_v60 = vunpack.i.h.bf16 %v11275_v37  ;;  %v17671_v34 = vunpack.i.h.bf16 %v11196_v62 }
 0x2b2   : > { %8644 = vrot.lane.b32.xlu1 %v8643_v52, %s8823_s15  ;;  %v8302_v37 = vunpack.i.h.bf16 %v11277_v2  ;;  %v17674_v2 = vunpack.i.l.bf16 %v11203_v12 }
 0x2b3   : > { %v11392_v49 = vsel %vm17322_vm7, %v4305_v4, %v8356_v53  ;;  %v8370_v3 = vpop.permute.xlu0 %8369  ;;  %v17670_v4 = vunpack.i.l.bf16 %v11196_v62  ;;  %v4312_v19 = vsel %vm4298_vm6, %v17671_v34, %v8292_v11 }
 0x2b4   : > { %v11398_v52 = vpop.permute.xlu1 %8364  ;;  %v8372_v44 = vunpack.i.h.bf16 %v8370_v3  ;;  %v8371_v53 = vunpack.i.l.bf16 %v8370_v3  ;;  %4463 = vrot.lane.b32.xlu0 %v17673_v13, %s8824_s16  ;;  %v8307_v13 = vunpack.i.h.bf16 %v11283_v50  ;;  %v8306_v3 = vunpack.i.l.bf16 %v11283_v50  ;;  %v17678_v50 = vld [vmem:[#allocation39_spill] sm:$0xff] }
 0x2b5   : > { %17668 = vst [vmem:[#allocation98_spill] sm:$0xff] %v11398_v52  ;;  %v8367_v25 = vunpack.i.h.bf16 %v11398_v52  ;;  %v4311_v29 = vsel %vm4298_vm6, %v17670_v4, %v8291_v1  ;;  %v4313_v4 = vsel %vm4298_vm6, %v17674_v2, %v8296_v32  ;;  %v17677_v32 = vunpack.i.h.bf16 %v11205_v35 }
 0x2b6   : > { %8654 = vrot.lane.b32.xlu1 %v17672_v63, %s8823_s15  ;;  %v11423_v11 = vsel %vm17322_vm7, %v4311_v29, %v8371_v53  ;;  %v11426_v34 = vsel %vm17322_vm7, %v4312_v19, %v8372_v44  ;;  %v17675_v63 = vunpack.i.h.bf16 %v11203_v12  ;;  %v17676_v19 = vunpack.i.l.bf16 %v11205_v35  ;;  %v17679_v12 = vld [vmem:[#allocation46_spill] sm:$0xff] }
 0x2b7   : > { %v11420_v1 = vsel %vm17322_vm7, %v4310_v16, %v8367_v25  ;;  %v8380_v25 = vpop.permute.xlu0 %8379  ;;  %v4316_v2 = vsel %vm4298_vm6, %v17677_v32, %v8302_v37  ;;  %v17681_v32 = vunpack.i.h.bf16 %v11211_v20 }
 0x2b8   : > { %v4314_v62 = vsel %vm4298_vm6, %v17675_v63, %v8297_v60  ;;  %v8375_v16 = vpop.permute.xlu1 %8374  ;;  %v8382_v53 = vunpack.i.h.bf16 %v8380_v25  ;;  %v8381_v24 = vunpack.i.l.bf16 %v8380_v25  ;;  %v4315_v44 = vsel %vm4298_vm6, %v17676_v19, %v8301_v7  ;;  %4467 = vrot.lane.b32.xlu0 %v17679_v12, %s8824_s16 }
 0x2b9   : > { %v8377_v15 = vunpack.i.h.bf16 %v8375_v16  ;;  %v8376_v29 = vunpack.i.l.bf16 %v8375_v16  ;;  %v8312_v60 = vunpack.i.h.bf16 %v11285_v42  ;;  %v8311_v63 = vunpack.i.l.bf16 %v11285_v42 }
 0x2ba   : > { %4465 = vrot.lane.b32.xlu1 %v17678_v50, %s8824_s16  ;;  %v11455_v7 = vsel %vm17322_vm7, %v4315_v44, %v8381_v24  ;;  %v11458_v37 = vsel %vm17322_vm7, %v4316_v2, %v8382_v53  ;;  %v17680_v42 = vunpack.i.l.bf16 %v11211_v20  ;;  %v4318_v12 = vsel %vm4298_vm6, %v17681_v32, %v8307_v13  ;;  %v17685_v20 = vld [vmem:[#allocation64_spill] sm:$0xff] }
 0x2bb   : > { %v11449_v16 = vsel %vm17322_vm7, %v4313_v4, %v8376_v29  ;;  %v11452_v25 = vsel %vm17322_vm7, %v4314_v62, %v8377_v15  ;;  %v8317_v4 = vunpack.i.h.bf16 %v11291_v43  ;;  %v8316_v29 = vunpack.i.l.bf16 %v11291_v43  ;;  %v8390_v62 = vpop.permute.xlu0 %8389  ;;  %v17684_v43 = vld [vmem:[#allocation56_spill] sm:$0xff] }
 0x2bc   : > { %v4317_v19 = vsel %vm4298_vm6, %v17680_v42, %v8306_v3  ;;  %v8385_v15 = vpop.permute.xlu1 %8384  ;;  %v8392_v44 = vunpack.i.h.bf16 %v8390_v62  ;;  %v8391_v35 = vunpack.i.l.bf16 %v8390_v62  ;;  %v17682_v53 = vunpack.i.l.bf16 %v11213_v5  ;;  %4471 = vrot.lane.b32.xlu0 %v17685_v20, %s8824_s16 }
 0x2bd   : > { %v8387_v50 = vunpack.i.h.bf16 %v8385_v15  ;;  %v8386_v24 = vunpack.i.l.bf16 %v8385_v15  ;;  %v17683_v3 = vunpack.i.h.bf16 %v11213_v5  ;;  %v8322_v13 = vunpack.i.h.bf16 %v11293_v18 }
 0x2be   : > { %v4319_v2 = vsel %vm4298_vm6, %v17682_v53, %v8311_v63  ;;  %v8321_v32 = vunpack.i.l.bf16 %v11293_v18  ;;  %4469 = vrot.lane.b32.xlu1 %v17684_v43, %s8824_s16  ;;  %v17686_v18 = vunpack.i.l.bf16 %v11219_v47 }
 0x2bf   : > { %v4320_v42 = vsel %vm4298_vm6, %v17683_v3, %v8312_v60  ;;  %v11481_v15 = vsel %vm17322_vm7, %v4317_v19, %v8386_v24  ;;  %v11484_v62 = vsel %vm17322_vm7, %v4318_v12, %v8387_v50  ;;  %v11487_v63 = vsel %vm17322_vm7, %v4319_v2, %v8391_v35  ;;  %v8400_v50 = vpop.permute.xlu0 %8399 }
 0x2c0   : > { %v11490_v60 = vsel %vm17322_vm7, %v4320_v42, %v8392_v44  ;;  %v4321_v53 = vsel %vm4298_vm6, %v17686_v18, %v8316_v29  ;;  %v17687_v3 = vunpack.i.h.bf16 %v11219_v47  ;;  %v8327_v19 = vunpack.i.h.bf16 %v11300_v56  ;;  %v8395_v12 = vpop.permute.xlu1 %8394  ;;  %v17691_v47 = vld [vmem:[#allocation63_spill] sm:$0xff] }
 0x2c1   : > { %v8326_v24 = vunpack.i.l.bf16 %v11300_v56  ;;  %v8397_v43 = vunpack.i.h.bf16 %v8395_v12  ;;  %v8396_v35 = vunpack.i.l.bf16 %v8395_v12  ;;  %v8402_v2 = vunpack.i.h.bf16 %v8400_v50  ;;  %v17690_v56 = vld [vmem:[#allocation68_spill] sm:$0xff]  ;;  %4475 = vrot.lane.b32.xlu0 %v17691_v47, %s8824_s16 }
 0x2c2   : > { %v4322_v20 = vsel %vm4298_vm6, %v17687_v3, %v8317_v4  ;;  %v8401_v5 = vunpack.i.l.bf16 %v8400_v50  ;;  %v17688_v44 = vunpack.i.l.bf16 %v11221_v8  ;;  %v17689_v29 = vunpack.i.h.bf16 %v11221_v8  ;;  %4473 = vrot.lane.b32.xlu1 %v17690_v56, %s8824_s16 }
 0x2c3   : > { %v8332_v4 = vunpack.i.h.bf16 %v11302_v0  ;;  %v8331_v3 = vunpack.i.l.bf16 %v11302_v0  ;;  %v11513_v12 = vsel %vm17322_vm7, %v4321_v53, %v8396_v35  ;;  %v11516_v50 = vsel %vm17322_vm7, %v4322_v20, %v8397_v43  ;;  %v8410_v43 = vpop.permute.xlu0 %8409 }
 0x2c4   : > { %v4323_v42 = vsel %vm4298_vm6, %v17688_v44, %v8321_v32  ;;  %v4324_v18 = vsel %vm4298_vm6, %v17689_v29, %v8322_v13  ;;  %v17154_v0 = vunpack.i.h.bf16 %v11229_v48  ;;  %v17155_v44 = vunpack.i.l.bf16 %v11229_v48  ;;  %v8405_v20 = vpop.permute.xlu1 %8404 }
 0x2c5   : > { %v11519_v32 = vsel %vm17322_vm7, %v4323_v42, %v8401_v5  ;;  %v11522_v13 = vsel %vm17322_vm7, %v4324_v18, %v8402_v2  ;;  %v17692_v29 = vunpack.i.l.bf16 %v11227_v30  ;;  %v17693_v53 = vunpack.i.h.bf16 %v11227_v30 }
 0x2c6   : > { %v8407_v56 = vunpack.i.h.bf16 %v8405_v20  ;;  %v8406_v5 = vunpack.i.l.bf16 %v8405_v20  ;;  %v8412_v42 = vunpack.i.h.bf16 %v8410_v43  ;;  %v8411_v8 = vunpack.i.l.bf16 %v8410_v43 }
 0x2c7   : > { %v4325_v47 = vsel %vm4298_vm6, %v17692_v29, %v8326_v24  ;;  %v4326_v35 = vsel %vm4298_vm6, %v17693_v53, %v8327_v19  ;;  %v4327_v2 = vsel %vm4298_vm6, %v17155_v44, %v8331_v3  ;;  %v4328_v18 = vsel %vm4298_vm6, %v17154_v0, %v8332_v4  ;;  %v17694_v19 = vld [vmem:[#allocation62_spill] sm:$0xff]  ;;  %v11558_v44 = vpop.permute.xlu0 %8419 }
 0x2c8   : > { %v8337_v24 = vunpack.i.h.bf16 %v11312_v23  ;;  %v8336_v29 = vunpack.i.l.bf16 %v11312_v23  ;;  %4477 = vrot.lane.b32.xlu1 %v17694_v19, %s8824_s16  ;;  %v17695_v53 = vld [vmem:[#allocation86_spill] sm:$0xff]  ;;  %v11545_v20 = vsel %vm17322_vm7, %v4325_v47, %v8406_v5  ;;  %v11548_v43 = vsel %vm17322_vm7, %v4326_v35, %v8407_v56  ;;  %v8415_v19 = vpop.permute.xlu1 %8414  ;;  %17696 = vst [vmem:[#allocation101_spill] sm:$0xff] %v11558_v44  ;;  %v17697_v35 = vld [vmem:[#allocation87_spill] sm:$0xff]  ;;  %v17707_v44 = vld [vmem:[#allocation136_spill] sm:$0xff] }
 0x2c9   : > { %4479 = vrot.lane.b32.xlu0 %v17695_v53, %s8824_s16  ;;  %v11551_v3 = vsel %vm17322_vm7, %v4327_v2, %v8411_v8  ;;  %v11554_v4 = vsel %vm17322_vm7, %v4328_v18, %v8412_v42  ;;  %v17163_v23 = vunpack.i.h.bf16 %v11235_v38  ;;  %v17160_v0 = vunpack.i.l.bf16 %v11235_v38  ;;  %v17698_v56 = vld [vmem:[#allocation94_spill] sm:$0xff] }
 0x2ca   : > { %v8417_v48 = vunpack.i.h.bf16 %v8415_v19  ;;  %v8416_v30 = vunpack.i.l.bf16 %v8415_v19 }
 0x2cb   : > { %v4329_v47 = vsel %vm4298_vm6, %v17160_v0, %v8336_v29  ;;  %v4330_v8 = vsel %vm4298_vm6, %v17163_v23, %v8337_v24  ;;  %v8430_v18 = vpop.permute.xlu0 %8429  ;;  %v17699_v24 = vld [vmem:[#allocation105_spill] sm:$0xff] }
 0x2cc   : > { %4481 = vrot.lane.b32.xlu1 %v17697_v35, %s8824_s16  ;;  %v11571_v5 = vsel %vm17322_vm7, %v4329_v47, %v8416_v30  ;;  %v11574_v42 = vsel %vm17322_vm7, %v4330_v8, %v8417_v48  ;;  %v8425_v2 = vpop.permute.xlu1 %8424  ;;  %v8432_v0 = vunpack.i.h.bf16 %v8430_v18  ;;  %v8431_v38 = vunpack.i.l.bf16 %v8430_v18  ;;  %v17700_v23 = vld [vmem:[#allocation113_spill] sm:$0xff] }
 0x2cd   : > { %4483 = vrot.lane.b32.xlu0 %v17698_v56, %s8824_s16  ;;  %v8427_v19 = vunpack.i.h.bf16 %v8425_v2  ;;  %v8426_v29 = vunpack.i.l.bf16 %v8425_v2 }
 0x2ce   : > { %v11590_v47 = vsel %vm17338_vm8, %v11363_v41, %v8431_v38  ;;  %v11594_v8 = vsel %vm17338_vm8, %v11366_v10, %v8432_v0 }
 0x2cf   : > { %v11582_v30 = vsel %vm17338_vm8, %v11357_v58, %v8426_v29  ;;  %v11586_v48 = vsel %vm17338_vm8, %v11360_v21, %v8427_v19  ;;  %v11598_v18 = vpop.permute.xlu0 %8439  ;;  %v17703_v58 = vld [vmem:[#allocation117_spill] sm:$0xff]  ;;  %v17704_v21 = vld [vmem:[#allocation112_spill] sm:$0xff] }
 0x2d0   : > { %4485 = vrot.lane.b32.xlu1 %v17699_v24, %s8824_s16  ;;  %v11596_v2 = vpop.permute.xlu1 %8434  ;;  %17702 = vst [vmem:[#allocation131_spill] sm:$0xff] %v11598_v18 }
 0x2d1   : > { %4487 = vrot.lane.b32.xlu0 %v17700_v23, %s8824_s16  ;;  %17701 = vst [vmem:[#allocation121_spill] sm:$0xff] %v11596_v2  ;;  %v8436_v52 = vunpack.i.l.bf16 %v11596_v2 }
 0x2d3   : > { %v11607_v38 = vsel %vm17338_vm8, %v11392_v49, %v8436_v52  ;;  %v8450_v10 = vpop.permute.xlu0 %8449 }
 0x2d4   : > { %4489 = vrot.lane.b32.xlu1 %v17703_v58, %s8824_s16  ;;  %v11609_v41 = vpop.permute.xlu1 %8444  ;;  %v8452_v19 = vunpack.i.h.bf16 %v8450_v10  ;;  %v8451_v29 = vunpack.i.l.bf16 %v8450_v10 }
 0x2d5   : > { %4491 = vrot.lane.b32.xlu0 %v17704_v21, %s8824_s16  ;;  %17705 = vst [vmem:[#allocation153_spill] sm:$0xff] %v11609_v41  ;;  %v8447_v0 = vunpack.i.h.bf16 %v11609_v41 }
 0x2d6   : > { %v11622_v49 = vsel %vm17338_vm8, %v11423_v11, %v8451_v29  ;;  %v11626_v52 = vsel %vm17338_vm8, %v11426_v34, %v8452_v19 }
 0x2d7   : > { %v11618_v18 = vsel %vm17338_vm8, %v11420_v1, %v8447_v0  ;;  %v8460_v10 = vpop.permute.xlu0 %8459  ;;  %v17709_v1 = vld [vmem:[#allocation149_spill] sm:$0xff] }
 0x2d8   : > { %4493 = vrot.lane.b32.xlu1 %v17706_v61, %s8824_s16  ;;  %v8455_v41 = vpop.permute.xlu1 %8454  ;;  %v8462_v9 = vunpack.i.h.bf16 %v8460_v10  ;;  %v8461_v39 = vunpack.i.l.bf16 %v8460_v10 }
 0x2d9   : > { %4495 = vrot.lane.b32.xlu0 %v17707_v44, %s8824_s16  ;;  %v8457_v57 = vunpack.i.h.bf16 %v8455_v41  ;;  %v8456_v2 = vunpack.i.l.bf16 %v8455_v41 }
 0x2da   : > { %v11642_v0 = vsel %vm17338_vm8, %v11455_v7, %v8461_v39  ;;  %v11646_v41 = vsel %vm17338_vm8, %v11458_v37, %v8462_v9 }
 0x2db   : > { %v11634_v11 = vsel %vm17338_vm8, %v11449_v16, %v8456_v2  ;;  %v11638_v34 = vsel %vm17338_vm8, %v11452_v25, %v8457_v57  ;;  %v8470_v29 = vpop.permute.xlu0 %8469  ;;  %v17710_v57 = vld [vmem:[#allocation172_spill] sm:$0xff] }
 0x2dc   : > { %4497 = vrot.lane.b32.xlu1 %v17708_v59, %s8824_s16  ;;  %v8465_v19 = vpop.permute.xlu1 %8464  ;;  %v8472_v21 = vunpack.i.h.bf16 %v8470_v29  ;;  %v8471_v31 = vunpack.i.l.bf16 %v8470_v29 }
 0x2dd   : > { %4499 = vrot.lane.b32.xlu0 %v17709_v1, %s8824_s16  ;;  %v8467_v10 = vunpack.i.h.bf16 %v8465_v19  ;;  %v8466_v61 = vunpack.i.l.bf16 %v8465_v19 }
 0x2de   : > { %v11662_v16 = vsel %vm17338_vm8, %v11487_v63, %v8471_v31  ;;  %v11666_v25 = vsel %vm17338_vm8, %v11490_v60, %v8472_v21 }
 0x2df   : > { %v11654_v39 = vsel %vm17338_vm8, %v11481_v15, %v8466_v61  ;;  %v11658_v9 = vsel %vm17338_vm8, %v11484_v62, %v8467_v10  ;;  %v8480_v37 = vpop.permute.xlu0 %8479  ;;  %v17711_v61 = vld [vmem:[#allocation175_spill] sm:$0xff]  ;;  %v17712_v15 = vld [vmem:[#allocation168_spill] sm:$0xff] }
 0x2e0   : > { %4501 = vrot.lane.b32.xlu1 %v10592_v14, %s8824_s16  ;;  %v8475_v7 = vpop.permute.xlu1 %8474  ;;  %v8482_v29 = vunpack.i.h.bf16 %v8480_v37 }
 0x2e1   : > { %4503 = vrot.lane.b32.xlu0 %v17710_v57, %s8824_s16  ;;  %v8477_v2 = vunpack.i.h.bf16 %v8475_v7  ;;  %v8476_v19 = vunpack.i.l.bf16 %v8475_v7  ;;  %v8481_v57 = vunpack.i.l.bf16 %v8480_v37 }
 0x2e2   : > { %v11686_v60 = vsel %vm17338_vm8, %v11522_v13, %v8482_v29 }
 0x2e3   : > { %v11674_v31 = vsel %vm17338_vm8, %v11513_v12, %v8476_v19  ;;  %v11678_v62 = vsel %vm17338_vm8, %v11516_v50, %v8477_v2  ;;  %v11682_v63 = vsel %vm17338_vm8, %v11519_v32, %v8481_v57  ;;  %v8490_v10 = vpop.permute.xlu0 %8489  ;;  %v17713_v12 = vld [vmem:[#allocation171_spill] sm:$0xff] }
 0x2e4   : > { %4505 = vrot.lane.b32.xlu1 %v17711_v61, %s8824_s16  ;;  %v8485_v21 = vpop.permute.xlu1 %8484  ;;  %v8491_v61 = vunpack.i.l.bf16 %v8490_v10 }
 0x2e5   : > { %4507 = vrot.lane.b32.xlu0 %v17712_v15, %s8824_s16  ;;  %v8487_v7 = vunpack.i.h.bf16 %v8485_v21  ;;  %v8486_v37 = vunpack.i.l.bf16 %v8485_v21  ;;  %v8492_v15 = vunpack.i.h.bf16 %v8490_v10 }
 0x2e6   : > { %v11702_v13 = vsel %vm17338_vm8, %v11551_v3, %v8491_v61  ;;  %v11722_v3 = vld [vmem:[#allocation3 + $0x310] sm:$0xff] }
 0x2e7   : > { %v11694_v50 = vsel %vm17338_vm8, %v11545_v20, %v8486_v37  ;;  %v11698_v32 = vsel %vm17338_vm8, %v11548_v43, %v8487_v7  ;;  %v11706_v57 = vsel %vm17338_vm8, %v11554_v4, %v8492_v15  ;;  %v11708_v19 = vpop.permute.xlu0 %8499  ;;  %17715 = vst [vmem:[#allocation40_spill] sm:$0xff] %v11722_v3  ;;  %v11724_v4 = vld [vmem:[#allocation3 + $0x318] sm:$0x3] }
 0x2e8   : > { %4509 = vrot.lane.b32.xlu1 %v17713_v12, %s8824_s16  ;;  %v8495_v2 = vpop.permute.xlu1 %8494  ;;  %17714 = vst [vmem:[#allocation157_spill] sm:$0xff] %v11708_v19 }
 0x2e9   : > { %4511 = vrot.lane.b32.xlu0 %v10983_v55, %s8824_s16  ;;  %v8497_v29 = vunpack.i.h.bf16 %v8495_v2  ;;  %v8496_v21 = vunpack.i.l.bf16 %v8495_v2 }
 0x2eb   : > { %v11716_v20 = vsel %vm17338_vm8, %v11571_v5, %v8496_v21  ;;  %v11720_v43 = vsel %vm17338_vm8, %v11574_v42, %v8497_v29  ;;  %v8510_v15 = vpop.permute.xlu0 %8509  ;;  %v2443_v5 = vrot.slane %v11722_v3, 1  ;;  %v2444_v42 = vrot.slane %v11724_v4, 1 }
 0x2ec   : > { %4513 = vrot.lane.b32.xlu1 %v10986_v26, %s8824_s16  ;;  %v8505_v61 = vpop.permute.xlu1 %8504  ;;  %v8512_v37 = vunpack.i.h.bf16 %v8510_v15  ;;  %v8511_v2 = vunpack.i.l.bf16 %v8510_v15 }
 0x2ed   : > { %4515 = vrot.lane.b32.xlu0 %v10991_v17, %s8824_s16  ;;  %v8507_v10 = vunpack.i.h.bf16 %v8505_v61  ;;  %v8506_v7 = vunpack.i.l.bf16 %v8505_v61 }
 0x2ee   : > { %v11742_v61 = vsel %vm17301_vm9, %v11590_v47, %v8511_v2  ;;  %v11746_v15 = vsel %vm17301_vm9, %v11594_v8, %v8512_v37  ;;  %v17720_v2 = vld [vmem:[#allocation43_spill] sm:$0xff] }
 0x2ef   : > { %v11734_v29 = vsel %vm17301_vm9, %v11582_v30, %v8506_v7  ;;  %v11738_v21 = vsel %vm17301_vm9, %v11586_v48, %v8507_v10  ;;  %v11750_v12 = vpop.permute.xlu0 %8519  ;;  %v11758_v30 = vsel %vm1167_vm4, %v2443_v5, %v2444_v42 }
 0x2f0   : > { %4517 = vrot.lane.b32.xlu1 %v10994_v28, %s8824_s16  ;;  %v11748_v19 = vpop.permute.xlu1 %8514  ;;  %17717 = vst [vmem:[#allocation46_spill] sm:$0xff] %v11750_v12  ;;  %17718 = vst [vmem:[#allocation56_spill] sm:$0xff] %v11758_v30 }
 0x2f1   : > { %4519 = vrot.lane.b32.xlu0 %v11010_v22, %s8824_s16  ;;  %17716 = vst [vmem:[#allocation39_spill] sm:$0xff] %v11748_v19  ;;  %v8516_v22 = vunpack.i.l.bf16 %v11748_v19 }
 0x2f3   : > { %v11762_v48 = vsel %vm17301_vm9, %v11607_v38, %v8516_v22  ;;  %v8530_v8 = vpop.permute.xlu0 %8529 }
 0x2f4   : > { %4521 = vrot.lane.b32.xlu1 %v11013_v45, %s8824_s16  ;;  %v11764_v47 = vpop.permute.xlu1 %8524  ;;  %v8532_v7 = vunpack.i.h.bf16 %v8530_v8  ;;  %v8531_v37 = vunpack.i.l.bf16 %v8530_v8 }
 0x2f5   : > { %4523 = vrot.lane.b32.xlu0 %v11262_v46, %s8824_s16  ;;  %17719 = vst [vmem:[#allocation64_spill] sm:$0xff] %v11764_v47  ;;  %v8527_v10 = vunpack.i.h.bf16 %v11764_v47 }
 0x2f6   : > { %v11777_v22 = vsel %vm17301_vm9, %v11622_v49, %v8531_v37  ;;  %v11781_v38 = vsel %vm17301_vm9, %v11626_v52, %v8532_v7 }
 0x2f7   : > { %v11773_v5 = vsel %vm17301_vm9, %v11618_v18, %v8527_v10  ;;  %v8540_v8 = vpop.permute.xlu0 %8539  ;;  %v17722_v18 = vld [vmem:[#allocation50_spill] sm:$0xff] }
 0x2f8   : > { %4525 = vrot.lane.b32.xlu1 %v11758_v30, %s8824_s16  ;;  %v8535_v42 = vpop.permute.xlu1 %8534  ;;  %v8542_v19 = vunpack.i.h.bf16 %v8540_v8  ;;  %v8541_v30 = vunpack.i.l.bf16 %v8540_v8 }
 0x2f9   : > { %4559 = vrot.lane.b32.xlu0 %v17720_v2, %s8825_s17  ;;  %v8537_v47 = vunpack.i.h.bf16 %v8535_v42  ;;  %v8536_v12 = vunpack.i.l.bf16 %v8535_v42  ;;  %v17721_v2 = vld [vmem:[#allocation42_spill] sm:$0xff] }
 0x2fa   : > { %v11797_v10 = vsel %vm17301_vm9, %v11642_v0, %v8541_v30  ;;  %v11801_v7 = vsel %vm17301_vm9, %v11646_v41, %v8542_v19 }
 0x2fb   : > { %v11789_v49 = vsel %vm17301_vm9, %v11634_v11, %v8536_v12  ;;  %v11793_v52 = vsel %vm17301_vm9, %v11638_v34, %v8537_v47  ;;  %v8550_v42 = vpop.permute.xlu0 %8549  ;;  %v17723_v11 = vld [vmem:[#allocation60_spill] sm:$0xff]  ;;  %v17724_v34 = vld [vmem:[#allocation69_spill] sm:$0xff] }
 0x2fc   : > { %4561 = vrot.lane.b32.xlu1 %v17721_v2, %s8825_s17  ;;  %v8545_v37 = vpop.permute.xlu1 %8544  ;;  %v8551_v46 = vunpack.i.l.bf16 %v8550_v42 }
 0x2fd   : > { %4563 = vrot.lane.b32.xlu0 %v17722_v18, %s8825_s17  ;;  %v8547_v8 = vunpack.i.h.bf16 %v8545_v37  ;;  %v8546_v2 = vunpack.i.l.bf16 %v8545_v37  ;;  %v8552_v18 = vunpack.i.h.bf16 %v8550_v42 }
 0x2fe   : > { %v11817_v12 = vsel %vm17301_vm9, %v11662_v16, %v8551_v46 }
 0x2ff   : > { %v11809_v0 = vsel %vm17301_vm9, %v11654_v39, %v8546_v2  ;;  %v11813_v41 = vsel %vm17301_vm9, %v11658_v9, %v8547_v8  ;;  %v11821_v19 = vsel %vm17301_vm9, %v11666_v25, %v8552_v18  ;;  %v8560_v47 = vpop.permute.xlu0 %8559  ;;  %v17725_v39 = vld [vmem:[#allocation72_spill] sm:$0xff]  ;;  %v17726_v9 = vld [vmem:[#allocation77_spill] sm:$0xff] }
 0x300   : > { %4565 = vrot.lane.b32.xlu1 %v17723_v11, %s8825_s17  ;;  %v8555_v30 = vpop.permute.xlu1 %8554  ;;  %v8562_v11 = vunpack.i.h.bf16 %v8560_v47 }
 0x301   : > { %4567 = vrot.lane.b32.xlu0 %v17724_v34, %s8825_s17  ;;  %v8557_v37 = vunpack.i.h.bf16 %v8555_v30  ;;  %v8556_v42 = vunpack.i.l.bf16 %v8555_v30  ;;  %v8561_v34 = vunpack.i.l.bf16 %v8560_v47 }
 0x302   : > { %v11841_v8 = vsel %vm17301_vm9, %v11686_v60, %v8562_v11 }
 0x303   : > { %v11829_v46 = vsel %vm17301_vm9, %v11674_v31, %v8556_v42  ;;  %v11833_v16 = vsel %vm17301_vm9, %v11678_v62, %v8557_v37  ;;  %v11837_v25 = vsel %vm17301_vm9, %v11682_v63, %v8561_v34  ;;  %v8570_v18 = vpop.permute.xlu0 %8569  ;;  %v17727_v31 = vld [vmem:[#allocation189_spill] sm:$0xff]  ;;  %v17728_v62 = vld [vmem:[#allocation90_spill] sm:$0xff] }
 0x304   : > { %4569 = vrot.lane.b32.xlu1 %v17725_v39, %s8825_s17  ;;  %v8565_v2 = vpop.permute.xlu1 %8564  ;;  %v8572_v39 = vunpack.i.h.bf16 %v8570_v18 }
 0x305   : > { %4571 = vrot.lane.b32.xlu0 %v17726_v9, %s8825_s17  ;;  %v8567_v30 = vunpack.i.h.bf16 %v8565_v2  ;;  %v8566_v47 = vunpack.i.l.bf16 %v8565_v2  ;;  %v8571_v9 = vunpack.i.l.bf16 %v8570_v18 }
 0x306   : > { %v11861_v42 = vsel %vm17301_vm9, %v11706_v57, %v8572_v39 }
 0x307   : > { %v11849_v63 = vsel %vm17301_vm9, %v11694_v50, %v8566_v47  ;;  %v11853_v60 = vsel %vm17301_vm9, %v11698_v32, %v8567_v30  ;;  %v11857_v37 = vsel %vm17301_vm9, %v11702_v13, %v8571_v9  ;;  %v11863_v34 = vpop.permute.xlu0 %8579  ;;  %v17730_v50 = vld [vmem:[#allocation91_spill] sm:$0xff] }
 0x308   : > { %4573 = vrot.lane.b32.xlu1 %v17727_v31, %s8825_s17  ;;  %v8575_v11 = vpop.permute.xlu1 %8574  ;;  %17729 = vst [vmem:[#allocation68_spill] sm:$0xff] %v11863_v34  ;;  %v17731_v47 = vld [vmem:[#allocation99_spill] sm:$0xff]  ;;  %v17732_v34 = vld [vmem:[#allocation108_spill] sm:$0xff] }
 0x309   : > { %4575 = vrot.lane.b32.xlu0 %v17728_v62, %s8825_s17  ;;  %v8577_v2 = vunpack.i.h.bf16 %v8575_v11  ;;  %v8576_v18 = vunpack.i.l.bf16 %v8575_v11 }
 0x30b   : > { %v11871_v32 = vsel %vm17301_vm9, %v11716_v20, %v8576_v18  ;;  %v11875_v13 = vsel %vm17301_vm9, %v11720_v43, %v8577_v2  ;;  %v8590_v30 = vpop.permute.xlu0 %8589  ;;  %vm17332_vm9 = vcmask 982016  }
 0x30c   : > { %4577 = vrot.lane.b32.xlu1 %v17730_v50, %s8825_s17  ;;  %v8585_v57 = vpop.permute.xlu1 %8584  ;;  %v8592_v31 = vunpack.i.h.bf16 %v8590_v30  ;;  %v8591_v11 = vunpack.i.l.bf16 %v8590_v30  ;;  %v17733_v50 = vld [vmem:[#allocation118_spill] sm:$0xff] }
 0x30d   : > { %4579 = vrot.lane.b32.xlu0 %v17731_v47, %s8825_s17  ;;  %v8587_v39 = vunpack.i.h.bf16 %v8585_v57  ;;  %v8586_v9 = vunpack.i.l.bf16 %v8585_v57 }
 0x30e   : > { %v11891_v2 = vsel %vm17300_vm10, %v11742_v61, %v8591_v11  ;;  %v11895_v18 = vsel %vm17300_vm10, %v11746_v15, %v8592_v31 }
 0x30f   : > { %v11883_v20 = vsel %vm17300_vm10, %v11734_v29, %v8586_v9  ;;  %v11887_v43 = vsel %vm17300_vm10, %v11738_v21, %v8587_v39  ;;  %17736 = vst [vmem:[#allocation43_spill] sm:$0xff] %v11891_v2  ;;  %17737 = vst [vmem:[#allocation42_spill] sm:$0xff] %v11895_v18  ;;  %v11899_v30 = vpop.permute.xlu0 %8599  ;;  %v17740_v29 = vld [vmem:[#allocation122_spill] sm:$0xff]  ;;  %v17741_v21 = vld [vmem:[#allocation128_spill] sm:$0xff] }
 0x310   : > { %4581 = vrot.lane.b32.xlu1 %v17732_v34, %s8825_s17  ;;  %17734 = vst [vmem:[#allocation63_spill] sm:$0xff] %v11883_v20  ;;  %17735 = vst [vmem:[#allocation62_spill] sm:$0xff] %v11887_v43  ;;  %v11897_v57 = vpop.permute.xlu1 %8594  ;;  %v17744_v18 = vld [vmem:[#allocation194_spill] sm:$0xff]  ;;  %v17745_v2 = vld [vmem:[#allocation144_spill] sm:$0xff] }
 0x311   : > { %4583 = vrot.lane.b32.xlu0 %v17733_v50, %s8825_s17  ;;  %17738 = vst [vmem:[#allocation50_spill] sm:$0xff] %v11897_v57  ;;  %17739 = vst [vmem:[#allocation60_spill] sm:$0xff] %v11899_v30  ;;  %v8596_v50 = vunpack.i.l.bf16 %v11897_v57 }
 0x313   : > { %v11908_v61 = vsel %vm17300_vm10, %v11762_v48, %v8596_v50  ;;  %v8610_v15 = vpop.permute.xlu0 %8609 }
 0x314   : > { %4585 = vrot.lane.b32.xlu1 %v17740_v29, %s8825_s17  ;;  %17742 = vst [vmem:[#allocation69_spill] sm:$0xff] %v11908_v61  ;;  %v11910_v39 = vpop.permute.xlu1 %8604  ;;  %v8612_v31 = vunpack.i.h.bf16 %v8610_v15  ;;  %v8611_v11 = vunpack.i.l.bf16 %v8610_v15 }
 0x315   : > { %4587 = vrot.lane.b32.xlu0 %v17741_v21, %s8825_s17  ;;  %17743 = vst [vmem:[#allocation72_spill] sm:$0xff] %v11910_v39  ;;  %v8607_v9 = vunpack.i.h.bf16 %v11910_v39  ;;  %v8691_v21 = vld [vmem:[#allocation3 + $0x280] sm:$0xff] }
 0x316   : > { %v11923_v48 = vsel %vm17300_vm10, %v11777_v22, %v8611_v11  ;;  %v11927_v50 = vsel %vm17300_vm10, %v11781_v38, %v8612_v31 }
 0x317   : > { %v11919_v43 = vsel %vm17300_vm10, %v11773_v5, %v8607_v9  ;;  %17747 = vst [vmem:[#allocation189_spill] sm:$0xff] %v11923_v48  ;;  %17748 = vst [vmem:[#allocation286_spill] sm:$0xff] %v11927_v50  ;;  %v8620_v15 = vpop.permute.xlu0 %8619  ;;  %v17750_v5 = vld [vmem:[#allocation154_spill] sm:$0xff] }
 0x318   : > { %4589 = vrot.lane.b32.xlu1 %v17744_v18, %s8825_s17  ;;  %17746 = vst [vmem:[#allocation77_spill] sm:$0xff] %v11919_v43  ;;  %v8615_v61 = vpop.permute.xlu1 %8614  ;;  %v8622_v30 = vunpack.i.h.bf16 %v8620_v15  ;;  %v8621_v57 = vunpack.i.l.bf16 %v8620_v15  ;;  %v17749_v18 = vld [vmem:[#allocation145_spill] sm:$0xff] }
 0x319   : > { %4591 = vrot.lane.b32.xlu0 %v17745_v2, %s8825_s17  ;;  %v8617_v20 = vunpack.i.h.bf16 %v8615_v61  ;;  %v8616_v39 = vunpack.i.l.bf16 %v8615_v61 }
 0x31a   : > { %v11943_v9 = vsel %vm17300_vm10, %v11797_v10, %v8621_v57  ;;  %v11947_v61 = vsel %vm17300_vm10, %v11801_v7, %v8622_v30 }
 0x31b   : > { %v11935_v22 = vsel %vm17300_vm10, %v11789_v49, %v8616_v39  ;;  %v11939_v38 = vsel %vm17300_vm10, %v11793_v52, %v8617_v20  ;;  %17753 = vst [vmem:[#allocation289_spill] sm:$0xff] %v11943_v9  ;;  %17754 = vst [vmem:[#allocation290_spill] sm:$0xff] %v11947_v61  ;;  %v8630_v11 = vpop.permute.xlu0 %8629  ;;  %v17755_v49 = vld [vmem:[#allocation167_spill] sm:$0xff]  ;;  %v17756_v52 = vld [vmem:[#allocation176_spill] sm:$0xff] }
 0x31c   : > { %4593 = vrot.lane.b32.xlu1 %v17749_v18, %s8825_s17  ;;  %17751 = vst [vmem:[#allocation287_spill] sm:$0xff] %v11935_v22  ;;  %17752 = vst [vmem:[#allocation288_spill] sm:$0xff] %v11939_v38  ;;  %v8625_v31 = vpop.permute.xlu1 %8624  ;;  %v8632_v48 = vunpack.i.h.bf16 %v8630_v11  ;;  %v8631_v43 = vunpack.i.l.bf16 %v8630_v11  ;;  %v12100_v38 = vld [vmem:[#allocation3 + $0x1f0] sm:$0xff]  ;;  %v12104_v22 = vld [vmem:[#allocation3 + $0x200] sm:$0xff] }
 0x31d   : > { %4595 = vrot.lane.b32.xlu0 %v17750_v5, %s8825_s17  ;;  %v8627_v15 = vunpack.i.h.bf16 %v8625_v31  ;;  %v8626_v50 = vunpack.i.l.bf16 %v8625_v31  ;;  %17785 = vst [vmem:[#allocation316_spill] sm:$0xff] %v12100_v38 }
 0x31e   : > { %v11963_v20 = vsel %vm17300_vm10, %v11817_v12, %v8631_v43  ;;  %v11967_v57 = vsel %vm17300_vm10, %v11821_v19, %v8632_v48 }
 0x31f   : > { %v11955_v10 = vsel %vm17300_vm10, %v11809_v0, %v8626_v50  ;;  %v11959_v7 = vsel %vm17300_vm10, %v11813_v41, %v8627_v15  ;;  %17759 = vst [vmem:[#allocation293_spill] sm:$0xff] %v11963_v20  ;;  %17760 = vst [vmem:[#allocation294_spill] sm:$0xff] %v11967_v57  ;;  %v8640_v39 = vpop.permute.xlu0 %8639  ;;  %v17761_v0 = vld [vmem:[#allocation179_spill] sm:$0xff]  ;;  %v17762_v41 = vld [vmem:[#allocation184_spill] sm:$0xff] }
 0x320   : > { %4597 = vrot.lane.b32.xlu1 %v17755_v49, %s8825_s17  ;;  %17757 = vst [vmem:[#allocation291_spill] sm:$0xff] %v11955_v10  ;;  %17758 = vst [vmem:[#allocation292_spill] sm:$0xff] %v11959_v7  ;;  %v8635_v30 = vpop.permute.xlu1 %8634  ;;  %v8642_v61 = vunpack.i.h.bf16 %v8640_v39  ;;  %v8641_v9 = vunpack.i.l.bf16 %v8640_v39 }
 0x321   : > { %4599 = vrot.lane.b32.xlu0 %v17756_v52, %s8825_s17  ;;  %v8637_v31 = vunpack.i.h.bf16 %v8635_v30  ;;  %v8636_v11 = vunpack.i.l.bf16 %v8635_v30 }
 0x322   : > { %v11983_v43 = vsel %vm17300_vm10, %v11837_v25, %v8641_v9  ;;  %v11987_v48 = vsel %vm17300_vm10, %v11841_v8, %v8642_v61 }
 0x323   : > { %v11975_v12 = vsel %vm17300_vm10, %v11829_v46, %v8636_v11  ;;  %v11979_v19 = vsel %vm17300_vm10, %v11833_v16, %v8637_v31  ;;  %17765 = vst [vmem:[#allocation297_spill] sm:$0xff] %v11983_v43  ;;  %17766 = vst [vmem:[#allocation298_spill] sm:$0xff] %v11987_v48  ;;  %v8650_v15 = vpop.permute.xlu0 %8649  ;;  %v17767_v46 = vld [vmem:[#allocation199_spill] sm:$0xff] }
 0x324   : > { %4601 = vrot.lane.b32.xlu1 %v17761_v0, %s8825_s17  ;;  %17763 = vst [vmem:[#allocation295_spill] sm:$0xff] %v11975_v12  ;;  %17764 = vst [vmem:[#allocation296_spill] sm:$0xff] %v11979_v19  ;;  %v8645_v50 = vpop.permute.xlu1 %8644  ;;  %v8652_v57 = vunpack.i.h.bf16 %v8650_v15  ;;  %v8651_v20 = vunpack.i.l.bf16 %v8650_v15  ;;  %v12091_v19 = vld [vmem:[#allocation3 + $0x1b0] sm:$0xff]  ;;  %v8683_v12 = vld [vmem:[#allocation3 + $0x1e0] sm:$0xff] }
 0x325   : > { %4603 = vrot.lane.b32.xlu0 %v17762_v41, %s8825_s17  ;;  %v8647_v30 = vunpack.i.h.bf16 %v8645_v50  ;;  %v8646_v39 = vunpack.i.l.bf16 %v8645_v50  ;;  %v12136_v41 = vld [vmem:[#allocation3 + $0x250] sm:$0xff] }
 0x326   : > { %v12003_v8 = vsel %vm17300_vm10, %v11857_v37, %v8651_v20  ;;  %v12009_v31 = vsel %vm17300_vm10, %v11861_v42, %v8652_v57  ;;  %v2446_v20 = vrot.slane %v11722_v3, 2  ;;  %v2447_v57 = vrot.slane %v11724_v4, 2  ;;  %v8675_v4 = vld [vmem:[#allocation3 + $0x140] sm:$0xff]  ;;  %17789 = vst [vmem:[#allocation320_spill] sm:$0xff] %v12136_v41  ;;  %v17813_v0 = vld [vmem:[#allocation81_spill] sm:$0xff] }
 0x327   : > { %v11995_v16 = vsel %vm17300_vm10, %v11849_v63, %v8646_v39  ;;  %v11999_v25 = vsel %vm17300_vm10, %v11853_v60, %v8647_v30  ;;  %17770 = vst [vmem:[#allocation301_spill] sm:$0xff] %v12003_v8  ;;  %v12005_v61 = vpop.permute.xlu0 %4463  ;;  %17772 = vst [vmem:[#allocation303_spill] sm:$0xff] %v12009_v31 }
 0x328   : > { %4605 = vrot.lane.b32.xlu1 %v17767_v46, %s8825_s17  ;;  %17768 = vst [vmem:[#allocation299_spill] sm:$0xff] %v11995_v16  ;;  %17769 = vst [vmem:[#allocation300_spill] sm:$0xff] %v11999_v25  ;;  %v8655_v9 = vpop.permute.xlu1 %8654  ;;  %v12079_v25 = vld [vmem:[#allocation3 + $0x190] sm:$0xff]  ;;  %v12083_v16 = vld [vmem:[#allocation3 + $0x1a0] sm:$0xff] }
 0x329   : > { %4607 = vrot.lane.b32.xlu0 %v11085_v51, %s8825_s17  ;;  %17771 = vst [vmem:[#allocation302_spill] sm:$0xff] %v12005_v61  ;;  %v8657_v11 = vunpack.i.h.bf16 %v8655_v9  ;;  %v8656_v50 = vunpack.i.l.bf16 %v8655_v9  ;;  %v12124_v61 = vld [vmem:[#allocation3 + $0x230] sm:$0xff] }
 0x32b   : > { %v12017_v63 = vsel %vm17300_vm10, %v11871_v32, %v8656_v50  ;;  %v12021_v60 = vsel %vm17300_vm10, %v11875_v13, %v8657_v11  ;;  %v12025_v42 = vpop.permute.xlu0 %4467  ;;  %v12042_v13 = vsel %vm1468_vm5, %v2446_v20, %v2447_v57  ;;  %v12055_v50 = vld [vmem:[#allocation3 + $0x150] sm:$0xff]  ;;  %v12059_v20 = vld [vmem:[#allocation3 + $0x160] sm:$0xff]  ;;  %vm17333_vm10 = vcmask 883712  }
 0x32c   : > { %4609 = vrot.lane.b32.xlu1 %v11094_v40, %s8825_s17  ;;  %17773 = vst [vmem:[#allocation304_spill] sm:$0xff] %v12017_v63  ;;  %17774 = vst [vmem:[#allocation305_spill] sm:$0xff] %v12021_v60  ;;  %v12023_v37 = vpop.permute.xlu1 %4465  ;;  %v12067_v63 = vld [vmem:[#allocation3 + $0x170] sm:$0xff]  ;;  %v12177_v40 = vld [vmem:[#allocation3 + $0x320] sm:$0xff] }
 0x32d   : > { %4611 = vrot.lane.b32.xlu0 %v11097_v27, %s8825_s17  ;;  %17775 = vst [vmem:[#allocation306_spill] sm:$0xff] %v12023_v37  ;;  %17776 = vst [vmem:[#allocation307_spill] sm:$0xff] %v12042_v13  ;;  %v12112_v37 = vld [vmem:[#allocation3 + $0x210] sm:$0xff]  ;;  %v12173_v27 = vld [vmem:[#allocation3 + $0x2e0] sm:$0xff] }
 0x32e   : > { %17779 = vst [vmem:[#allocation310_spill] sm:$0xff] %v12055_v50  ;;  %17780 = vst [vmem:[#allocation311_spill] sm:$0xff] %v12059_v20 }
 0x32f   : > { %v12035_v15 = vpop.permute.xlu0 %4471  ;;  %17783 = vst [vmem:[#allocation314_spill] sm:$0xff] %v12067_v63  ;;  %17801 = vst [vmem:[#allocation332_spill] sm:$0xff] %v12173_v27 }
 0x330   : > { %4613 = vrot.lane.b32.xlu1 %v11101_v54, %s8825_s17  ;;  %v12033_v32 = vpop.permute.xlu1 %4469  ;;  %v12169_v54 = vld [vmem:[#allocation3 + $0x2d0] sm:$0xff]  ;;  %17802 = vst [vmem:[#allocation333_spill] sm:$0xff] %v12177_v40 }
 0x331   : > { %4615 = vrot.lane.b32.xlu0 %v11118_v6, %s8825_s17  ;;  %17800 = vst [vmem:[#allocation331_spill] sm:$0xff] %v12169_v54 }
 0x333   : > { %v12046_v39 = vpop.permute.xlu0 %4475 }
 0x334   : > { %4617 = vrot.lane.b32.xlu1 %v11121_v33, %s8825_s17  ;;  %v12044_v30 = vpop.permute.xlu1 %4473  ;;  %v12157_v33 = vld [vmem:[#allocation3 + $0x2b0] sm:$0xff] }
 0x335   : > { %4619 = vrot.lane.b32.xlu0 %v11309_v36, %s8825_s17  ;;  %v12128_v36 = vld [vmem:[#allocation3 + $0x240] sm:$0xff]  ;;  %17796 = vst [vmem:[#allocation327_spill] sm:$0xff] %v12157_v33 }
 0x336   : > { %17786 = vst [vmem:[#allocation317_spill] sm:$0xff] %v12128_v36 }
 0x338   : > { %4621 = vrot.lane.b32.xlu1 %v12042_v13, %s8825_s17 }
 0x339   : > { %4655 = vrot.lane.b32.xlu0 %v8675_v4, %s8826_s23  ;;  %v12071_v4 = vld [vmem:[#allocation3 + $0x180] sm:$0xff] }
 0x33a   : > { %v12051_v9 = vpop.permute.xlu1 %4477  ;;  %17784 = vst [vmem:[#allocation315_spill] sm:$0xff] %v12071_v4 }
 0x33b   : > { %17777 = vst [vmem:[#allocation308_spill] sm:$0xff] %v12051_v9  ;;  %v12053_v11 = vpop.permute.xlu0 %4479 }
 0x33c   : > { %17778 = vst [vmem:[#allocation309_spill] sm:$0xff] %v12053_v11  ;;  %4657 = vrot.lane.b32.xlu1 %v12055_v50, %s8826_s23 }
 0x33d   : > { %4659 = vrot.lane.b32.xlu0 %v12059_v20, %s8826_s23  ;;  %v12149_v20 = vld [vmem:[#allocation3 + $0x2a0] sm:$0xff] }
 0x33e   : > { %v12063_v57 = vpop.permute.xlu1 %4481  ;;  %17793 = vst [vmem:[#allocation324_spill] sm:$0xff] %v12149_v20 }
 0x33f   : > { %17781 = vst [vmem:[#allocation312_spill] sm:$0xff] %v12063_v57  ;;  %v12065_v60 = vpop.permute.xlu0 %4483 }
 0x340   : > { %17782 = vst [vmem:[#allocation313_spill] sm:$0xff] %v12065_v60  ;;  %4661 = vrot.lane.b32.xlu1 %v12067_v63, %s8826_s23  ;;  %v12145_v63 = vld [vmem:[#allocation3 + $0x290] sm:$0xff] }
 0x341   : > { %4663 = vrot.lane.b32.xlu0 %v12071_v4, %s8826_s23  ;;  %17792 = vst [vmem:[#allocation323_spill] sm:$0xff] %v12145_v63 }
 0x342   : > { %v12075_v31 = vpop.permute.xlu1 %4485 }
 0x343   : > { %v12077_v8 = vpop.permute.xlu0 %4487 }
 0x344   : > { %4665 = vrot.lane.b32.xlu1 %v12079_v25, %s8826_s23 }
 0x345   : > { %4667 = vrot.lane.b32.xlu0 %v12083_v16, %s8826_s23 }
 0x346   : > { %v12087_v48 = vpop.permute.xlu1 %4489 }
 0x347   : > { %v12089_v43 = vpop.permute.xlu0 %4491 }
 0x348   : > { %4669 = vrot.lane.b32.xlu1 %v12091_v19, %s8826_s23 }
 0x349   : > { %4671 = vrot.lane.b32.xlu0 %v8683_v12, %s8826_s23  ;;  %v12116_v12 = vld [vmem:[#allocation3 + $0x220] sm:$0xff] }
 0x34a   : > { %v12096_v7 = vpop.permute.xlu1 %4493 }
 0x34b   : > { %v12098_v10 = vpop.permute.xlu0 %4495 }
 0x34c   : > { %4673 = vrot.lane.b32.xlu1 %v12100_v38, %s8826_s23 }
 0x34d   : > { %4675 = vrot.lane.b32.xlu0 %v12104_v22, %s8826_s23 }
 0x34e   : > { %v12108_v13 = vpop.permute.xlu1 %4497 }
 0x34f   : > { %v12110_v60 = vpop.permute.xlu0 %4499 }
 0x350   : > { %4677 = vrot.lane.b32.xlu1 %v12112_v37, %s8826_s23 }
 0x351   : > { %4679 = vrot.lane.b32.xlu0 %v12116_v12, %s8826_s23 }
 0x352   : > { %v12120_v46 = vpop.permute.xlu1 %4501 }
 0x353   : > { %v12122_v57 = vpop.permute.xlu0 %4503 }
 0x354   : > { %4681 = vrot.lane.b32.xlu1 %v12124_v61, %s8826_s23 }
 0x355   : > { %4683 = vrot.lane.b32.xlu0 %v12128_v36, %s8826_s23  ;;  %v17826_v36 = vld [vmem:[#allocation175_spill] sm:$0xff] }
 0x356   : > { %v12132_v11 = vpop.permute.xlu1 %4505 }
 0x357   : > { %17787 = vst [vmem:[#allocation318_spill] sm:$0xff] %v12132_v11  ;;  %v12134_v9 = vpop.permute.xlu0 %4507  ;;  %v17816_v11 = vld [vmem:[#allocation82_spill] sm:$0xff] }
 0x358   : > { %17788 = vst [vmem:[#allocation319_spill] sm:$0xff] %v12134_v9  ;;  %4685 = vrot.lane.b32.xlu1 %v12136_v41, %s8826_s23 }
 0x359   : > { %4687 = vrot.lane.b32.xlu0 %v8691_v21, %s8826_s23  ;;  %v12161_v21 = vld [vmem:[#allocation3 + $0x2c0] sm:$0xff] }
 0x35a   : > { %v12141_v38 = vpop.permute.xlu1 %4509  ;;  %17797 = vst [vmem:[#allocation328_spill] sm:$0xff] %v12161_v21 }
 0x35b   : > { %17790 = vst [vmem:[#allocation321_spill] sm:$0xff] %v12141_v38  ;;  %v12143_v4 = vpop.permute.xlu0 %4511 }
 0x35c   : > { %17791 = vst [vmem:[#allocation322_spill] sm:$0xff] %v12143_v4  ;;  %4689 = vrot.lane.b32.xlu1 %v12145_v63, %s8826_s23 }
 0x35d   : > { %4691 = vrot.lane.b32.xlu0 %v12149_v20, %s8826_s23 }
 0x35e   : > { %v12153_v50 = vpop.permute.xlu1 %4513 }
 0x35f   : > { %17794 = vst [vmem:[#allocation325_spill] sm:$0xff] %v12153_v50  ;;  %v12155_v3 = vpop.permute.xlu0 %4515 }
 0x360   : > { %17795 = vst [vmem:[#allocation326_spill] sm:$0xff] %v12155_v3  ;;  %4693 = vrot.lane.b32.xlu1 %v12157_v33, %s8826_s23 }
 0x361   : > { %4695 = vrot.lane.b32.xlu0 %v12161_v21, %s8826_s23  ;;  %v12183_v21 = vld [vmem:[#allocation3 + $0x2f0] sm:$0xff] }
 0x362   : > { %v12165_v63 = vpop.permute.xlu1 %4517  ;;  %17805 = vst [vmem:[#allocation336_spill] sm:$0xff] %v12183_v21 }
 0x363   : > { %17798 = vst [vmem:[#allocation329_spill] sm:$0xff] %v12165_v63  ;;  %v12167_v6 = vpop.permute.xlu0 %4519 }
 0x364   : > { %17799 = vst [vmem:[#allocation330_spill] sm:$0xff] %v12167_v6  ;;  %4697 = vrot.lane.b32.xlu1 %v12169_v54, %s8826_s23  ;;  %v12189_v6 = vld [vmem:[#allocation3 + $0x330] sm:$0xff]  ;;  %v12191_v54 = vld [vmem:[#allocation3 + $0x340] sm:$0xff] }
 0x365   : > { %4699 = vrot.lane.b32.xlu0 %v12173_v27, %s8826_s23  ;;  %17806 = vst [vmem:[#allocation337_spill] sm:$0xff] %v12189_v6  ;;  %17807 = vst [vmem:[#allocation338_spill] sm:$0xff] %v12191_v54 }
 0x366   : > { %v12179_v3 = vpop.permute.xlu1 %4521 }
 0x367   : > { %17803 = vst [vmem:[#allocation334_spill] sm:$0xff] %v12179_v3  ;;  %v12181_v33 = vpop.permute.xlu0 %4523 }
 0x368   : > { %17804 = vst [vmem:[#allocation335_spill] sm:$0xff] %v12181_v33  ;;  %4701 = vrot.lane.b32.xlu1 %v12183_v21, %s8826_s23  ;;  %v12201_v33 = vld [vmem:[#allocation3 + $0x350] sm:$0xff]  ;;  %v12203_v21 = vld [vmem:[#allocation3 + $0x360] sm:$0xff] }
 0x369   : > { %4703 = vrot.lane.b32.xlu0 %v12177_v40, %s8826_s23  ;;  %17810 = vst [vmem:[#allocation341_spill] sm:$0xff] %v12201_v33  ;;  %17811 = vst [vmem:[#allocation342_spill] sm:$0xff] %v12203_v21 }
 0x36a   : > { %v12193_v63 = vpop.permute.xlu1 %4525 }
 0x36b   : > { %17808 = vst [vmem:[#allocation339_spill] sm:$0xff] %v12193_v63  ;;  %v12195_v27 = vpop.permute.xlu0 %4559  ;;  %v12215_v63 = vld [vmem:[#allocation3 + $0x380] sm:$0xff] }
 0x36c   : > { %17809 = vst [vmem:[#allocation340_spill] sm:$0xff] %v12195_v27  ;;  %4705 = vrot.lane.b32.xlu1 %v12189_v6, %s8826_s23  ;;  %v12213_v27 = vld [vmem:[#allocation3 + $0x370] sm:$0xff] }
 0x36d   : > { %4707 = vrot.lane.b32.xlu0 %v12191_v54, %s8826_s23 }
 0x36e   : > { %v12205_v3 = vpop.permute.xlu1 %4561 }
 0x36f   : > { %17812 = vst [vmem:[#allocation343_spill] sm:$0xff] %v12205_v3  ;;  %v12207_v50 = vpop.permute.xlu0 %4563  ;;  %v12225_v3 = vld [vmem:[#allocation3 + $0x390] sm:$0xff] }
 0x370   : > { %4709 = vrot.lane.b32.xlu1 %v12201_v33, %s8826_s23 }
 0x371   : > { %4711 = vrot.lane.b32.xlu0 %v12203_v21, %s8826_s23 }
 0x372   : > { %v12217_v51 = vpop.permute.xlu1 %4565 }
 0x373   : > { %v12219_v20 = vpop.permute.xlu0 %4567 }
 0x374   : > { %4713 = vrot.lane.b32.xlu1 %v12213_v27, %s8826_s23 }
 0x375   : > { %4715 = vrot.lane.b32.xlu0 %v12215_v63, %s8826_s23 }
 0x376   : > { %v12227_v4 = vpop.permute.xlu1 %4569 }
 0x377   : > { %v12229_v38 = vpop.permute.xlu0 %4571 }
 0x378   : > { %4717 = vrot.lane.b32.xlu1 %v12225_v3, %s8826_s23 }
 0x379   : > { %4751 = vrot.lane.b32.xlu0 %v17813_v0, %s8827_s25 }
 0x37a   : > { %v12235_v9 = vpop.permute.xlu1 %4573 }
 0x37b   : > { %17814 = vst [vmem:[#allocation81_spill] sm:$0xff] %v12235_v9  ;;  %v12237_v41 = vpop.permute.xlu0 %4575 }
 0x37c   : > { %17815 = vst [vmem:[#allocation344_spill] sm:$0xff] %v12237_v41  ;;  %4753 = vrot.lane.b32.xlu1 %v17816_v11, %s8827_s25 }
 0x37d   : > { %4755 = vrot.lane.b32.xlu0 %v17695_v53, %s8827_s25  ;;  %v17820_v53 = vld [vmem:[#allocation135_spill] sm:$0xff] }
 0x37e   : > { %v12243_v52 = vpop.permute.xlu1 %4577 }
 0x37f   : > { %17817 = vst [vmem:[#allocation345_spill] sm:$0xff] %v12243_v52  ;;  %v12245_v49 = vpop.permute.xlu0 %4579 }
 0x380   : > { %17818 = vst [vmem:[#allocation346_spill] sm:$0xff] %v12245_v49  ;;  %4757 = vrot.lane.b32.xlu1 %v17697_v35, %s8827_s25  ;;  %v17819_v49 = vld [vmem:[#allocation134_spill] sm:$0xff] }
 0x381   : > { %4759 = vrot.lane.b32.xlu0 %v17698_v56, %s8827_s25 }
 0x382   : > { %v12251_v0 = vpop.permute.xlu1 %4581 }
 0x383   : > { %v12253_v9 = vpop.permute.xlu0 %4583 }
 0x384   : > { %4761 = vrot.lane.b32.xlu1 %v17699_v24, %s8827_s25 }
 0x385   : > { %4763 = vrot.lane.b32.xlu0 %v17700_v23, %s8827_s25 }
 0x386   : > { %v12259_v41 = vpop.permute.xlu1 %4585 }
 0x387   : > { %v12261_v52 = vpop.permute.xlu0 %4587 }
 0x388   : > { %4765 = vrot.lane.b32.xlu1 %v17703_v58, %s8827_s25 }
 0x389   : > { %4767 = vrot.lane.b32.xlu0 %v17819_v49, %s8827_s25 }
 0x38a   : > { %v12267_v56 = vpop.permute.xlu1 %4589 }
 0x38b   : > { %v12269_v35 = vpop.permute.xlu0 %4591 }
 0x38c   : > { %4769 = vrot.lane.b32.xlu1 %v17820_v53, %s8827_s25  ;;  %v17823_v53 = vld [vmem:[#allocation172_spill] sm:$0xff] }
 0x38d   : > { %4771 = vrot.lane.b32.xlu0 %v17707_v44, %s8827_s25 }
 0x38e   : > { %v12275_v23 = vpop.permute.xlu1 %4593 }
 0x38f   : > { %v12277_v24 = vpop.permute.xlu0 %4595 }
 0x390   : > { %4773 = vrot.lane.b32.xlu1 %v17708_v59, %s8827_s25  ;;  %v17827_v59 = vld [vmem:[#allocation226_spill] sm:$0xff] }
 0x391   : > { %4775 = vrot.lane.b32.xlu0 %v17709_v1, %s8827_s25 }
 0x392   : > { %v12283_v49 = vpop.permute.xlu1 %4597 }
 0x393   : > { %17821 = vst [vmem:[#allocation134_spill] sm:$0xff] %v12283_v49  ;;  %v12285_v58 = vpop.permute.xlu0 %4599 }
 0x394   : > { %17822 = vst [vmem:[#allocation347_spill] sm:$0xff] %v12285_v58  ;;  %4777 = vrot.lane.b32.xlu1 %v10592_v14, %s8827_s25  ;;  %v17830_v58 = vld [vmem:[#allocation227_spill] sm:$0xff] }
 0x395   : > { %4779 = vrot.lane.b32.xlu0 %v17823_v53, %s8827_s25 }
 0x396   : > { %v12291_v44 = vpop.permute.xlu1 %4601 }
 0x397   : > { %17824 = vst [vmem:[#allocation348_spill] sm:$0xff] %v12291_v44  ;;  %v12293_v11 = vpop.permute.xlu0 %4603 }
 0x398   : > { %17825 = vst [vmem:[#allocation349_spill] sm:$0xff] %v12293_v11  ;;  %4781 = vrot.lane.b32.xlu1 %v17826_v36, %s8827_s25  ;;  %v12311_v11 = vld [vmem:[#allocation3 + $0x328] sm:$0x3] }
 0x399   : > { %4783 = vrot.lane.b32.xlu0 %v17827_v59, %s8827_s25  ;;  %17833 = vst [vmem:[#allocation353_spill] sm:$0xff] %v12311_v11  ;;  %v2465_v59 = vrot.slane %v12177_v40, 1  ;;  %v2466_v36 = vrot.slane %v12311_v11, 1  ;;  %v2471_v40 = vrot.slane %v12191_v54, 1 }
 0x39a   : > { %v12299_v1 = vpop.permute.xlu1 %4605 }
 0x39b   : > { %17828 = vst [vmem:[#allocation226_spill] sm:$0xff] %v12299_v1  ;;  %v12301_v49 = vpop.permute.xlu0 %4607  ;;  %v2467_v11 = vsel %vm1167_vm4, %v2465_v59, %v2466_v36  ;;  %v12336_v1 = vld [vmem:[#allocation3 + $0x358] sm:$0x3]  ;;  %v2477_v59 = vrot.slane %v12203_v21, 1 }
 0x39c   : > { %17829 = vst [vmem:[#allocation350_spill] sm:$0xff] %v12301_v49  ;;  %4785 = vrot.lane.b32.xlu1 %v17830_v58, %s8827_s25  ;;  %v12319_v58 = vld [vmem:[#allocation3 + $0x338] sm:$0x3]  ;;  %v2475_v36 = vrot.slane %v12336_v1, 1 }
 0x39d   : > { %4787 = vrot.lane.b32.xlu0 %v10983_v55, %s8827_s25 }
 0x39e   : > { %v12307_v53 = vpop.permute.xlu1 %4609 }
 0x39f   : > { %17831 = vst [vmem:[#allocation351_spill] sm:$0xff] %v12307_v53  ;;  %v12309_v14 = vpop.permute.xlu0 %4611  ;;  %v12325_v53 = vld [vmem:[#allocation3 + $0x348] sm:$0x3] }
 0x3a0   : > { %17832 = vst [vmem:[#allocation352_spill] sm:$0xff] %v12309_v14  ;;  %4789 = vrot.lane.b32.xlu1 %v10986_v26, %s8827_s25  ;;  %17836 = vst [vmem:[#allocation356_spill] sm:$0xff] %v12325_v53  ;;  %v2468_v14 = vrot.slane %v12189_v6, 1  ;;  %v17837_v26 = vld [vmem:[#allocation238_spill] sm:$0xff] }
 0x3a1   : > { %4791 = vrot.lane.b32.xlu0 %v10991_v17, %s8827_s25  ;;  %v2469_v17 = vrot.slane %v12319_v58, 1 }
 0x3a2   : > { %v12321_v49 = vpop.permute.xlu1 %4613 }
 0x3a3   : > { %17834 = vst [vmem:[#allocation354_spill] sm:$0xff] %v12321_v49  ;;  %v12323_v55 = vpop.permute.xlu0 %4615  ;;  %v2472_v49 = vrot.slane %v12325_v53, 1  ;;  %v12352_v53 = vsel %vm1167_vm4, %v2468_v14, %v2469_v17 }
 0x3a4   : > { %17835 = vst [vmem:[#allocation355_spill] sm:$0xff] %v12323_v55  ;;  %4793 = vrot.lane.b32.xlu1 %v10994_v28, %s8827_s25  ;;  %v12338_v55 = vld [vmem:[#allocation3 + $0x368] sm:$0x3]  ;;  %17840 = vst [vmem:[#allocation359_spill] sm:$0xff] %v12352_v53 }
 0x3a5   : > { %4795 = vrot.lane.b32.xlu0 %v17837_v26, %s8827_s25  ;;  %v2474_v26 = vrot.slane %v12201_v33, 1  ;;  %v2478_v28 = vrot.slane %v12338_v55, 1  ;;  %v8699_v33 = vld [vmem:[#allocation3 + $0xe0] sm:$0xff] }
 0x3a6   : > { %v12340_v44 = vpop.permute.xlu1 %4617  ;;  %v5649_v21 = vsel %vm739_vm2, %v8699_v33, %v12025_v42 }
 0x3a7   : > { %17838 = vst [vmem:[#allocation357_spill] sm:$0xff] %v12340_v44  ;;  %v12342_v6 = vpop.permute.xlu0 %4619  ;;  %v12355_v44 = vsel %vm1167_vm4, %v2471_v40, %v2472_v49  ;;  %v12372_v14 = vsel %vm1167_vm4, %v2474_v26, %v2475_v36  ;;  %v12375_v17 = vsel %vm1167_vm4, %v2477_v59, %v2478_v28  ;;  %v2480_v40 = vrot.slane %v12213_v27, 1  ;;  %v12385_v26 = vld [vmem:[#allocation3 + $0x398] sm:$0x3]  ;;  %v8700_v36 = vld [vmem:[#allocation3 + $0xf0] sm:$0xff] }
 0x3a8   : > { %17839 = vst [vmem:[#allocation358_spill] sm:$0xff] %v12342_v6  ;;  %4797 = vrot.lane.b32.xlu1 %v11013_v45, %s8827_s25  ;;  %17841 = vst [vmem:[#allocation360_spill] sm:$0xff] %v12355_v44  ;;  %v12361_v45 = vld [vmem:[#allocation3 + $0x378] sm:$0x3]  ;;  %v5682_v42 = vsel %vm5679_vm11, %v5649_v21, %v12207_v50  ;;  %v5650_v59 = vsel %vm739_vm2, %v8700_v36, %v12033_v32  ;;  %v2486_v21 = vrot.slane %v12225_v3, 1  ;;  %v2487_v32 = vrot.slane %v12385_v26, 1 }
 0x3a9   : > { %4799 = vrot.lane.b32.xlu0 %v2467_v11, %s8827_s25  ;;  %17843 = vst [vmem:[#allocation362_spill] sm:$0xff] %v12361_v45  ;;  %v12363_v11 = vld [vmem:[#allocation3 + $0x388] sm:$0x3]  ;;  %17845 = vst [vmem:[#allocation364_spill] sm:$0xff] %v12372_v14  ;;  %v2481_v49 = vrot.slane %v12361_v45, 1  ;;  %v8701_v45 = vld [vmem:[#allocation3 + $0x100] sm:$0xff] }
 0x3aa   : > { %v12357_v6 = vpop.permute.xlu1 %4621  ;;  %17844 = vst [vmem:[#allocation363_spill] sm:$0xff] %v12363_v11  ;;  %17846 = vst [vmem:[#allocation365_spill] sm:$0xff] %v12375_v17  ;;  %v2484_v33 = vrot.slane %v12363_v11, 1  ;;  %v5651_v11 = vsel %vm739_vm2, %v8701_v45, %v12035_v15 }
 0x3ab   : > { %v12359_v54 = vpop.permute.xlu0 %4655  ;;  %v12399_v50 = vsel %vm1167_vm4, %v2480_v40, %v2481_v49  ;;  %v5684_v45 = vsel %vm5679_vm11, %v5651_v11, %v12219_v20  ;;  %v8703_v49 = vld [vmem:[#allocation3 + $0x120] sm:$0xff]  ;;  %v12425_v11 = vsel %vm1167_vm4, %v2486_v21, %v2487_v32 }
 0x3ac   : > { %17842 = vst [vmem:[#allocation361_spill] sm:$0xff] %v12359_v54  ;;  %4801 = vrot.lane.b32.xlu1 %v12352_v53, %s8827_s25  ;;  %v2483_v54 = vrot.slane %v12215_v63, 1  ;;  %17848 = vst [vmem:[#allocation367_spill] sm:$0xff] %v12399_v50  ;;  %v5653_v20 = vsel %vm739_vm2, %v8703_v49, %v12046_v39  ;;  %v17851_v39 = vld [vmem:[#allocation84_spill] sm:$0xff]  ;;  %v5659_v49 = vsel %vm739_vm2, %v12083_v16, %v12077_v8 }
 0x3ad   : > { %4803 = vrot.lane.b32.xlu0 %v12355_v44, %s8827_s25  ;;  %17850 = vst [vmem:[#allocation369_spill] sm:$0xff] %v12425_v11  ;;  %v5660_v8 = vsel %vm739_vm2, %v12091_v19, %v12087_v48  ;;  %v17859_v48 = vld [vmem:[#allocation140_spill] sm:$0xff] }
 0x3ae   : > { %v12383_v53 = vpop.permute.xlu1 %4657 }
 0x3af   : > { %17847 = vst [vmem:[#allocation366_spill] sm:$0xff] %v12383_v53  ;;  %v4660_v44 = vpop.permute.xlu0 %4659 }
 0x3b0   : > { %v12388_v28 = vsel %vm5712_vm12, %v5682_v42, %v4660_v44  ;;  %4805 = vrot.lane.b32.xlu1 %v12372_v14, %s8827_s25  ;;  %v12402_v44 = vsel %vm1167_vm4, %v2483_v54, %v2484_v33  ;;  %v5683_v42 = vsel %vm5679_vm11, %v5650_v59, %v12217_v51  ;;  %v8702_v54 = vld [vmem:[#allocation3 + $0x110] sm:$0xff]  ;;  %v5686_v59 = vsel %vm5679_vm11, %v5653_v20, %v12229_v38  ;;  %v17854_v38 = vld [vmem:[#allocation88_spill] sm:$0xff] }
 0x3b1   : > { %4807 = vrot.lane.b32.xlu0 %v12375_v17, %s8827_s25  ;;  %17849 = vst [vmem:[#allocation368_spill] sm:$0xff] %v12402_v44  ;;  %v5652_v51 = vsel %vm739_vm2, %v8702_v54, %v12044_v30  ;;  %v17857_v54 = vld [vmem:[#allocation91_spill] sm:$0xff]  ;;  %v17906_v17 = vld [vmem:[#allocation356_spill] sm:$0xff] }
 0x3b2   : > { %v4662_v15 = vpop.permute.xlu1 %4661  ;;  %v5685_v33 = vsel %vm5679_vm11, %v5652_v51, %v12227_v4  ;;  %v5658_v51 = vsel %vm739_vm2, %v12079_v25, %v12075_v31  ;;  %v17858_v31 = vld [vmem:[#allocation118_spill] sm:$0xff]  ;;  %v2496_v14 = vrot.slane %v17906_v17, 2  ;;  %v17910_v17 = vld [vmem:[#allocation341_spill] sm:$0xff] }
 0x3b3   : > { %v4664_v36 = vpop.permute.xlu0 %4663  ;;  %v12411_v53 = vsel %vm5712_vm12, %v5683_v42, %v4662_v15  ;;  %v5691_v20 = vsel %vm5679_vm11, %v5658_v51, %v12251_v0  ;;  %v12480_v0 = vld [vmem:[#allocation3 + $0x1c0] sm:$0xff]  ;;  %v5693_v51 = vsel %vm5679_vm11, %v5660_v8, %v12259_v41  ;;  %v5663_v41 = vsel %vm739_vm2, %v12104_v22, %v12098_v10 }
 0x3b4   : > { %v12414_v40 = vsel %vm5712_vm12, %v5684_v45, %v4664_v36  ;;  %4809 = vrot.lane.b32.xlu1 %v12399_v50, %s8827_s25  ;;  %v12643_v50 = vld [vmem:[#allocation3 + $0x300] sm:$0xff] }
 0x3b5   : > { %4811 = vrot.lane.b32.xlu0 %v12402_v44, %s8827_s25  ;;  %v17898_v44 = vld [vmem:[#allocation334_spill] sm:$0xff] }
 0x3b6   : > { %v4666_v42 = vpop.permute.xlu1 %4665 }
 0x3b7   : > { %v4668_v45 = vpop.permute.xlu0 %4667  ;;  %v12432_v15 = vsel %vm5712_vm12, %v5685_v33, %v4666_v42  ;;  %v5692_v33 = vsel %vm5679_vm11, %v5659_v49, %v12253_v9  ;;  %v5661_v9 = vsel %vm739_vm2, %v12480_v0, %v12089_v43  ;;  %v12499_v43 = vld [vmem:[#allocation3 + $0x1d0] sm:$0xff] }
 0x3b8   : > { %v12435_v30 = vsel %vm5712_vm12, %v5686_v59, %v4668_v45  ;;  %4813 = vrot.lane.b32.xlu1 %v12425_v11, %s8827_s25  ;;  %v5694_v49 = vsel %vm5679_vm11, %v5661_v9, %v12261_v52  ;;  %17860 = vst [vmem:[#allocation140_spill] sm:$0xff] %v12499_v43  ;;  %v5662_v52 = vsel %vm739_vm2, %v12499_v43, %v12096_v7  ;;  %v17861_v7 = vld [vmem:[#allocation141_spill] sm:$0xff] }
 0x3b9   : > { %4847 = vrot.lane.b32.xlu0 %v17851_v39, %s8828_s26  ;;  %v5695_v8 = vsel %vm5679_vm11, %v5662_v52, %v12267_v56  ;;  %v5696_v9 = vsel %vm5679_vm11, %v5663_v41, %v12269_v35  ;;  %v5664_v56 = vsel %vm739_vm2, %v12112_v37, %v12108_v13  ;;  %v5665_v35 = vsel %vm739_vm2, %v12116_v12, %v12110_v60  ;;  %v17863_v13 = vld [vmem:[#allocation134_spill] sm:$0xff] }
 0x3ba   : > { %v12441_v21 = vpop.permute.xlu1 %4669  ;;  %v5697_v10 = vsel %vm5679_vm11, %v5664_v56, %v12275_v23  ;;  %v5666_v23 = vsel %vm739_vm2, %v12124_v61, %v12120_v46  ;;  %v17865_v46 = vld [vmem:[#allocation167_spill] sm:$0xff]  ;;  %17900 = vst [vmem:[#allocation134_spill] sm:$0xff] %v12643_v50 }
 0x3bb   : > { %17852 = vst [vmem:[#allocation84_spill] sm:$0xff] %v12441_v21  ;;  %v12443_v4 = vpop.permute.xlu0 %4671 }
 0x3bc   : > { %17853 = vst [vmem:[#allocation370_spill] sm:$0xff] %v12443_v4  ;;  %4849 = vrot.lane.b32.xlu1 %v17854_v38, %s8828_s26 }
 0x3bd   : > { %4851 = vrot.lane.b32.xlu0 %v17728_v62, %s8828_s26  ;;  %v17896_v62 = vld [vmem:[#allocation355_spill] sm:$0xff] }
 0x3be   : > { %v12449_v32 = vpop.permute.xlu1 %4673 }
 0x3bf   : > { %17855 = vst [vmem:[#allocation371_spill] sm:$0xff] %v12449_v32  ;;  %v12451_v36 = vpop.permute.xlu0 %4675 }
 0x3c0   : > { %17856 = vst [vmem:[#allocation372_spill] sm:$0xff] %v12451_v36  ;;  %4853 = vrot.lane.b32.xlu1 %v17857_v54, %s8828_s26  ;;  %v17868_v36 = vld [vmem:[#allocation320_spill] sm:$0xff] }
 0x3c1   : > { %4855 = vrot.lane.b32.xlu0 %v17731_v47, %s8828_s26  ;;  %v17893_v47 = vld [vmem:[#allocation333_spill] sm:$0xff] }
 0x3c2   : > { %v4678_v59 = vpop.permute.xlu1 %4677 }
 0x3c3   : > { %v4680_v42 = vpop.permute.xlu0 %4679  ;;  %v12468_v45 = vsel %vm5712_vm12, %v5691_v20, %v4678_v59 }
 0x3c4   : > { %v12471_v39 = vsel %vm5712_vm12, %v5692_v33, %v4680_v42  ;;  %4857 = vrot.lane.b32.xlu1 %v17732_v34, %s8828_s26  ;;  %v17890_v34 = vld [vmem:[#allocation331_spill] sm:$0xff] }
 0x3c5   : > { %4859 = vrot.lane.b32.xlu0 %v17858_v31, %s8828_s26  ;;  %v17888_v31 = vld [vmem:[#allocation258_spill] sm:$0xff] }
 0x3c6   : > { %v4682_v20 = vpop.permute.xlu1 %4681 }
 0x3c7   : > { %v4684_v33 = vpop.permute.xlu0 %4683  ;;  %v12490_v59 = vsel %vm5712_vm12, %v5693_v51, %v4682_v20 }
 0x3c8   : > { %v12493_v42 = vsel %vm5712_vm12, %v5694_v49, %v4684_v33  ;;  %4861 = vrot.lane.b32.xlu1 %v17740_v29, %s8828_s26 }
 0x3c9   : > { %4863 = vrot.lane.b32.xlu0 %v17859_v48, %s8828_s26  ;;  %v5698_v48 = vsel %vm5679_vm11, %v5665_v35, %v12277_v24  ;;  %v17862_v24 = vld [vmem:[#allocation317_spill] sm:$0xff] }
 0x3ca   : > { %v4686_v51 = vpop.permute.xlu1 %4685  ;;  %v5667_v60 = vsel %vm739_vm2, %v17862_v24, %v12122_v57  ;;  %v17867_v57 = vld [vmem:[#allocation318_spill] sm:$0xff] }
 0x3cb   : > { %v4688_v49 = vpop.permute.xlu0 %4687  ;;  %v12512_v20 = vsel %vm5712_vm12, %v5695_v8, %v4686_v51  ;;  %v5699_v51 = vsel %vm5679_vm11, %v5666_v23, %v17863_v13  ;;  %v5668_v23 = vsel %vm739_vm2, %v17868_v36, %v17867_v57  ;;  %v12564_v13 = vld [vmem:[#allocation3 + $0x260] sm:$0xff] }
 0x3cc   : > { %v12515_v33 = vsel %vm5712_vm12, %v5696_v9, %v4688_v49  ;;  %4865 = vrot.lane.b32.xlu1 %v17861_v7, %s8828_s26  ;;  %v17864_v49 = vld [vmem:[#allocation347_spill] sm:$0xff] }
 0x3cd   : > { %4867 = vrot.lane.b32.xlu0 %v17745_v2, %s8828_s26  ;;  %v5700_v56 = vsel %vm5679_vm11, %v5667_v60, %v17864_v49  ;;  %v17869_v60 = vld [vmem:[#allocation319_spill] sm:$0xff]  ;;  %v17870_v49 = vld [vmem:[#allocation348_spill] sm:$0xff] }
 0x3ce   : > { %v4690_v52 = vpop.permute.xlu1 %4689  ;;  %v17872_v57 = vld [vmem:[#allocation179_spill] sm:$0xff] }
 0x3cf   : > { %v4692_v41 = vpop.permute.xlu0 %4691  ;;  %v12532_v8 = vsel %vm5712_vm12, %v5697_v10, %v4690_v52  ;;  %v17882_v2 = vld [vmem:[#allocation327_spill] sm:$0xff] }
 0x3d0   : > { %v12535_v9 = vsel %vm5712_vm12, %v5698_v48, %v4692_v41  ;;  %4869 = vrot.lane.b32.xlu1 %v17749_v18, %s8828_s26  ;;  %v17866_v41 = vld [vmem:[#allocation176_spill] sm:$0xff]  ;;  %v17885_v7 = vld [vmem:[#allocation351_spill] sm:$0xff] }
 0x3d1   : > { %4871 = vrot.lane.b32.xlu0 %v17750_v5, %s8828_s26  ;;  %v17877_v5 = vld [vmem:[#allocation226_spill] sm:$0xff] }
 0x3d2   : > { %v4694_v35 = vpop.permute.xlu1 %4693 }
 0x3d3   : > { %v4696_v10 = vpop.permute.xlu0 %4695  ;;  %v12552_v48 = vsel %vm5712_vm12, %v5699_v51, %v4694_v35  ;;  %v5669_v51 = vsel %vm739_vm2, %v12564_v13, %v17869_v60  ;;  %v17871_v35 = vld [vmem:[#allocation349_spill] sm:$0xff] }
 0x3d4   : > { %v12555_v52 = vsel %vm5712_vm12, %v5700_v56, %v4696_v10  ;;  %4873 = vrot.lane.b32.xlu1 %v17865_v46, %s8828_s26  ;;  %v5701_v56 = vsel %vm5679_vm11, %v5668_v23, %v17870_v49  ;;  %v5702_v10 = vsel %vm5679_vm11, %v5669_v51, %v17871_v35  ;;  %v8707_v60 = vld [vmem:[#allocation3 + $0x270] sm:$0xff]  ;;  %v17875_v49 = vld [vmem:[#allocation322_spill] sm:$0xff]  ;;  %v17876_v51 = vld [vmem:[#allocation324_spill] sm:$0xff] }
 0x3d5   : > { %4875 = vrot.lane.b32.xlu0 %v17866_v41, %s8828_s26  ;;  %v17873_v41 = vld [vmem:[#allocation252_spill] sm:$0xff]  ;;  %v17874_v46 = vld [vmem:[#allocation321_spill] sm:$0xff]  ;;  %v5671_v35 = vsel %vm739_vm2, %v17876_v51, %v17875_v49 }
 0x3d6   : > { %v4698_v32 = vpop.permute.xlu1 %4697  ;;  %v5670_v23 = vsel %vm739_vm2, %v8707_v60, %v17874_v46  ;;  %v17879_v46 = vld [vmem:[#allocation253_spill] sm:$0xff]  ;;  %v17880_v60 = vld [vmem:[#allocation254_spill] sm:$0xff] }
 0x3d7   : > { %v4700_v4 = vpop.permute.xlu0 %4699  ;;  %v12574_v21 = vsel %vm5712_vm12, %v5701_v56, %v4698_v32  ;;  %v5703_v32 = vsel %vm5679_vm11, %v5670_v23, %v17877_v5  ;;  %v17878_v56 = vld [vmem:[#allocation350_spill] sm:$0xff]  ;;  %v17881_v49 = vld [vmem:[#allocation325_spill] sm:$0xff] }
 0x3d8   : > { %v12577_v43 = vsel %vm5712_vm12, %v5702_v10, %v4700_v4  ;;  %4877 = vrot.lane.b32.xlu1 %v17872_v57, %s8828_s26  ;;  %v5704_v4 = vsel %vm5679_vm11, %v5671_v35, %v17878_v56  ;;  %v5672_v5 = vsel %vm739_vm2, %v17882_v2, %v17881_v49  ;;  %v17883_v23 = vld [vmem:[#allocation326_spill] sm:$0xff]  ;;  %v17884_v35 = vld [vmem:[#allocation328_spill] sm:$0xff]  ;;  %v17887_v49 = vld [vmem:[#allocation257_spill] sm:$0xff] }
 0x3d9   : > { %4879 = vrot.lane.b32.xlu0 %v17873_v41, %s8828_s26  ;;  %v5673_v56 = vsel %vm739_vm2, %v17884_v35, %v17883_v23  ;;  %v17889_v23 = vld [vmem:[#allocation329_spill] sm:$0xff] }
 0x3da   : > { %v4702_v10 = vpop.permute.xlu1 %4701 }
 0x3db   : > { %v4704_v18 = vpop.permute.xlu0 %4703  ;;  %v12593_v57 = vsel %vm5712_vm12, %v5703_v32, %v4702_v10  ;;  %v5705_v32 = vsel %vm5679_vm11, %v5672_v5, %v17885_v7  ;;  %v17886_v10 = vld [vmem:[#allocation352_spill] sm:$0xff]  ;;  %v5674_v7 = vsel %vm739_vm2, %v17890_v34, %v17889_v23  ;;  %v17891_v5 = vld [vmem:[#allocation330_spill] sm:$0xff] }
 0x3dc   : > { %v12596_v41 = vsel %vm5712_vm12, %v5704_v4, %v4704_v18  ;;  %4881 = vrot.lane.b32.xlu1 %v17879_v46, %s8828_s26  ;;  %v5706_v18 = vsel %vm5679_vm11, %v5673_v56, %v17886_v10  ;;  %v17892_v56 = vld [vmem:[#allocation332_spill] sm:$0xff] }
 0x3dd   : > { %4883 = vrot.lane.b32.xlu0 %v17880_v60, %s8828_s26  ;;  %v5675_v10 = vsel %vm739_vm2, %v17892_v56, %v17891_v5  ;;  %v17899_v5 = vld [vmem:[#allocation336_spill] sm:$0xff] }
 0x3de   : > { %v4706_v4 = vpop.permute.xlu1 %4705 }
 0x3df   : > { %v4708_v29 = vpop.permute.xlu0 %4707  ;;  %v12613_v46 = vsel %vm5712_vm12, %v5705_v32, %v4706_v4  ;;  %v2489_v32 = vrot.slane %v17893_v47, 2  ;;  %v17894_v4 = vld [vmem:[#allocation353_spill] sm:$0xff]  ;;  %v5676_v47 = vsel %vm739_vm2, %v17899_v5, %v17898_v44 }
 0x3e0   : > { %v12616_v60 = vsel %vm5712_vm12, %v5706_v18, %v4708_v29  ;;  %4885 = vrot.lane.b32.xlu1 %v17887_v49, %s8828_s26  ;;  %v2490_v54 = vrot.slane %v17894_v4, 2  ;;  %v17895_v29 = vld [vmem:[#allocation354_spill] sm:$0xff]  ;;  %v5708_v49 = vsel %vm5679_vm11, %v5675_v10, %v17896_v62  ;;  %v17901_v4 = vld [vmem:[#allocation335_spill] sm:$0xff]  ;;  %v17907_v5 = vld [vmem:[#allocation357_spill] sm:$0xff] }
 0x3e1   : > { %4887 = vrot.lane.b32.xlu0 %v17888_v31, %s8828_s26  ;;  %v5707_v18 = vsel %vm5679_vm11, %v5674_v7, %v17895_v29  ;;  %v5677_v7 = vsel %vm739_vm2, %v12643_v50, %v17901_v4  ;;  %v17902_v29 = vld [vmem:[#allocation337_spill] sm:$0xff]  ;;  %v17903_v10 = vld [vmem:[#allocation259_spill] sm:$0xff]  ;;  %v5709_v56 = vsel %vm5679_vm11, %v5676_v47, %v17907_v5  ;;  %v17908_v4 = vld [vmem:[#allocation358_spill] sm:$0xff] }
 0x3e2   : > { %v4710_v38 = vpop.permute.xlu1 %4709  ;;  %v2492_v62 = vrot.slane %v17902_v29, 2  ;;  %v5710_v29 = vsel %vm5679_vm11, %v5677_v7, %v17908_v4  ;;  %v17911_v5 = vld [vmem:[#allocation342_spill] sm:$0xff]  ;;  %v2502_v7 = vrot.slane %v12338_v55, 2  ;;  %v17912_v4 = vld [vmem:[#allocation339_spill] sm:$0xff] }
 0x3e3   : > { %v4712_v31 = vpop.permute.xlu0 %4711  ;;  %v12635_v11 = vsel %vm5712_vm12, %v5707_v18, %v4710_v38  ;;  %v17904_v38 = vld [vmem:[#allocation262_spill] sm:$0xff]  ;;  %v2501_v47 = vrot.slane %v17911_v5, 2 }
 0x3e4   : > { %v12638_v23 = vsel %vm5712_vm12, %v5708_v49, %v4712_v31  ;;  %4889 = vrot.lane.b32.xlu1 %v17903_v10, %s8828_s26  ;;  %v2491_v31 = vsel %vm1468_vm5, %v2489_v32, %v2490_v54  ;;  %v2493_v49 = vrot.slane %v12319_v58, 2  ;;  %v17905_v18 = vld [vmem:[#allocation338_spill] sm:$0xff]  ;;  %v17909_v58 = vld [vmem:[#allocation263_spill] sm:$0xff]  ;;  %v2498_v54 = vrot.slane %v17910_v17, 2 }
 0x3e5   : > { %17897 = vst [vmem:[#allocation317_spill] sm:$0xff] %v12638_v23  ;;  %4891 = vrot.lane.b32.xlu0 %v17904_v38, %s8828_s26  ;;  %v2495_v44 = vrot.slane %v17905_v18, 2  ;;  %v2499_v32 = vrot.slane %v12336_v1, 2  ;;  %v17913_v18 = vld [vmem:[#allocation40_spill] sm:$0xff] }
 0x3e6   : > { %v4714_v50 = vpop.permute.xlu1 %4713 }
 0x3e7   : > { %v4716_v23 = vpop.permute.xlu0 %4715  ;;  %v12662_v10 = vsel %vm5712_vm12, %v5709_v56, %v4714_v50  ;;  %v5678_v50 = vsel %vm739_vm2, %v17913_v18, %v17912_v4  ;;  %v12678_v56 = vsel %vm1468_vm5, %v2492_v62, %v2493_v49  ;;  %v12695_v55 = vsel %vm1468_vm5, %v2498_v54, %v2499_v32  ;;  %v17919_v62 = vld [vmem:[#allocation362_spill] sm:$0xff] }
 0x3e8   : > { %v12665_v38 = vsel %vm5712_vm12, %v5710_v29, %v4716_v23  ;;  %4893 = vrot.lane.b32.xlu1 %v17909_v58, %s8828_s26  ;;  %17914 = vst [vmem:[#allocation347_spill] sm:$0xff] %v12678_v56  ;;  %v12681_v23 = vsel %vm1468_vm5, %v2495_v44, %v2496_v14  ;;  %v5711_v29 = vsel %vm5679_vm11, %v5678_v50, %v12357_v6  ;;  %17917 = vst [vmem:[#allocation319_spill] sm:$0xff] %v12695_v55  ;;  %v17920_v44 = vld [vmem:[#allocation363_spill] sm:$0xff] }
 0x3e9   : > { %4895 = vrot.lane.b32.xlu0 %v2491_v31, %s8828_s26  ;;  %17915 = vst [vmem:[#allocation318_spill] sm:$0xff] %v12681_v23  ;;  %v12698_v14 = vsel %vm1468_vm5, %v2501_v47, %v2502_v7  ;;  %v2504_v6 = vrot.slane %v12213_v27, 2  ;;  %v2505_v49 = vrot.slane %v17919_v62, 2  ;;  %v2507_v18 = vrot.slane %v12215_v63, 2 }
 0x3ea   : > { %v4718_v31 = vpop.permute.xlu1 %4717  ;;  %17918 = vst [vmem:[#allocation348_spill] sm:$0xff] %v12698_v14  ;;  %v2508_v4 = vrot.slane %v17920_v44, 2  ;;  %v2510_v47 = vrot.slane %v12225_v3, 2  ;;  %v2511_v7 = vrot.slane %v12385_v26, 2 }
 0x3eb   : > { %v12685_v58 = vpop.permute.xlu0 %4751  ;;  %v12688_v1 = vsel %vm5712_vm12, %v5711_v29, %v4718_v31  ;;  %v12715_v54 = vsel %vm1468_vm5, %v2504_v6, %v2505_v49 }
 0x3ec   : > { %17916 = vst [vmem:[#allocation320_spill] sm:$0xff] %v12685_v58  ;;  %4897 = vrot.lane.b32.xlu1 %v12678_v56, %s8828_s26  ;;  %17922 = vst [vmem:[#allocation252_spill] sm:$0xff] %v12715_v54  ;;  %v12718_v32 = vsel %vm1468_vm5, %v2507_v18, %v2508_v4  ;;  %v12735_v6 = vsel %vm1468_vm5, %v2510_v47, %v2511_v7  ;;  %v17928_v7 = vld [vmem:[#allocation311_spill] sm:$0xff] }
 0x3ed   : > { %4899 = vrot.lane.b32.xlu0 %v12681_v23, %s8828_s26  ;;  %17923 = vst [vmem:[#allocation321_spill] sm:$0xff] %v12718_v32  ;;  %17924 = vst [vmem:[#allocation322_spill] sm:$0xff] %v12735_v6 }
 0x3ee   : > { %v12704_v50 = vpop.permute.xlu1 %4753 }
 0x3ef   : > { %17921 = vst [vmem:[#allocation349_spill] sm:$0xff] %v12704_v50  ;;  %v4756_v29 = vpop.permute.xlu0 %4755 }
 0x3f0   : > { %v12708_v31 = vsel %vm5745_vm13, %v12388_v28, %v4756_v29  ;;  %4901 = vrot.lane.b32.xlu1 %v12695_v55, %s8828_s26 }
 0x3f1   : > { %4903 = vrot.lane.b32.xlu0 %v12698_v14, %s8828_s26 }
 0x3f2   : > { %v4758_v62 = vpop.permute.xlu1 %4757 }
 0x3f3   : > { %v4760_v44 = vpop.permute.xlu0 %4759  ;;  %v12724_v28 = vsel %vm5745_vm13, %v12411_v53, %v4758_v62 }
 0x3f4   : > { %v12728_v29 = vsel %vm5745_vm13, %v12414_v40, %v4760_v44  ;;  %4905 = vrot.lane.b32.xlu1 %v12715_v54, %s8828_s26  ;;  %v17925_v40 = vld [vmem:[#allocation310_spill] sm:$0xff]  ;;  %v17932_v44 = vld [vmem:[#allocation315_spill] sm:$0xff] }
 0x3f5   : > { %4907 = vrot.lane.b32.xlu0 %v12718_v32, %s8828_s26 }
 0x3f6   : > { %v4762_v26 = vpop.permute.xlu1 %4761 }
 0x3f7   : > { %v4764_v49 = vpop.permute.xlu0 %4763  ;;  %v12739_v18 = vsel %vm5745_vm13, %v12432_v15, %v4762_v26  ;;  %v17929_v15 = vld [vmem:[#allocation314_spill] sm:$0xff] }
 0x3f8   : > { %v12743_v53 = vsel %vm5745_vm13, %v12435_v30, %v4764_v49  ;;  %4909 = vrot.lane.b32.xlu1 %v12735_v6, %s8828_s26 }
 0x3f9   : > { %4943 = vrot.lane.b32.xlu0 %v17925_v40, %s8829_s30 }
 0x3fa   : > { %v12749_v4 = vpop.permute.xlu1 %4765 }
 0x3fb   : > { %17926 = vst [vmem:[#allocation324_spill] sm:$0xff] %v12749_v4  ;;  %v12751_v47 = vpop.permute.xlu0 %4767 }
 0x3fc   : > { %17927 = vst [vmem:[#allocation226_spill] sm:$0xff] %v12751_v47  ;;  %4945 = vrot.lane.b32.xlu1 %v17928_v7, %s8829_s30 }
 0x3fd   : > { %4947 = vrot.lane.b32.xlu0 %v17929_v15, %s8829_s30 }
 0x3fe   : > { %v12757_v62 = vpop.permute.xlu1 %4769 }
 0x3ff   : > { %17930 = vst [vmem:[#allocation350_spill] sm:$0xff] %v12757_v62  ;;  %v12759_v30 = vpop.permute.xlu0 %4771 }
 0x400   : > { %17931 = vst [vmem:[#allocation325_spill] sm:$0xff] %v12759_v30  ;;  %4949 = vrot.lane.b32.xlu1 %v17932_v44, %s8829_s30 }
 0x401   : > { %4951 = vrot.lane.b32.xlu0 %v12079_v25, %s8829_s30 }
 0x402   : > { %v4774_v26 = vpop.permute.xlu1 %4773 }
 0x403   : > { %v4776_v49 = vpop.permute.xlu0 %4775  ;;  %v12767_v40 = vsel %vm5745_vm13, %v12468_v45, %v4774_v26 }
 0x404   : > { %v12771_v7 = vsel %vm5745_vm13, %v12471_v39, %v4776_v49  ;;  %4953 = vrot.lane.b32.xlu1 %v12083_v16, %s8829_s30  ;;  %v17933_v39 = vld [vmem:[#allocation316_spill] sm:$0xff] }
 0x405   : > { %4955 = vrot.lane.b32.xlu0 %v12091_v19, %s8829_s30 }
 0x406   : > { %v4778_v15 = vpop.permute.xlu1 %4777 }
 0x407   : > { %v4780_v44 = vpop.permute.xlu0 %4779  ;;  %v12779_v25 = vsel %vm5745_vm13, %v12490_v59, %v4778_v15 }
 0x408   : > { %v12783_v45 = vsel %vm5745_vm13, %v12493_v42, %v4780_v44  ;;  %4957 = vrot.lane.b32.xlu1 %v12480_v0, %s8829_s30 }
 0x409   : > { %4959 = vrot.lane.b32.xlu0 %v17933_v39, %s8829_s30  ;;  %v17935_v39 = vld [vmem:[#allocation317_spill] sm:$0xff] }
 0x40a   : > { %v4782_v16 = vpop.permute.xlu1 %4781 }
 0x40b   : > { %v4784_v26 = vpop.permute.xlu0 %4783  ;;  %v12791_v19 = vsel %vm5745_vm13, %v12512_v20, %v4782_v16  ;;  %v17936_v16 = vld [vmem:[#allocation332_spill] sm:$0xff] }
 0x40c   : > { %v12795_v59 = vsel %vm5745_vm13, %v12515_v33, %v4784_v26  ;;  %4961 = vrot.lane.b32.xlu1 %v12104_v22, %s8829_s30 }
 0x40d   : > { %4963 = vrot.lane.b32.xlu0 %v12112_v37, %s8829_s30 }
 0x40e   : > { %v4786_v0 = vpop.permute.xlu1 %4785 }
 0x40f   : > { %v4788_v42 = vpop.permute.xlu0 %4787  ;;  %v12803_v49 = vsel %vm5745_vm13, %v12532_v8, %v4786_v0  ;;  %v17938_v0 = vld [vmem:[#allocation134_spill] sm:$0xff] }
 0x410   : > { %v12807_v20 = vsel %vm5745_vm13, %v12535_v9, %v4788_v42  ;;  %4965 = vrot.lane.b32.xlu1 %v12116_v12, %s8829_s30  ;;  %v17939_v42 = vld [vmem:[#allocation337_spill] sm:$0xff] }
 0x411   : > { %4967 = vrot.lane.b32.xlu0 %v12124_v61, %s8829_s30 }
 0x412   : > { %v4790_v22 = vpop.permute.xlu1 %4789 }
 0x413   : > { %v4792_v33 = vpop.permute.xlu0 %4791  ;;  %v12815_v37 = vsel %vm5745_vm13, %v12552_v48, %v4790_v22 }
 0x414   : > { %v12819_v8 = vsel %vm5745_vm13, %v12555_v52, %v4792_v33  ;;  %4969 = vrot.lane.b32.xlu1 %v17862_v24, %s8829_s30  ;;  %v17934_v52 = vld [vmem:[#allocation323_spill] sm:$0xff] }
 0x415   : > { %4971 = vrot.lane.b32.xlu0 %v17868_v36, %s8829_s30 }
 0x416   : > { %v4794_v12 = vpop.permute.xlu1 %4793 }
 0x417   : > { %v4796_v9 = vpop.permute.xlu0 %4795  ;;  %v12827_v61 = vsel %vm5745_vm13, %v12574_v21, %v4794_v12 }
 0x418   : > { %v12831_v48 = vsel %vm5745_vm13, %v12577_v43, %v4796_v9  ;;  %4973 = vrot.lane.b32.xlu1 %v12564_v13, %s8829_s30 }
 0x419   : > { %4975 = vrot.lane.b32.xlu0 %v17934_v52, %s8829_s30 }
 0x41a   : > { %v4798_v24 = vpop.permute.xlu1 %4797 }
 0x41b   : > { %v4800_v15 = vpop.permute.xlu0 %4799  ;;  %v12839_v36 = vsel %vm5745_vm13, %v12593_v57, %v4798_v24 }
 0x41c   : > { %v12843_v21 = vsel %vm5745_vm13, %v12596_v41, %v4800_v15  ;;  %4977 = vrot.lane.b32.xlu1 %v17876_v51, %s8829_s30 }
 0x41d   : > { %4979 = vrot.lane.b32.xlu0 %v17882_v2, %s8829_s30 }
 0x41e   : > { %v4802_v43 = vpop.permute.xlu1 %4801 }
 0x41f   : > { %v4804_v13 = vpop.permute.xlu0 %4803  ;;  %v12851_v44 = vsel %vm5745_vm13, %v12613_v46, %v4802_v43 }
 0x420   : > { %v12855_v57 = vsel %vm5745_vm13, %v12616_v60, %v4804_v13  ;;  %4981 = vrot.lane.b32.xlu1 %v17884_v35, %s8829_s30  ;;  %v17937_v60 = vld [vmem:[#allocation336_spill] sm:$0xff]  ;;  %v17946_v13 = vld [vmem:[#allocation86_spill] sm:$0xff] }
 0x421   : > { %4983 = vrot.lane.b32.xlu0 %v17890_v34, %s8829_s30 }
 0x422   : > { %v4806_v51 = vpop.permute.xlu1 %4805 }
 0x423   : > { %v4808_v41 = vpop.permute.xlu0 %4807  ;;  %v12863_v2 = vsel %vm5745_vm13, %v12635_v11, %v4806_v51 }
 0x424   : > { %v12867_v46 = vsel %vm5745_vm13, %v17935_v39, %v4808_v41  ;;  %4985 = vrot.lane.b32.xlu1 %v17936_v16, %s8829_s30  ;;  %v17950_v41 = vld [vmem:[#allocation94_spill] sm:$0xff]  ;;  %v17951_v39 = vld [vmem:[#allocation105_spill] sm:$0xff] }
 0x425   : > { %4987 = vrot.lane.b32.xlu0 %v17937_v60, %s8829_s30 }
 0x426   : > { %v4810_v35 = vpop.permute.xlu1 %4809 }
 0x427   : > { %v4812_v26 = vpop.permute.xlu0 %4811  ;;  %v12875_v34 = vsel %vm5745_vm13, %v12662_v10, %v4810_v35  ;;  %v17941_v10 = vld [vmem:[#allocation338_spill] sm:$0xff] }
 0x428   : > { %v12879_v11 = vsel %vm5745_vm13, %v12665_v38, %v4812_v26  ;;  %4989 = vrot.lane.b32.xlu1 %v17938_v0, %s8829_s30  ;;  %v17952_v0 = vld [vmem:[#allocation113_spill] sm:$0xff] }
 0x429   : > { %4991 = vrot.lane.b32.xlu0 %v17939_v42, %s8829_s30  ;;  %v17953_v42 = vld [vmem:[#allocation117_spill] sm:$0xff] }
 0x42a   : > { %v4814_v22 = vpop.permute.xlu1 %4813 }
 0x42b   : > { %v12885_v33 = vpop.permute.xlu0 %4847  ;;  %v12889_v12 = vsel %vm5745_vm13, %v12688_v1, %v4814_v22 }
 0x42c   : > { %17940 = vst [vmem:[#allocation327_spill] sm:$0xff] %v12885_v33  ;;  %4993 = vrot.lane.b32.xlu1 %v17941_v10, %s8829_s30  ;;  %v2046_v33 = vld [vmem:[#allocation3 + $0x3a8] sm:$0x3] }
 0x42d   : > { %4995 = vrot.lane.b32.xlu0 %v17910_v17, %s8829_s30 }
 0x42e   : > { %v12895_v38 = vpop.permute.xlu1 %4849 }
 0x42f   : > { %17942 = vst [vmem:[#allocation326_spill] sm:$0xff] %v12895_v38  ;;  %v4852_v9 = vpop.permute.xlu0 %4851 }
 0x430   : > { %v12899_v52 = vsel %vm5778_vm14, %v12708_v31, %v4852_v9  ;;  %4997 = vrot.lane.b32.xlu1 %v17911_v5, %s8829_s30  ;;  %v12917_v5 = vld [vmem:[#allocation3 + $0x3a0] sm:$0xff] }
 0x431   : > { %4999 = vrot.lane.b32.xlu0 %v12213_v27, %s8829_s30 }
 0x432   : > { %v4854_v1 = vpop.permute.xlu1 %4853 }
 0x433   : > { %v4856_v24 = vpop.permute.xlu0 %4855  ;;  %v12907_v15 = vsel %vm5778_vm14, %v12724_v28, %v4854_v1  ;;  %v17954_v1 = vld [vmem:[#allocation112_spill] sm:$0xff] }
 0x434   : > { %v12911_v17 = vsel %vm5778_vm14, %v12728_v29, %v4856_v24  ;;  %5001 = vrot.lane.b32.xlu1 %v12215_v63, %s8829_s30  ;;  %v17943_v63 = vld [vmem:[#allocation82_spill] sm:$0xff] }
 0x435   : > { %5003 = vrot.lane.b32.xlu0 %v12225_v3, %s8829_s30 }
 0x436   : > { %v4858_v31 = vpop.permute.xlu1 %4857 }
 0x437   : > { %v4860_v27 = vpop.permute.xlu0 %4859  ;;  %v12921_v43 = vsel %vm5778_vm14, %v12739_v18, %v4858_v31  ;;  %v17947_v18 = vld [vmem:[#allocation87_spill] sm:$0xff] }
 0x438   : > { %v12925_v28 = vsel %vm5778_vm14, %v12743_v53, %v4860_v27  ;;  %5005 = vrot.lane.b32.xlu1 %v12917_v5, %s8829_s30  ;;  %s8835_s30 = smov 68  }
 0x439   : > { %5039 = vrot.lane.b32.xlu0 %v17943_v63, %s8830_s6  ;;  %v17956_v63 = vld [vmem:[#allocation136_spill] sm:$0xff] }
 0x43a   : > { %v12931_v3 = vpop.permute.xlu1 %4861 }
 0x43b   : > { %17944 = vst [vmem:[#allocation328_spill] sm:$0xff] %v12931_v3  ;;  %v12933_v29 = vpop.permute.xlu0 %4863 }
 0x43c   : > { %17945 = vst [vmem:[#allocation351_spill] sm:$0xff] %v12933_v29  ;;  %5041 = vrot.lane.b32.xlu1 %v17946_v13, %s8830_s6 }
 0x43d   : > { %5043 = vrot.lane.b32.xlu0 %v17947_v18, %s8830_s6 }
 0x43e   : > { %v12939_v51 = vpop.permute.xlu1 %4865 }
 0x43f   : > { %17948 = vst [vmem:[#allocation352_spill] sm:$0xff] %v12939_v51  ;;  %v12941_v53 = vpop.permute.xlu0 %4867 }
 0x440   : > { %17949 = vst [vmem:[#allocation329_spill] sm:$0xff] %v12941_v53  ;;  %5045 = vrot.lane.b32.xlu1 %v17950_v41, %s8830_s6 }
 0x441   : > { %5047 = vrot.lane.b32.xlu0 %v17951_v39, %s8830_s6 }
 0x442   : > { %v4870_v16 = vpop.permute.xlu1 %4869 }
 0x443   : > { %v4872_v60 = vpop.permute.xlu0 %4871  ;;  %v12949_v35 = vsel %vm5778_vm14, %v12767_v40, %v4870_v16 }
 0x444   : > { %v12953_v26 = vsel %vm5778_vm14, %v12771_v7, %v4872_v60  ;;  %5049 = vrot.lane.b32.xlu1 %v17952_v0, %s8830_s6  ;;  %v17955_v7 = vld [vmem:[#allocation135_spill] sm:$0xff] }
 0x445   : > { %5051 = vrot.lane.b32.xlu0 %v17953_v42, %s8830_s6 }
 0x446   : > { %v4874_v22 = vpop.permute.xlu1 %4873 }
 0x447   : > { %v4876_v10 = vpop.permute.xlu0 %4875  ;;  %v12961_v9 = vsel %vm5778_vm14, %v12779_v25, %v4874_v22 }
 0x448   : > { %v12965_v40 = vsel %vm5778_vm14, %v12783_v45, %v4876_v10  ;;  %5053 = vrot.lane.b32.xlu1 %v17954_v1, %s8830_s6  ;;  %v17957_v45 = vld [vmem:[#allocation139_spill] sm:$0xff]  ;;  %v17958_v10 = vld [vmem:[#allocation149_spill] sm:$0xff] }
 0x449   : > { %5055 = vrot.lane.b32.xlu0 %v17955_v7, %s8830_s6 }
 0x44a   : > { %v4878_v24 = vpop.permute.xlu1 %4877 }
 0x44b   : > { %v4880_v31 = vpop.permute.xlu0 %4879  ;;  %v12973_v27 = vsel %vm5778_vm14, %v12791_v19, %v4878_v24 }
 0x44c   : > { %v12977_v25 = vsel %vm5778_vm14, %v12795_v59, %v4880_v31  ;;  %5057 = vrot.lane.b32.xlu1 %v17956_v63, %s8830_s6  ;;  %v17959_v59 = vld [vmem:[#allocation162_spill] sm:$0xff] }
 0x44d   : > { %5059 = vrot.lane.b32.xlu0 %v17957_v45, %s8830_s6 }
 0x44e   : > { %v4882_v16 = vpop.permute.xlu1 %4881 }
 0x44f   : > { %v4884_v60 = vpop.permute.xlu0 %4883  ;;  %v12985_v22 = vsel %vm5778_vm14, %v12803_v49, %v4882_v16  ;;  %v17960_v16 = vld [vmem:[#allocation172_spill] sm:$0xff] }
 0x450   : > { %v12989_v19 = vsel %vm5778_vm14, %v12807_v20, %v4884_v60  ;;  %5061 = vrot.lane.b32.xlu1 %v17958_v10, %s8830_s6  ;;  %v17961_v20 = vld [vmem:[#allocation175_spill] sm:$0xff] }
 0x451   : > { %5063 = vrot.lane.b32.xlu0 %v17959_v59, %s8830_s6 }
 0x452   : > { %v4886_v7 = vpop.permute.xlu1 %4885 }
 0x453   : > { %v4888_v24 = vpop.permute.xlu0 %4887  ;;  %v12997_v31 = vsel %vm5778_vm14, %v12815_v37, %v4886_v7  ;;  %v17962_v7 = vld [vmem:[#allocation168_spill] sm:$0xff] }
 0x454   : > { %v13001_v49 = vsel %vm5778_vm14, %v12819_v8, %v4888_v24  ;;  %5065 = vrot.lane.b32.xlu1 %v17960_v16, %s8830_s6  ;;  %v17963_v8 = vld [vmem:[#allocation227_spill] sm:$0xff] }
 0x455   : > { %5067 = vrot.lane.b32.xlu0 %v17961_v20, %s8830_s6 }
 0x456   : > { %v4890_v60 = vpop.permute.xlu1 %4889 }
 0x457   : > { %v4892_v6 = vpop.permute.xlu0 %4891  ;;  %v13009_v32 = vsel %vm5778_vm14, %v12827_v61, %v4890_v60  ;;  %v17964_v60 = vld [vmem:[#allocation232_spill] sm:$0xff] }
 0x458   : > { %v13013_v37 = vsel %vm5778_vm14, %v12831_v48, %v4892_v6  ;;  %5069 = vrot.lane.b32.xlu1 %v17962_v7, %s8830_s6  ;;  %v17965_v6 = vld [vmem:[#allocation233_spill] sm:$0xff] }
 0x459   : > { %5071 = vrot.lane.b32.xlu0 %v17963_v8, %s8830_s6 }
 0x45a   : > { %v4894_v24 = vpop.permute.xlu1 %4893 }
 0x45b   : > { %v4896_v54 = vpop.permute.xlu0 %4895  ;;  %v13021_v14 = vsel %vm5778_vm14, %v12839_v36, %v4894_v24  ;;  %v17966_v24 = vld [vmem:[#allocation234_spill] sm:$0xff] }
 0x45c   : > { %v13025_v61 = vsel %vm5778_vm14, %v12843_v21, %v4896_v54  ;;  %5073 = vrot.lane.b32.xlu1 %v17964_v60, %s8830_s6  ;;  %v17967_v54 = vld [vmem:[#allocation235_spill] sm:$0xff]  ;;  %v13293_v60 = vld [vmem:[#allocation2 + $0x168] sm:$0x3] }
 0x45d   : > { %5075 = vrot.lane.b32.xlu0 %v17965_v6, %s8830_s6 }
 0x45e   : > { %v4898_v48 = vpop.permute.xlu1 %4897 }
 0x45f   : > { %v4900_v55 = vpop.permute.xlu0 %4899  ;;  %v13033_v8 = vsel %vm5778_vm14, %v12851_v44, %v4898_v48  ;;  %v17968_v48 = vld [vmem:[#allocation238_spill] sm:$0xff] }
 0x460   : > { %v13037_v36 = vsel %vm5778_vm14, %v12855_v57, %v4900_v55  ;;  %5077 = vrot.lane.b32.xlu1 %v17966_v24, %s8830_s6  ;;  %v17969_v55 = vld [vmem:[#allocation239_spill] sm:$0xff] }
 0x461   : > { %5079 = vrot.lane.b32.xlu0 %v17967_v54, %s8830_s6  ;;  %v13265_v54 = vld [vmem:[#allocation2 + $0xc0] sm:$0xff] }
 0x462   : > { %v4902_v21 = vpop.permute.xlu1 %4901 }
 0x463   : > { %v4904_v53 = vpop.permute.xlu0 %4903  ;;  %v13045_v23 = vsel %vm5778_vm14, %v12863_v2, %v4902_v21  ;;  %v17970_v21 = vld [vmem:[#allocation284_spill] sm:$0xff] }
 0x464   : > { %v13049_v44 = vsel %vm5778_vm14, %v12867_v46, %v4904_v53  ;;  %5081 = vrot.lane.b32.xlu1 %v17968_v48, %s8830_s6  ;;  %v17971_v46 = vld [vmem:[#allocation359_spill] sm:$0xff] }
 0x465   : > { %5083 = vrot.lane.b32.xlu0 %v17969_v55, %s8830_s6 }
 0x466   : > { %v4906_v57 = vpop.permute.xlu1 %4905 }
 0x467   : > { %v4908_v30 = vpop.permute.xlu0 %4907  ;;  %v13057_v38 = vsel %vm5778_vm14, %v12875_v34, %v4906_v57  ;;  %v17973_v34 = vld [vmem:[#allocation360_spill] sm:$0xff] }
 0x468   : > { %v13061_v2 = vsel %vm5778_vm14, %v12879_v11, %v4908_v30  ;;  %5085 = vrot.lane.b32.xlu1 %v17970_v21, %s8830_s6  ;;  %v17974_v57 = vld [vmem:[#allocation364_spill] sm:$0xff] }
 0x469   : > { %5087 = vrot.lane.b32.xlu0 %v17971_v46, %s8830_s6 }
 0x46a   : > { %v4910_v53 = vpop.permute.xlu1 %4909 }
 0x46b   : > { %v13067_v50 = vpop.permute.xlu0 %4943  ;;  %v13071_v51 = vsel %vm5778_vm14, %v12889_v12, %v4910_v53  ;;  %v17977_v12 = vld [vmem:[#allocation367_spill] sm:$0xff]  ;;  %v2515_v53 = vrot.slane %v12917_v5, 1 }
 0x46c   : > { %17972 = vst [vmem:[#allocation331_spill] sm:$0xff] %v13067_v50  ;;  %5089 = vrot.lane.b32.xlu1 %v17973_v34, %s8830_s6  ;;  %v17976_v50 = vld [vmem:[#allocation365_spill] sm:$0xff]  ;;  %v2516_v34 = vrot.slane %v2046_v33, 1 }
 0x46d   : > { %5091 = vrot.lane.b32.xlu0 %v17974_v57, %s8830_s6 }
 0x46e   : > { %v13077_v30 = vpop.permute.xlu1 %4945 }
 0x46f   : > { %17975 = vst [vmem:[#allocation330_spill] sm:$0xff] %v13077_v30  ;;  %v4948_v11 = vpop.permute.xlu0 %4947 }
 0x470   : > { %v13081_v46 = vsel %vm5811_vm15, %v12899_v52, %v4948_v11  ;;  %5093 = vrot.lane.b32.xlu1 %v17976_v50, %s8830_s6  ;;  %v17978_v52 = vld [vmem:[#allocation368_spill] sm:$0xff]  ;;  %v17979_v11 = vld [vmem:[#allocation369_spill] sm:$0xff] }
 0x471   : > { %5095 = vrot.lane.b32.xlu0 %v17977_v12, %s8830_s6  ;;  %v13101_v12 = vsel %vm1167_vm4, %v2515_v53, %v2516_v34 }
 0x472   : > { %v4950_v56 = vpop.permute.xlu1 %4949  ;;  %17980 = vst [vmem:[#allocation333_spill] sm:$0xff] %v13101_v12 }
 0x473   : > { %v4952_v57 = vpop.permute.xlu0 %4951  ;;  %v13090_v30 = vsel %vm5811_vm15, %v12907_v15, %v4950_v56  ;;  %v17981_v15 = vld [vmem:[#allocation88_spill] sm:$0xff] }
 0x474   : > { %v13094_v62 = vsel %vm5811_vm15, %v12911_v17, %v4952_v57  ;;  %5097 = vrot.lane.b32.xlu1 %v17978_v52, %s8830_s6  ;;  %v17984_v57 = vld [vmem:[#allocation90_spill] sm:$0xff] }
 0x475   : > { %5099 = vrot.lane.b32.xlu0 %v17979_v11, %s8830_s6 }
 0x476   : > { %v4954_v33 = vpop.permute.xlu1 %4953 }
 0x477   : > { %v4956_v5 = vpop.permute.xlu0 %4955  ;;  %v13105_v50 = vsel %vm5811_vm15, %v12921_v43, %v4954_v33  ;;  %v17985_v43 = vld [vmem:[#allocation91_spill] sm:$0xff] }
 0x478   : > { %v13109_v56 = vsel %vm5811_vm15, %v12925_v28, %v4956_v5  ;;  %5101 = vrot.lane.b32.xlu1 %v13101_v12, %s8830_s6  ;;  %v17988_v33 = vld [vmem:[#allocation99_spill] sm:$0xff]  ;;  %v17989_v5 = vld [vmem:[#allocation108_spill] sm:$0xff] }
 0x479   : > { %5135 = vrot.lane.b32.xlu0 %v17981_v15, %s8831_s7 }
 0x47a   : > { %v13115_v17 = vpop.permute.xlu1 %4957 }
 0x47b   : > { %17982 = vst [vmem:[#allocation353_spill] sm:$0xff] %v13115_v17  ;;  %v13117_v34 = vpop.permute.xlu0 %4959 }
 0x47c   : > { %17983 = vst [vmem:[#allocation354_spill] sm:$0xff] %v13117_v34  ;;  %5137 = vrot.lane.b32.xlu1 %v17984_v57, %s8831_s7 }
 0x47d   : > { %5139 = vrot.lane.b32.xlu0 %v17985_v43, %s8831_s7  ;;  %v13291_v43 = vld [vmem:[#allocation2 + $0x160] sm:$0xff] }
 0x47e   : > { %v13123_v53 = vpop.permute.xlu1 %4961 }
 0x47f   : > { %17986 = vst [vmem:[#allocation355_spill] sm:$0xff] %v13123_v53  ;;  %v13125_v28 = vpop.permute.xlu0 %4963  ;;  %v17990_v53 = vld [vmem:[#allocation118_spill] sm:$0xff] }
 0x480   : > { %17987 = vst [vmem:[#allocation334_spill] sm:$0xff] %v13125_v28  ;;  %5141 = vrot.lane.b32.xlu1 %v17988_v33, %s8831_s7  ;;  %v17991_v28 = vld [vmem:[#allocation122_spill] sm:$0xff] }
 0x481   : > { %5143 = vrot.lane.b32.xlu0 %v17989_v5, %s8831_s7  ;;  %v8712_v5 = vld [vmem:[#allocation3 + $0x170] sm:$0xff]  ;;  %v13283_v33 = vld [vmem:[#allocation2 + $0x158] sm:$0x3] }
 0x482   : > { %v4966_v15 = vpop.permute.xlu1 %4965 }
 0x483   : > { %v4968_v12 = vpop.permute.xlu0 %4967  ;;  %v13133_v11 = vsel %vm5811_vm15, %v12949_v35, %v4966_v15  ;;  %v17992_v15 = vld [vmem:[#allocation128_spill] sm:$0xff] }
 0x484   : > { %v13137_v52 = vsel %vm5811_vm15, %v12953_v26, %v4968_v12  ;;  %5145 = vrot.lane.b32.xlu1 %v17990_v53, %s8831_s7  ;;  %v17993_v26 = vld [vmem:[#allocation141_spill] sm:$0xff] }
 0x485   : > { %5147 = vrot.lane.b32.xlu0 %v17991_v28, %s8831_s7  ;;  %v13269_v28 = vld [vmem:[#allocation2 + $0x148] sm:$0x3] }
 0x486   : > { %v4970_v58 = vpop.permute.xlu1 %4969 }
 0x487   : > { %v4972_v34 = vpop.permute.xlu0 %4971  ;;  %v13145_v29 = vsel %vm5811_vm15, %v12961_v9, %v4970_v58  ;;  %v17994_v9 = vld [vmem:[#allocation144_spill] sm:$0xff] }
 0x488   : > { %v13149_v35 = vsel %vm5811_vm15, %v12965_v40, %v4972_v34  ;;  %5149 = vrot.lane.b32.xlu1 %v17992_v15, %s8831_s7  ;;  %v17995_v40 = vld [vmem:[#allocation145_spill] sm:$0xff]  ;;  %v13267_v15 = vld [vmem:[#allocation2 + $0x140] sm:$0xff] }
 0x489   : > { %5151 = vrot.lane.b32.xlu0 %v17993_v26, %s8831_s7 }
 0x48a   : > { %v4974_v12 = vpop.permute.xlu1 %4973 }
 0x48b   : > { %v4976_v47 = vpop.permute.xlu0 %4975  ;;  %v13157_v21 = vsel %vm5811_vm15, %v12973_v27, %v4974_v12  ;;  %v17996_v12 = vld [vmem:[#allocation154_spill] sm:$0xff] }
 0x48c   : > { %v13161_v58 = vsel %vm5811_vm15, %v12977_v25, %v4976_v47  ;;  %5153 = vrot.lane.b32.xlu1 %v17994_v9, %s8831_s7  ;;  %v17997_v47 = vld [vmem:[#allocation167_spill] sm:$0xff] }
 0x48d   : > { %5155 = vrot.lane.b32.xlu0 %v17995_v40, %s8831_s7  ;;  %v13254_v40 = vld [vmem:[#allocation2 + $0xb8] sm:$0x3] }
 0x48e   : > { %v4978_v34 = vpop.permute.xlu1 %4977 }
 0x48f   : > { %v4980_v17 = vpop.permute.xlu0 %4979  ;;  %v13169_v26 = vsel %vm5811_vm15, %v12985_v22, %v4978_v34  ;;  %v17998_v34 = vld [vmem:[#allocation176_spill] sm:$0xff] }
 0x490   : > { %v13173_v27 = vsel %vm5811_vm15, %v12989_v19, %v4980_v17  ;;  %5157 = vrot.lane.b32.xlu1 %v17996_v12, %s8831_s7  ;;  %v17999_v19 = vld [vmem:[#allocation179_spill] sm:$0xff]  ;;  %v13250_v12 = vld [vmem:[#allocation2 + $0xa8] sm:$0x3] }
 0x491   : > { %5159 = vrot.lane.b32.xlu0 %v17997_v47, %s8831_s7 }
 0x492   : > { %v4982_v25 = vpop.permute.xlu1 %4981 }
 0x493   : > { %v4984_v3 = vpop.permute.xlu0 %4983  ;;  %v13181_v4 = vsel %vm5811_vm15, %v12997_v31, %v4982_v25  ;;  %v18002_v25 = vld [vmem:[#allocation184_spill] sm:$0xff] }
 0x494   : > { %v13185_v22 = vsel %vm5811_vm15, %v13001_v49, %v4984_v3  ;;  %5161 = vrot.lane.b32.xlu1 %v17998_v34, %s8831_s7  ;;  %v18003_v3 = vld [vmem:[#allocation140_spill] sm:$0xff] }
 0x495   : > { %5163 = vrot.lane.b32.xlu0 %v17999_v19, %s8831_s7 }
 0x496   : > { %v4986_v17 = vpop.permute.xlu1 %4985 }
 0x497   : > { %v4988_v55 = vpop.permute.xlu0 %4987  ;;  %v13193_v47 = vsel %vm5811_vm15, %v13009_v32, %v4986_v17 }
 0x498   : > { %18000 = vst [vmem:[#allocation335_spill] sm:$0xff] %v13193_v47  ;;  %v13197_v31 = vsel %vm5811_vm15, %v13013_v37, %v4988_v55  ;;  %5165 = vrot.lane.b32.xlu1 %v18002_v25, %s8831_s7  ;;  %v18006_v37 = vld [vmem:[#allocation110_spill] sm:$0xff]  ;;  %v8709_v55 = vld [vmem:[#allocation3 + $0x200] sm:$0xff] }
 0x499   : > { %18001 = vst [vmem:[#allocation356_spill] sm:$0xff] %v13197_v31  ;;  %5245 = vrot.lane.b32.xlu0 %v18003_v3, %s8832_s8 }
 0x49a   : > { %v4990_v49 = vpop.permute.xlu1 %4989 }
 0x49b   : > { %v4992_v34 = vpop.permute.xlu0 %4991  ;;  %v13205_v19 = vsel %vm5811_vm15, %v13021_v14, %v4990_v49 }
 0x49c   : > { %18004 = vst [vmem:[#allocation357_spill] sm:$0xff] %v13205_v19  ;;  %v13209_v32 = vsel %vm5811_vm15, %v13025_v61, %v4992_v34  ;;  %5341 = vrot.lane.b32.xlu1 %v18006_v37, %s8833_s9  ;;  %v8710_v61 = vld [vmem:[#allocation3 + $0x160] sm:$0xff]  ;;  %v1204_v19 = vrot.slane %v13265_v54, 1 }
 0x49d   : > { %18005 = vst [vmem:[#allocation358_spill] sm:$0xff] %v13209_v32  ;;  %5247 = vrot.lane.b32.xlu0 %v8709_v55, %s8832_s8  ;;  %v13233_v55 = vld [vmem:[#allocation2] sm:$0xff] }
 0x49e   : > { %v4994_v17 = vpop.permute.xlu1 %4993 }
 0x49f   : > { %v4996_v25 = vpop.permute.xlu0 %4995  ;;  %v13216_v3 = vsel %vm5811_vm15, %v13033_v8, %v4994_v17  ;;  %v13242_v17 = vld [vmem:[#allocation2 + $0x18] sm:$0x3] }
 0x4a0   : > { %18007 = vst [vmem:[#allocation341_spill] sm:$0xff] %v13216_v3  ;;  %v13220_v14 = vsel %vm5811_vm15, %v13037_v36, %v4996_v25  ;;  %5343 = vrot.lane.b32.xlu1 %v17956_v63, %s8833_s9  ;;  %v8711_v36 = vld [vmem:[#allocation3 + $0x210] sm:$0xff]  ;;  %v13238_v63 = vld [vmem:[#allocation2 + $0x8] sm:$0x3]  ;;  %v1229_v3 = vrot.slane %v13269_v28, 1 }
 0x4a1   : > { %18008 = vst [vmem:[#allocation342_spill] sm:$0xff] %v13220_v14  ;;  %5231 = vrot.lane.b32.xlu0 %v8710_v61, %s8832_s8  ;;  %v13240_v25 = vld [vmem:[#allocation2 + $0x10] sm:$0xff]  ;;  %v13246_v61 = vld [vmem:[#allocation2 + $0x28] sm:$0x3]  ;;  %v1169_v24 = vrot.slane %v13238_v63, 1  ;;  %v1228_v14 = vrot.slane %v13267_v15, 1 }
 0x4a2   : > { %v4998_v34 = vpop.permute.xlu1 %4997  ;;  %v1171_v53 = vrot.slane %v13240_v25, 1  ;;  %v1175_v6 = vrot.slane %v13246_v61, 1 }
 0x4a3   : > { %v5000_v49 = vpop.permute.xlu0 %4999  ;;  %v13227_v37 = vsel %vm5811_vm15, %v13045_v23, %v4998_v34  ;;  %v13244_v23 = vld [vmem:[#allocation2 + $0x20] sm:$0xff] }
 0x4a4   : > { %18009 = vst [vmem:[#allocation339_spill] sm:$0xff] %v13227_v37  ;;  %v13231_v8 = vsel %vm5811_vm15, %v13049_v44, %v5000_v49  ;;  %5249 = vrot.lane.b32.xlu1 %v8711_v36, %s8832_s8  ;;  %v13248_v44 = vld [vmem:[#allocation2 + $0xa0] sm:$0xff]  ;;  %v13252_v36 = vld [vmem:[#allocation2 + $0xb0] sm:$0xff] }
 0x4a5   : > { %18010 = vst [vmem:[#allocation40_spill] sm:$0xff] %v13231_v8  ;;  %5327 = vrot.lane.b32.xlu0 %v17946_v13, %s8833_s9  ;;  %v1168_v13 = vrot.slane %v13233_v55, 1 }
 0x4a6   : > { %v5002_v34 = vpop.permute.xlu1 %5001 }
 0x4a7   : > { %v5004_v49 = vpop.permute.xlu0 %5003  ;;  %v13259_v48 = vsel %vm5811_vm15, %v13057_v38, %v5002_v34  ;;  %v13276_v38 = vld [vmem:[#allocation2 + $0xc8] sm:$0x3]  ;;  %v1172_v34 = vrot.slane %v13242_v17, 1  ;;  %v13302_v32 = vsel %vm1167_vm4, %v1168_v13, %v1169_v24  ;;  %v1232_v24 = vrot.slane %v13283_v33, 1 }
 0x4a8   : > { %18011 = vst [vmem:[#allocation362_spill] sm:$0xff] %v13259_v48  ;;  %v13263_v9 = vsel %vm5811_vm15, %v13061_v2, %v5004_v49  ;;  %5345 = vrot.lane.b32.xlu1 %v17957_v45, %s8833_s9  ;;  %v13278_v2 = vld [vmem:[#allocation2 + $0x150] sm:$0xff]  ;;  %v1174_v49 = vrot.slane %v13244_v23, 1  ;;  %v1199_v48 = vrot.slane %v13250_v12, 1  ;;  %v1201_v45 = vrot.slane %v13252_v36, 1 }
 0x4a9   : > { %18012 = vst [vmem:[#allocation363_spill] sm:$0xff] %v13263_v9  ;;  %5233 = vrot.lane.b32.xlu0 %v8712_v5, %s8832_s8  ;;  %v1198_v9 = vrot.slane %v13248_v44, 1  ;;  %v1202_v5 = vrot.slane %v13254_v40, 1  ;;  %v1205_v31 = vrot.slane %v13276_v38, 1  ;;  %v13310_v47 = vsel %vm1167_vm4, %v1171_v53, %v1172_v34 }
 0x4aa   : > { %v5006_v8 = vpop.permute.xlu1 %5005  ;;  %v13313_v1 = vsel %vm1167_vm4, %v1174_v49, %v1175_v6  ;;  %v13328_v6 = vsel %vm1167_vm4, %v1228_v14, %v1229_v3  ;;  %v8714_v3 = vld [vmem:[#allocation3 + $0x180] sm:$0xff]  ;;  %v8715_v49 = vld [vmem:[#allocation3 + $0x230] sm:$0xff] }
 0x4ab   : > { %v13289_v37 = vpop.permute.xlu0 %5039  ;;  %v13299_v57 = vsel %vm5811_vm15, %v13071_v51, %v5006_v8  ;;  %v1231_v51 = vrot.slane %v13278_v2, 1  ;;  %v13318_v8 = vsel %vm1167_vm4, %v1198_v9, %v1199_v48  ;;  %v13321_v13 = vsel %vm1167_vm4, %v1201_v45, %v1202_v5 }
 0x4ac   : > { %18013 = vst [vmem:[#allocation310_spill] sm:$0xff] %v13289_v37  ;;  %v8713_v37 = vld [vmem:[#allocation3 + $0x220] sm:$0xff]  ;;  %v13337_v9 = vsel %vm1167_vm4, %v1204_v19, %v1205_v31  ;;  %v1470_v5 = vrot.slane %v13238_v63, 2  ;;  %v1500_v19 = vrot.slane %v13250_v12, 2  ;;  %v1502_v63 = vrot.slane %v13252_v36, 2 }
 0x4ad   : > { %5251 = vrot.lane.b32.xlu1 %v8713_v37, %s8832_s8  ;;  %5329 = vrot.lane.b32.xlu0 %v17947_v18, %s8833_s9  ;;  %v1234_v37 = vrot.slane %v13291_v43, 1  ;;  %v1235_v18 = vrot.slane %v13293_v60, 1  ;;  %v13347_v14 = vsel %vm1167_vm4, %v1231_v51, %v1232_v24  ;;  %v1472_v51 = vrot.slane %v13240_v25, 2 }
 0x4ae   : > { %v13325_v53 = vpop.permute.xlu1 %5041  ;;  %v1473_v24 = vrot.slane %v13242_v17, 2  ;;  %v1529_v12 = vrot.slane %v13267_v15, 2  ;;  %v1530_v17 = vrot.slane %v13269_v28, 2 }
 0x4af   : > { %18014 = vst [vmem:[#allocation311_spill] sm:$0xff] %v13325_v53  ;;  %v5044_v34 = vpop.permute.xlu0 %5043  ;;  %v13354_v31 = vsel %vm1167_vm4, %v1234_v37, %v1235_v18 }
 0x4b0   : > { %v13334_v48 = vsel %vm5844_vm1, %v13081_v46, %v5044_v34  ;;  %v1418_v46 = vmax.f32 %v13248_v44, %v13318_v8  ;;  %v1499_v8 = vrot.slane %v13248_v44, 2  ;;  %v1503_v34 = vrot.slane %v13254_v40, 2 }
 0x4b1   : > { %18015 = vst [vmem:[#allocation314_spill] sm:$0xff] %v13334_v48  ;;  %5347 = vrot.lane.b32.xlu1 %v17958_v10, %s8833_s9  ;;  %5235 = vrot.lane.b32.xlu0 %v8714_v3, %s8832_s8  ;;  %v1469_v10 = vrot.slane %v13233_v55, 2  ;;  %v1533_v44 = vrot.slane %v13283_v33, 2  ;;  %v1475_v40 = vrot.slane %v13244_v23, 2  ;;  %v1474_v28 = vsel %vm1468_vm5, %v1472_v51, %v1473_v24 }
 0x4b2   : > { %v5046_v3 = vpop.permute.xlu1 %5045  ;;  %v1501_v48 = vsel %vm1468_vm5, %v1499_v8, %v1500_v19  ;;  %v1505_v33 = vrot.slane %v13265_v54, 2  ;;  %v1535_v51 = vrot.slane %v13291_v43, 2  ;;  %v1536_v19 = vrot.slane %v13293_v60, 2 }
 0x4b3   : > { %v5048_v45 = vpop.permute.xlu0 %5047  ;;  %v13366_v37 = vsel %vm5844_vm1, %v13090_v30, %v5046_v3  ;;  %v1532_v30 = vrot.slane %v13278_v2, 2  ;;  %v13386_v3 = vld [vmem:[#allocation2 + $0x30] sm:$0xff]  ;;  %v1504_v24 = vsel %vm1468_vm5, %v1502_v63, %v1503_v34  ;;  %v1531_v8 = vsel %vm1468_vm5, %v1529_v12, %v1530_v17 }
 0x4b4   : > { %18016 = vst [vmem:[#allocation315_spill] sm:$0xff] %v13366_v37  ;;  %v13370_v18 = vsel %vm5844_vm1, %v13094_v62, %v5048_v45  ;;  %v1429_v62 = vmax.f32 %v13278_v2, %v13347_v14  ;;  %v1471_v45 = vsel %vm1468_vm5, %v1469_v10, %v1470_v5  ;;  %v1506_v2 = vrot.slane %v13276_v38, 2  ;;  %v13394_v14 = vld [vmem:[#allocation2 + $0x38] sm:$0x3]  ;;  %v8716_v38 = vld [vmem:[#allocation3 + $0x190] sm:$0xff] }
 0x4b5   : > { %18017 = vst [vmem:[#allocation316_spill] sm:$0xff] %v13370_v18  ;;  %5253 = vrot.lane.b32.xlu1 %v8715_v49, %s8832_s8  ;;  %5331 = vrot.lane.b32.xlu0 %v17950_v41, %s8833_s9  ;;  %v1476_v49 = vrot.slane %v13246_v61, 2  ;;  %v13388_v41 = vld [vmem:[#allocation2 + $0xd0] sm:$0xff]  ;;  %v13396_v5 = vld [vmem:[#allocation2 + $0xd8] sm:$0x3]  ;;  %v1430_v34 = vmax.f32 %v13291_v43, %v13354_v31  ;;  %v1719_v43 = vmax.f32 %v1418_v46, %v1501_v48  ;;  %v8717_v31 = vld [vmem:[#allocation3 + $0x240] sm:$0xff] }
 0x4b6   : > { %v5050_v18 = vpop.permute.xlu1 %5049  ;;  %v1208_v60 = vrot.slane %v13396_v5, 1  ;;  %v1507_v12 = vsel %vm1468_vm5, %v1505_v33, %v1506_v2  ;;  %v13428_v17 = vld [vmem:[#allocation2 + $0x170] sm:$0xff] }
 0x4b7   : > { %v5052_v37 = vpop.permute.xlu0 %5051  ;;  %v13400_v61 = vsel %vm5844_vm1, %v13105_v50, %v5050_v18  ;;  %v1534_v50 = vsel %vm1468_vm5, %v1532_v30, %v1533_v44  ;;  %v1177_v18 = vrot.slane %v13386_v3, 1  ;;  %v1477_v63 = vsel %vm1468_vm5, %v1475_v40, %v1476_v49  ;;  %v13430_v30 = vld [vmem:[#allocation2 + $0x178] sm:$0x3] }
 0x4b8   : > { %18018 = vst [vmem:[#allocation323_spill] sm:$0xff] %v13400_v61  ;;  %v13404_v10 = vsel %vm5844_vm1, %v13109_v56, %v5052_v37  ;;  %v1178_v56 = vrot.slane %v13394_v14, 1  ;;  %v1207_v37 = vrot.slane %v13388_v41, 1  ;;  %v1537_v44 = vsel %vm1468_vm5, %v1535_v51, %v1536_v19 }
 0x4b9   : > { %18019 = vst [vmem:[#allocation317_spill] sm:$0xff] %v13404_v10  ;;  %5349 = vrot.lane.b32.xlu1 %v17959_v59, %s8833_s9  ;;  %5237 = vrot.lane.b32.xlu0 %v8716_v38, %s8832_s8  ;;  %v1420_v38 = vmax.f32 %v13265_v54, %v13337_v9  ;;  %v18020_v61 = vmax.f32 %v13233_v55, %v13302_v32  ;;  %v1237_v48 = vrot.slane %v13428_v17, 1  ;;  %v1238_v46 = vrot.slane %v13430_v30, 1 }
 0x4ba   : > { %v13418_v10 = vpop.permute.xlu1 %5053  ;;  %v18021_v54 = vmax.f32 %v13240_v25, %v13310_v47  ;;  %v18022_v40 = vmax.f32 %v13252_v36, %v13321_v13  ;;  %v18023_v32 = vmax.f32 %v13267_v15, %v13328_v6  ;;  %v1179_v47 = vsel %vm1167_vm4, %v1177_v18, %v1178_v56  ;;  %v13490_v18 = vld [vmem:[#allocation2 + $0xe8] sm:$0x3] }
 0x4bb   : > { %v13420_v59 = vpop.permute.xlu0 %5055  ;;  %v1709_v53 = vmax.f32 %v18020_v61, %v1471_v45  ;;  %v13452_v45 = vmax.f32 %v1429_v62, %v1534_v50  ;;  %v1209_v25 = vsel %vm1167_vm4, %v1207_v37, %v1208_v60  ;;  %v1478_v36 = vrot.slane %v13386_v3, 2  ;;  %v8718_v61 = vld [vmem:[#allocation3 + $0x1a0] sm:$0xff] }
 0x4bc   : > { %v13439_v9 = vmax.f32 %v18021_v54, %v1474_v28  ;;  %v13447_v49 = vmax.f32 %v18022_v40, %v1504_v24  ;;  %v1729_v55 = vmax.f32 %v18023_v32, %v1531_v8  ;;  %v1479_v13 = vrot.slane %v13394_v14, 2  ;;  %v13482_v24 = vld [vmem:[#allocation2 + $0x48] sm:$0x3]  ;;  %v13488_v50 = vld [vmem:[#allocation2 + $0xe0] sm:$0xff] }
 0x4bd   : > { %5255 = vrot.lane.b32.xlu1 %v8717_v31, %s8832_s8  ;;  %5333 = vrot.lane.b32.xlu0 %v17951_v39, %s8833_s9  ;;  %v1508_v15 = vrot.slane %v13388_v41, 2  ;;  %v1509_v6 = vrot.slane %v13396_v5, 2  ;;  %v18024_v62 = vmax.f32 %v13244_v23, %v13313_v1  ;;  %v13471_v2 = vmax.f32 %v1420_v38, %v1507_v12  ;;  %v13480_v5 = vld [vmem:[#allocation2 + $0x40] sm:$0xff]  ;;  %v13525_v32 = vld [vmem:[#allocation2 + $0x188] sm:$0x3] }
 0x4be   : > { %v13458_v39 = vpop.permute.xlu1 %5057  ;;  %v13476_v51 = vmax.f32 %v1430_v34, %v1537_v44  ;;  %v1769_v14 = vmax.f32 %v1709_v53, %v13439_v9  ;;  %v1777_v19 = vmax.f32 %v1719_v43, %v13447_v49  ;;  %v1785_v1 = vmax.f32 %v1729_v55, %v13452_v45  ;;  %v8719_v44 = vld [vmem:[#allocation3 + $0x250] sm:$0xff]  ;;  %v13512_v54 = vld [vmem:[#allocation2 + $0x180] sm:$0xff] }
 0x4bf   : > { %v13460_v28 = vpop.permute.xlu0 %5059  ;;  %v13469_v33 = vmax.f32 %v18024_v62, %v1477_v63  ;;  %v1239_v23 = vsel %vm1167_vm4, %v1237_v48, %v1238_v46  ;;  %v1411_v8 = vmax.f32 %v13386_v3, %v1179_v47  ;;  %v1480_v37 = vsel %vm1468_vm5, %v1478_v36, %v1479_v13  ;;  %v13534_v13 = vld [vmem:[#allocation2 + $0x50] sm:$0xff] }
 0x4c0   : > { %v1510_v60 = vsel %vm1468_vm5, %v1508_v15, %v1509_v6  ;;  %v1538_v38 = vrot.slane %v13428_v17, 2  ;;  %v1539_v34 = vrot.slane %v13430_v30, 2  ;;  %v1181_v12 = vrot.slane %v13482_v24, 1  ;;  %v13536_v15 = vld [vmem:[#allocation2 + $0x58] sm:$0x3] }
 0x4c1   : > { %5351 = vrot.lane.b32.xlu1 %v17960_v16, %s8833_s9  ;;  %5239 = vrot.lane.b32.xlu0 %v8718_v61, %s8832_s8  ;;  %v1421_v16 = vmax.f32 %v13388_v41, %v1209_v25  ;;  %v1180_v41 = vrot.slane %v13480_v5, 1  ;;  %v13510_v30 = vmax.f32 %v1769_v14, %v13469_v33  ;;  %v13517_v43 = vmax.f32 %v1777_v19, %v13471_v2  ;;  %v13548_v61 = vld [vmem:[#allocation2 + $0xf0] sm:$0xff]  ;;  %v13550_v14 = vld [vmem:[#allocation2 + $0xf8] sm:$0x3] }
 0x4c2   : > { %v5062_v56 = vpop.permute.xlu1 %5061  ;;  %v13520_v31 = vmax.f32 %v1785_v1, %v13476_v51  ;;  %v1431_v40 = vmax.f32 %v13428_v17, %v1239_v23  ;;  %v1540_v25 = vsel %vm1468_vm5, %v1538_v38, %v1539_v34  ;;  %v13528_v48 = vmax.f32 %v1411_v8, %v1480_v37  ;;  %v8720_v19 = vld [vmem:[#allocation3 + $0x1b0] sm:$0xff] }
 0x4c3   : > { %v5064_v53 = vpop.permute.xlu0 %5063  ;;  %v13498_v63 = vsel %vm5844_vm1, %v13133_v11, %v5062_v56  ;;  %v1210_v11 = vrot.slane %v13488_v50, 1  ;;  %v13530_v46 = vmax.f32 %v1421_v16, %v1510_v60  ;;  %v1778_v36 = vmax.f32 %v13447_v49, %v13471_v2  ;;  %v13567_v34 = vld [vmem:[#allocation2 + $0x190] sm:$0xff] }
 0x4c4   : > { %18025 = vst [vmem:[#allocation332_spill] sm:$0xff] %v13498_v63  ;;  %v13502_v3 = vsel %vm5844_vm1, %v13137_v52, %v5064_v53  ;;  %v1211_v52 = vrot.slane %v13490_v18, 1  ;;  %v1182_v6 = vsel %vm1167_vm4, %v1180_v41, %v1181_v12  ;;  %v1240_v62 = vrot.slane %v13512_v54, 1 }
 0x4c5   : > { %18026 = vst [vmem:[#allocation336_spill] sm:$0xff] %v13502_v3  ;;  %5257 = vrot.lane.b32.xlu1 %v8719_v44, %s8832_s8  ;;  %5335 = vrot.lane.b32.xlu0 %v17952_v0, %s8833_s9  ;;  %v1770_v0 = vmax.f32 %v13439_v9, %v13469_v33  ;;  %v1241_v1 = vrot.slane %v13525_v32, 1  ;;  %v1482_v23 = vrot.slane %v13482_v24, 2  ;;  %v1511_v8 = vrot.slane %v13488_v50, 2 }
 0x4c6   : > { %v5066_v55 = vpop.permute.xlu1 %5065  ;;  %v1512_v16 = vrot.slane %v13490_v18, 2  ;;  %v1183_v56 = vrot.slane %v13534_v13, 1  ;;  %v1184_v53 = vrot.slane %v13536_v15, 1  ;;  %v13563_v60 = vmax.f32 %v1431_v40, %v1540_v25  ;;  %v8721_v40 = vld [vmem:[#allocation3 + $0x260] sm:$0xff] }
 0x4c7   : > { %v5068_v47 = vpop.permute.xlu0 %5067  ;;  %v13540_v17 = vsel %vm5844_vm1, %v13145_v29, %v5066_v55  ;;  %v1212_v29 = vsel %vm1167_vm4, %v1210_v11, %v1211_v52  ;;  %v1786_v38 = vmax.f32 %v13452_v45, %v13476_v51  ;;  %v1213_v41 = vrot.slane %v13548_v61, 1  ;;  %v13583_v52 = vld [vmem:[#allocation2 + $0x198] sm:$0x3] }
 0x4c8   : > { %18027 = vst [vmem:[#allocation134_spill] sm:$0xff] %v13540_v17  ;;  %v13544_v9 = vsel %vm5844_vm1, %v13149_v35, %v5068_v47  ;;  %v1481_v35 = vrot.slane %v13480_v5, 2  ;;  %v1214_v24 = vrot.slane %v13550_v14, 1  ;;  %v13580_v44 = vmax.f32 %v1770_v0, %v13528_v48 }
 0x4c9   : > { %18028 = vst [vmem:[#allocation337_spill] sm:$0xff] %v13544_v9  ;;  %5353 = vrot.lane.b32.xlu1 %v17961_v20, %s8833_s9  ;;  %5241 = vrot.lane.b32.xlu0 %v8720_v19, %s8832_s8  ;;  %v1412_v11 = vmax.f32 %v13480_v5, %v1182_v6  ;;  %v1422_v55 = vmax.f32 %v13488_v50, %v1212_v29  ;;  %v1541_v47 = vrot.slane %v13512_v54, 2  ;;  %v1542_v5 = vrot.slane %v13525_v32, 2 }
 0x4ca   : > { %v5070_v20 = vpop.permute.xlu1 %5069  ;;  %v1513_v0 = vsel %vm1468_vm5, %v1511_v8, %v1512_v16  ;;  %v1185_v25 = vsel %vm1167_vm4, %v1183_v56, %v1184_v53  ;;  %v1243_v6 = vrot.slane %v13567_v34, 1  ;;  %v1484_v50 = vrot.slane %v13534_v13, 2  ;;  %v8722_v8 = vld [vmem:[#allocation3 + $0x1c0] sm:$0xff] }
 0x4cb   : > { %v5072_v37 = vpop.permute.xlu0 %5071  ;;  %v13573_v18 = vsel %vm5844_vm1, %v13157_v21, %v5070_v20  ;;  %v1242_v21 = vsel %vm1167_vm4, %v1240_v62, %v1241_v1  ;;  %v1244_v62 = vrot.slane %v13583_v52, 1  ;;  %v1485_v29 = vrot.slane %v13536_v15, 2 }
 0x4cc   : > { %18029 = vst [vmem:[#allocation338_spill] sm:$0xff] %v13573_v18  ;;  %v13577_v12 = vsel %vm5844_vm1, %v13161_v58, %v5072_v37  ;;  %v1483_v58 = vsel %vm1468_vm5, %v1481_v35, %v1482_v23  ;;  %v1514_v35 = vrot.slane %v13548_v61, 2  ;;  %v1515_v23 = vrot.slane %v13550_v14, 2 }
 0x4cd   : > { %18030 = vst [vmem:[#allocation82_spill] sm:$0xff] %v13577_v12  ;;  %5259 = vrot.lane.b32.xlu1 %v8721_v40, %s8832_s8  ;;  %5337 = vrot.lane.b32.xlu0 %v17953_v42, %s8833_s9  ;;  %v1215_v42 = vsel %vm1167_vm4, %v1213_v41, %v1214_v24  ;;  %v1432_v15 = vmax.f32 %v13512_v54, %v1242_v21  ;;  %v1545_v21 = vrot.slane %v13583_v52, 2  ;;  %v13652_v52 = vld [vmem:[#allocation2 + $0x68] sm:$0x3]  ;;  %v18072_v12 = vld [vmem:[#allocation257_spill] sm:$0xff] }
 0x4ce   : > { %v5074_v19 = vpop.permute.xlu1 %5073  ;;  %v13614_v16 = vmax.f32 %v1412_v11, %v1483_v58  ;;  %v13619_v56 = vmax.f32 %v1422_v55, %v1513_v0  ;;  %v1779_v14 = vmax.f32 %v13471_v2, %v13530_v46  ;;  %v1413_v53 = vmax.f32 %v13534_v13, %v1185_v25  ;;  %v13638_v55 = vld [vmem:[#allocation2 + $0x60] sm:$0xff]  ;;  %v8723_v58 = vld [vmem:[#allocation3 + $0x270] sm:$0xff] }
 0x4cf   : > { %v5076_v20 = vpop.permute.xlu0 %5075  ;;  %v13602_v1 = vsel %vm5844_vm1, %v13169_v26, %v5074_v19  ;;  %v1771_v26 = vmax.f32 %v13469_v33, %v13528_v48  ;;  %v1245_v41 = vsel %vm1167_vm4, %v1243_v6, %v1244_v62  ;;  %v1423_v54 = vmax.f32 %v13548_v61, %v1215_v42  ;;  %v18035_v61 = vld [vmem:[#allocation112_spill] sm:$0xff]  ;;  %v13668_v42 = vld [vmem:[#allocation2 + $0x100] sm:$0xff] }
 0x4d0   : > { %18031 = vst [vmem:[#allocation86_spill] sm:$0xff] %v13602_v1  ;;  %v13606_v32 = vsel %vm5844_vm1, %v13173_v27, %v5076_v20  ;;  %v1543_v27 = vsel %vm1468_vm5, %v1541_v47, %v1542_v5  ;;  %v1486_v24 = vsel %vm1468_vm5, %v1484_v50, %v1485_v29  ;;  %v1544_v11 = vrot.slane %v13567_v34, 2  ;;  %v13670_v62 = vld [vmem:[#allocation2 + $0x108] sm:$0x3]  ;;  %v18036_v29 = vld [vmem:[#allocation335_spill] sm:$0xff] }
 0x4d1   : > { %18032 = vst [vmem:[#allocation87_spill] sm:$0xff] %v13606_v32  ;;  %5355 = vrot.lane.b32.xlu1 %v17962_v7, %s8833_s9  ;;  %5243 = vrot.lane.b32.xlu0 %v8722_v8, %s8832_s8  ;;  %v1516_v13 = vsel %vm1468_vm5, %v1514_v35, %v1515_v23  ;;  %v1819_v47 = vmax.f32 %v1771_v26, %v13614_v16  ;;  %v1186_v50 = vrot.slane %v13638_v55, 1  ;;  %v18038_v35 = vld [vmem:[#allocation356_spill] sm:$0xff] }
 0x4d2   : > { %v5078_v7 = vpop.permute.xlu1 %5077  ;;  %v13654_v0 = vmax.f32 %v1432_v15, %v1543_v27  ;;  %v13657_v5 = vmax.f32 %v1779_v14, %v13619_v56  ;;  %v1433_v25 = vmax.f32 %v13567_v34, %v1245_v41  ;;  %v13660_v6 = vmax.f32 %v1413_v53, %v1486_v24  ;;  %v18041_v15 = vld [vmem:[#allocation253_spill] sm:$0xff]  ;;  %v13703_v41 = vld [vmem:[#allocation2 + $0x1a8] sm:$0x3] }
 0x4d3   : > { %v5080_v37 = vpop.permute.xlu0 %5079  ;;  %v13630_v33 = vsel %vm5844_vm1, %v13181_v4, %v5078_v7  ;;  %v13647_v4 = vmax.f32 %v1778_v36, %v13530_v46  ;;  %v13662_v2 = vmax.f32 %v1423_v54, %v1516_v13  ;;  %v1772_v36 = vmax.f32 %v13528_v48, %v13614_v16  ;;  %v18042_v13 = vld [vmem:[#allocation357_spill] sm:$0xff] }
 0x4d4   : > { %18033 = vst [vmem:[#allocation94_spill] sm:$0xff] %v13630_v33  ;;  %v13634_v40 = vsel %vm5844_vm1, %v13185_v22, %v5080_v37  ;;  %v1787_v22 = vmax.f32 %v13476_v51, %v13563_v60  ;;  %v1780_v20 = vmax.f32 %v13530_v46, %v13619_v56  ;;  %v1546_v8 = vsel %vm1468_vm5, %v1544_v11, %v1545_v21  ;;  %v18040_v46 = vld [vmem:[#allocation171_spill] sm:$0xff] }
 0x4d5   : > { %18034 = vst [vmem:[#allocation105_spill] sm:$0xff] %v13634_v40  ;;  %5261 = vrot.lane.b32.xlu1 %v8723_v58, %s8832_s8  ;;  %5339 = vrot.lane.b32.xlu0 %v18035_v61, %s8833_s9  ;;  %v1187_v48 = vrot.slane %v13652_v52, 1  ;;  %v1865_v26 = vmax.f32 %v13510_v30, %v13517_v43  ;;  %v13693_v27 = vmax.f32 %v1786_v38, %v13563_v60  ;;  %v13701_v37 = vld [vmem:[#allocation2 + $0x1a0] sm:$0xff]  ;;  %v1216_v30 = vrot.slane %v13668_v42, 1  ;;  %v18044_v58 = vld [vmem:[#allocation358_spill] sm:$0xff] }
 0x4d6   : > { %v5082_v19 = vpop.permute.xlu1 %5081  ;;  %v1866_v14 = vmax.f32 %v13580_v44, %v13647_v4  ;;  %v13698_v53 = vmax.f32 %v1787_v22, %v13654_v0  ;;  %v1867_v7 = vmax.f32 %v1819_v47, %v13657_v5  ;;  %v1217_v54 = vrot.slane %v13670_v62, 1  ;;  %v13726_v47 = vld [vmem:[#allocation2 + $0x70] sm:$0xff] }
 0x4d7   : > { %v5084_v49 = vpop.permute.xlu0 %5083  ;;  %v13675_v34 = vsel %vm5844_vm1, %v18036_v29, %v5082_v19  ;;  %v13707_v51 = vmax.f32 %v1433_v25, %v1546_v8  ;;  %v1788_v38 = vmax.f32 %v13563_v60, %v13654_v0  ;;  %v13712_v44 = vmax.f32 %v1772_v36, %v13660_v6  ;;  %v8724_v25 = vld [vmem:[#allocation3 + $0x2a0] sm:$0xff]  ;;  %v18046_v60 = vld [vmem:[#allocation90_spill] sm:$0xff] }
 0x4d8   : > { %18037 = vst [vmem:[#allocation113_spill] sm:$0xff] %v13675_v34  ;;  %v13679_v23 = vsel %vm5844_vm1, %v18038_v35, %v5084_v49  ;;  %v13715_v11 = vmax.f32 %v1780_v20, %v13662_v2  ;;  %v1188_v22 = vsel %vm1167_vm4, %v1186_v50, %v1187_v48  ;;  %v1246_v19 = vrot.slane %v13701_v37, 1  ;;  %v13735_v29 = vld [vmem:[#allocation2 + $0x78] sm:$0x3] }
 0x4d9   : > { %18039 = vst [vmem:[#allocation117_spill] sm:$0xff] %v13679_v23  ;;  %5357 = vrot.lane.b32.xlu1 %v18040_v46, %s8833_s9  ;;  %5167 = vrot.lane.b32.xlu0 %v18041_v15, %s8831_s7  ;;  %v1247_v49 = vrot.slane %v13703_v41, 1  ;;  %v1487_v36 = vrot.slane %v13638_v55, 2  ;;  %v1488_v20 = vrot.slane %v13652_v52, 2  ;;  %v1897_v50 = vmax.f32 %v1865_v26, %v13520_v31  ;;  %v962_v26 = vld [vmem:[#allocation2 + $0x118] sm:$0x3] }
 0x4da   : > { %v5086_v24 = vpop.permute.xlu1 %5085  ;;  %v1898_v35 = vmax.f32 %v1866_v14, %v13693_v27  ;;  %v1218_v8 = vsel %vm1167_vm4, %v1216_v30, %v1217_v54  ;;  %v13741_v15 = vmax.f32 %v1867_v7, %v13698_v53  ;;  %v1414_v52 = vmax.f32 %v13638_v55, %v1188_v22  ;;  %v18050_v30 = vld [vmem:[#allocation342_spill] sm:$0xff]  ;;  %v13759_v7 = vld [vmem:[#allocation2 + $0x1b0] sm:$0xff]  ;;  %v18052_v55 = vld [vmem:[#allocation232_spill] sm:$0xff] }
 0x4db   : > { %v5088_v45 = vpop.permute.xlu0 %5087  ;;  %v13719_v21 = vsel %vm5844_vm1, %v18042_v13, %v5086_v24  ;;  %v13744_v24 = vmax.f32 %v1788_v38, %v13707_v51  ;;  %v13749_v13 = vld [vmem:[#allocation2 + $0x110] sm:$0xff]  ;;  %v13761_v38 = vld [vmem:[#allocation2 + $0x1b8] sm:$0x3]  ;;  %v18053_v22 = vld [vmem:[#allocation91_spill] sm:$0xff]  ;;  %v1548_v23 = vrot.slane %v13703_v41, 2  ;;  %v1773_v34 = vmax.f32 %v13614_v16, %v13660_v6 }
 0x4dc   : > { %18043 = vst [vmem:[#allocation135_spill] sm:$0xff] %v13719_v21  ;;  %v13723_v61 = vsel %vm5844_vm1, %v18044_v58, %v5088_v45  ;;  %v18048_v58 = vld [vmem:[#allocation341_spill] sm:$0xff]  ;;  %v1518_v45 = vrot.slane %v13670_v62, 2 }
 0x4dd   : > { %18045 = vst [vmem:[#allocation136_spill] sm:$0xff] %v13723_v61  ;;  %5263 = vrot.lane.b32.xlu1 %v8724_v25, %s8832_s8  ;;  %5423 = vrot.lane.b32.xlu0 %v18046_v60, %s8834_s11  ;;  %18047 = vst [vmem:[#allocation139_spill] sm:$0xff] %v13744_v24  ;;  %v1189_v25 = vrot.slane %v13726_v47, 1  ;;  %v1190_v60 = vrot.slane %v13735_v29, 1 }
 0x4de   : > { %v5090_v48 = vpop.permute.xlu1 %5089 }
 0x4df   : > { %v5092_v46 = vpop.permute.xlu0 %5091  ;;  %v13753_v14 = vsel %vm5844_vm1, %v18048_v58, %v5090_v48  ;;  %v1248_v48 = vsel %vm1167_vm4, %v1246_v19, %v1247_v49  ;;  %v1424_v58 = vmax.f32 %v13668_v42, %v1218_v8  ;;  %v1250_v19 = vrot.slane %v13761_v38, 1  ;;  %v18054_v49 = vld [vmem:[#allocation339_spill] sm:$0xff] }
 0x4e0   : > { %18049 = vst [vmem:[#allocation149_spill] sm:$0xff] %v13753_v14  ;;  %v13757_v54 = vsel %vm5844_vm1, %v18050_v30, %v5092_v46  ;;  %v1489_v46 = vsel %vm1468_vm5, %v1487_v36, %v1488_v20  ;;  %v1517_v30 = vrot.slane %v13668_v42, 2  ;;  %v1220_v14 = vrot.slane %v962_v26, 1  ;;  %v18056_v42 = vld [vmem:[#allocation40_spill] sm:$0xff] }
 0x4e1   : > { %18051 = vst [vmem:[#allocation162_spill] sm:$0xff] %v13757_v54  ;;  %5359 = vrot.lane.b32.xlu1 %v18052_v55, %s8833_s9  ;;  %5425 = vrot.lane.b32.xlu0 %v18053_v22, %s8834_s11  ;;  %v1219_v54 = vrot.slane %v13749_v13, 1  ;;  %v1547_v55 = vrot.slane %v13701_v37, 2  ;;  %v1249_v22 = vrot.slane %v13759_v7, 1  ;;  %v1434_v20 = vmax.f32 %v13701_v37, %v1248_v48 }
 0x4e2   : > { %v5094_v61 = vpop.permute.xlu1 %5093  ;;  %v1191_v8 = vsel %vm1167_vm4, %v1189_v25, %v1190_v60  ;;  %v13791_v41 = vmax.f32 %v1414_v52, %v1489_v46  ;;  %v1520_v37 = vrot.slane %v13749_v13, 2  ;;  %v1521_v25 = vrot.slane %v962_v26, 2  ;;  %v18058_v46 = vld [vmem:[#allocation362_spill] sm:$0xff] }
 0x4e3   : > { %v5096_v21 = vpop.permute.xlu0 %5095  ;;  %v13781_v36 = vsel %vm5844_vm1, %v18054_v49, %v5094_v61  ;;  %v1490_v61 = vrot.slane %v13726_v47, 2  ;;  %v1491_v49 = vrot.slane %v13735_v29, 2  ;;  %v1781_v52 = vmax.f32 %v13619_v56, %v13662_v2  ;;  %v8725_v56 = vld [vmem:[#allocation3 + $0x2b0] sm:$0xff] }
 0x4e4   : > { %18055 = vst [vmem:[#allocation172_spill] sm:$0xff] %v13781_v36  ;;  %v13785_v62 = vsel %vm5844_vm1, %v18056_v42, %v5096_v21  ;;  %v1519_v21 = vsel %vm1468_vm5, %v1517_v30, %v1518_v45  ;;  %v1221_v42 = vsel %vm1167_vm4, %v1219_v54, %v1220_v14  ;;  %v1251_v16 = vsel %vm1167_vm4, %v1249_v22, %v1250_v19  ;;  %v18060_v45 = vld [vmem:[#allocation363_spill] sm:$0xff]  ;;  %v6345_v22 = vld [vmem:[%s16833_s3 + $0x78] sm:$0xff] }
 0x4e5   : > { %18057 = vst [vmem:[#allocation175_spill] sm:$0xff] %v13785_v62  ;;  %5551 = vrot.lane.b32.xlu1 %v1897_v50, %s8809_s14  ;;  %5553 = vrot.lane.b32.xlu0 %v1898_v35, %s8809_s14  ;;  %v1549_v35 = vsel %vm1468_vm5, %v1547_v55, %v1548_v23  ;;  %v1415_v48 = vmax.f32 %v13726_v47, %v1191_v8  ;;  %v1550_v26 = vrot.slane %v13759_v7, 2  ;;  %v1551_v54 = vrot.slane %v13761_v38, 2  ;;  %v18062_v23 = vld [vmem:[#allocation254_spill] sm:$0xff]  ;;  %v13921_v62 = vld [vmem:[#allocation2 + $0x130] sm:$0xff] }
 0x4e6   : > { %v5098_v60 = vpop.permute.xlu1 %5097  ;;  %v13818_v30 = vmax.f32 %v1424_v58, %v1519_v21  ;;  %v1425_v47 = vmax.f32 %v13749_v13, %v1221_v42  ;;  %v1492_v55 = vsel %vm1468_vm5, %v1490_v61, %v1491_v49  ;;  %v1789_v19 = vmax.f32 %v13654_v0, %v13707_v51  ;;  %v13833_v58 = vld [vmem:[#allocation2 + $0x88] sm:$0x3]  ;;  %7358 = vmatpush1.msra.mxu1 %v6345_v22  ;;  %v13923_v36 = vld [vmem:[#allocation2 + $0x138] sm:$0x3] }
 0x4e7   : > { %v5100_v50 = vpop.permute.xlu0 %5099  ;;  %v13807_v29 = vsel %vm5844_vm1, %v18058_v46, %v5098_v60  ;;  %v13828_v38 = vmax.f32 %v1773_v34, %v13791_v41  ;;  %v1522_v8 = vsel %vm1468_vm5, %v1520_v37, %v1521_v25  ;;  %v13831_v60 = vld [vmem:[#allocation2 + $0x80] sm:$0xff]  ;;  %6451 = vmatpush1.msra.mxu0 %v6345_v22  ;;  %v13837_v49 = vmax.f32 %v1434_v20, %v1549_v35  ;;  %v13845_v42 = vld [vmem:[#allocation2 + $0x128] sm:$0x3] }
 0x4e8   : > { %18059 = vst [vmem:[#allocation168_spill] sm:$0xff] %v13807_v29  ;;  %v13811_v14 = vsel %vm5844_vm1, %v18060_v45, %v5100_v50  ;;  %v13840_v21 = vmax.f32 %v1781_v52, %v13818_v30  ;;  %v1435_v0 = vmax.f32 %v13759_v7, %v1251_v16  ;;  %v13843_v34 = vld [vmem:[#allocation2 + $0x120] sm:$0xff]  ;;  %v18063_v37 = vmov 0.0   ;;  %v6344_v7 = vld [vmem:[%s16833_s3 + $0x70] sm:$0xff]  ;;  %v13871_v45 = vld [vmem:[#allocation2 + $0x1c8] sm:$0x3] }
 0x4e9   : > { %18061 = vst [vmem:[#allocation227_spill] sm:$0xff] %v13811_v14  ;;  %5169 = vrot.lane.b32.xlu1 %v18062_v23, %s8831_s7  ;;  %5265 = vrot.lane.b32.xlu0 %v8725_v56, %s8832_s8  ;;  %v1552_v20 = vsel %vm1468_vm5, %v1550_v26, %v1551_v54  ;;  %v13854_v50 = vmax.f32 %v1415_v48, %v1492_v55  ;;  %v18065_v52 = vld [vmem:[#allocation99_spill] sm:$0xff]  ;;  %v18066_v16 = vld [vmem:[#allocation233_spill] sm:$0xff]  ;;  %v1193_v26 = vrot.slane %v13833_v58, 1  ;;  %v6343_v54 = vld [vmem:[%s16833_s3 + $0x68] sm:$0xff]  ;;  %v1223_v55 = vrot.slane %v13845_v42, 1 }
 0x4ea   : > { %v5102_v13 = vpop.permute.xlu1 %5101  ;;  %7327 = vmatprep.subr.mxu1 %v18063_v37  ;;  %6452 = vmatprep.subr.mxu0 %v18063_v37  ;;  %v1774_v35 = vmax.f32 %v13660_v6, %v13791_v41  ;;  %v13865_v46 = vmax.f32 %v1425_v47, %v1522_v8  ;;  %v13869_v48 = vld [vmem:[#allocation2 + $0x1c0] sm:$0xff]  ;;  %v1192_v6 = vrot.slane %v13831_v60, 1  ;;  %v13879_v56 = vmax.f32 %v1789_v19, %v13837_v49  ;;  %v18069_v14 = vld [vmem:[#allocation108_spill] sm:$0xff] }
 0x4eb   : > { %v13835_v61 = vpop.permute.xlu0 %5135  ;;  %v13851_v25 = vsel %vm5844_vm1, %v13299_v57, %v5102_v13  ;;  %v1782_v57 = vmax.f32 %v13662_v2, %v13818_v30  ;;  %v1222_v47 = vrot.slane %v13843_v34, 1  ;;  %7359 = vmatpush1.msra.mxu1 %v6344_v7  ;;  %6453 = vmatpush1.msra.mxu0 %v6344_v7  ;;  %v1869_v8 = vmax.f32 %v13828_v38, %v13840_v21 }
 0x4ec   : > { %18064 = vst [vmem:[#allocation359_spill] sm:$0xff] %v13851_v25  ;;  %v13889_v13 = vmax.f32 %v1435_v0, %v1552_v20  ;;  %7328 = vmatprep.subr.mxu1 %v18063_v37  ;;  %6454 = vmatprep.subr.mxu0 %v18063_v37  ;;  %v18068_v19 = vmax.f32 %v13712_v44, %v13715_v11  ;;  %v1252_v25 = vrot.slane %v13869_v48, 1  ;;  %v1253_v38 = vrot.slane %v13871_v45, 1  ;;  %v13904_v0 = vld [vmem:[#allocation2 + $0x90] sm:$0xff]  ;;  %v13906_v20 = vld [vmem:[#allocation2 + $0x98] sm:$0x3] }
 0x4ed   : > { %5427 = vrot.lane.b32.xlu1 %v18065_v52, %s8834_s11  ;;  %5361 = vrot.lane.b32.xlu0 %v18066_v16, %s8833_s9  ;;  %v1790_v52 = vmax.f32 %v13707_v51, %v13837_v49  ;;  %v13900_v16 = vmax.f32 %v1774_v35, %v13854_v50  ;;  %v6342_v51 = vld [vmem:[%s16833_s3 + $0x60] sm:$0xff]  ;;  %v13916_v44 = vmax.f32 %v1782_v57, %v13865_v46  ;;  %v1494_v29 = vrot.slane %v13833_v58, 2 }
 0x4ee   : > { %v13883_v2 = vpop.permute.xlu1 %5137  ;;  %v1900_v7 = vmax.f32 %v18068_v19, %v13744_v24  ;;  %7360 = vmatpush1.msra.mxu1 %v6343_v54  ;;  %v1194_v35 = vsel %vm1167_vm4, %v1192_v6, %v1193_v26  ;;  %v1493_v19 = vrot.slane %v13831_v60, 2  ;;  %v1224_v40 = vsel %vm1167_vm4, %v1222_v47, %v1223_v55  ;;  %6455 = vmatpush1.msra.mxu0 %v6343_v54  ;;  %v13939_v26 = vld [vmem:[#allocation2 + $0x1d0] sm:$0xff]  ;;  %v13941_v47 = vld [vmem:[#allocation2 + $0x1d8] sm:$0x3] }
 0x4ef   : > { %v13885_v22 = vpop.permute.xlu0 %5139  ;;  %v1524_v33 = vrot.slane %v13845_v42, 2  ;;  %7329 = vmatprep.subr.mxu1 %v18063_v37  ;;  %v13934_v6 = vmax.f32 %v1869_v8, %v13879_v56  ;;  %v13937_v58 = vmax.f32 %v1790_v52, %v13889_v13  ;;  %v1195_v55 = vrot.slane %v13904_v0, 1  ;;  %v6341_v54 = vld [vmem:[%s16833_s3 + $0x58] sm:$0xff]  ;;  %6456 = vmatprep.subr.mxu0 %v18063_v37 }
 0x4f0   : > { %18067 = vst [vmem:[#allocation88_spill] sm:$0xff] %v13885_v22  ;;  %v1196_v42 = vrot.slane %v13906_v20, 1  ;;  %7361 = vmatpush1.msra.mxu1 %v6342_v51  ;;  %v13950_v8 = vsel %vm1167_vm4, %v1252_v25, %v1253_v38  ;;  %v1416_v52 = vmax.f32 %v13831_v60, %v1194_v35  ;;  %v1225_v32 = vrot.slane %v13921_v62, 1  ;;  %v6340_v38 = vld [vmem:[%s16833_s3 + $0x50] sm:$0xff]  ;;  %6457 = vmatpush1.msra.mxu0 %v6342_v51 }
 0x4f1   : > { %5429 = vrot.lane.b32.xlu1 %v18069_v14, %s8834_s11  ;;  %5555 = vrot.lane.b32.xlu0 %v13741_v15, %s8809_s14  ;;  %v1523_v14 = vrot.slane %v13843_v34, 2  ;;  %v1226_v1 = vrot.slane %v13923_v36, 1  ;;  %v1870_v18 = vmax.f32 %v13900_v16, %v13916_v44  ;;  %v1426_v9 = vmax.f32 %v13843_v34, %v1224_v40 }
 0x4f2   : > { %v13929_v15 = vpop.permute.xlu1 %5141  ;;  %7330 = vmatprep.subr.mxu1 %v18063_v37  ;;  %v1495_v25 = vsel %vm1468_vm5, %v1493_v19, %v1494_v29  ;;  %v1553_v60 = vrot.slane %v13869_v48, 2  ;;  %v1255_v17 = vrot.slane %v13939_v26, 1  ;;  %v1436_v29 = vmax.f32 %v13869_v48, %v13950_v8  ;;  %6458 = vmatprep.subr.mxu0 %v18063_v37  ;;  %v6339_v48 = vld [vmem:[%s16833_s3 + $0x48] sm:$0xff] }
 0x4f3   : > { %18070 = vst [vmem:[#allocation141_spill] sm:$0xff] %v13929_v15  ;;  %v13931_v57 = vpop.permute.xlu0 %5143  ;;  %v1525_v35 = vsel %vm1468_vm5, %v1523_v14, %v1524_v33  ;;  %7362 = vmatpush1.msra.mxu1 %v6341_v54  ;;  %v1197_v34 = vsel %vm1167_vm4, %v1195_v55, %v1196_v42  ;;  %v1496_v19 = vrot.slane %v13904_v0, 2  ;;  %v1497_v33 = vrot.slane %v13906_v20, 2  ;;  %6459 = vmatpush1.msra.mxu0 %v6341_v54  ;;  %v8726_v55 = vld [vmem:[#allocation3 + $0x2c0] sm:$0xff]  ;;  %v18075_v20 = vld [vmem:[#allocation118_spill] sm:$0xff] }
 0x4f4   : > { %18071 = vst [vmem:[#allocation140_spill] sm:$0xff] %v13931_v57  ;;  %v1256_v57 = vrot.slane %v13941_v47, 1  ;;  %7331 = vmatprep.subr.mxu1 %v18063_v37  ;;  %v1227_v51 = vsel %vm1167_vm4, %v1225_v32, %v1226_v1  ;;  %v1526_v14 = vrot.slane %v13921_v62, 2  ;;  %v13993_v42 = vmax.f32 %v1426_v9, %v1525_v35  ;;  %6460 = vmatprep.subr.mxu0 %v18063_v37 }
 0x4f5   : > { %5557 = vrot.lane.b32.xlu1 %v1900_v7, %s8809_s14  ;;  %5171 = vrot.lane.b32.xlu0 %v18072_v12, %s8831_s7  ;;  %v1554_v7 = vrot.slane %v13871_v45, 2  ;;  %v13982_v45 = vmax.f32 %v1416_v52, %v1495_v25  ;;  %v1775_v1 = vmax.f32 %v13791_v41, %v13854_v50  ;;  %v1783_v32 = vmax.f32 %v13818_v30, %v13865_v46 }
 0x4f6   : > { %v13971_v16 = vpop.permute.xlu1 %5145  ;;  %7363 = vmatpush1.msra.mxu1 %v6340_v38  ;;  %v1257_v8 = vsel %vm1167_vm4, %v1255_v17, %v1256_v57  ;;  %v1417_v54 = vmax.f32 %v13904_v0, %v1197_v34  ;;  %v1427_v25 = vmax.f32 %v13921_v62, %v1227_v51  ;;  %v1498_v41 = vsel %vm1468_vm5, %v1496_v19, %v1497_v33  ;;  %v6338_v17 = vld [vmem:[%s16833_s3 + $0x40] sm:$0xff]  ;;  %v14037_v34 = vld [vmem:[#allocation2 + $0x1f0] sm:$0xff]  ;;  %v14039_v19 = vld [vmem:[#allocation2 + $0x1f8] sm:$0x3] }
 0x4f7   : > { %18073 = vst [vmem:[#allocation110_spill] sm:$0xff] %v13971_v16  ;;  %v13973_v40 = vpop.permute.xlu0 %5147  ;;  %7332 = vmatprep.subr.mxu1 %v18063_v37  ;;  %v1556_v30 = vrot.slane %v13939_v26, 2  ;;  %6461 = vmatpush1.msra.mxu0 %v6340_v38  ;;  %v1902_v0 = vmax.f32 %v1870_v18, %v13937_v58  ;;  %v1791_v57 = vmax.f32 %v13837_v49, %v13889_v13  ;;  %v14019_v62 = vld [vmem:[#allocation2 + $0x1e0] sm:$0xff]  ;;  %v18077_v38 = vld [vmem:[#allocation122_spill] sm:$0xff] }
 0x4f8   : > { %18074 = vst [vmem:[#allocation112_spill] sm:$0xff] %v13973_v40  ;;  %v1527_v40 = vrot.slane %v13923_v36, 2  ;;  %v1555_v36 = vsel %vm1468_vm5, %v1553_v60, %v1554_v7  ;;  %v1557_v60 = vrot.slane %v13941_v47, 2  ;;  %7364 = vmatpush1.msra.mxu1 %v6339_v48  ;;  %v14021_v7 = vld [vmem:[#allocation2 + $0x1e8] sm:$0x3]  ;;  %6462 = vmatprep.subr.mxu0 %v18063_v37  ;;  %v18076_v47 = vld [vmem:[#allocation234_spill] sm:$0xff]  ;;  %v14032_v49 = vmax.f32 %v1775_v1, %v13982_v45 }
 0x4f9   : > { %5267 = vrot.lane.b32.xlu1 %v8726_v55, %s8832_s8  ;;  %5431 = vrot.lane.b32.xlu0 %v18075_v20, %s8834_s11  ;;  %v14029_v18 = vmax.f32 %v1436_v29, %v1555_v36  ;;  %v6337_v33 = vld [vmem:[%s16833_s3 + $0x38] sm:$0xff]  ;;  %v1437_v51 = vmax.f32 %v13939_v26, %v1257_v8  ;;  %v1776_v29 = vmax.f32 %v13854_v50, %v13982_v45  ;;  %v14047_v55 = vld [vmem:[#allocation2 + $0x200] sm:$0xff]  ;;  %v14049_v20 = vld [vmem:[#allocation2 + $0x208] sm:$0x3]  ;;  %v1258_v50 = vrot.slane %v14019_v62, 1 }
 0x4fa   : > { %v14004_v52 = vpop.permute.xlu1 %5149  ;;  %v1528_v35 = vsel %vm1468_vm5, %v1526_v14, %v1527_v40  ;;  %7333 = vmatprep.subr.mxu1 %v18063_v37  ;;  %v14035_v40 = vmax.f32 %v1783_v32, %v13993_v42  ;;  %v1718_v14 = vmax.f32 %v1417_v54, %v1498_v41  ;;  %6463 = vmatpush1.msra.mxu0 %v6339_v48  ;;  %v1259_v45 = vrot.slane %v14021_v7, 1  ;;  %v6336_v54 = vld [vmem:[%s16833_s3 + $0x30] sm:$0xff]  ;;  %v14086_v16 = vld [vmem:[#allocation2 + $0x218] sm:$0x3] }
 0x4fb   : > { %v14006_v9 = vpop.permute.xlu0 %5151  ;;  %7365 = vmatpush1.msra.mxu1 %v6338_v17  ;;  %v1558_v36 = vsel %vm1468_vm5, %v1556_v30, %v1557_v60  ;;  %v1784_v26 = vmax.f32 %v13865_v46, %v13993_v42  ;;  %6464 = vmatprep.subr.mxu0 %v18063_v37  ;;  %v1261_v48 = vrot.slane %v14037_v34, 1  ;;  %v1262_v8 = vrot.slane %v14039_v19, 1 }
 0x4fc   : > { %7334 = vmatprep.subr.mxu1 %v18063_v37  ;;  %v1264_v46 = vrot.slane %v14047_v55, 1  ;;  %v1265_v42 = vrot.slane %v14049_v20, 1  ;;  %v1871_v41 = vmax.f32 %v14032_v49, %v14035_v40  ;;  %6465 = vmatpush1.msra.mxu0 %v6338_v17  ;;  %v1260_v49 = vsel %vm1167_vm4, %v1258_v50, %v1259_v45  ;;  %v6334_v50 = vld [vmem:[%s16833_s3 + $0x20] sm:$0xff] }
 0x4fd   : > { %5363 = vrot.lane.b32.xlu1 %v18076_v47, %s8833_s9  ;;  %5433 = vrot.lane.b32.xlu0 %v18077_v38, %s8834_s11  ;;  %v1728_v47 = vmax.f32 %v1427_v25, %v1528_v35  ;;  %v14073_v25 = vmax.f32 %v1791_v57, %v14029_v18  ;;  %v1824_v35 = vmax.f32 %v1776_v29, %v1718_v14  ;;  %v14084_v38 = vld [vmem:[#allocation2 + $0x210] sm:$0xff]  ;;  %v6335_v57 = vld [vmem:[%s16833_s3 + $0x28] sm:$0xff]  ;;  %v1566_v45 = vrot.slane %v14049_v20, 2 }
 0x4fe   : > { %v14051_v1 = vpop.permute.xlu1 %5153  ;;  %7366 = vmatpush1.msra.mxu1 %v6337_v33  ;;  %6466 = vmatprep.subr.mxu0 %v18063_v37  ;;  %v8727_v14 = vld [vmem:[#allocation3 + $0x2d0] sm:$0xff]  ;;  %v1266_v29 = vsel %vm1167_vm4, %v1264_v46, %v1265_v42  ;;  %v1876_v22 = vmax.f32 %v13715_v11, %v13744_v24  ;;  %v18106_v24 = vld [vmem:[#allocation308_spill] sm:$0xff] }
 0x4ff   : > { %v14053_v32 = vpop.permute.xlu0 %5155  ;;  %18079 = vst [vmem:[#allocation356_spill] sm:$0xff] %v14073_v25  ;;  %7335 = vmatprep.subr.mxu1 %v18063_v37  ;;  %v14092_v17 = vmax.f32 %v1784_v26, %v1728_v47  ;;  %6467 = vmatpush1.msra.mxu0 %v6337_v33  ;;  %v1562_v47 = vrot.slane %v14037_v34, 2  ;;  %v1563_v26 = vrot.slane %v14039_v19, 2  ;;  %v1565_v33 = vrot.slane %v14047_v55, 2  ;;  %v8730_v11 = vld [vmem:[#allocation3 + $0x130] sm:$0xff] }
 0x500   : > { %18078 = vst [vmem:[#allocation335_spill] sm:$0xff] %v14053_v32  ;;  %7367 = vmatpush1.msra.mxu1 %v6336_v54  ;;  %6468 = vmatprep.subr.mxu0 %v18063_v37  ;;  %v1903_v19 = vmax.f32 %v1871_v41, %v14073_v25  ;;  %v18086_v41 = vld [vmem:[#allocation235_spill] sm:$0xff] }
 0x501   : > { %5559 = vrot.lane.b32.xlu1 %v13934_v6, %s8809_s14  ;;  %5561 = vrot.lane.b32.xlu0 %v1902_v0, %s8809_s14  ;;  %v1738_v6 = vmax.f32 %v1437_v51, %v1558_v36  ;;  %v1792_v0 = vmax.f32 %v13889_v13, %v14029_v18  ;;  %v1263_v51 = vsel %vm1167_vm4, %v1261_v48, %v1262_v8  ;;  %v1559_v13 = vrot.slane %v14019_v62, 2  ;;  %v18082_v18 = vld [vmem:[#allocation258_spill] sm:$0xff] }
 0x502   : > { %v14078_v30 = vpop.permute.xlu1 %5157  ;;  %7336 = vmatprep.subr.mxu1 %v18063_v37  ;;  %v1560_v36 = vrot.slane %v14021_v7, 2  ;;  %v1267_v48 = vrot.slane %v14084_v38, 1  ;;  %v1268_v8 = vrot.slane %v14086_v16, 1  ;;  %6469 = vmatpush1.msra.mxu0 %v6336_v54  ;;  %v1872_v20 = vmax.f32 %v1824_v35, %v14092_v17 }
 0x503   : > { %18080 = vst [vmem:[#allocation171_spill] sm:$0xff] %v14078_v30  ;;  %v14080_v60 = vpop.permute.xlu0 %5159  ;;  %7368 = vmatpush1.msra.mxu1 %v6335_v57  ;;  %v14119_v42 = vmax.f32 %v1792_v0, %v1738_v6  ;;  %v1439_v3 = vmax.f32 %v14037_v34, %v1263_v51  ;;  %v1440_v54 = vmax.f32 %v14047_v55, %v1266_v29  ;;  %v1568_v35 = vrot.slane %v14084_v38, 2  ;;  %v6332_v55 = vld [vmem:[%s16833_s3 + $0x10] sm:$0xff] }
 0x504   : > { %18081 = vst [vmem:[#allocation253_spill] sm:$0xff] %v14080_v60  ;;  %7337 = vmatprep.subr.mxu1 %v18063_v37  ;;  %v1561_v6 = vsel %vm1468_vm5, %v1559_v13, %v1560_v36  ;;  %v1564_v0 = vsel %vm1468_vm5, %v1562_v47, %v1563_v26  ;;  %v1269_v34 = vsel %vm1167_vm4, %v1267_v48, %v1268_v8  ;;  %v14164_v8 = vld [vmem:[#allocation2 + $0x220] sm:$0xff] }
 0x505   : > { %5173 = vrot.lane.b32.xlu1 %v18082_v18, %s8831_s7  ;;  %5269 = vrot.lane.b32.xlu0 %v8727_v14, %s8832_s8  ;;  %v1438_v14 = vmax.f32 %v14019_v62, %v1260_v49  ;;  %v1567_v62 = vsel %vm1468_vm5, %v1565_v33, %v1566_v45  ;;  %v1569_v49 = vrot.slane %v14086_v16, 2  ;;  %v1904_v13 = vmax.f32 %v1872_v20, %v14119_v42  ;;  %v18088_v16 = vld [vmem:[#allocation194_spill] sm:$0xff] }
 0x506   : > { %v14113_v7 = vpop.permute.xlu1 %5161  ;;  %7369 = vmatpush1.msra.mxu1 %v6334_v50  ;;  %6470 = vmatprep.subr.mxu0 %v18063_v37  ;;  %v1740_v36 = vmax.f32 %v1439_v3, %v1564_v0  ;;  %v14153_v47 = vmax.f32 %v1440_v54, %v1567_v62  ;;  %v1441_v26 = vmax.f32 %v14084_v38, %v1269_v34  ;;  %v6330_v3 = vld [vmem:[%s16833_s3] sm:$0xff]  ;;  %v14184_v0 = vld [vmem:[#allocation2 + $0x230] sm:$0xff]  ;;  %v998_v62 = vld [vmem:[#allocation2 + $0x238] sm:$0x3] }
 0x507   : > { %18083 = vst [vmem:[#allocation357_spill] sm:$0xff] %v14113_v7  ;;  %v14115_v46 = vpop.permute.xlu0 %5163  ;;  %v6333_v7 = vld [vmem:[%s16833_s3 + $0x18] sm:$0xff]  ;;  %7338 = vmatprep.subr.mxu1 %v18063_v37  ;;  %6471 = vmatpush1.msra.mxu0 %v6335_v57  ;;  %v1739_v29 = vmax.f32 %v1438_v14, %v1561_v6  ;;  %v6331_v57 = vld [vmem:[%s16833_s3 + $0x8] sm:$0xff]  ;;  %v1570_v33 = vsel %vm1468_vm5, %v1568_v35, %v1569_v49  ;;  %v18090_v38 = vld [vmem:[#allocation259_spill] sm:$0xff]  ;;  %v1574_v63 = vrot.slane %v14184_v0, 2  ;;  %v1575_v30 = vrot.slane %v998_v62, 2 }
 0x508   : > { %18084 = vst [vmem:[#allocation358_spill] sm:$0xff] %v14115_v46  ;;  %v18085_v46 = vld [vmem:[#allocation128_spill] sm:$0xff]  ;;  %7370 = vmatpush1.msra.mxu1 %v6333_v7  ;;  %6472 = vmatprep.subr.mxu0 %v18063_v37  ;;  %v14174_v20 = vmax.f32 %v1441_v26, %v1570_v33  ;;  %v1794_v14 = vmax.f32 %v1740_v36, %v14153_v47  ;;  %v6361_v34 = vld [vmem:[%s16833_s3 + $0xf8] sm:$0xff]  ;;  %v8728_v49 = vld [vmem:[#allocation3 + $0x2e0] sm:$0xff] }
 0x509   : > { %5435 = vrot.lane.b32.xlu1 %v18085_v46, %s8834_s11  ;;  %5365 = vrot.lane.b32.xlu0 %v18086_v41, %s8833_s9  ;;  %v1270_v41 = vrot.slane %v14164_v8, 1  ;;  %v1873_v35 = vmax.f32 %v13517_v43, %v13520_v31  ;;  %v6360_v43 = vld [vmem:[%s16833_s3 + $0xf0] sm:$0xff] }
 0x50a   : > { %v14140_v51 = vpop.permute.xlu1 %5165  ;;  %7339 = vmatprep.subr.mxu1 %v18063_v37  ;;  %6473 = vmatpush1.msra.mxu0 %v6334_v50  ;;  %v1793_v50 = vmax.f32 %v1739_v29, %v1740_v36  ;;  %v1571_v36 = vrot.slane %v14164_v8, 2 }
 0x50b   : > { %18087 = vst [vmem:[#allocation90_spill] sm:$0xff] %v14140_v51  ;;  %v14142_v46 = vpop.permute.xlu0 %5245  ;;  %7371 = vmatpush1.msra.mxu1 %v6332_v55  ;;  %6474 = vmatprep.subr.mxu0 %v18063_v37 }
 0x50c   : > { %7340 = vmatprep.subr.mxu1 %v18063_v37  ;;  %6475 = vmatpush1.msra.mxu0 %v6333_v7  ;;  %v14196_v29 = vmax.f32 %v1793_v50, %v14153_v47 }
 0x50d   : > { %5437 = vrot.lane.b32.xlu1 %v18088_v16, %s8834_s11  ;;  %5563 = vrot.lane.b32.xlu0 %v1903_v19, %s8809_s14  ;;  %v996_v19 = vld [vmem:[#allocation2 + $0x228] sm:$0x3]  ;;  %v14199_v16 = vmax.f32 %v1794_v14, %v14174_v20 }
 0x50e   : > { %v14160_v45 = vpop.permute.xlu1 %5341  ;;  %7372 = vmatpush1.msra.mxu1 %v6331_v57  ;;  %v1271_v54 = vrot.slane %v996_v19, 1  ;;  %6476 = vmatprep.subr.mxu0 %v18063_v37  ;;  %v1572_v33 = vrot.slane %v996_v19, 2  ;;  %v18094_v19 = vld [vmem:[#allocation238_spill] sm:$0xff] }
 0x50f   : > { %18089 = vst [vmem:[#allocation341_spill] sm:$0xff] %v14160_v45  ;;  %v14162_v48 = vpop.permute.xlu0 %5247  ;;  %7341 = vmatprep.subr.mxu1 %v18063_v37  ;;  %6477 = vmatpush1.msra.mxu0 %v6332_v55  ;;  %v1874_v55 = vmax.f32 %v13647_v4, %v13693_v27  ;;  %v6359_v4 = vld [vmem:[%s16833_s3 + $0xe8] sm:$0xff] }
 0x510   : > { %7373 = vmatpush1.msra.mxu1 %v6330_v3  ;;  %v1272_v26 = vsel %vm1167_vm4, %v1270_v41, %v1271_v54  ;;  %6478 = vmatprep.subr.mxu0 %v18063_v37  ;;  %v18095_v41 = vld [vmem:[#allocation145_spill] sm:$0xff]  ;;  %v1905_v54 = vmax.f32 %v1873_v35, %v14196_v29  ;;  %v1573_v15 = vsel %vm1468_vm5, %v1571_v36, %v1572_v33  ;;  %v14249_v36 = vld [vmem:[%s16833_s3 + $0xd8] sm:$0xff] }
 0x511   : > { %5565 = vrot.lane.b32.xlu1 %v1904_v13, %s8809_s14  ;;  %5175 = vrot.lane.b32.xlu0 %v18090_v38, %s8831_s7  ;;  %v18092_v13 = vld [vmem:[#allocation144_spill] sm:$0xff]  ;;  %v1906_v51 = vmax.f32 %v1874_v55, %v14199_v16  ;;  %v1442_v60 = vmax.f32 %v14164_v8, %v1272_v26  ;;  %v6358_v8 = vld [vmem:[%s16833_s3 + $0xe0] sm:$0xff]  ;;  %v1795_v35 = vmax.f32 %v14153_v47, %v14174_v20  ;;  %v8729_v47 = vld [vmem:[#allocation3 + $0x2f0] sm:$0xff] }
 0x512   : > { %v14180_v6 = vpop.permute.xlu1 %5343  ;;  %7342 = vmatprep.subr.mxu1 %v18063_v37  ;;  %6479 = vmatpush1.msra.mxu0 %v6331_v57 }
 0x513   : > { %18091 = vst [vmem:[#allocation342_spill] sm:$0xff] %v14180_v6  ;;  %v14182_v7 = vpop.permute.xlu0 %5231  ;;  %7374 = vmatpush2.msra.mxu1 %v6361_v34  ;;  %6480 = vmatprep.subr.mxu0 %v18063_v37 }
 0x514   : > { %7343 = vmatprep.subr.mxu1 %v18063_v37  ;;  %6481 = vmatpush1.msra.mxu0 %v6330_v3  ;;  %v1576_v3 = vsel %vm1468_vm5, %v1574_v63, %v1575_v30  ;;  %v14266_v63 = vld [vmem:[%s16833_s3 + $0xd0] sm:$0xff]  ;;  %v18099_v30 = vld [vmem:[#allocation262_spill] sm:$0xff] }
 0x515   : > { %5271 = vrot.lane.b32.xlu1 %v8728_v49, %s8832_s8  ;;  %5439 = vrot.lane.b32.xlu0 %v18092_v13, %s8834_s11  ;;  %v1273_v49 = vrot.slane %v14184_v0, 1  ;;  %v1274_v13 = vrot.slane %v998_v62, 1  ;;  %v14241_v62 = vmax.f32 %v1442_v60, %v1573_v15  ;;  %v14256_v15 = vld [vmem:[#allocation2 + $0x240] sm:$0xff]  ;;  %v1000_v60 = vld [vmem:[#allocation2 + $0x248] sm:$0x3] }
 0x516   : > { %v14210_v50 = vpop.permute.xlu1 %5249  ;;  %7375 = vmatpush2.msra.mxu1 %v6360_v43  ;;  %6482 = vmatprep.subr.mxu0 %v18063_v37  ;;  %v1578_v38 = vrot.slane %v1000_v60, 2 }
 0x517   : > { %v14212_v14 = vpop.permute.xlu0 %5327  ;;  %v1275_v57 = vsel %vm1167_vm4, %v1273_v49, %v1274_v13  ;;  %7344 = vmatprep.subr.mxu1 %v18063_v37  ;;  %6483 = vmatpush2.msra.mxu0 %v6361_v34  ;;  %v1276_v49 = vrot.slane %v14256_v15, 1  ;;  %v1277_v13 = vrot.slane %v1000_v60, 1  ;;  %v14326_v60 = vld [vmem:[%s16833_s3 + $0xb8] sm:$0xff] }
 0x518   : > { %18093 = vst [vmem:[#allocation232_spill] sm:$0xff] %v14212_v14  ;;  %7376 = vmatpush2.msra.mxu1 %v6359_v4  ;;  %v1443_v55 = vmax.f32 %v14184_v0, %v1275_v57  ;;  %6484 = vmatprep.subr.mxu0 %v18063_v37  ;;  %v14272_v0 = vmax.f32 %v1795_v35, %v14241_v62  ;;  %v14285_v57 = vld [vmem:[#allocation2 + $0x250] sm:$0xff]  ;;  %v1002_v35 = vld [vmem:[#allocation2 + $0x258] sm:$0x3] }
 0x519   : > { %5367 = vrot.lane.b32.xlu1 %v18094_v19, %s8833_s9  ;;  %5441 = vrot.lane.b32.xlu0 %v18095_v41, %s8834_s11  ;;  %v1580_v32 = vrot.slane %v14285_v57, 2  ;;  %v1581_v18 = vrot.slane %v1002_v35, 2 }
 0x51a   : > { %v14230_v19 = vpop.permute.xlu1 %5345  ;;  %7345 = vmatprep.subr.mxu1 %v18063_v37  ;;  %6485 = vmatpush2.msra.mxu0 %v6360_v43  ;;  %v14274_v34 = vmax.f32 %v1443_v55, %v1576_v3  ;;  %v18102_v55 = vld [vmem:[#allocation154_spill] sm:$0xff]  ;;  %v18103_v3 = vld [vmem:[#allocation239_spill] sm:$0xff] }
 0x51b   : > { %18096 = vst [vmem:[#allocation91_spill] sm:$0xff] %v14230_v19  ;;  %v14232_v41 = vpop.permute.xlu0 %5233  ;;  %7377 = vmatpush2.msra.mxu1 %v6358_v8  ;;  %6486 = vmatprep.subr.mxu0 %v18063_v37 }
 0x51c   : > { %7346 = vmatprep.subr.mxu1 %v18063_v37  ;;  %6487 = vmatpush2.msra.mxu0 %v6359_v4  ;;  %v1577_v4 = vrot.slane %v14256_v15, 2 }
 0x51d   : > { %5567 = vrot.lane.b32.xlu1 %v1905_v54, %s8809_s14  ;;  %5569 = vrot.lane.b32.xlu0 %v1906_v51, %s8809_s14  ;;  %v1875_v51 = vmax.f32 %v13657_v5, %v13698_v53  ;;  %v1796_v5 = vmax.f32 %v14174_v20, %v14241_v62  ;;  %v14291_v20 = vld [vmem:[%s16833_s3 + $0xc8] sm:$0xff] }
 0x51e   : > { %7378 = vmatpush2.msra.mxu1 %v14249_v36  ;;  %6488 = vmatprep.subr.mxu0 %v18063_v37 }
 0x51f   : > { %v14252_v26 = vpop.permute.xlu1 %5251  ;;  %v14254_v33 = vpop.permute.xlu0 %5329  ;;  %7347 = vmatprep.subr.mxu1 %v18063_v37  ;;  %6489 = vmatpush2.msra.mxu0 %v6358_v8  ;;  %v18107_v8 = vld [vmem:[#allocation81_spill] sm:$0xff] }
 0x520   : > { %18097 = vst [vmem:[#allocation339_spill] sm:$0xff] %v14252_v26  ;;  %18098 = vst [vmem:[#allocation40_spill] sm:$0xff] %v14254_v33  ;;  %7379 = vmatpush2.msra.mxu1 %v14266_v63  ;;  %6490 = vmatprep.subr.mxu0 %v18063_v37  ;;  %v5654_v26 = vsel %vm739_vm2, %v8730_v11, %v18106_v24  ;;  %v1579_v24 = vsel %vm1468_vm5, %v1577_v4, %v1578_v38  ;;  %v18112_v38 = vld [vmem:[#allocation324_spill] sm:$0xff] }
 0x521   : > { %5177 = vrot.lane.b32.xlu1 %v18099_v30, %s8831_s7  ;;  %5273 = vrot.lane.b32.xlu0 %v8729_v47, %s8832_s8  ;;  %v1907_v47 = vmax.f32 %v1875_v51, %v14272_v0  ;;  %v14309_v30 = vld [vmem:[%s16833_s3 + $0xc0] sm:$0xff] }
 0x522   : > { %7348 = vmatprep.subr.mxu1 %v18063_v37  ;;  %6491 = vmatpush2.msra.mxu0 %v14249_v36  ;;  %v18113_v36 = vld [vmem:[#allocation263_spill] sm:$0xff] }
 0x523   : > { %v14281_v43 = vpop.permute.xlu1 %5347  ;;  %v14283_v54 = vpop.permute.xlu0 %5235  ;;  %7380 = vmatpush2.msra.mxu1 %v14291_v20  ;;  %6492 = vmatprep.subr.mxu0 %v18063_v37 }
 0x524   : > { %18100 = vst [vmem:[#allocation362_spill] sm:$0xff] %v14281_v43  ;;  %18101 = vst [vmem:[#allocation363_spill] sm:$0xff] %v14283_v54  ;;  %v14301_v54 = vmax.f32 %v1796_v5, %v14274_v34  ;;  %v1280_v43 = vrot.slane %v1002_v35, 1  ;;  %7349 = vmatprep.subr.mxu1 %v18063_v37  ;;  %v1797_v35 = vmax.f32 %v14241_v62, %v14274_v34  ;;  %6493 = vmatpush2.msra.mxu0 %v14266_v63  ;;  %v18115_v62 = vld [vmem:[#allocation353_spill] sm:$0xff] }
 0x525   : > { %5443 = vrot.lane.b32.xlu1 %v18102_v55, %s8834_s11  ;;  %5369 = vrot.lane.b32.xlu0 %v18103_v3, %s8833_s9  ;;  %v1278_v55 = vsel %vm1167_vm4, %v1276_v49, %v1277_v13  ;;  %v1279_v3 = vrot.slane %v14285_v57, 1  ;;  %v5687_v49 = vsel %vm5679_vm11, %v5654_v26, %v18107_v8  ;;  %v18108_v13 = vld [vmem:[#allocation167_spill] sm:$0xff]  ;;  %v18109_v26 = vld [vmem:[#allocation84_spill] sm:$0xff] }
 0x526   : > { %7381 = vmatpush2.msra.mxu1 %v14309_v30  ;;  %v5720_v8 = vsel %vm5712_vm12, %v5687_v49, %v18109_v26  ;;  %v14369_v49 = vld [vmem:[%s16833_s3 + $0xa8] sm:$0xff]  ;;  %6494 = vmatprep.subr.mxu0 %v18063_v37 }
 0x527   : > { %v14314_v51 = vpop.permute.xlu1 %5253  ;;  %v14316_v5 = vpop.permute.xlu0 %5331  ;;  %v1281_v11 = vsel %vm1167_vm4, %v1279_v3, %v1280_v43  ;;  %7350 = vmatprep.subr.mxu1 %v18063_v37  ;;  %v1004_v3 = vld [vmem:[#allocation2 + $0x268] sm:$0x3]  ;;  %6495 = vmatpush2.msra.mxu0 %v14291_v20 }
 0x528   : > { %18104 = vst [vmem:[#allocation254_spill] sm:$0xff] %v14314_v51  ;;  %18105 = vst [vmem:[#allocation99_spill] sm:$0xff] %v14316_v5  ;;  %v1908_v5 = vmax.f32 %v1876_v22, %v14301_v54  ;;  %v1444_v51 = vmax.f32 %v14256_v15, %v1278_v55  ;;  %7382 = vmatpush2.msra.mxu1 %v14326_v60  ;;  %v14350_v22 = vld [vmem:[%s16833_s3 + $0xb0] sm:$0xff]  ;;  %v5753_v15 = vsel %vm5745_vm13, %v5720_v8, %v18112_v38  ;;  %v14364_v55 = vld [vmem:[#allocation2 + $0x260] sm:$0xff] }
 0x529   : > { %5445 = vrot.lane.b32.xlu1 %v18108_v13, %s8834_s11  ;;  %5571 = vrot.lane.b32.xlu0 %v1907_v47, %s8809_s14  ;;  %v1445_v4 = vmax.f32 %v14285_v57, %v1281_v11  ;;  %v18114_v26 = vld [vmem:[#allocation328_spill] sm:$0xff]  ;;  %v1582_v8 = vsel %vm1468_vm5, %v1580_v32, %v1581_v18  ;;  %v1877_v18 = vmax.f32 %v13840_v21, %v13879_v56  ;;  %v1282_v63 = vrot.slane %v14364_v55, 1  ;;  %v14393_v38 = vld [vmem:[%s16833_s3 + $0xa0] sm:$0xff] }
 0x52a   : > { %7351 = vmatprep.subr.mxu1 %v18063_v37  ;;  %v14359_v43 = vmax.f32 %v1444_v51, %v1579_v24  ;;  %v1283_v11 = vrot.slane %v1004_v3, 1  ;;  %6496 = vmatprep.subr.mxu0 %v18063_v37 }
 0x52b   : > { %v14342_v13 = vpop.permute.xlu1 %5349  ;;  %v14344_v47 = vpop.permute.xlu0 %5237  ;;  %7383 = vmatpush2.msra.mxu1 %v14350_v22  ;;  %v14401_v21 = vmax.f32 %v1445_v4, %v1582_v8  ;;  %v1583_v8 = vrot.slane %v14364_v55, 2  ;;  %6497 = vmatpush2.msra.mxu0 %v14309_v30 }
 0x52c   : > { %18110 = vst [vmem:[#allocation233_spill] sm:$0xff] %v14342_v13  ;;  %18111 = vst [vmem:[#allocation108_spill] sm:$0xff] %v14344_v47  ;;  %7352 = vmatprep.subr.mxu1 %v18063_v37  ;;  %6498 = vmatprep.subr.mxu0 %v18063_v37 }
 0x52d   : > { %5573 = vrot.lane.b32.xlu1 %v1908_v5, %s8809_s14  ;;  %5179 = vrot.lane.b32.xlu0 %v18113_v36, %s8831_s7  ;;  %v5786_v5 = vsel %vm5778_vm14, %v5753_v15, %v18114_v26  ;;  %v8731_v15 = vld [vmem:[#allocation3 + $0x300] sm:$0xff]  ;;  %v18118_v26 = vld [vmem:[#allocation176_spill] sm:$0xff] }
 0x52e   : > { %v5819_v57 = vsel %vm5811_vm15, %v5786_v5, %v18115_v62  ;;  %7384 = vmatpush2.msra.mxu1 %v14369_v49  ;;  %v1798_v5 = vmax.f32 %v14274_v34, %v14359_v43  ;;  %v1878_v34 = vmax.f32 %v13916_v44, %v13937_v58  ;;  %v18121_v44 = vld [vmem:[#allocation284_spill] sm:$0xff]  ;;  %6499 = vmatpush2.msra.mxu0 %v14326_v60 }
 0x52f   : > { %v14378_v51 = vpop.permute.xlu1 %5255  ;;  %v14380_v24 = vpop.permute.xlu0 %5333  ;;  %v5852_v32 = vsel %vm5844_vm1, %v5819_v57, %v13418_v10  ;;  %v14399_v10 = vmax.f32 %v1797_v35, %v14359_v43  ;;  %v14407_v57 = vld [vmem:[#allocation2 + $0x270] sm:$0xff]  ;;  %7353 = vmatprep.subr.mxu1 %v18063_v37  ;;  %6500 = vmatprep.subr.mxu0 %v18063_v37 }
 0x530   : > { %18116 = vst [vmem:[#allocation257_spill] sm:$0xff] %v14378_v51  ;;  %18117 = vst [vmem:[#allocation118_spill] sm:$0xff] %v14380_v24  ;;  %v5885_v62 = vsel %vm5877_vm3, %v5852_v32, %v14004_v52  ;;  %v1006_v51 = vld [vmem:[#allocation2 + $0x278] sm:$0x3]  ;;  %7385 = vmatpush2.msra.mxu1 %v14393_v38  ;;  %v1584_v32 = vrot.slane %v1004_v3, 2  ;;  %v14443_v3 = vld [vmem:[%s16833_s3 + $0x90] sm:$0xff]  ;;  %6501 = vmatpush2.msra.mxu0 %v14350_v22 }
 0x531   : > { %5275 = vrot.lane.b32.xlu1 %v8731_v15, %s8832_s8  ;;  %5447 = vrot.lane.b32.xlu0 %v18118_v26, %s8834_s11  ;;  %v5918_v15 = vsel %vm17333_vm10, %v5885_v62, %v14142_v46  ;;  %v14423_v52 = vld [vmem:[%s16833_s3 + $0x98] sm:$0xff]  ;;  %v1284_v46 = vsel %vm1167_vm4, %v1282_v63, %v1283_v11  ;;  %v1909_v26 = vmax.f32 %v1877_v18, %v14399_v10  ;;  %v1285_v63 = vrot.slane %v14407_v57, 1 }
 0x532   : > { %v5951_v20 = vsel %vm17332_vm9, %v5918_v15, %v14160_v45  ;;  %7354 = vmatprep.subr.mxu1 %v18063_v37  ;;  %v14437_v62 = vmax.f32 %v1798_v5, %v14401_v21  ;;  %v1286_v11 = vrot.slane %v1006_v51, 1  ;;  %v1446_v18 = vmax.f32 %v14364_v55, %v1284_v46  ;;  %v14498_v22 = vld [vmem:[#allocation2 + $0x298] sm:$0x3]  ;;  %6502 = vmatprep.subr.mxu0 %v18063_v37 }
 0x533   : > { %v14413_v35 = vpop.permute.xlu1 %5351  ;;  %v14415_v4 = vpop.permute.xlu0 %5239  ;;  %7386 = vmatpush2.msra.mxu1 %v14423_v52  ;;  %v1585_v5 = vsel %vm1468_vm5, %v1583_v8, %v1584_v32  ;;  %v1586_v60 = vrot.slane %v14407_v57, 2  ;;  %v1587_v45 = vrot.slane %v1006_v51, 2  ;;  %v8732_v8 = vld [vmem:[#allocation3 + $0x160] sm:$0xff]  ;;  %v18125_v32 = vld [vmem:[#allocation309_spill] sm:$0xff]  ;;  %6503 = vmatpush2.msra.mxu0 %v14369_v49  ;;  %v14534_v49 = vld [vmem:[#allocation2 + $0x2b8] sm:$0x3] }
 0x534   : > { %18119 = vst [vmem:[#allocation234_spill] sm:$0xff] %v14413_v35  ;;  %18120 = vst [vmem:[#allocation122_spill] sm:$0xff] %v14415_v4  ;;  %7355 = vmatprep.subr.mxu1 %v18063_v37  ;;  %v1910_v55 = vmax.f32 %v1878_v34, %v14437_v62  ;;  %v1287_v46 = vsel %vm1167_vm4, %v1285_v63, %v1286_v11  ;;  %v1747_v34 = vmax.f32 %v1446_v18, %v1585_v5  ;;  %v14483_v51 = vld [vmem:[%s16833_s3 + $0x80] sm:$0xff]  ;;  %v18129_v11 = vld [vmem:[#allocation370_spill] sm:$0xff] }
 0x535   : > { %5371 = vrot.lane.b32.xlu0 %v18121_v44, %s8833_s9  ;;  %6133 = vrot.lane.b32.xlu1 %v5951_v20, %s8835_s30  ;;  %v14459_v20 = vld [vmem:[%s16833_s3 + $0x88] sm:$0xff]  ;;  %v18124_v44 = vld [vmem:[#allocation179_spill] sm:$0xff]  ;;  %v1799_v63 = vmax.f32 %v14359_v43, %v14401_v21  ;;  %v18130_v18 = vld [vmem:[#allocation226_spill] sm:$0xff] }
 0x536   : > { %7387 = vmatpush2.msra.mxu1 %v14443_v3  ;;  %v18131_v43 = vld [vmem:[#allocation49_spill] sm:$0xff]  ;;  %v1800_v35 = vmax.f32 %v14401_v21, %v1747_v34  ;;  %6504 = vmatprep.subr.mxu0 %v18063_v37 }
 0x537   : > { %v14447_v30 = vpop.permute.xlu1 %5257  ;;  %v14449_v15 = vpop.permute.xlu0 %5335  ;;  %7356 = vmatprep.subr.mxu1 %v18063_v37  ;;  %6505 = vmatpush2.msra.mxu0 %v14393_v38 }
 0x538   : > { %18122 = vst [vmem:[#allocation128_spill] sm:$0xff] %v14447_v30  ;;  %18123 = vst [vmem:[#allocation235_spill] sm:$0xff] %v14449_v15  ;;  %v5655_v15 = vsel %vm739_vm2, %v8732_v8, %v18125_v32  ;;  %v18126_v30 = vld [vmem:[#allocation344_spill] sm:$0xff]  ;;  %7388 = vmatpush2.msra.mxu1 %v14459_v20  ;;  %v1588_v8 = vsel %vm1468_vm5, %v1586_v60, %v1587_v45  ;;  %v14496_v32 = vld [vmem:[#allocation2 + $0x290] sm:$0xff]  ;;  %v14514_v60 = vmax.f32 %v1799_v63, %v1747_v34 }
 0x539   : > { %5575 = vrot.lane.b32.xlu0 %v1909_v26, %s8809_s14  ;;  %5449 = vrot.lane.b32.xlu1 %v18124_v44, %s8834_s11  ;;  %v5688_v26 = vsel %vm5679_vm11, %v5655_v15, %v18126_v30  ;;  %v1447_v15 = vmax.f32 %v14407_v57, %v1287_v46  ;;  %v14502_v57 = vld [vmem:[#allocation2 + $0x2a0] sm:$0xff]  ;;  %v14504_v46 = vld [vmem:[#allocation2 + $0x2a8] sm:$0x3] }
 0x53a   : > { %v5721_v30 = vsel %vm5712_vm12, %v5688_v26, %v18129_v11  ;;  %7357 = vmatprep.subr.mxu1 %v18063_v37  ;;  %v18133_v11 = vld [vmem:[#allocation354_spill] sm:$0xff]  ;;  %18136 = vst [vmem:[#allocation154_spill] sm:$0xff] %v14514_v60  ;;  %v18137_v63 = vld [vmem:[#allocation184_spill] sm:$0xff]  ;;  %v1294_v21 = vrot.slane %v14502_v57, 1  ;;  %v1295_v34 = vrot.slane %v14504_v46, 1  ;;  %6506 = vmatprep.subr.mxu0 %v18063_v37 }
 0x53b   : > { %v14473_v4 = vpop.permute.xlu1 %5353  ;;  %v14475_v44 = vpop.permute.xlu0 %5241  ;;  %v5754_v5 = vsel %vm5745_vm13, %v5721_v30, %v18130_v18  ;;  %7389 = vmatpush2.msra.mxu1 %v14483_v51  ;;  %v14518_v18 = vld [vmem:[#allocation2 + $0x280] sm:$0xff]  ;;  %6507 = vmatpush2.msra.mxu0 %v14423_v52 }
 0x53c   : > { %18127 = vst [vmem:[#allocation194_spill] sm:$0xff] %v14473_v4  ;;  %18128 = vst [vmem:[#allocation144_spill] sm:$0xff] %v14475_v44  ;;  %v18132_v44 = vld [vmem:[#allocation351_spill] sm:$0xff]  ;;  %v1748_v4 = vmax.f32 %v1447_v15, %v1588_v8  ;;  %v18138_v8 = vld [vmem:[#allocation302_spill] sm:$0xff]  ;;  %6508 = vmatprep.subr.mxu0 %v18063_v37 }
 0x53d   : > { %5181 = vrot.lane.b32.xlu0 %v18131_v43, %s8831_s7  ;;  %5577 = vrot.lane.b32.xlu1 %v1910_v55, %s8809_s14  ;;  %v5787_v26 = vsel %vm5778_vm14, %v5754_v5, %v18132_v44  ;;  %v1879_v44 = vmax.f32 %v14035_v40, %v14073_v25  ;;  %v14520_v5 = vld [vmem:[#allocation2 + $0x288] sm:$0x3]  ;;  %v14524_v43 = vld [vmem:[#allocation2 + $0x2b0] sm:$0xff]  ;;  %v8734_v15 = vld [vmem:[#allocation3 + $0xc0] sm:$0xff] }
 0x53e   : > { %v5820_v55 = vsel %vm5811_vm15, %v5787_v26, %v18133_v11  ;;  %v1291_v26 = vrot.slane %v14496_v32, 1  ;;  %v1292_v11 = vrot.slane %v14498_v22, 1  ;;  %v14558_v38 = vmax.f32 %v1800_v35, %v1748_v4  ;;  %6509 = vmatpush2.msra.mxu0 %v14443_v3 }
 0x53f   : > { %v14510_v30 = vpop.permute.xlu1 %5259  ;;  %v14512_v45 = vpop.permute.xlu0 %5337  ;;  %v5853_v40 = vsel %vm5844_vm1, %v5820_v55, %v13420_v59  ;;  %v1288_v59 = vrot.slane %v14518_v18, 1  ;;  %v1289_v55 = vrot.slane %v14520_v5, 1  ;;  %v1911_v25 = vmax.f32 %v1879_v44, %v14514_v60  ;;  %v18142_v44 = vld [vmem:[#allocation56_spill] sm:$0xff]  ;;  %6510 = vmatprep.subr.mxu0 %v18063_v37 }
 0x540   : > { %18134 = vst [vmem:[#allocation238_spill] sm:$0xff] %v14510_v30  ;;  %18135 = vst [vmem:[#allocation145_spill] sm:$0xff] %v14512_v45  ;;  %v8733_v30 = vld [vmem:[#allocation3 + $0x310] sm:$0xff]  ;;  %v5647_v45 = vsel %vm739_vm2, %v8734_v15, %v18138_v8  ;;  %v5886_v24 = vsel %vm5877_vm3, %v5853_v40, %v14006_v9  ;;  %v1880_v15 = vmax.f32 %v14092_v17, %v14119_v42  ;;  %v1297_v9 = vrot.slane %v14524_v43, 1 }
 0x541   : > { %5451 = vrot.lane.b32.xlu0 %v18137_v63, %s8834_s11  ;;  %5277 = vrot.lane.b32.xlu1 %v8733_v30, %s8832_s8  ;;  %v5919_v30 = vsel %vm17333_vm10, %v5886_v24, %v14162_v48  ;;  %18141 = vst [vmem:[#allocation81_spill] sm:$0xff] %v14558_v38  ;;  %v1293_v48 = vsel %vm1167_vm4, %v1291_v26, %v1292_v11  ;;  %v1298_v24 = vrot.slane %v14534_v49, 1  ;;  %v1592_v8 = vrot.slane %v14496_v32, 2 }
 0x542   : > { %v5952_v40 = vsel %vm17332_vm9, %v5919_v30, %v14180_v6  ;;  %v1296_v17 = vsel %vm1167_vm4, %v1294_v21, %v1295_v34  ;;  %v1595_v35 = vrot.slane %v14502_v57, 2  ;;  %v1596_v4 = vrot.slane %v14504_v46, 2  ;;  %v8735_v30 = vld [vmem:[#allocation3 + $0x170] sm:$0xff]  ;;  %v18144_v34 = vld [vmem:[#allocation340_spill] sm:$0xff]  ;;  %6511 = vmatpush2.msra.mxu0 %v14459_v20 }
 0x543   : > { %v14547_v63 = vpop.permute.xlu1 %5355  ;;  %v14549_v47 = vpop.permute.xlu0 %5243  ;;  %v1290_v26 = vsel %vm1167_vm4, %v1288_v59, %v1289_v55  ;;  %v1589_v11 = vrot.slane %v14518_v18, 2  ;;  %v1590_v52 = vrot.slane %v14520_v5, 2  ;;  %v18145_v46 = vld [vmem:[#allocation345_spill] sm:$0xff]  ;;  %v1912_v5 = vmax.f32 %v1880_v15, %v14558_v38  ;;  %6512 = vmatprep.subr.mxu0 %v18063_v37  ;;  %v18152_v37 = vld [vmem:[#allocation327_spill] sm:$0xff] }
 0x544   : > { %18139 = vst [vmem:[#allocation239_spill] sm:$0xff] %v14547_v63  ;;  %18140 = vst [vmem:[#allocation308_spill] sm:$0xff] %v14549_v47  ;;  %v1593_v47 = vrot.slane %v14498_v22, 2  ;;  %v1299_v55 = vsel %vm1167_vm4, %v1297_v9, %v1298_v24  ;;  %v1449_v63 = vmax.f32 %v14496_v32, %v1293_v48  ;;  %v1598_v15 = vrot.slane %v14524_v43, 2  ;;  %v18148_v24 = vld [vmem:[#allocation371_spill] sm:$0xff]  ;;  %6513 = vmatpush2.msra.mxu0 %v14483_v51 }
 0x545   : > { %5373 = vrot.lane.b32.xlu0 %v18142_v44, %s8833_s9  ;;  %6137 = vrot.lane.b32.xlu1 %v5952_v40, %s8835_s30  ;;  %v18143_v40 = vld [vmem:[#allocation312_spill] sm:$0xff]  ;;  %v5680_v44 = vsel %vm5679_vm11, %v5647_v45, %v18144_v34  ;;  %v18146_v45 = vld [vmem:[#allocation199_spill] sm:$0xff]  ;;  %v1599_v9 = vrot.slane %v14534_v49, 2  ;;  %v1591_v32 = vsel %vm1468_vm5, %v1589_v11, %v1590_v52  ;;  %v18150_v49 = vld [vmem:[#allocation350_spill] sm:$0xff]  ;;  %v1451_v20 = vmax.f32 %v14524_v43, %v1299_v55 }
 0x546   : > { %v5656_v21 = vsel %vm739_vm2, %v8735_v30, %v18143_v40  ;;  %v1450_v30 = vmax.f32 %v14502_v57, %v1296_v17  ;;  %v1594_v3 = vsel %vm1468_vm5, %v1592_v8, %v1593_v47  ;;  %v1448_v40 = vmax.f32 %v14518_v18, %v1290_v26  ;;  %v18149_v18 = vld [vmem:[#allocation320_spill] sm:$0xff]  ;;  %v18154_v43 = vld [vmem:[#allocation331_spill] sm:$0xff] }
 0x547   : > { %v14579_v22 = vpop.permute.xlu1 %5261  ;;  %v14581_v6 = vpop.permute.xlu0 %5339  ;;  %v5689_v59 = vsel %vm5679_vm11, %v5656_v21, %v18145_v46  ;;  %v1597_v21 = vsel %vm1468_vm5, %v1595_v35, %v1596_v4  ;;  %v18151_v4 = vld [vmem:[#allocation347_spill] sm:$0xff]  ;;  %v1750_v26 = vmax.f32 %v1449_v63, %v1594_v3 }
 0x548   : > { %v5722_v57 = vsel %vm5712_vm12, %v5689_v59, %v18148_v24  ;;  %v14619_v11 = vmax.f32 %v1450_v30, %v1597_v21  ;;  %v1749_v52 = vmax.f32 %v1448_v40, %v1591_v32  ;;  %v1600_v59 = vsel %vm1468_vm5, %v1598_v15, %v1599_v9  ;;  %v18155_v55 = vld [vmem:[#allocation355_spill] sm:$0xff] }
 0x549   : > { %5579 = vrot.lane.b32.xlu0 %v1911_v25, %s8809_s14  ;;  %5453 = vrot.lane.b32.xlu1 %v18146_v45, %s8834_s11  ;;  %v18147_v25 = vld [vmem:[#allocation361_spill] sm:$0xff]  ;;  %v5755_v35 = vsel %vm5745_vm13, %v5722_v57, %v18150_v49  ;;  %v8736_v40 = vld [vmem:[#allocation3 + $0x340] sm:$0xff]  ;;  %v14641_v21 = vmax.f32 %v1451_v20, %v1600_v59 }
 0x54a   : > { %v5713_v48 = vsel %vm5712_vm12, %v5680_v44, %v18147_v25  ;;  %v18153_v44 = vld [vmem:[#allocation352_spill] sm:$0xff]  ;;  %v1802_v15 = vmax.f32 %v1750_v26, %v14619_v11  ;;  %v1801_v9 = vmax.f32 %v1749_v52, %v1750_v26  ;;  %v18163_v59 = vld [vmem:[#allocation343_spill] sm:$0xff] }
 0x54b   : > { %v14605_v17 = vpop.permute.xlu1 %5357  ;;  %v14607_v47 = vpop.permute.xlu0 %5167  ;;  %v5746_v8 = vsel %vm5745_vm13, %v5713_v48, %v18149_v18  ;;  %v5788_v46 = vsel %vm5778_vm14, %v5755_v35, %v18153_v44  ;;  %v1015_v18 = vld [vmem:[#allocation2 + $0x2c0] sm:$0xff]  ;;  %v1881_v35 = vmax.f32 %v13520_v31, %v14196_v29  ;;  %v18162_v44 = vld [vmem:[#allocation306_spill] sm:$0xff]  ;;  %v18164_v31 = vld [vmem:[#allocation360_spill] sm:$0xff] }
 0x54c   : > { %v5779_v34 = vsel %vm5778_vm14, %v5746_v8, %v18152_v37  ;;  %v5821_v45 = vsel %vm5811_vm15, %v5788_v46, %v18155_v55  ;;  %v1016_v8 = vld [vmem:[#allocation2 + $0x2c8] sm:$0x3]  ;;  %v1300_v20 = vrot.slane %v1015_v18, 1  ;;  %v1018_v37 = vld [vmem:[#allocation2 + $0x2d8] sm:$0x3] }
 0x54d   : > { %5183 = vrot.lane.b32.xlu0 %v18151_v4, %s8831_s7  ;;  %5581 = vrot.lane.b32.xlu1 %v1912_v5, %s8809_s14  ;;  %v5812_v51 = vsel %vm5811_vm15, %v5779_v34, %v18154_v43  ;;  %v18157_v5 = vld [vmem:[#allocation310_spill] sm:$0xff]  ;;  %v5854_v3 = vsel %vm5844_vm1, %v5821_v45, %v13458_v39  ;;  %v1301_v4 = vrot.slane %v1016_v8, 1  ;;  %v8737_v34 = vld [vmem:[#allocation3 + $0xd0] sm:$0xff]  ;;  %v1601_v45 = vrot.slane %v1015_v18, 2 }
 0x54e   : > { %v5845_v30 = vsel %vm5844_vm1, %v5812_v51, %v18157_v5  ;;  %v5887_v48 = vsel %vm5877_vm3, %v5854_v3, %v14051_v1  ;;  %v1882_v1 = vmax.f32 %v13693_v27, %v14199_v16  ;;  %v1017_v27 = vld [vmem:[#allocation2 + $0x2d0] sm:$0xff]  ;;  %v5648_v46 = vsel %vm739_vm2, %v8737_v34, %v18162_v44 }
 0x54f   : > { %v14630_v25 = vpop.permute.xlu1 %5263  ;;  %v14632_v63 = vpop.permute.xlu0 %5423  ;;  %v5878_v32 = vsel %vm5877_vm3, %v5845_v30, %v13835_v61  ;;  %v5681_v43 = vsel %vm5679_vm11, %v5648_v46, %v18163_v59  ;;  %v1302_v5 = vsel %vm1167_vm4, %v1300_v20, %v1301_v4  ;;  %v1602_v30 = vrot.slane %v1016_v8, 2  ;;  %v18171_v8 = vld [vmem:[#allocation326_spill] sm:$0xff] }
 0x550   : > { %18156 = vst [vmem:[#allocation167_spill] sm:$0xff] %v14630_v25  ;;  %v5911_v39 = vsel %vm17333_vm10, %v5878_v32, %v14182_v7  ;;  %v14665_v7 = vmax.f32 %v1802_v15, %v14641_v21  ;;  %v1303_v3 = vrot.slane %v1017_v27, 1  ;;  %v18165_v15 = vld [vmem:[#allocation366_spill] sm:$0xff]  ;;  %v1452_v4 = vmax.f32 %v1015_v18, %v1302_v5  ;;  %v18177_v18 = vld [vmem:[#allocation311_spill] sm:$0xff]  ;;  %v8739_v5 = vld [vmem:[#allocation3 + $0x350] sm:$0xff] }
 0x551   : > { %5455 = vrot.lane.b32.xlu0 %v18062_v23, %s8834_s11  ;;  %5279 = vrot.lane.b32.xlu1 %v8736_v40, %s8832_s8  ;;  %v5920_v23 = vsel %vm17333_vm10, %v5887_v48, %v14210_v50  ;;  %v5944_v61 = vsel %vm17332_vm9, %v5911_v39, %v14212_v14  ;;  %v14668_v50 = vmax.f32 %v1801_v9, %v14619_v11  ;;  %v1304_v40 = vrot.slane %v1018_v37, 1  ;;  %v18168_v39 = vld [vmem:[#allocation313_spill] sm:$0xff] }
 0x552   : > { %v5953_v49 = vsel %vm17332_vm9, %v5920_v23, %v14230_v19  ;;  %v1914_v51 = vmax.f32 %v1882_v1, %v14665_v7  ;;  %v5714_v9 = vsel %vm5712_vm12, %v5681_v43, %v18165_v15  ;;  %v18170_v1 = vld [vmem:[#allocation346_spill] sm:$0xff]  ;;  %v1603_v34 = vsel %vm1468_vm5, %v1601_v45, %v1602_v30  ;;  %v18172_v43 = vld [vmem:[#allocation372_spill] sm:$0xff] }
 0x553   : > { %v14652_v24 = vpop.permute.xlu1 %5359  ;;  %v14654_v57 = vpop.permute.xlu0 %5425  ;;  %v1913_v55 = vmax.f32 %v1881_v35, %v14668_v50  ;;  %v1305_v44 = vsel %vm1167_vm4, %v1303_v3, %v1304_v40  ;;  %v1604_v46 = vrot.slane %v1017_v27, 2  ;;  %v1605_v59 = vrot.slane %v1018_v37, 2  ;;  %v18173_v15 = vld [vmem:[#allocation330_spill] sm:$0xff] }
 0x554   : > { %18158 = vst [vmem:[#allocation84_spill] sm:$0xff] %v14652_v24  ;;  %18159 = vst [vmem:[#allocation324_spill] sm:$0xff] %v14654_v57  ;;  %v18178_v37 = vld [vmem:[#allocation318_spill] sm:$0xff]  ;;  %v14720_v30 = vmax.f32 %v1452_v4, %v1603_v34  ;;  %v1803_v3 = vmax.f32 %v14619_v11, %v14641_v21  ;;  %v1453_v40 = vmax.f32 %v1017_v27, %v1305_v44  ;;  %v1019_v11 = vld [vmem:[#allocation2 + $0x2e0] sm:$0xff] }
 0x555   : > { %6141 = vrot.lane.b32.xlu0 %v5953_v49, %s8835_s30  ;;  %6105 = vrot.lane.b32.xlu1 %v5944_v61, %s8835_s30  ;;  %v18169_v49 = vld [vmem:[#allocation349_spill] sm:$0xff]  ;;  %v1020_v27 = vld [vmem:[#allocation2 + $0x2e8] sm:$0x3]  ;;  %v18205_v19 = vld [vmem:[#allocation254_spill] sm:$0xff] }
 0x556   : > { %v5747_v61 = vsel %vm5745_vm13, %v5714_v9, %v18169_v49  ;;  %v18246_v57 = vld [vmem:[#allocation234_spill] sm:$0xff]  ;;  %v18322_v24 = vld [vmem:[#allocation60_spill] sm:$0xff] }
 0x557   : > { %v14672_v26 = vpop.permute.xlu1 %5551  ;;  %v14674_v52 = vpop.permute.xlu0 %5553  ;;  %v5780_v20 = vsel %vm5778_vm14, %v5747_v61, %v18171_v8  ;;  %v8601_v25 = vunpack.i.l.bf16 %v18322_v24 }
 0x558   : > { %18160 = vst [vmem:[#allocation263_spill] sm:$0xff] %v14672_v26  ;;  %18161 = vst [vmem:[#allocation328_spill] sm:$0xff] %v14674_v52  ;;  %v5813_v9 = vsel %vm5811_vm15, %v5780_v20, %v18173_v15 }
 0x559   : > { %5457 = vrot.lane.b32.xlu0 %v18072_v12, %s8834_s11  ;;  %5375 = vrot.lane.b32.xlu1 %v18164_v31, %s8833_s9  ;;  %v8738_v12 = vld [vmem:[#allocation3 + $0x180] sm:$0xff]  ;;  %v5846_v45 = vsel %vm5844_vm1, %v5813_v9, %v18177_v18  ;;  %v1306_v9 = vrot.slane %v1019_v11, 1 }
 0x55a   : > { %v5657_v23 = vsel %vm739_vm2, %v8738_v12, %v18168_v39  ;;  %v5879_v61 = vsel %vm5877_vm3, %v5846_v45, %v13883_v2  ;;  %vm17331_vm2 = vcmask 228352  }
 0x55b   : > { %v14689_v32 = vpop.permute.xlu1 %5169  ;;  %v14691_v48 = vpop.permute.xlu0 %5265  ;;  %v5690_v35 = vsel %vm5679_vm11, %v5657_v23, %v18170_v1  ;;  %v18179_v23 = vld [vmem:[#allocation329_spill] sm:$0xff]  ;;  %v1606_v1 = vsel %vm1468_vm5, %v1604_v46, %v1605_v59  ;;  %v5912_v20 = vsel %vm17333_vm10, %v5879_v61, %v14232_v41  ;;  %v1883_v46 = vmax.f32 %v13698_v53, %v14272_v0  ;;  %v18183_v59 = vld [vmem:[#allocation258_spill] sm:$0xff] }
 0x55c   : > { %18166 = vst [vmem:[#allocation353_spill] sm:$0xff] %v14689_v32  ;;  %18167 = vst [vmem:[#allocation176_spill] sm:$0xff] %v14691_v48  ;;  %v5723_v31 = vsel %vm5712_vm12, %v5690_v35, %v18172_v43  ;;  %v18180_v35 = vld [vmem:[#allocation334_spill] sm:$0xff]  ;;  %v5945_v2 = vsel %vm17332_vm9, %v5912_v20, %v14254_v33  ;;  %v14747_v41 = vmax.f32 %v1803_v3, %v14720_v30  ;;  %vm4034_vm11 = vcmask 326656  }
 0x55d   : > { %5585 = vrot.lane.b32.xlu0 %v1914_v51, %s8809_s14  ;;  %5583 = vrot.lane.b32.xlu1 %v1913_v55, %s8809_s14  ;;  %v18176_v51 = vld [vmem:[#allocation325_spill] sm:$0xff]  ;;  %v14749_v43 = vmax.f32 %v1453_v40, %v1606_v1  ;;  %v1022_v3 = vld [vmem:[#allocation2 + $0x2f8] sm:$0x3]  ;;  %v18190_v1 = vld [vmem:[#allocation139_spill] sm:$0xff]  ;;  %vm4067_vm12 = vcmask 424960  }
 0x55e   : > { %v5756_v55 = vsel %vm5745_vm13, %v5723_v31, %v18176_v51  ;;  %v1804_v31 = vmax.f32 %v14641_v21, %v14720_v30  ;;  %v1307_v51 = vrot.slane %v1020_v27, 1  ;;  %v18189_v21 = vld [vmem:[#allocation364_spill] sm:$0xff]  ;;  %vm17337_vm13 = vcmask 523264  }
 0x55f   : > { %v14709_v12 = vpop.permute.xlu1 %5427  ;;  %v14711_v39 = vpop.permute.xlu0 %5361  ;;  %v5789_v49 = vsel %vm5778_vm14, %v5756_v55, %v18179_v23  ;;  %v18185_v55 = vld [vmem:[#allocation339_spill] sm:$0xff]  ;;  %v18188_v23 = vld [vmem:[#allocation362_spill] sm:$0xff]  ;;  %vm17319_vm14 = vcmask 621568  }
 0x560   : > { %18174 = vst [vmem:[#allocation284_spill] sm:$0xff] %v14709_v12  ;;  %18175 = vst [vmem:[#allocation179_spill] sm:$0xff] %v14711_v39  ;;  %v5822_v8 = vsel %vm5811_vm15, %v5789_v49, %v18180_v35  ;;  %v1915_v49 = vmax.f32 %v1883_v46, %v14747_v41  ;;  %v14768_v61 = vmax.f32 %v1804_v31, %v14749_v43  ;;  %vm17321_vm15 = vcmask 719872  }
 0x561   : > { %5281 = vrot.lane.b32.xlu0 %v8739_v5, %s8832_s8  ;;  %5185 = vrot.lane.b32.xlu1 %v18178_v37, %s8831_s7  ;;  %v5855_v44 = vsel %vm5844_vm1, %v5822_v8, %v13460_v28  ;;  %v18184_v28 = vld [vmem:[#allocation335_spill] sm:$0xff]  ;;  %v1021_v5 = vld [vmem:[#allocation2 + $0x2f0] sm:$0xff]  ;;  %v1884_v35 = vmax.f32 %v18190_v1, %v14301_v54  ;;  %v1607_v8 = vrot.slane %v1019_v11, 2  ;;  %v1308_v20 = vsel %vm1167_vm4, %v1306_v9, %v1307_v51 }
 0x562   : > { %v5888_v15 = vsel %vm5877_vm3, %v5855_v44, %v18184_v28  ;;  %v1608_v44 = vrot.slane %v1020_v27, 2  ;;  %v1454_v31 = vmax.f32 %v1019_v11, %v1308_v20  ;;  %v1610_v9 = vrot.slane %v1021_v5, 2  ;;  %v18196_v1 = vld [vmem:[#allocation319_spill] sm:$0xff] }
 0x563   : > { %v14733_v4 = vpop.permute.xlu1 %5429  ;;  %v14735_v34 = vpop.permute.xlu0 %5555  ;;  %v5921_v53 = vsel %vm17333_vm10, %v5888_v15, %v18185_v55  ;;  %v18193_v55 = vld [vmem:[#allocation259_spill] sm:$0xff]  ;;  %v1916_v46 = vmax.f32 %v1884_v35, %v14768_v61  ;;  %v1611_v27 = vrot.slane %v1022_v3, 2  ;;  %vm4199_vm1 = vcmask 818176  }
 0x564   : > { %18181 = vst [vmem:[#allocation309_spill] sm:$0xff] %v14733_v4  ;;  %18182 = vst [vmem:[#allocation344_spill] sm:$0xff] %v14735_v34  ;;  %v5954_v40 = vsel %vm17332_vm9, %v5921_v53, %v18188_v23  ;;  %v1609_v53 = vsel %vm1468_vm5, %v1607_v8, %v1608_v44  ;;  %v8740_v20 = vld [vmem:[#allocation3 + $0x360] sm:$0xff]  ;;  %v1805_v44 = vmax.f32 %v14720_v30, %v14749_v43 }
 0x565   : > { %5459 = vrot.lane.b32.xlu1 %v18183_v59, %s8834_s11  ;;  %6109 = vrot.lane.b32.xlu0 %v5945_v2, %s8835_s30  ;;  %v1309_v2 = vrot.slane %v1021_v5, 1  ;;  %v1310_v59 = vrot.slane %v1022_v3, 1  ;;  %v1612_v11 = vsel %vm1468_vm5, %v1610_v9, %v1611_v27  ;;  %v18199_v3 = vld [vmem:[#allocation262_spill] sm:$0xff]  ;;  %v18202_v9 = vld [vmem:[#allocation171_spill] sm:$0xff]  ;;  %v18203_v27 = vld [vmem:[#allocation332_spill] sm:$0xff] }
 0x566   : > { %v18204_v23 = vld [vmem:[#allocation363_spill] sm:$0xff] }
 0x567   : > { %v14757_v18 = vpop.permute.xlu1 %5557  ;;  %v14759_v45 = vpop.permute.xlu0 %5171  ;;  %v18221_v34 = vld [vmem:[#allocation47_spill] sm:$0xff] }
 0x568   : > { %18186 = vst [vmem:[#allocation370_spill] sm:$0xff] %v14757_v18  ;;  %18187 = vst [vmem:[#allocation226_spill] sm:$0xff] %v14759_v45  ;;  %v18215_v45 = vld [vmem:[#allocation52_spill] sm:$0xff]  ;;  %v18218_v18 = vld [vmem:[#allocation57_spill] sm:$0xff]  ;;  %v7466_v48 = vunpack.i.l.bf16 %v18221_v34 }
 0x569   : > { %6145 = vrot.lane.b32.xlu1 %v5954_v40, %s8835_s30  ;;  %5377 = vrot.lane.b32.xlu0 %v18189_v21, %s8833_s9  ;;  %v1311_v40 = vsel %vm1167_vm4, %v1309_v2, %v1310_v59  ;;  %v1023_v59 = vld [vmem:[#allocation2 + $0x300] sm:$0xff] }
 0x56b   : > { %v14773_v28 = vpop.permute.xlu1 %5267  ;;  %v14775_v15 = vpop.permute.xlu0 %5431 }
 0x56c   : > { %18191 = vst [vmem:[#allocation351_spill] sm:$0xff] %v14773_v28  ;;  %18192 = vst [vmem:[#allocation354_spill] sm:$0xff] %v14775_v15  ;;  %v18213_v28 = vld [vmem:[#allocation365_spill] sm:$0xff]  ;;  %v18217_v15 = vld [vmem:[#allocation14_spill] sm:$0xff] }
 0x56d   : > { %5461 = vrot.lane.b32.xlu1 %v18193_v55, %s8834_s11  ;;  %5587 = vrot.lane.b32.xlu0 %v1915_v49, %s8809_s14  ;;  %v14790_v55 = vmax.f32 %v1454_v31, %v1609_v53  ;;  %v1455_v49 = vmax.f32 %v1021_v5, %v1311_v40  ;;  %v18200_v31 = vld [vmem:[#allocation88_spill] sm:$0xff]  ;;  %v18201_v53 = vld [vmem:[#allocation314_spill] sm:$0xff] }
 0x56e   : > { %v5880_v40 = vsel %vm5877_vm3, %v18201_v53, %v18200_v31 }
 0x56f   : > { %v14783_v51 = vpop.permute.xlu1 %5363  ;;  %v14785_v21 = vpop.permute.xlu0 %5433  ;;  %v14802_v2 = vmax.f32 %v1455_v49, %v1612_v11  ;;  %v1806_v5 = vmax.f32 %v14749_v43, %v14790_v55  ;;  %v1885_v43 = vmax.f32 %v13879_v56, %v14399_v10  ;;  %v1886_v56 = vmax.f32 %v13937_v58, %v14437_v62 }
 0x570   : > { %18194 = vst [vmem:[#allocation184_spill] sm:$0xff] %v14783_v51  ;;  %18195 = vst [vmem:[#allocation302_spill] sm:$0xff] %v14785_v21 }
 0x571   : > { %5589 = vrot.lane.b32.xlu1 %v1916_v46, %s8809_s14  ;;  %5187 = vrot.lane.b32.xlu0 %v18196_v1, %s8831_s7  ;;  %v1024_v46 = vld [vmem:[#allocation2 + $0x308] sm:$0x3] }
 0x572   : > { %v1614_v51 = vrot.slane %v1024_v46, 2 }
 0x573   : > { %v14793_v35 = vpop.permute.xlu1 %5559  ;;  %v14795_v8 = vpop.permute.xlu0 %5561 }
 0x574   : > { %18197 = vst [vmem:[#allocation56_spill] sm:$0xff] %v14793_v35  ;;  %18198 = vst [vmem:[#allocation312_spill] sm:$0xff] %v14795_v8  ;;  %v18208_v8 = vld [vmem:[#allocation99_spill] sm:$0xff] }
 0x575   : > { %5283 = vrot.lane.b32.xlu1 %v8740_v20, %s8832_s8  ;;  %5463 = vrot.lane.b32.xlu0 %v18199_v3, %s8834_s11  ;;  %v5889_v20 = vsel %vm5877_vm3, %v18203_v27, %v18202_v9  ;;  %v5913_v3 = vsel %vm17333_vm10, %v5880_v40, %v18204_v23  ;;  %v1312_v9 = vrot.slane %v1023_v59, 1  ;;  %v1313_v27 = vrot.slane %v1024_v46, 1  ;;  %v14836_v40 = vld [vmem:[#allocation2 + $0x310] sm:$0xff] }
 0x576   : > { %v5922_v30 = vsel %vm17333_vm10, %v5889_v20, %v18205_v19  ;;  %v5946_v31 = vsel %vm17332_vm9, %v5913_v3, %v18208_v8  ;;  %v14829_v19 = vmax.f32 %v1805_v44, %v14790_v55  ;;  %v14832_v23 = vmax.f32 %v1806_v5, %v14802_v2  ;;  %v1026_v20 = vld [vmem:[#allocation2 + $0x318] sm:$0x3]  ;;  %v18209_v3 = vld [vmem:[#allocation41_spill] sm:$0xff] }
 0x577   : > { %v14816_v49 = vpop.permute.xlu1 %5173  ;;  %v14818_v11 = vpop.permute.xlu0 %5269  ;;  %v5955_v53 = vsel %vm17332_vm9, %v5922_v30, %v14342_v13  ;;  %v7461_v30 = vunpack.i.l.bf16 %v18209_v3  ;;  %v7462_v13 = vunpack.i.h.bf16 %v18209_v3  ;;  %v1613_v44 = vrot.slane %v1023_v59, 2 }
 0x578   : > { %18206 = vst [vmem:[#allocation340_spill] sm:$0xff] %v14816_v49  ;;  %18207 = vst [vmem:[#allocation345_spill] sm:$0xff] %v14818_v11  ;;  %v18210_v11 = vld [vmem:[#allocation51_spill] sm:$0xff]  ;;  %v1314_v5 = vsel %vm1167_vm4, %v1312_v9, %v1313_v27  ;;  %v1315_v21 = vrot.slane %v14836_v40, 1  ;;  %v1316_v58 = vrot.slane %v1026_v20, 1  ;;  %v1917_v3 = vmax.f32 %v1885_v43, %v14829_v19  ;;  %v18216_v27 = vld [vmem:[#allocation8_spill] sm:$0xff] }
 0x579   : > { %6113 = vrot.lane.b32.xlu1 %v5946_v31, %s8835_s30  ;;  %6149 = vrot.lane.b32.xlu0 %v5955_v53, %s8835_s30  ;;  %v7477_v31 = vunpack.i.h.bf16 %v18210_v11  ;;  %v1918_v11 = vmax.f32 %v1886_v56, %v14832_v23  ;;  %v7482_v9 = vunpack.i.h.bf16 %v18215_v45  ;;  %v7481_v46 = vunpack.i.l.bf16 %v18215_v45 }
 0x57a   : > { %v3970_v35 = vsel %vm264_vm0, %v18216_v27, %v7462_v13  ;;  %v1456_v56 = vmax.f32 %v1023_v59, %v1314_v5  ;;  %v1616_v39 = vrot.slane %v14836_v40, 2  ;;  %v1617_v45 = vrot.slane %v1026_v20, 2  ;;  %v18222_v13 = vld [vmem:[#allocation58_spill] sm:$0xff] }
 0x57b   : > { %v14841_v49 = vpop.permute.xlu1 %5435  ;;  %v14843_v53 = vpop.permute.xlu0 %5365  ;;  %v7502_v27 = vunpack.i.h.bf16 %v18222_v13  ;;  %v4003_v59 = vsel %vm17331_vm2, %v3970_v35, %v7482_v9  ;;  %v18227_v9 = vld [vmem:[#allocation9_spill] sm:$0xff] }
 0x57c   : > { %18211 = vst [vmem:[#allocation199_spill] sm:$0xff] %v14841_v49  ;;  %18212 = vst [vmem:[#allocation361_spill] sm:$0xff] %v14843_v53  ;;  %v18214_v49 = vld [vmem:[#allocation7_spill] sm:$0xff]  ;;  %v1618_v35 = vsel %vm1468_vm5, %v1616_v39, %v1617_v45  ;;  %v14900_v39 = vld [vmem:[#allocation2 + $0x330] sm:$0xff] }
 0x57d   : > { %5379 = vrot.lane.b32.xlu1 %v18213_v28, %s8833_s9  ;;  %5465 = vrot.lane.b32.xlu0 %v18113_v36, %s8834_s11  ;;  %v3969_v53 = vsel %vm264_vm0, %v18214_v49, %v7461_v30  ;;  %v3976_v28 = vsel %vm264_vm0, %v18217_v15, %v7477_v31  ;;  %v7497_v36 = vunpack.i.h.bf16 %v18218_v18  ;;  %v1615_v49 = vsel %vm1468_vm5, %v1613_v44, %v1614_v51  ;;  %v18223_v51 = vld [vmem:[#allocation65_spill] sm:$0xff]  ;;  %v18232_v18 = vld [vmem:[#allocation108_spill] sm:$0xff] }
 0x57e   : > { %v1317_v30 = vsel %vm1167_vm4, %v1315_v21, %v1316_v58  ;;  %v7501_v15 = vunpack.i.l.bf16 %v18222_v13  ;;  %v4002_v31 = vsel %vm17331_vm2, %v3969_v53, %v7481_v46  ;;  %v7517_v21 = vunpack.i.h.bf16 %v18223_v51  ;;  %v18229_v45 = vld [vmem:[#allocation141_spill] sm:$0xff]  ;;  %v1032_v51 = vld [vmem:[#allocation2 + $0x348] sm:$0x3] }
 0x57f   : > { %v14862_v4 = vpop.permute.xlu1 %5437  ;;  %v14864_v43 = vpop.permute.xlu0 %5563  ;;  %v4009_v44 = vsel %vm17331_vm2, %v3976_v28, %v7497_v36  ;;  %v1757_v58 = vmax.f32 %v1456_v56, %v1615_v49  ;;  %v1807_v13 = vmax.f32 %v14790_v55, %v14802_v2  ;;  %v14889_v46 = vsel %vm264_vm0, %v18227_v9, %v7466_v48  ;;  %v18228_v56 = vld [vmem:[#allocation348_spill] sm:$0xff]  ;;  %v8741_v55 = vld [vmem:[#allocation3 + $0x370] sm:$0xff]  ;;  %v14909_v9 = vld [vmem:[#allocation2 + $0x338] sm:$0x3] }
 0x580   : > { %18219 = vst [vmem:[#allocation371_spill] sm:$0xff] %v14862_v4  ;;  %18220 = vst [vmem:[#allocation320_spill] sm:$0xff] %v14864_v43  ;;  %v4035_v28 = vsel %vm4034_vm11, %v4002_v31, %v7501_v15  ;;  %v4036_v36 = vsel %vm4034_vm11, %v4003_v59, %v7502_v27  ;;  %v14898_v49 = vld [vmem:[#allocation2 + $0x328] sm:$0x3]  ;;  %v4042_v48 = vsel %vm4034_vm11, %v4009_v44, %v7517_v21  ;;  %v18230_v15 = vld [vmem:[#allocation315_spill] sm:$0xff] }
 0x581   : > { %5591 = vrot.lane.b32.xlu1 %v1917_v3, %s8809_s14  ;;  %5593 = vrot.lane.b32.xlu0 %v1918_v11, %s8809_s14  ;;  %v1457_v3 = vmax.f32 %v14836_v40, %v1317_v30  ;;  %v18226_v11 = vld [vmem:[#allocation66_spill] sm:$0xff]  ;;  %v14896_v40 = vld [vmem:[#allocation2 + $0x320] sm:$0xff]  ;;  %v5881_v27 = vsel %vm5877_vm3, %v18230_v15, %v18229_v45  ;;  %v18231_v31 = vld [vmem:[#allocation356_spill] sm:$0xff]  ;;  %v14919_v44 = vmax.f32 %v1807_v13, %v1757_v58  ;;  %v1319_v8 = vrot.slane %v14898_v49, 1 }
 0x582   : > { %v7521_v53 = vunpack.i.l.bf16 %v18226_v11  ;;  %v7522_v30 = vunpack.i.h.bf16 %v18226_v11  ;;  %v1887_v59 = vmax.f32 %v18231_v31, %v14514_v60  ;;  %v1808_v45 = vmax.f32 %v14802_v2, %v1757_v58  ;;  %v18236_v31 = vld [vmem:[#allocation118_spill] sm:$0xff] }
 0x583   : > { %v14878_v20 = vpop.permute.xlu1 %5565  ;;  %v14880_v5 = vpop.permute.xlu0 %5175  ;;  %18235 = vst [vmem:[#allocation331_spill] sm:$0xff] %v14919_v44  ;;  %v1758_v11 = vmax.f32 %v1457_v3, %v1618_v35  ;;  %v1318_v43 = vrot.slane %v14896_v40, 1  ;;  %v1321_v13 = vrot.slane %v14900_v39, 1  ;;  %v1322_v3 = vrot.slane %v14909_v9, 1 }
 0x584   : > { %18224 = vst [vmem:[#allocation350_spill] sm:$0xff] %v14878_v20  ;;  %18225 = vst [vmem:[#allocation347_spill] sm:$0xff] %v14880_v5  ;;  %v5914_v5 = vsel %vm17333_vm10, %v5881_v27, %v18232_v18  ;;  %v4068_v15 = vsel %vm4067_vm12, %v4035_v28, %v7521_v53  ;;  %v18237_v18 = vld [vmem:[#allocation49_spill] sm:$0xff]  ;;  %v1325_v58 = vrot.slane %v1032_v51, 1  ;;  %v4069_v53 = vsel %vm4067_vm12, %v4036_v36, %v7522_v30  ;;  %v18239_v28 = vld [vmem:[#allocation75_spill] sm:$0xff] }
 0x585   : > { %5189 = vrot.lane.b32.xlu1 %v18228_v56, %s8831_s7  ;;  %5285 = vrot.lane.b32.xlu0 %v8741_v55, %s8832_s8  ;;  %v14911_v55 = vld [vmem:[#allocation2 + $0x340] sm:$0xff]  ;;  %v5947_v4 = vsel %vm17332_vm9, %v5914_v5, %v18236_v31  ;;  %v18238_v5 = vld [vmem:[#allocation74_spill] sm:$0xff]  ;;  %v7541_v27 = vunpack.i.l.bf16 %v18239_v28  ;;  %v1919_v52 = vmax.f32 %v1887_v59, %v14919_v44  ;;  %v14946_v33 = vmax.f32 %v1808_v45, %v1758_v11  ;;  %v14950_v30 = vld [vmem:[#allocation2 + $0x350] sm:$0xff] }
 0x586   : > { %v1324_v2 = vrot.slane %v14911_v55, 1  ;;  %v7537_v35 = vunpack.i.h.bf16 %v18238_v5  ;;  %v1888_v36 = vmax.f32 %v14119_v42, %v14558_v38  ;;  %v1034_v5 = vld [vmem:[#allocation2 + $0x358] sm:$0x3]  ;;  %v18247_v59 = vld [vmem:[#allocation367_spill] sm:$0xff]  ;;  %v1323_v11 = vsel %vm1167_vm4, %v1321_v13, %v1322_v3 }
 0x587   : > { %v14915_v20 = vpop.permute.xlu1 %5271  ;;  %v14917_v21 = vpop.permute.xlu0 %5439  ;;  %18245 = vst [vmem:[#allocation306_spill] sm:$0xff] %v14946_v33  ;;  %v1622_v45 = vrot.slane %v14900_v39, 2  ;;  %v1459_v38 = vmax.f32 %v14900_v39, %v1323_v11  ;;  %v18253_v39 = vld [vmem:[#allocation54_spill] sm:$0xff] }
 0x588   : > { %18233 = vst [vmem:[#allocation327_spill] sm:$0xff] %v14915_v20  ;;  %18234 = vst [vmem:[#allocation352_spill] sm:$0xff] %v14917_v21  ;;  %v18240_v20 = vld [vmem:[#allocation253_spill] sm:$0xff]  ;;  %v18241_v21 = vld [vmem:[#allocation336_spill] sm:$0xff]  ;;  %v1326_v42 = vsel %vm1167_vm4, %v1324_v2, %v1325_v58  ;;  %v1920_v34 = vmax.f32 %v1888_v36, %v14946_v33  ;;  %v7486_v11 = vunpack.i.l.bf16 %v18253_v39  ;;  %v1892_v39 = vmax.f32 %v14301_v54, %v14768_v61 }
 0x589   : > { %5467 = vrot.lane.b32.xlu1 %v18237_v18, %s8834_s11  ;;  %6117 = vrot.lane.b32.xlu0 %v5947_v4, %s8835_s30  ;;  %v5890_v31 = vsel %vm5877_vm3, %v18241_v21, %v18240_v20  ;;  %v18242_v18 = vld [vmem:[#allocation257_spill] sm:$0xff]  ;;  %v1320_v21 = vsel %vm1167_vm4, %v1318_v43, %v1319_v8  ;;  %v1626_v8 = vrot.slane %v1032_v51, 2  ;;  %v1327_v43 = vrot.slane %v14950_v30, 1 }
 0x58a   : > { %v5923_v4 = vsel %vm17333_vm10, %v5890_v31, %v18242_v18  ;;  %v1619_v31 = vrot.slane %v14896_v40, 2  ;;  %v1620_v18 = vrot.slane %v14898_v49, 2  ;;  %v4075_v49 = vsel %vm4067_vm12, %v4042_v48, %v7537_v35  ;;  %v18251_v58 = vld [vmem:[#allocation85_spill] sm:$0xff]  ;;  %v18252_v48 = vld [vmem:[#allocation307_spill] sm:$0xff] }
 0x58b   : > { %v14941_v12 = vpop.permute.xlu1 %5367  ;;  %v14943_v32 = vpop.permute.xlu0 %5441  ;;  %v5956_v20 = vsel %vm17332_vm9, %v5923_v4, %v18246_v57  ;;  %v1625_v4 = vrot.slane %v14911_v55, 2  ;;  %v1328_v57 = vrot.slane %v1034_v5, 1  ;;  %v1458_v51 = vmax.f32 %v14896_v40, %v1320_v21 }
 0x58c   : > { %18243 = vst [vmem:[#allocation355_spill] sm:$0xff] %v14941_v12  ;;  %18244 = vst [vmem:[#allocation310_spill] sm:$0xff] %v14943_v32  ;;  %v1623_v12 = vrot.slane %v14909_v9, 2  ;;  %v18248_v32 = vld [vmem:[#allocation83_spill] sm:$0xff]  ;;  %v7561_v9 = vunpack.i.l.bf16 %v18251_v58  ;;  %v1621_v35 = vsel %vm1468_vm5, %v1619_v31, %v1620_v18  ;;  %v1628_v40 = vrot.slane %v14950_v30, 2 }
 0x58d   : > { %6153 = vrot.lane.b32.xlu1 %v5956_v20, %s8835_s30  ;;  %5381 = vrot.lane.b32.xlu0 %v18247_v59, %s8833_s9  ;;  %v7542_v20 = vunpack.i.h.bf16 %v18239_v28  ;;  %v4101_v59 = vsel %vm17337_vm13, %v4068_v15, %v7541_v27  ;;  %v7557_v13 = vunpack.i.h.bf16 %v18248_v32  ;;  %v1460_v15 = vmax.f32 %v14911_v55, %v1326_v42 }
 0x58e   : > { %v1624_v28 = vsel %vm1468_vm5, %v1622_v45, %v1623_v12  ;;  %v1627_v27 = vsel %vm1468_vm5, %v1625_v4, %v1626_v8  ;;  %v1329_v36 = vsel %vm1167_vm4, %v1327_v43, %v1328_v57  ;;  %v1629_v21 = vrot.slane %v1034_v5, 2  ;;  %v18258_v5 = vld [vmem:[#allocation252_spill] sm:$0xff]  ;;  %v18259_v8 = vld [vmem:[#allocation103_spill] sm:$0xff] }
 0x58f   : > { %v14970_v3 = vpop.permute.xlu1 %5567  ;;  %v14972_v2 = vpop.permute.xlu0 %5569  ;;  %v4102_v32 = vsel %vm17337_vm13, %v4069_v53, %v7542_v20  ;;  %v4108_v12 = vsel %vm17337_vm13, %v4075_v49, %v7557_v13  ;;  %v7562_v18 = vunpack.i.h.bf16 %v18251_v58  ;;  %v4134_v57 = vsel %vm17319_vm14, %v4101_v59, %v7561_v9  ;;  %v18260_v20 = vld [vmem:[#allocation104_spill] sm:$0xff]  ;;  %v18277_v9 = vld [vmem:[#allocation71_spill] sm:$0xff] }
 0x590   : > { %18249 = vst [vmem:[#allocation343_spill] sm:$0xff] %v14970_v3  ;;  %18250 = vst [vmem:[#allocation360_spill] sm:$0xff] %v14972_v2  ;;  %v1759_v42 = vmax.f32 %v1458_v51, %v1621_v35  ;;  %v1760_v53 = vmax.f32 %v1459_v38, %v1624_v28  ;;  %v15001_v45 = vmax.f32 %v1460_v15, %v1627_v27  ;;  %v7597_v43 = vunpack.i.h.bf16 %v18259_v8  ;;  %v8742_v35 = vld [vmem:[#allocation3 + $0x380] sm:$0xff] }
 0x591   : > { %5469 = vrot.lane.b32.xlu1 %v18252_v48, %s8834_s11  ;;  %5595 = vrot.lane.b32.xlu0 %v1919_v52, %s8809_s14  ;;  %v18254_v48 = vld [vmem:[#allocation95_spill] sm:$0xff]  ;;  %v18255_v52 = vld [vmem:[#allocation96_spill] sm:$0xff]  ;;  %v1461_v4 = vmax.f32 %v14950_v30, %v1329_v36  ;;  %v1630_v49 = vsel %vm1468_vm5, %v1628_v40, %v1629_v21  ;;  %v15015_v38 = vsel %vm17331_vm2, %v14889_v46, %v7486_v11  ;;  %v18266_v21 = vld [vmem:[#allocation357_spill] sm:$0xff] }
 0x592   : > { %v7577_v2 = vunpack.i.h.bf16 %v18254_v48  ;;  %v7581_v3 = vunpack.i.l.bf16 %v18255_v52  ;;  %v7601_v48 = vunpack.i.l.bf16 %v18260_v20  ;;  %v18263_v30 = vld [vmem:[#allocation59_spill] sm:$0xff]  ;;  %v4135_v51 = vsel %vm17319_vm14, %v4102_v32, %v7562_v18  ;;  %v18264_v36 = vld [vmem:[#allocation140_spill] sm:$0xff]  ;;  %v18267_v11 = vld [vmem:[#allocation134_spill] sm:$0xff] }
 0x593   : > { %v14991_v55 = vpop.permute.xlu1 %5177  ;;  %v14993_v31 = vpop.permute.xlu0 %5273  ;;  %v7582_v15 = vunpack.i.h.bf16 %v18255_v52  ;;  %v1810_v28 = vmax.f32 %v1760_v53, %v15001_v45  ;;  %v18265_v40 = vld [vmem:[#allocation316_spill] sm:$0xff]  ;;  %v5891_v52 = vsel %vm5877_vm3, %v18267_v11, %v18266_v21  ;;  %v15050_v21 = vld [vmem:[#allocation2 + $0x360] sm:$0xff] }
 0x594   : > { %18256 = vst [vmem:[#allocation366_spill] sm:$0xff] %v14991_v55  ;;  %18257 = vst [vmem:[#allocation313_spill] sm:$0xff] %v14993_v31  ;;  %v4141_v13 = vsel %vm17319_vm14, %v4108_v12, %v7577_v2  ;;  %v4167_v59 = vsel %vm17321_vm15, %v4134_v57, %v7581_v3  ;;  %v1809_v3 = vmax.f32 %v1759_v42, %v1760_v53  ;;  %v18268_v12 = vld [vmem:[#allocation109_spill] sm:$0xff]  ;;  %v18270_v42 = vld [vmem:[#allocation122_spill] sm:$0xff]  ;;  %vm17323_vm14 = vcmask 916480  }
 0x595   : > { %5597 = vrot.lane.b32.xlu1 %v1920_v34, %s8809_s14  ;;  %5191 = vrot.lane.b32.xlu0 %v18258_v5, %s8831_s7  ;;  %v15023_v2 = vmax.f32 %v1461_v4, %v1630_v49  ;;  %v4174_v46 = vsel %vm17321_vm15, %v4141_v13, %v7597_v43  ;;  %v4200_v27 = vsel %vm4199_vm1, %v4167_v59, %v7601_v48  ;;  %v7617_v18 = vunpack.i.h.bf16 %v18268_v12  ;;  %v18271_v53 = vld [vmem:[#allocation128_spill] sm:$0xff]  ;;  %v18274_v13 = vld [vmem:[#allocation235_spill] sm:$0xff] }
 0x596   : > { %v5882_v32 = vsel %vm5877_vm3, %v18265_v40, %v18264_v36  ;;  %v5924_v43 = vsel %vm17333_vm10, %v5891_v52, %v18271_v53  ;;  %v1889_v40 = vmax.f32 %v14196_v29, %v14668_v50  ;;  %v18276_v11 = vld [vmem:[#allocation152_spill] sm:$0xff]  ;;  %v1857_v52 = vmax.f32 %v1809_v3, %v15001_v45 }
 0x597   : > { %v15009_v34 = vpop.permute.xlu1 %5443  ;;  %v15011_v58 = vpop.permute.xlu0 %5369  ;;  %v5915_v4 = vsel %vm17333_vm10, %v5882_v32, %v18270_v42  ;;  %v1036_v32 = vld [vmem:[#allocation2 + $0x368] sm:$0x3]  ;;  %v8277_v42 = vunpack.i.h.bf16 %v18276_v11  ;;  %v1890_v53 = vmax.f32 %v14199_v16, %v14665_v7  ;;  %v7602_v29 = vunpack.i.h.bf16 %v18260_v20  ;;  %v18278_v11 = vld [vmem:[#allocation119_spill] sm:$0xff]  ;;  %v15070_v16 = vld [vmem:[#allocation2 + $0x370] sm:$0xff] }
 0x598   : > { %18261 = vst [vmem:[#allocation349_spill] sm:$0xff] %v15009_v34  ;;  %18262 = vst [vmem:[#allocation346_spill] sm:$0xff] %v15011_v58  ;;  %v5948_v59 = vsel %vm17332_vm9, %v5915_v4, %v18274_v13  ;;  %v1858_v4 = vmax.f32 %v1810_v28, %v15023_v2  ;;  %v8357_v12 = vunpack.i.h.bf16 %v18277_v9  ;;  %v7637_v8 = vunpack.i.h.bf16 %v18278_v11  ;;  %v1038_v7 = vld [vmem:[#allocation2 + $0x378] sm:$0x3] }
 0x599   : > { %5287 = vrot.lane.b32.xlu1 %v8742_v35, %s8832_s8  ;;  %5471 = vrot.lane.b32.xlu0 %v18178_v37, %s8834_s11  ;;  %v18269_v37 = vld [vmem:[#allocation111_spill] sm:$0xff]  ;;  %v18275_v35 = vld [vmem:[#allocation194_spill] sm:$0xff]  ;;  %v1330_v28 = vrot.slane %v15050_v21, 1  ;;  %v4207_v9 = vsel %vm4199_vm1, %v4174_v46, %v7617_v18  ;;  %v1333_v46 = vrot.slane %v15070_v16, 1  ;;  %v1631_v13 = vrot.slane %v15050_v21, 2 }
 0x59a   : > { %v7621_v57 = vunpack.i.l.bf16 %v18269_v37  ;;  %v5957_v36 = vsel %vm17332_vm9, %v5924_v43, %v18275_v35  ;;  %v4168_v43 = vsel %vm17321_vm15, %v4135_v51, %v7582_v15  ;;  %v18282_v51 = vld [vmem:[#allocation120_spill] sm:$0xff]  ;;  %v18283_v15 = vld [vmem:[#allocation121_spill] sm:$0xff]  ;;  %v1922_v31 = vmax.f32 %v1890_v53, %v1858_v4  ;;  %v18286_v34 = vld [vmem:[#allocation126_spill] sm:$0xff] }
 0x59b   : > { %v15040_v49 = vpop.permute.xlu1 %5445  ;;  %v15042_v48 = vpop.permute.xlu0 %5571  ;;  %v7641_v20 = vunpack.i.l.bf16 %v18282_v51  ;;  %v8437_v50 = vunpack.i.h.bf16 %v18283_v15  ;;  %v7651_v55 = vunpack.i.l.bf16 %v18286_v34  ;;  %v18287_v18 = vld [vmem:[#allocation50_spill] sm:$0xff]  ;;  %v15098_v53 = vsel %vm4199_vm1, %v4168_v43, %v7602_v29 }
 0x59c   : > { %18272 = vst [vmem:[#allocation326_spill] sm:$0xff] %v15040_v49  ;;  %18273 = vst [vmem:[#allocation372_spill] sm:$0xff] %v15042_v48  ;;  %v1331_v49 = vrot.slane %v1036_v32, 1  ;;  %v15076_v11 = vsel %vm17323_vm14, %v4200_v27, %v7621_v57  ;;  %v1921_v48 = vmax.f32 %v1889_v40, %v1857_v52  ;;  %v1334_v27 = vrot.slane %v1038_v7, 1  ;;  %v18290_v40 = vld [vmem:[#allocation130_spill] sm:$0xff] }
 0x59d   : > { %6121 = vrot.lane.b32.xlu1 %v5948_v59, %s8835_s30  ;;  %6157 = vrot.lane.b32.xlu0 %v5957_v36, %s8835_s30  ;;  %v18279_v59 = vld [vmem:[#allocation278_spill] sm:$0xff]  ;;  %v8597_v57 = vunpack.i.h.bf16 %v18287_v18  ;;  %v7656_v52 = vunpack.i.l.bf16 %v18290_v40  ;;  %v18291_v18 = vld [vmem:[#allocation15_spill] sm:$0xff]  ;;  %vm18292_vm15 = vcmask 359424   ;;  %v1635_v43 = vrot.slane %v1038_v7, 2  ;;  %v18297_v7 = vld [vmem:[#allocation16_spill] sm:$0xff] }
 0x59e   : > { %v8197_v35 = vunpack.i.h.bf16 %v18279_v59  ;;  %v7652_v29 = vunpack.i.h.bf16 %v18286_v34 }
 0x59f   : > { %v15065_v36 = vpop.permute.xlu1 %5573  ;;  %v15067_v3 = vpop.permute.xlu0 %5179 }
 0x5a0   : > { %18280 = vst [vmem:[#allocation330_spill] sm:$0xff] %v15065_v36  ;;  %18281 = vst [vmem:[#allocation325_spill] sm:$0xff] %v15067_v3  ;;  %v4306_v59 = vsel %vm4298_vm6, %v8197_v35, %v8277_v42  ;;  %v18284_v36 = vld [vmem:[#allocation39_spill] sm:$0xff]  ;;  %v18285_v3 = vld [vmem:[#allocation368_spill] sm:$0xff] }
 0x5a1   : > { %v8517_v58 = vunpack.i.h.bf16 %v18284_v36  ;;  %5383 = vrot.lane.b32.xlu1 %v18285_v3, %s8833_s9  ;;  %5473 = vrot.lane.b32.xlu0 %v18196_v1, %s8834_s11  ;;  %v4339_v15 = vsel %vm17322_vm7, %v4306_v59, %v8357_v12  ;;  %v1332_v3 = vsel %vm1167_vm4, %v1330_v28, %v1331_v49  ;;  %v1632_v1 = vrot.slane %v1036_v32, 2 }
 0x5a2   : > { %v4372_v4 = vsel %vm17338_vm8, %v4339_v15, %v8437_v50  ;;  %v4240_v12 = vsel %vm17323_vm14, %v4207_v9, %v7637_v8  ;;  %v7642_v59 = vunpack.i.h.bf16 %v18282_v51  ;;  %vm6233_vm7 = vcmask 556032  }
 0x5a3   : > { %v15088_v42 = vpop.permute.xlu1 %5275  ;;  %v15090_v36 = vpop.permute.xlu0 %5447  ;;  %v4405_v49 = vsel %vm18292_vm15, %v4372_v4, %v8517_v58  ;;  %v1462_v32 = vmax.f32 %v15050_v21, %v1332_v3  ;;  %v1335_v50 = vsel %vm1167_vm4, %v1333_v46, %v1334_v27  ;;  %v1634_v8 = vrot.slane %v15070_v16, 2  ;;  %v18296_v21 = vld [vmem:[#allocation133_spill] sm:$0xff] }
 0x5a4   : > { %18288 = vst [vmem:[#allocation311_spill] sm:$0xff] %v15088_v42  ;;  %18289 = vst [vmem:[#allocation318_spill] sm:$0xff] %v15090_v36  ;;  %v3977_v42 = vsel %vm264_vm0, %v18291_v18, %v7641_v20  ;;  %vm18295_vm14 = vcmask 457728   ;;  %v1633_v58 = vsel %vm1468_vm5, %v1631_v13, %v1632_v1  ;;  %v7661_v9 = vunpack.i.l.bf16 %v18296_v21  ;;  %v18299_v27 = vld [vmem:[#allocation321_spill] sm:$0xff]  ;;  %v18312_v18 = vld [vmem:[#allocation279_spill] sm:$0xff] }
 0x5a5   : > { %5599 = vrot.lane.b32.xlu1 %v1921_v48, %s8809_s14  ;;  %5601 = vrot.lane.b32.xlu0 %v1922_v31, %s8809_s14  ;;  %v4010_v28 = vsel %vm17331_vm2, %v3977_v42, %v7651_v55  ;;  %v4438_v31 = vsel %vm18295_vm14, %v4405_v49, %v8597_v57  ;;  %vm4265_vm15 = vcmask 1014784   ;;  %v3978_v34 = vsel %vm264_vm0, %v18297_v7, %v7642_v59  ;;  %v18298_v55 = vld [vmem:[#allocation124_spill] sm:$0xff]  ;;  %v18300_v42 = vld [vmem:[#allocation123_spill] sm:$0xff]  ;;  %v8743_v1 = vld [vmem:[#allocation3 + $0x390] sm:$0xff] }
 0x5a6   : > { %v4043_v48 = vsel %vm4034_vm11, %v4010_v28, %v7656_v52  ;;  %v7646_v46 = vunpack.i.l.bf16 %v18298_v55  ;;  %v4273_v57 = vsel %vm4265_vm15, %v4240_v12, %v8197_v35  ;;  %v1463_v13 = vmax.f32 %v15070_v16, %v1335_v50  ;;  %v18301_v16 = vld [vmem:[#allocation110_spill] sm:$0xff]  ;;  %v18302_v12 = vld [vmem:[#allocation323_spill] sm:$0xff] }
 0x5a7   : > { %v15111_v51 = vpop.permute.xlu1 %6133  ;;  %v15113_v20 = vpop.permute.xlu0 %5371  ;;  %v15130_v52 = vmax.f32 %v1462_v32, %v1633_v58  ;;  %v1811_v4 = vmax.f32 %v15001_v45, %v15023_v2  ;;  %v1636_v59 = vsel %vm1468_vm5, %v1634_v8, %v1635_v43  ;;  %v4011_v49 = vsel %vm17331_vm2, %v3978_v34, %v7652_v29  ;;  %v18305_v58 = vld [vmem:[#allocation138_spill] sm:$0xff]  ;;  %v18306_v43 = vld [vmem:[#allocation144_spill] sm:$0xff]  ;;  %v15150_v29 = vld [vmem:[#allocation2 + $0x380] sm:$0xff] }
 0x5a8   : > { %18293 = vst [vmem:[#allocation329_spill] sm:$0xff] %v15111_v51  ;;  %18294 = vst [vmem:[#allocation334_spill] sm:$0xff] %v15113_v20  ;;  %v6305_v15 = vsel %vm6233_vm7, %v4438_v31, %v15111_v51  ;;  %v4076_v35 = vsel %vm4067_vm12, %v4043_v48, %v7646_v46  ;;  %v5883_v50 = vsel %vm5877_vm3, %v18302_v12, %v18301_v16  ;;  %v7657_v32 = vunpack.i.h.bf16 %v18290_v40  ;;  %v1040_v48 = vld [vmem:[#allocation2 + $0x388] sm:$0x3]  ;;  %v18307_v7 = vld [vmem:[#allocation283_spill] sm:$0xff] }
 0x5a9   : > { %6549 = vmatprep.mubr.f32.mxu1 %v6305_v15  ;;  %5193 = vrot.lane.b32.xlu1 %v18299_v27, %s8831_s7  ;;  %v4109_v45 = vsel %vm17337_vm13, %v4076_v35, %v7661_v9  ;;  %v7666_v8 = vunpack.i.l.bf16 %v18305_v58  ;;  %v5916_v15 = vsel %vm17333_vm10, %v5883_v50, %v18306_v43  ;;  %v8281_v34 = vunpack.i.l.bf16 %v18307_v7  ;;  %v18308_v46 = vld [vmem:[#allocation145_spill] sm:$0xff]  ;;  %v18309_v9 = vld [vmem:[#allocation79_spill] sm:$0xff]  ;;  %v18310_v16 = vld [vmem:[#allocation358_spill] sm:$0xff] }
 0x5aa   : > { %5289 = vrot.lane.b32.xlu0 %v8743_v1, %s8832_s8  ;;  %6550 = vmatmul.mubr.f32.vlgmr.msra.gmra.mxu1 %v4273_v57  ;;  %v5949_v57 = vsel %vm17332_vm9, %v5916_v15, %v18308_v46  ;;  %v15157_v1 = vmax.f32 %v1463_v13, %v1636_v59  ;;  %v1812_v40 = vmax.f32 %v15023_v2, %v15130_v52  ;;  %v8361_v35 = vunpack.i.l.bf16 %v18309_v9  ;;  %v18311_v12 = vld [vmem:[#allocation337_spill] sm:$0xff]  ;;  %v18313_v13 = vld [vmem:[#allocation238_spill] sm:$0xff]  ;;  %v18319_v36 = vld [vmem:[#allocation239_spill] sm:$0xff] }
 0x5ab   : > { %v15141_v28 = vpop.permute.xlu1 %5449  ;;  %v15143_v31 = vpop.permute.xlu0 %5575  ;;  %v5892_v50 = vsel %vm5877_vm3, %v18311_v12, %v18310_v16  ;;  %v1859_v43 = vmax.f32 %v1811_v4, %v15130_v52  ;;  %v8201_v15 = vunpack.i.l.bf16 %v18312_v18  ;;  %v1336_v51 = vrot.slane %v15150_v29, 1  ;;  %v18316_v16 = vld [vmem:[#allocation143_spill] sm:$0xff]  ;;  %v1042_v46 = vld [vmem:[#allocation2 + $0x398] sm:$0x3] }
 0x5ac   : > { %18303 = vst [vmem:[#allocation258_spill] sm:$0xff] %v15141_v28  ;;  %18304 = vst [vmem:[#allocation335_spill] sm:$0xff] %v15143_v31  ;;  %v5925_v59 = vsel %vm17333_vm10, %v5892_v50, %v18313_v13  ;;  %v1337_v20 = vrot.slane %v1040_v48, 1  ;;  %v7681_v12 = vunpack.i.l.bf16 %v18316_v16  ;;  %v18318_v4 = vld [vmem:[#allocation131_spill] sm:$0xff]  ;;  %v18320_v13 = vld [vmem:[#allocation46_spill] sm:$0xff]  ;;  %vm18321_vm14 = vcmask 162816  }
 0x5ad   : > { %5475 = vrot.lane.b32.xlu1 %v18228_v56, %s8834_s11  ;;  %v1891_v56 = vmax.f32 %v14272_v0, %v14747_v41  ;;  %v8441_v31 = vunpack.i.l.bf16 %v18318_v4  ;;  %v5958_v0 = vsel %vm17332_vm9, %v5925_v59, %v18319_v36  ;;  %v15182_v41 = vld [vmem:[#allocation2 + $0x390] sm:$0xff]  ;;  %v4307_v50 = vsel %vm4298_vm6, %v8201_v15, %v8281_v34 }
 0x5ae   : > { %6125 = vrot.lane.b32.xlu0 %v5949_v57, %s8835_s30  ;;  %v18317_v57 = vld [vmem:[#allocation147_spill] sm:$0xff]  ;;  %v4340_v33 = vsel %vm18321_vm14, %v4307_v50, %v8361_v35  ;;  %v18323_v59 = vld [vmem:[#allocation369_spill] sm:$0xff]  ;;  %v1637_v60 = vrot.slane %v15150_v29, 2  ;;  %v1339_v26 = vrot.slane %v15182_v41, 1  ;;  %v1340_v54 = vrot.slane %v1042_v46, 1 }
 0x5af   : > { %v15172_v3 = vpop.permute.xlu1 %5577  ;;  %v15174_v2 = vpop.permute.xlu0 %5181  ;;  %v7706_v28 = vunpack.i.l.bf16 %v18317_v57  ;;  %v1923_v36 = vmax.f32 %v1891_v56, %v1859_v43  ;;  %v4044_v61 = vsel %vm4034_vm11, %v4011_v49, %v7657_v32  ;;  %vm18324_vm14 = vcmask 621568   ;;  %v18325_v50 = vld [vmem:[#allocation261_spill] sm:$0xff] }
 0x5b0   : > { %18314 = vst [vmem:[#allocation339_spill] sm:$0xff] %v15172_v3  ;;  %18315 = vst [vmem:[#allocation364_spill] sm:$0xff] %v15174_v2  ;;  %v8521_v3 = vunpack.i.l.bf16 %v18320_v13  ;;  %v1860_v2 = vmax.f32 %v1812_v40, %v15157_v1  ;;  %v1638_v40 = vrot.slane %v1040_v48, 2  ;;  %v4142_v35 = vsel %vm18324_vm14, %v4109_v45, %v7666_v8 }
 0x5b1   : > { %6161 = vrot.lane.b32.xlu1 %v5958_v0, %s8835_s30  ;;  %v1338_v0 = vsel %vm1167_vm4, %v1336_v51, %v1337_v20  ;;  %v8121_v14 = vunpack.i.l.bf16 %v18325_v50  ;;  %v4373_v43 = vsel %vm17338_vm8, %v4340_v33, %v8441_v31  ;;  %v7662_v56 = vunpack.i.h.bf16 %v18296_v21 }
 0x5b2   : > { %5385 = vrot.lane.b32.xlu0 %v18323_v59, %s8833_s9  ;;  %vm18326_vm2 = vcmask 719872   ;;  %v1924_v51 = vmax.f32 %v1892_v39, %v1860_v2  ;;  %vm18327_vm9 = vcmask 359424   ;;  %vm18328_vm10 = vcmask 457728   ;;  %v18334_v2 = vld [vmem:[#allocation125_spill] sm:$0xff] }
 0x5b3   : > { %v15195_v34 = vpop.permute.xlu1 %5277  ;;  %v15197_v44 = vpop.permute.xlu0 %5451  ;;  %v4175_v59 = vsel %vm18326_vm2, %v4142_v35, %v7681_v12  ;;  %v4406_v20 = vsel %vm18327_vm9, %v4373_v43, %v8521_v3  ;;  %v1464_v45 = vmax.f32 %v15150_v29, %v1338_v0  ;;  %v1640_v33 = vrot.slane %v15182_v41, 2  ;;  %v18330_v3 = vld [vmem:[#allocation148_spill] sm:$0xff]  ;;  %v18337_v43 = vld [vmem:[#allocation322_spill] sm:$0xff]  ;;  %vm18340_vm2 = vmmov %vm18324_vm14 }
 0x5b4   : > { %v4439_v49 = vsel %vm18328_vm10, %v4406_v20, %v8601_v25  ;;  %v4208_v32 = vsel %vm4199_vm1, %v4175_v59, %v7706_v28  ;;  %v1639_v8 = vsel %vm1468_vm5, %v1637_v60, %v1638_v40  ;;  %v1341_v39 = vsel %vm1167_vm4, %v1339_v26, %v1340_v54  ;;  %v18333_v26 = vld [vmem:[#allocation17_spill] sm:$0xff]  ;;  %v18336_v54 = vld [vmem:[#allocation275_spill] sm:$0xff] }
 0x5b5   : > { %5477 = vrot.lane.b32.xlu1 %v18258_v5, %s8834_s11  ;;  %v1641_v5 = vrot.slane %v1042_v46, 2  ;;  %vm6446_vm9 = vcmask 1043456   ;;  %v7667_v25 = vunpack.i.h.bf16 %v18305_v58  ;;  %v8261_v28 = vunpack.i.l.bf16 %v18330_v3 }
 0x5b6   : > { %5603 = vrot.lane.b32.xlu0 %v1923_v36, %s8809_s14  ;;  %v15224_v36 = vld [vmem:[%s16833_s3 + $0x160] sm:$0xf]  ;;  %vm18331_vm10 = vcmask 916480   ;;  %v18332_v60 = vunpack.i.l.bf16 %v18300_v42  ;;  %v8282_v58 = vunpack.i.h.bf16 %v18307_v7  ;;  %v17335_v35 = vunpack.i.l.bf16 %v18336_v54  ;;  %v18338_v7 = vld [vmem:[#allocation129_spill] sm:$0xff] }
 0x5b7   : > { %v15215_v31 = vpop.permute.xlu1 %6137  ;;  %v15217_v21 = vpop.permute.xlu0 %5373  ;;  %v4241_v48 = vsel %vm18331_vm10, %v4208_v32, %v8121_v14  ;;  %7252 = vmatprep.subr.msk.mxu0 %vm6446_vm9, %v15224_v36  ;;  %v18335_v14 = vunpack.i.h.bf16 %v18298_v55  ;;  %v15249_v59 = vmax.f32 %v1464_v45, %v1639_v8  ;;  %v1465_v20 = vmax.f32 %v15182_v41, %v1341_v39  ;;  %v18341_v8 = vld [vmem:[#allocation53_spill] sm:$0xff] }
 0x5b8   : > { %18329 = vst [vmem:[#allocation139_spill] sm:$0xff] %v15215_v31  ;;  %v6306_v29 = vsel %vm6233_vm7, %v4439_v49, %v15215_v31  ;;  %v15237_v46 = vsel %vm264_vm0, %v18333_v26, %v18332_v60  ;;  %v4274_v0 = vsel %vm4265_vm15, %v4241_v48, %v8201_v15  ;;  %v17334_v15 = vunpack.i.h.bf16 %v18312_v18  ;;  %v18348_v48 = vld [vmem:[#allocation308_spill] sm:$0xff]  ;;  %v15304_v31 = vld [vmem:[#allocation2 + $0x3a0] sm:$0xff] }
 0x5b9   : > { %5605 = vrot.lane.b32.xlu1 %v1924_v51, %s8809_s14  ;;  %6554 = vmatprep.mubr.f32.mxu1 %v6306_v29  ;;  %v4077_v40 = vsel %vm4067_vm12, %v4044_v61, %v18335_v14  ;;  %v1642_v61 = vsel %vm1468_vm5, %v1640_v33, %v1641_v5  ;;  %v18339_v29 = vld [vmem:[#allocation132_spill] sm:$0xff]  ;;  %v7682_v45 = vunpack.i.h.bf16 %v18316_v16  ;;  %v4299_v41 = vsel %vm4298_vm6, %v17335_v35, %v8261_v28  ;;  %v18342_v33 = vld [vmem:[#allocation101_spill] sm:$0xff] }
 0x5ba   : > { %5195 = vrot.lane.b32.xlu0 %v18337_v43, %s8831_s7  ;;  %6555 = vmatmul.mubr.f32.gmra.mxu1 %v4274_v0  ;;  %v4110_v51 = vsel %vm17337_vm13, %v4077_v40, %v7662_v56  ;;  %v4308_v56 = vsel %vm4298_vm6, %v17334_v15, %v8282_v58  ;;  %v8341_v39 = vunpack.i.l.bf16 %v18341_v8  ;;  %v8362_v26 = vunpack.i.h.bf16 %v18309_v9  ;;  %v15271_v0 = vld [vmem:[#allocation3 + $0x3a0] sm:$0xff]  ;;  %v18344_v28 = vld [vmem:[#allocation317_spill] sm:$0xff]  ;;  %v18346_v15 = vld [vmem:[#allocation90_spill] sm:$0xff] }
 0x5bb   : > { %v15255_v32 = vpop.permute.xlu1 %5453  ;;  %v15257_v55 = vpop.permute.xlu0 %5579  ;;  %v4143_v60 = vsel %vm18340_vm2, %v4110_v51, %v7667_v25  ;;  %v1813_v16 = vmax.f32 %v15130_v52, %v15157_v1  ;;  %v8421_v5 = vunpack.i.l.bf16 %v18342_v33  ;;  %v18343_v25 = vld [vmem:[#allocation112_spill] sm:$0xff]  ;;  %v15283_v58 = vmax.f32 %v1465_v20, %v1642_v61  ;;  %v18345_v51 = vld [vmem:[#allocation157_spill] sm:$0xff]  ;;  %v18347_v52 = vld [vmem:[#allocation338_spill] sm:$0xff] }
 0x5bc   : > { %v5884_v14 = vsel %vm5877_vm3, %v18344_v28, %v18343_v25  ;;  %v1814_v9 = vmax.f32 %v15157_v1, %v15249_v59  ;;  %v8442_v40 = vunpack.i.h.bf16 %v18318_v4  ;;  %v8501_v12 = vunpack.i.l.bf16 %v18345_v51  ;;  %v18351_v20 = vld [vmem:[#allocation68_spill] sm:$0xff] }
 0x5bd   : > { %5291 = vrot.lane.b32.xlu1 %v15271_v0, %s8832_s8  ;;  %v5893_v35 = vsel %vm5877_vm3, %v18347_v52, %v18346_v15  ;;  %vm18349_vm14 = vcmask 883712   ;;  %v8581_v61 = vunpack.i.l.bf16 %v18351_v20  ;;  %vm18353_vm2 = vcmask 982016   ;;  %v15306_v15 = vld [vmem:[#allocation2 + $0x3a8] sm:$0x3] }
 0x5be   : > { %5479 = vrot.lane.b32.xlu0 %v18299_v27, %s8834_s11  ;;  %v5917_v49 = vsel %vm18349_vm14, %v5884_v14, %v18348_v48  ;;  %v8522_v27 = vunpack.i.h.bf16 %v18320_v13  ;;  %vm18352_vm10 = vmmov %vm18349_vm14  ;;  %v8602_v48 = vunpack.i.h.bf16 %v18322_v24  ;;  %v1861_v13 = vmax.f32 %v1813_v16, %v15249_v59 }
 0x5bf   : > { %v15294_v25 = vpop.permute.xlu1 %5581  ;;  %v15296_v28 = vpop.permute.xlu0 %5183  ;;  %v5926_v1 = vsel %vm18352_vm10, %v5893_v35, %v14579_v22  ;;  %v5950_v4 = vsel %vm18353_vm2, %v5917_v49, %v14581_v6  ;;  %vm18354_vm14 = vmmov %vm18353_vm2  ;;  %v1893_v52 = vmax.f32 %v14399_v10, %v14829_v19  ;;  %vm18355_vm10 = vcmask 162816  }
 0x5c0   : > { %18350 = vst [vmem:[#allocation259_spill] sm:$0xff] %v15296_v28  ;;  %v5959_v14 = vsel %vm18354_vm14, %v5926_v1, %v14605_v17  ;;  %v4332_v22 = vsel %vm18355_vm10, %v4299_v41, %v8341_v39  ;;  %vm18356_vm13 = vmmov %vm18355_vm10  ;;  %v1862_v49 = vmax.f32 %v1814_v9, %v15283_v58  ;;  %v1894_v24 = vmax.f32 %v14437_v62, %v14832_v23  ;;  %v15333_v23 = vld [vmem:[#allocation2 + $0x3b0] sm:$0xff] }
 0x5c1   : > { %6129 = vrot.lane.b32.xlu1 %v5950_v4, %s8835_s30  ;;  %v4341_v35 = vsel %vm18356_vm13, %v4308_v56, %v8362_v26  ;;  %v4365_v4 = vsel %vm17338_vm8, %v4332_v22, %v8421_v5  ;;  %v1342_v10 = vrot.slane %v15304_v31, 1  ;;  %v1343_v19 = vrot.slane %v15306_v15, 1  ;;  %v15335_v26 = vld [vmem:[#allocation2 + $0x3b8] sm:$0x3]  ;;  %v18360_v9 = vld [vmem:[#allocation333_spill] sm:$0xff] }
 0x5c2   : > { %6165 = vrot.lane.b32.xlu0 %v5959_v14, %s8835_s30  ;;  %v4374_v1 = vsel %vm17338_vm8, %v4341_v35, %v8442_v40  ;;  %vm18357_vm13 = vcmask 719872   ;;  %v7707_v56 = vunpack.i.h.bf16 %v18317_v57  ;;  %vm18358_vm2 = vcmask 359424  }
 0x5c3   : > { %v15323_v28 = vpop.permute.xlu1 %5279  ;;  %v15325_v16 = vpop.permute.xlu0 %5455  ;;  %v4176_v41 = vsel %vm18357_vm13, %v4143_v60, %v7682_v45  ;;  %v4398_v39 = vsel %vm18358_vm2, %v4365_v4, %v8501_v12  ;;  %vm18359_vm14 = vmmov %vm18358_vm2  ;;  %v8122_v5 = vunpack.i.h.bf16 %v18325_v50  ;;  %v1925_v40 = vmax.f32 %v1893_v52, %v1861_v13  ;;  %v8745_v45 = vld [vmem:[#allocation3 + $0x3a8] sm:$0x3] }
 0x5c4   : > { %v4407_v62 = vsel %vm18359_vm14, %v4374_v1, %v8522_v27  ;;  %vm18361_vm10 = vcmask 457728   ;;  %v2518_v57 = vrot.slane %v15271_v0, 2  ;;  %v1926_v12 = vmax.f32 %v1894_v24, %v1862_v49 }
 0x5c5   : > { %5387 = vrot.lane.b32.xlu1 %v18360_v9, %s8833_s9  ;;  %v4431_v14 = vsel %vm18361_vm10, %v4398_v39, %v8581_v61  ;;  %vm18362_vm8 = vmmov %vm18361_vm10  ;;  %v2519_v27 = vrot.slane %v8745_v45, 2  ;;  %v1643_v22 = vrot.slane %v15304_v31, 2  ;;  %v1344_v13 = vsel %vm1167_vm4, %v1342_v10, %v1343_v19 }
 0x5c6   : > { %v4440_v60 = vsel %vm18362_vm8, %v4407_v62, %v8602_v48  ;;  %5481 = vrot.lane.b32.xlu0 %v18337_v43, %s8834_s11  ;;  %v1644_v61 = vrot.slane %v15306_v15, 2  ;;  %v1345_v48 = vrot.slane %v15333_v23, 1  ;;  %v1346_v0 = vrot.slane %v15335_v26, 1 }
 0x5c7   : > { %v15346_v35 = vpop.permute.xlu1 %6105  ;;  %v15348_v50 = vpop.permute.xlu0 %6141  ;;  %v18365_v52 = vunpack.i.l.bf16 %v18338_v7  ;;  %vm18366_vm8 = vcmask 228352   ;;  %v4209_v4 = vsel %vm4199_vm1, %v4176_v41, %v7707_v56  ;;  %v18367_v1 = vunpack.i.l.bf16 %v18339_v29 }
 0x5c8   : > { %18363 = vst [vmem:[#allocation319_spill] sm:$0xff] %v15346_v35  ;;  %18364 = vst [vmem:[#allocation262_spill] sm:$0xff] %v15348_v50  ;;  %v6298_v49 = vsel %vm6233_vm7, %v4431_v14, %v15346_v35  ;;  %v6307_v24 = vsel %vm6233_vm7, %v4440_v60, %v15348_v50  ;;  %v8262_v10 = vunpack.i.h.bf16 %v18330_v3  ;;  %v18368_v19 = vunpack.i.l.bf16 %v18336_v54  ;;  %v15387_v14 = vld [vmem:[#allocation3 + $0x3b0] sm:$0xff] }
 0x5c9   : > { %v4012_v43 = vsel %vm18366_vm8, %v15237_v46, %v18365_v52  ;;  %5607 = vrot.lane.b32.xlu1 %v1925_v40, %s8809_s14  ;;  %6514 = vmatprep.mubr.f32.mxu0 %v6298_v49  ;;  %vm18369_vm13 = vcmask 916480   ;;  %v17339_v62 = vunpack.i.h.bf16 %v18336_v54  ;;  %v18370_v41 = vunpack.i.h.bf16 %v18312_v18  ;;  %v6373_v40 = vld [vmem:[%s16833_s3 + $0x158] sm:$0xff]  ;;  %v18509_v50 = vld [vmem:[#allocation313_spill] sm:$0xff] }
 0x5ca   : > { %v4045_v15 = vsel %vm4034_vm11, %v4012_v43, %v18367_v1  ;;  %v4266_v46 = vsel %vm4265_vm15, %v15076_v11, %v18368_v19  ;;  %v4242_v39 = vsel %vm18369_vm13, %v4209_v4, %v8122_v5  ;;  %5609 = vrot.lane.b32.xlu0 %v1926_v12, %s8809_s14  ;;  %6559 = vmatprep.mubr.f32.mxu1 %v6307_v24  ;;  %v18371_v12 = vunpack.i.l.bf16 %v18263_v30  ;;  %vm18373_vm2 = vmmov %vm18369_vm13  ;;  %v6371_v24 = vld [vmem:[%s16833_s3 + $0x148] sm:$0xff] }
 0x5cb   : > { %v4275_v56 = vsel %vm4265_vm15, %v4242_v39, %v18370_v41  ;;  %v2520_v3 = vsel %vm1468_vm5, %v2518_v57, %v2519_v27  ;;  %v1466_v9 = vmax.f32 %v15304_v31, %v1344_v13  ;;  %6515 = vmatmul.mubr.f32.vlgmr.msra.gmra.mxu0 %v4266_v46  ;;  %v15383_v11 = vpop.permute.xlu1 %5375  ;;  %v15385_v5 = vpop.permute.xlu0 %5457  ;;  %v1645_v18 = vsel %vm1468_vm5, %v1643_v22, %v1644_v61  ;;  %v2048_v27 = vld [vmem:[#allocation3 + $0x3b8] sm:$0x3]  ;;  %v18374_v22 = vld [vmem:[#allocation137_spill] sm:$0xff] }
 0x5cc   : > { %6560 = vmatmul.mubr.f32.gmra.mxu1 %v4275_v56  ;;  %v1347_v60 = vsel %vm1167_vm4, %v1345_v48, %v1346_v0  ;;  %v1646_v57 = vrot.slane %v15333_v23, 2  ;;  %v1647_v31 = vrot.slane %v15335_v26, 2  ;;  %v15397_v45 = vsel %vm4034_vm11, %v15015_v38, %v18371_v12  ;;  %7253 = vmatpush3.msk.msra.mxu0 %vm6446_vm9, %v15224_v36  ;;  %v6372_v26 = vld [vmem:[%s16833_s3 + $0x150] sm:$0xff]  ;;  %v18377_v39 = vld [vmem:[#allocation82_spill] sm:$0xff] }
 0x5cd   : > { %v18372_v13 = vunpack.i.h.bf16 %v18269_v37  ;;  %v7696_v61 = vunpack.i.l.bf16 %v18374_v22  ;;  %v18375_v48 = vunpack.i.l.bf16 %v18334_v2  ;;  %v4300_v37 = vsel %vm4298_vm6, %v17339_v62, %v8262_v10  ;;  %5197 = vrot.lane.b32.xlu1 %v2520_v3, %s8831_s7  ;;  %7254 = vmatprep.subr.mxu0 %v6373_v40  ;;  %s8836_s7 = smov [#allocation4]  }
 0x5ce   : > { %vm5976_vm14 = vcmask 31744   ;;  %5293 = vrot.lane.b32.xlu0 %v15387_v14, %s8832_s8  ;;  %v1767_v0 = vmax.f32 %v1466_v9, %v1645_v18  ;;  %v1815_v43 = vmax.f32 %v15249_v59, %v15283_v58  ;;  %v1467_v49 = vmax.f32 %v15333_v23, %v1347_v60  ;;  %7255 = vmatpush3.msra.mxu0 %v6373_v40  ;;  %v6370_v9 = vld [vmem:[%s16833_s3 + $0x140] sm:$0xff]  ;;  %s8750_s8 = sshll.u32 %s8836_s7, 4  ;;  %s8751_s8 = int_to_ptr.vmem [resolvable:$false] %s8750_s8 }
 0x5cf   : > { %v15403_v52 = vsel %vm18373_vm2, %v15098_v53, %v18372_v13  ;;  %v15414_v38 = vsel %vm4067_vm12, %v4045_v15, %v18375_v48  ;;  %v18376_v53 = vld [vmem:[#allocation142_spill] sm:$0xff]  ;;  %v8342_v4 = vunpack.i.h.bf16 %v18341_v8  ;;  %v2523_v1 = vrot.slane %v15387_v14, 1  ;;  %v15431_v15 = vpop.permute.xlu1 %5583  ;;  %v15433_v10 = vpop.permute.xlu0 %5585  ;;  %7256 = vmatprep.subr.mxu0 %v6372_v26  ;;  %v18378_v8 = vld [vmem:[#allocation232_spill] sm:$0xff]  ;;  %v18379_v40 = vld [vmem:[#allocation263_spill] sm:$0xff]  ;;  %s8752_s17 = scalar_lea.vmem %s8751_s8, 8192 }
 0x5d0   : > { %v2524_v19 = vrot.slane %v2048_v27, 1  ;;  %v1648_v46 = vsel %vm1468_vm5, %v1646_v57, %v1647_v31  ;;  %v8422_v59 = vunpack.i.h.bf16 %v18342_v33  ;;  %v8502_v23 = vunpack.i.h.bf16 %v18345_v51  ;;  %7257 = vmatpush3.msra.mxu0 %v6372_v26  ;;  %v18380_v60 = vld [vmem:[#allocation331_spill] sm:$0xff]  ;;  %v18381_v57 = vld [vmem:[#allocation154_spill] sm:$0xff]  ;;  %v18382_v31 = vld [vmem:[#allocation285_spill] sm:$0xff] }
 0x5d1   : > { %v5894_v41 = vsel %vm5877_vm3, %v18377_v39, %v14607_v47  ;;  %v5977_v56 = vsel %vm5976_vm14, %v18378_v8, %v14632_v63  ;;  %v2526_v33 = vrot.slane %v15387_v14, 2  ;;  %5483 = vrot.lane.b32.xlu1 %v2520_v3, %s8834_s11  ;;  %v2527_v51 = vrot.slane %v2048_v27, 2  ;;  %7258 = vmatprep.subr.mxu0 %v6371_v24  ;;  %v6369_v14 = vld [vmem:[%s16833_s3 + $0x138] sm:$0xff]  ;;  %v18384_v48 = vld [vmem:[#allocation167_spill] sm:$0xff] }
 0x5d2   : > { %v6009_v18 = vsel %vm264_vm0, %v5977_v56, %v18379_v40  ;;  %v1895_v47 = vmax.f32 %v18381_v57, %v18380_v60  ;;  %v8286_v12 = vunpack.i.l.bf16 %v18382_v31  ;;  %v1863_v63 = vmax.f32 %v1815_v43, %v1767_v0  ;;  %7259 = vmatpush3.msra.mxu0 %v6371_v24  ;;  %v18389_v40 = vld [vmem:[#allocation84_spill] sm:$0xff] }
 0x5d3   : > { %6107 = vrot.lane.b32.xlu0 %v6009_v18, %s8835_s30  ;;  %v1768_v13 = vmax.f32 %v1467_v49, %v1648_v46  ;;  %v1816_v26 = vmax.f32 %v15283_v58, %v1767_v0  ;;  %vm18383_vm9 = vcmask 162816   ;;  %v8582_v27 = vunpack.i.h.bf16 %v18351_v20  ;;  %v15463_v8 = vpop.permute.xlu1 %5185  ;;  %v15465_v56 = vpop.permute.xlu0 %5281  ;;  %7260 = vmatprep.subr.mxu0 %v6370_v9  ;;  %v18386_v58 = vld [vmem:[#allocation146_spill] sm:$0xff]  ;;  %v6368_v20 = vld [vmem:[%s16833_s3 + $0x130] sm:$0xff] }
 0x5d4   : > { %v4333_v3 = vsel %vm18383_vm9, %v4300_v37, %v8342_v4  ;;  %vm18385_vm10 = vcmask 883712   ;;  %v2525_v43 = vsel %vm1167_vm4, %v2523_v1, %v2524_v19  ;;  %v7721_v0 = vunpack.i.l.bf16 %v18386_v58  ;;  %v18387_v49 = vld [vmem:[#allocation98_spill] sm:$0xff]  ;;  %7261 = vmatpush3.msra.mxu0 %v6370_v9  ;;  %v18391_v4 = vld [vmem:[#allocation280_spill] sm:$0xff]  ;;  %v18392_v18 = vld [vmem:[#allocation153_spill] sm:$0xff] }
 0x5d5   : > { %v5927_v39 = vsel %vm18385_vm10, %v5894_v41, %v18384_v48  ;;  %v8366_v24 = vunpack.i.l.bf16 %v18387_v49  ;;  %vm18388_vm8 = vcmask 261120   ;;  %vm18390_vm13 = vcmask 982016   ;;  %7262 = vmatprep.subr.mxu0 %v6369_v14  ;;  %v18396_v48 = vld [vmem:[#allocation81_spill] sm:$0xff]  ;;  %v18397_v49 = vld [vmem:[#allocation155_spill] sm:$0xff] }
 0x5d6   : > { %v4366_v46 = vsel %vm18388_vm8, %v4333_v3, %v8422_v59  ;;  %v5960_v37 = vsel %vm18390_vm13, %v5927_v39, %v18389_v40  ;;  %v8206_v41 = vunpack.i.l.bf16 %v18391_v4  ;;  %v8446_v60 = vunpack.i.l.bf16 %v18392_v18  ;;  %v18394_v59 = vld [vmem:[#allocation64_spill] sm:$0xff]  ;;  %v18395_v3 = vld [vmem:[#allocation306_spill] sm:$0xff]  ;;  %7263 = vmatpush3.msra.mxu0 %v6369_v14  ;;  %vm18406_vm10 = vmmov %vm18388_vm8 }
 0x5d7   : > { %6169 = vrot.lane.b32.xlu1 %v5960_v37, %s8835_s30  ;;  %v2528_v1 = vsel %vm1468_vm5, %v2526_v33, %v2527_v51  ;;  %vm18393_vm4 = vcmask 359424   ;;  %v8526_v57 = vunpack.i.l.bf16 %v18394_v59  ;;  %5389 = vrot.lane.b32.xlu0 %v2525_v43, %s8833_s9  ;;  %v1927_v9 = vmax.f32 %v1895_v47, %v1863_v63  ;;  %v18398_v37 = vld [vmem:[#allocation72_spill] sm:$0xff]  ;;  %v15488_v33 = vpop.permute.xlu1 %5459  ;;  %v18403_v43 = vld [vmem:[#allocation70_spill] sm:$0xff] }
 0x5d8   : > { %v4399_v19 = vsel %vm18393_vm4, %v4366_v46, %v8502_v23  ;;  %v1864_v31 = vmax.f32 %v1816_v26, %v1768_v13  ;;  %v1896_v39 = vmax.f32 %v18396_v48, %v18395_v3  ;;  %v7751_v62 = vunpack.i.l.bf16 %v18397_v49  ;;  %v15490_v23 = vpop.permute.xlu0 %6109  ;;  %7264 = vmatprep.subr.mxu0 %v6368_v20  ;;  %v18402_v63 = vld [vmem:[#allocation264_spill] sm:$0xff]  ;;  %vm18409_vm13 = vmmov %vm18393_vm4  ;;  %v18410_v48 = vld [vmem:[#allocation47_spill] sm:$0xff] }
 0x5d9   : > { %v4309_v18 = vsel %vm4298_vm6, %v8206_v41, %v8286_v12  ;;  %v8606_v36 = vunpack.i.l.bf16 %v18398_v37  ;;  %18399 = vst [vmem:[#allocation88_spill] sm:$0xff] %v15490_v23  ;;  %vm18400_vm5 = vcmask 457728   ;;  %vm18401_vm2 = vcmask 523264   ;;  %7265 = vmatpush3.msra.mxu0 %v6368_v20  ;;  %v6367_v14 = vld [vmem:[%s16833_s3 + $0x128] sm:$0xff] }
 0x5da   : > { %v4432_v51 = vsel %vm18400_vm5, %v4399_v19, %v8582_v27  ;;  %v4111_v47 = vsel %vm18401_vm2, %v15414_v38, %v7696_v61  ;;  %v8126_v13 = vunpack.i.l.bf16 %v18402_v63  ;;  %v4342_v26 = vsel %vm18383_vm9, %v4309_v18, %v8366_v24  ;;  %v18411_v37 = vld [vmem:[#allocation324_spill] sm:$0xff]  ;;  %vm18414_vm4 = vmmov %vm18400_vm5  ;;  %7266 = vmatprep.subr.mxu0 %v6367_v14 }
 0x5db   : > { %v6299_v12 = vsel %vm6233_vm7, %v4432_v51, %v15490_v23  ;;  %v7526_v27 = vunpack.i.l.bf16 %v18403_v43  ;;  %v18404_v46 = vunpack.i.l.bf16 %v18376_v53  ;;  %vm18405_vm6 = vcmask 621568   ;;  %5485 = vrot.lane.b32.xlu1 %v2528_v1, %s8834_s11  ;;  %5611 = vrot.lane.b32.xlu0 %v1927_v9, %s8809_s14  ;;  %v15521_v51 = vpop.permute.xlu1 %6145  ;;  %v18415_v9 = vld [vmem:[#allocation78_spill] sm:$0xff]  ;;  %v18516_v23 = vld [vmem:[#allocation61_spill] sm:$0xff]  ;;  %s7120_s11 = sshll.u32 %s8889_s22, 12 }
 0x5dc   : > { %v4375_v61 = vsel %vm18406_vm10, %v4342_v26, %v8446_v60  ;;  %6519 = vmatprep.mubr.f32.mxu0 %v6299_v12  ;;  %v18407_v38 = vunpack.i.h.bf16 %v18336_v54  ;;  %vm18408_vm8 = vcmask 719872   ;;  %v1928_v59 = vmax.f32 %v1896_v39, %v1864_v31  ;;  %v18412_v60 = vld [vmem:[#allocation40_spill] sm:$0xff]  ;;  %18413 = vst [vmem:[#allocation314_spill] sm:$0xff] %v15521_v51  ;;  %v15523_v54 = vpop.permute.xlu0 %5377  ;;  %7267 = vmatpush3.msra.mxu0 %v6367_v14  ;;  %v6366_v12 = vld [vmem:[%s16833_s3 + $0x120] sm:$0xff]  ;;  %v18421_v14 = vld [vmem:[#allocation10_spill] sm:$0xff] }
 0x5dd   : > { %v4144_v19 = vsel %vm18405_vm6, %v4111_v47, %v18404_v46  ;;  %v4408_v3 = vsel %vm18409_vm13, %v4375_v61, %v8526_v57  ;;  %v7467_v18 = vunpack.i.h.bf16 %v18410_v48  ;;  %v5978_v1 = vsel %vm5976_vm14, %v18412_v60, %v18411_v37  ;;  %v18416_v31 = vld [vmem:[#allocation328_spill] sm:$0xff]  ;;  %v18419_v46 = vld [vmem:[#allocation86_spill] sm:$0xff]  ;;  %7268 = vmatprep.subr.mxu0 %v6366_v12 }
 0x5de   : > { %v4267_v24 = vsel %vm4265_vm15, %v15403_v52, %v18407_v38  ;;  %v4177_v20 = vsel %vm18408_vm8, %v4144_v19, %v7721_v0  ;;  %v4441_v52 = vsel %vm18414_vm4, %v4408_v3, %v8606_v36  ;;  %v7546_v47 = vunpack.i.l.bf16 %v18415_v9  ;;  %v18420_v38 = vld [vmem:[#allocation54_spill] sm:$0xff]  ;;  %v18423_v37 = vld [vmem:[#allocation284_spill] sm:$0xff]  ;;  %7269 = vmatpush3.msra.mxu0 %v6366_v12 }
 0x5df   : > { %6520 = vmatmul.mubr.f32.gmra.mxu0 %v4267_v24  ;;  %v4210_v0 = vsel %vm4199_vm1, %v4177_v20, %v7751_v62  ;;  %v6010_v57 = vsel %vm264_vm0, %v5978_v1, %v18416_v31  ;;  %v6308_v39 = vsel %vm6233_vm7, %v4441_v52, %v15521_v51  ;;  %vm18417_vm5 = vcmask 916480   ;;  %v18418_v62 = vld [vmem:[#allocation353_spill] sm:$0xff]  ;;  %5613 = vrot.lane.b32.xlu0 %v1928_v59, %s8809_s14  ;;  %v15556_v1 = vpop.permute.xlu1 %5461  ;;  %v18427_v31 = vld [vmem:[#allocation344_spill] sm:$0xff]  ;;  %s16781_s14 = scalar_lea.hbm %s16835_s5, %s7120_s11 }
 0x5e0   : > { %v4243_v26 = vsel %vm18417_vm5, %v4210_v0, %v8126_v13  ;;  %v4070_v36 = vsel %vm4067_vm12, %v15397_v45, %v7526_v27  ;;  %v5895_v19 = vsel %vm5877_vm3, %v18419_v46, %v18418_v62  ;;  %6111 = vrot.lane.b32.xlu1 %v6010_v57, %s8835_s30  ;;  %6564 = vmatprep.mubr.f32.mxu1 %v6308_v39  ;;  %v7487_v24 = vunpack.i.h.bf16 %v18420_v38  ;;  %v6365_v45 = vld [vmem:[%s16833_s3 + $0x118] sm:$0xff]  ;;  %v18422_v20 = vld [vmem:[#allocation89_spill] sm:$0xff]  ;;  %v18425_v0 = vld [vmem:[#allocation176_spill] sm:$0xff] }
 0x5e1   : > { %v4276_v61 = vsel %vm4265_vm15, %v4243_v26, %v8206_v41  ;;  %v7672_v13 = vunpack.i.h.bf16 %v18300_v42  ;;  %v3972_v27 = vsel %vm264_vm0, %v18421_v14, %v7467_v18  ;;  %v7566_v3 = vunpack.i.l.bf16 %v18422_v20  ;;  %v18424_v41 = vld [vmem:[#allocation99_spill] sm:$0xff]  ;;  %v15558_v42 = vpop.permute.xlu0 %5587  ;;  %7270 = vmatprep.subr.mxu0 %v6365_v45  ;;  %v6363_v12 = vld [vmem:[%s16833_s3 + $0x108] sm:$0xff]  ;;  %v18435_v38 = vld [vmem:[#allocation309_spill] sm:$0xff] }
 0x5e2   : > { %6565 = vmatmul.mubr.f32.gmra.mxu1 %v4276_v61  ;;  %v7687_v48 = vunpack.i.h.bf16 %v18338_v7  ;;  %v5979_v60 = vsel %vm5976_vm14, %v18424_v41, %v18423_v37  ;;  %v4103_v59 = vsel %vm18401_vm2, %v4070_v36, %v7546_v47  ;;  %v7692_v52 = vunpack.i.h.bf16 %v18339_v29  ;;  %v6364_v7 = vld [vmem:[%s16833_s3 + $0x110] sm:$0xff]  ;;  %v18428_v26 = vld [vmem:[#allocation179_spill] sm:$0xff]  ;;  %v18431_v36 = vld [vmem:[#allocation18_spill] sm:$0xff]  ;;  %7271 = vmatpush3.msra.mxu0 %v6365_v45 }
 0x5e3   : > { %vm18426_vm9 = vcmask 883712   ;;  %v6011_v57 = vsel %vm264_vm0, %v5979_v60, %v18427_v31  ;;  %v7507_v39 = vunpack.i.h.bf16 %v18263_v30  ;;  %vm18429_vm6 = vcmask 982016   ;;  %v18433_v46 = vld [vmem:[#allocation100_spill] sm:$0xff]  ;;  %v18436_v14 = vld [vmem:[#allocation118_spill] sm:$0xff]  ;;  %7272 = vmatprep.subr.mxu0 %v6364_v7 }
 0x5e4   : > { %v5928_v18 = vsel %vm18426_vm9, %v5895_v19, %v18425_v0  ;;  %6115 = vrot.lane.b32.xlu1 %v6011_v57, %s8835_s30  ;;  %vm18430_vm10 = vcmask 228352   ;;  %v3980_v62 = vsel %vm264_vm0, %v18431_v36, %v7672_v13  ;;  %vm18432_vm8 = vcmask 621568   ;;  %v18437_v41 = vld [vmem:[#allocation370_spill] sm:$0xff]  ;;  %7273 = vmatpush3.msra.mxu0 %v6364_v7  ;;  %v6362_v0 = vld [vmem:[%s16833_s3 + $0x100] sm:$0xff]  ;;  %v18440_v57 = vld [vmem:[#allocation56_spill] sm:$0xff] }
 0x5e5   : > { %v5961_v47 = vsel %vm18429_vm6, %v5928_v18, %v18428_v26  ;;  %v4005_v29 = vsel %vm18430_vm10, %v3972_v27, %v7487_v24  ;;  %v4136_v30 = vsel %vm18432_vm8, %v4103_v59, %v7566_v3  ;;  %v7586_v19 = vunpack.i.l.bf16 %v18433_v46  ;;  %vm18434_vm13 = vmmov %vm18430_vm10  ;;  %v15586_v27 = vpop.permute.xlu1 %5589  ;;  %v15588_v13 = vpop.permute.xlu0 %5187  ;;  %v18438_v60 = vld [vmem:[#allocation354_spill] sm:$0xff]  ;;  %v18439_v59 = vld [vmem:[#allocation235_spill] sm:$0xff]  ;;  %7274 = vmatprep.subr.mxu0 %v6363_v12 }
 0x5e6   : > { %6173 = vrot.lane.b32.xlu0 %v5961_v47, %s8835_s30  ;;  %v4013_v61 = vsel %vm18434_vm13, %v3980_v62, %v7687_v48  ;;  %v5980_v24 = vsel %vm5976_vm14, %v18436_v14, %v18435_v38  ;;  %v7697_v37 = vunpack.i.h.bf16 %v18374_v22  ;;  %v5981_v48 = vsel %vm5976_vm14, %v18439_v59, %v18438_v60  ;;  %v18441_v36 = vld [vmem:[#allocation106_spill] sm:$0xff]  ;;  %v18443_v38 = vld [vmem:[#allocation87_spill] sm:$0xff]  ;;  %7275 = vmatpush3.msra.mxu0 %v6363_v12  ;;  %vm18446_vm5 = vmmov %vm18426_vm9 }
 0x5e7   : > { %v4046_v45 = vsel %vm4034_vm11, %v4013_v61, %v7692_v52  ;;  %v6012_v3 = vsel %vm264_vm0, %v5980_v24, %v18437_v41  ;;  %v4038_v18 = vsel %vm4034_vm11, %v4005_v29, %v7507_v39  ;;  %v7677_v31 = vunpack.i.h.bf16 %v18334_v2  ;;  %v18442_v61 = vld [vmem:[#allocation226_spill] sm:$0xff]  ;;  %v18445_v14 = vld [vmem:[#allocation351_spill] sm:$0xff]  ;;  %7276 = vmatprep.subr.mxu0 %v6362_v0  ;;  %v18450_v12 = vld [vmem:[#allocation145_spill] sm:$0xff] }
 0x5e8   : > { %v7702_v52 = vunpack.i.h.bf16 %v18376_v53  ;;  %v6013_v22 = vsel %vm264_vm0, %v5981_v48, %v18440_v57  ;;  %6119 = vrot.lane.b32.xlu1 %v6012_v3, %s8835_s30  ;;  %v7527_v47 = vunpack.i.h.bf16 %v18403_v43  ;;  %v7606_v7 = vunpack.i.l.bf16 %v18441_v36  ;;  %v18449_v59 = vld [vmem:[#allocation302_spill] sm:$0xff]  ;;  %vm18452_vm9 = vmmov %vm18429_vm6  ;;  %7277 = vmatpush3.msra.mxu0 %v6362_v0 }
 0x5e9   : > { %v7722_v62 = vunpack.i.h.bf16 %v18386_v58  ;;  %v5896_v39 = vsel %vm5877_vm3, %v18443_v38, %v18442_v61  ;;  %vm18444_vm4 = vcmask 719872   ;;  %v4079_v53 = vsel %vm4067_vm12, %v4046_v45, %v7677_v31  ;;  %v15618_v24 = vpop.permute.xlu1 %5283  ;;  %v15620_v41 = vpop.permute.xlu0 %5463  ;;  %v18448_v58 = vld [vmem:[#allocation114_spill] sm:$0xff]  ;;  %vm18453_vm6 = vmmov %vm18432_vm8  ;;  %v18454_v31 = vld [vmem:[#allocation312_spill] sm:$0xff] }
 0x5ea   : > { %6123 = vrot.lane.b32.xlu0 %v6013_v22, %s8835_s30  ;;  %v4169_v2 = vsel %vm18444_vm4, %v4136_v30, %v7586_v19  ;;  %v7752_v29 = vunpack.i.h.bf16 %v18397_v49  ;;  %v5929_v43 = vsel %vm18446_vm5, %v5896_v39, %v18445_v14  ;;  %18447 = vst [vmem:[#allocation171_spill] sm:$0xff] %v15618_v24  ;;  %v7626_v3 = vunpack.i.l.bf16 %v18448_v58  ;;  %v18451_v19 = vld [vmem:[#allocation184_spill] sm:$0xff]  ;;  %v18456_v61 = vld [vmem:[#allocation94_spill] sm:$0xff]  ;;  %vm18457_vm10 = vmmov %vm18444_vm4 }
 0x5eb   : > { %v4112_v60 = vsel %vm18401_vm2, %v4079_v53, %v7697_v37  ;;  %v5982_v30 = vsel %vm5976_vm14, %v18450_v12, %v18449_v59  ;;  %v5962_v45 = vsel %vm18452_vm9, %v5929_v43, %v18451_v19  ;;  %v8127_v48 = vunpack.i.h.bf16 %v18402_v63  ;;  %v18455_v22 = vld [vmem:[#allocation340_spill] sm:$0xff]  ;;  %v18458_v63 = vld [vmem:[#allocation199_spill] sm:$0xff]  ;;  %v18461_v59 = vld [vmem:[#allocation345_spill] sm:$0xff] }
 0x5ec   : > { %v4145_v49 = vsel %vm18453_vm6, %v4112_v60, %v7702_v52  ;;  %v6014_v57 = vsel %vm264_vm0, %v5982_v30, %v18454_v31  ;;  %v5897_v38 = vsel %vm5877_vm3, %v18456_v61, %v18455_v22  ;;  %6177 = vrot.lane.b32.xlu1 %v5962_v45, %s8835_s30  ;;  %v4202_v39 = vsel %vm4199_vm1, %v4169_v2, %v7606_v7  ;;  %vm18462_vm8 = vmmov %vm18446_vm5  ;;  %v18463_v12 = vld [vmem:[#allocation320_spill] sm:$0xff]  ;;  %v18466_v2 = vld [vmem:[#allocation361_spill] sm:$0xff] }
 0x5ed   : > { %v4178_v37 = vsel %vm18457_vm10, %v4145_v49, %v7722_v62  ;;  %v4071_v0 = vsel %vm4067_vm12, %v4038_v18, %v7527_v47  ;;  %v7547_v52 = vunpack.i.h.bf16 %v18415_v9  ;;  %v5983_v53 = vsel %vm5976_vm14, %v14581_v6, %v18458_v63  ;;  %v15645_v14 = vpop.permute.xlu1 %6113  ;;  %v15647_v43 = vpop.permute.xlu0 %6149  ;;  %v18464_v18 = vld [vmem:[#allocation63_spill] sm:$0xff]  ;;  %v18465_v47 = vld [vmem:[#allocation77_spill] sm:$0xff]  ;;  %vm18467_vm13 = vmmov %vm18452_vm9 }
 0x5ee   : > { %6127 = vrot.lane.b32.xlu0 %v6014_v57, %s8835_s30  ;;  %18459 = vst [vmem:[#allocation332_spill] sm:$0xff] %v15645_v14  ;;  %18460 = vst [vmem:[#allocation363_spill] sm:$0xff] %v15647_v43  ;;  %v4211_v60 = vsel %vm4199_vm1, %v4178_v37, %v7752_v29  ;;  %v5930_v62 = vsel %vm18462_vm8, %v5897_v38, %v18461_v59  ;;  %v6015_v7 = vsel %vm264_vm0, %v5983_v53, %v18463_v12  ;;  %vm18468_vm4 = vcmask 916480   ;;  %v18470_v31 = vld [vmem:[#allocation276_spill] sm:$0xff]  ;;  %v18473_v63 = vld [vmem:[#allocation371_spill] sm:$0xff] }
 0x5ef   : > { %v6300_v9 = vsel %vm6233_vm7, %v18464_v18, %v15645_v14  ;;  %v6309_v6 = vsel %vm6233_vm7, %v18465_v47, %v15647_v43  ;;  %v5963_v30 = vsel %vm18467_vm13, %v5930_v62, %v18466_v2  ;;  %v4235_v29 = vsel %vm18468_vm4, %v4202_v39, %v7626_v3  ;;  %vm18469_vm5 = vmmov %vm18468_vm4  ;;  %v18474_v53 = vld [vmem:[#allocation341_spill] sm:$0xff]  ;;  %v18477_v39 = vld [vmem:[#allocation350_spill] sm:$0xff] }
 0x5f0   : > { %6131 = vrot.lane.b32.xlu1 %v6015_v7, %s8835_s30  ;;  %6524 = vmatprep.mubr.f32.mxu0 %v6300_v9  ;;  %v4244_v45 = vsel %vm18469_vm5, %v4211_v60, %v8127_v48  ;;  %v7567_v49 = vunpack.i.h.bf16 %v18422_v20  ;;  %v18471_v57 = vunpack.i.l.bf16 %v18470_v31  ;;  %v18472_v61 = vunpack.i.h.bf16 %v18391_v4  ;;  %v18478_v59 = vld [vmem:[#allocation352_spill] sm:$0xff]  ;;  %v18479_v62 = vld [vmem:[#allocation342_spill] sm:$0xff]  ;;  %v18481_v7 = vld [vmem:[#allocation343_spill] sm:$0xff] }
 0x5f1   : > { %6569 = vmatprep.mubr.f32.mxu1 %v6309_v6  ;;  %v4104_v37 = vsel %vm18401_vm2, %v4071_v0, %v7547_v52  ;;  %v5984_v3 = vsel %vm5976_vm14, %v18474_v53, %v18473_v63  ;;  %v15677_v20 = vpop.permute.xlu1 %5379  ;;  %v15679_v48 = vpop.permute.xlu0 %5465  ;;  %v5985_v4 = vsel %vm5976_vm14, %v18479_v62, %v18478_v59  ;;  %v7587_v12 = vunpack.i.h.bf16 %v18433_v46  ;;  %v18480_v0 = vld [vmem:[#allocation151_spill] sm:$0xff]  ;;  %v18482_v9 = vld [vmem:[#allocation44_spill] sm:$0xff]  ;;  %vm18483_vm9 = vmmov %vm18453_vm6 }
 0x5f2   : > { %6181 = vrot.lane.b32.xlu0 %v5963_v30, %s8835_s30  ;;  %v4268_v22 = vsel %vm4265_vm15, %v4235_v29, %v18471_v57  ;;  %v4277_v38 = vsel %vm4265_vm15, %v4244_v45, %v18472_v61  ;;  %18475 = vst [vmem:[#allocation254_spill] sm:$0xff] %v15677_v20  ;;  %18476 = vst [vmem:[#allocation41_spill] sm:$0xff] %v15679_v48  ;;  %v6016_v60 = vsel %vm264_vm0, %v5984_v3, %v18477_v39  ;;  %v18484_v30 = vld [vmem:[#allocation159_spill] sm:$0xff]  ;;  %v18486_v57 = vld [vmem:[#allocation105_spill] sm:$0xff] }
 0x5f3   : > { %6525 = vmatmul.mubr.f32.gmra.mxu0 %v4268_v22  ;;  %6570 = vmatmul.mubr.f32.gmra.mxu1 %v4277_v38  ;;  %v7711_v52 = vunpack.i.l.bf16 %v18480_v0  ;;  %v6017_v18 = vsel %vm264_vm0, %v5985_v4, %v18481_v7  ;;  %v7471_v47 = vunpack.i.l.bf16 %v18482_v9  ;;  %v4137_v6 = vsel %vm18483_vm9, %v4104_v37, %v7567_v49  ;;  %v18485_v45 = vld [vmem:[#allocation347_spill] sm:$0xff]  ;;  %v18487_v46 = vld [vmem:[#allocation161_spill] sm:$0xff]  ;;  %vm18489_vm6 = vmmov %vm18462_vm8 }
 0x5f4   : > { %6135 = vrot.lane.b32.xlu1 %v6016_v60, %s8835_s30  ;;  %v7731_v29 = vunpack.i.l.bf16 %v18484_v30  ;;  %v5898_v22 = vsel %vm5877_vm3, %v18486_v57, %v18485_v45  ;;  %v7736_v61 = vunpack.i.l.bf16 %v18487_v46  ;;  %v18488_v38 = vld [vmem:[#allocation327_spill] sm:$0xff]  ;;  %v7607_v39 = vunpack.i.h.bf16 %v18441_v36  ;;  %v18491_v49 = vld [vmem:[#allocation310_spill] sm:$0xff]  ;;  %vm18494_vm10 = vmmov %vm18467_vm13 }
 0x5f5   : > { %v5931_v63 = vsel %vm18489_vm6, %v5898_v22, %v18488_v38  ;;  %v15701_v53 = vpop.permute.xlu1 %5591  ;;  %v15703_v3 = vpop.permute.xlu0 %5593  ;;  %v18492_v37 = vld [vmem:[#allocation91_spill] sm:$0xff]  ;;  %vm18495_vm8 = vcmask 719872   ;;  %v18497_v45 = vld [vmem:[#allocation360_spill] sm:$0xff]  ;;  %v18498_v22 = vld [vmem:[#allocation366_spill] sm:$0xff]  ;;  %vm18502_vm13 = vcmask 228352   ;;  %v7511_v35 = vunpack.i.l.bf16 %v18516_v23 }
 0x5f6   : > { %6139 = vrot.lane.b32.xlu0 %v6017_v18, %s8835_s30  ;;  %18490 = vst [vmem:[#allocation365_spill] sm:$0xff] %v15703_v3  ;;  %v5986_v60 = vsel %vm5976_vm14, %v18492_v37, %v18491_v49  ;;  %v18493_v59 = vld [vmem:[#allocation355_spill] sm:$0xff]  ;;  %v4170_v4 = vsel %vm18495_vm8, %v4137_v6, %v7587_v12  ;;  %v18499_v38 = vld [vmem:[#allocation113_spill] sm:$0xff]  ;;  %v7627_v12 = vunpack.i.h.bf16 %v18448_v58  ;;  %v18503_v6 = vld [vmem:[#allocation164_spill] sm:$0xff]  ;;  %vm18518_vm9 = vcmask 523264  }
 0x5f7   : > { %v5964_v62 = vsel %vm18494_vm10, %v5931_v63, %v18493_v59  ;;  %v18496_v7 = vld [vmem:[#allocation19_spill] sm:$0xff]  ;;  %v6018_v57 = vsel %vm264_vm0, %v5986_v60, %v18497_v45  ;;  %v5899_v43 = vsel %vm5877_vm3, %v18499_v38, %v18498_v22  ;;  %v7741_v60 = vunpack.i.l.bf16 %v18503_v6  ;;  %v18505_v45 = vld [vmem:[#allocation362_spill] sm:$0xff]  ;;  %vm18510_vm4 = vmmov %vm18489_vm6 }
 0x5f8   : > { %v3981_v18 = vsel %vm264_vm0, %v18496_v7, %v7711_v52  ;;  %6185 = vrot.lane.b32.xlu1 %v5964_v62, %s8835_s30  ;;  %v18500_v36 = vld [vmem:[#allocation11_spill] sm:$0xff]  ;;  %v18504_v7 = vld [vmem:[#allocation349_spill] sm:$0xff]  ;;  %v18513_v14 = vld [vmem:[#allocation346_spill] sm:$0xff]  ;;  %vm18524_vm6 = vcmask 916480  }
 0x5f9   : > { %v3973_v49 = vsel %vm264_vm0, %v18500_v36, %v7471_v47  ;;  %v18501_v37 = vld [vmem:[#allocation55_spill] sm:$0xff]  ;;  %v4014_v63 = vsel %vm18502_vm13, %v3981_v18, %v7731_v29  ;;  %v5987_v22 = vsel %vm5976_vm14, %v18505_v45, %v18504_v7  ;;  %v15731_v62 = vpop.permute.xlu1 %5189  ;;  %v15733_v38 = vpop.permute.xlu0 %5285  ;;  %v18508_v47 = vld [vmem:[#allocation156_spill] sm:$0xff]  ;;  %v5932_v29 = vsel %vm18510_vm4, %v5899_v43, %v18509_v50  ;;  %vm18514_vm5 = vmmov %vm18494_vm10 }
 0x5fa   : > { %v7491_v51 = vunpack.i.l.bf16 %v18501_v37  ;;  %6143 = vrot.lane.b32.xlu0 %v6018_v57, %s8835_s30  ;;  %v4047_v52 = vsel %vm4034_vm11, %v4014_v63, %v7736_v61  ;;  %18506 = vst [vmem:[#allocation7_spill] sm:$0xff] %v15731_v62  ;;  %18507 = vst [vmem:[#allocation52_spill] sm:$0xff] %v15733_v38  ;;  %v7716_v36 = vunpack.i.l.bf16 %v18508_v47  ;;  %v18511_v18 = vld [vmem:[#allocation372_spill] sm:$0xff]  ;;  %v4203_v61 = vsel %vm4199_vm1, %v4170_v4, %v7607_v39  ;;  %v18512_v57 = vld [vmem:[#allocation166_spill] sm:$0xff] }
 0x5fb   : > { %v6019_v58 = vsel %vm264_vm0, %v5987_v22, %v18511_v18  ;;  %v7746_v63 = vunpack.i.l.bf16 %v18512_v57  ;;  %v5965_v7 = vsel %vm18514_vm5, %v5932_v29, %v18513_v14  ;;  %vm18515_vm2 = vmmov %vm18502_vm13  ;;  %v18517_v62 = vld [vmem:[#allocation170_spill] sm:$0xff]  ;;  %v18521_v18 = vld [vmem:[#allocation233_spill] sm:$0xff]  ;;  %vm18531_vm10 = vcmask 621568  }
 0x5fc   : > { %6147 = vrot.lane.b32.xlu1 %v6019_v58, %s8835_s30  ;;  %v4006_v45 = vsel %vm18515_vm2, %v3973_v49, %v7491_v51  ;;  %v4080_v38 = vsel %vm4067_vm12, %v4047_v52, %v7716_v36  ;;  %v7766_v50 = vunpack.i.l.bf16 %v18517_v62  ;;  %v18519_v39 = vld [vmem:[#allocation174_spill] sm:$0xff]  ;;  %v4236_v51 = vsel %vm18524_vm6, %v4203_v61, %v7627_v12  ;;  %v18525_v49 = vld [vmem:[#allocation265_spill] sm:$0xff]  ;;  %v18532_v24 = vld [vmem:[#allocation335_spill] sm:$0xff] }
 0x5fd   : > { %v4113_v43 = vsel %vm18518_vm9, %v4080_v38, %v7741_v60  ;;  %v7796_v4 = vunpack.i.l.bf16 %v18519_v39  ;;  %v18520_v22 = vld [vmem:[#allocation326_spill] sm:$0xff]  ;;  %v15755_v3 = vpop.permute.xlu1 %5467  ;;  %v15757_v29 = vpop.permute.xlu0 %6117  ;;  %v8131_v52 = vunpack.i.l.bf16 %v18525_v49  ;;  %v18533_v61 = vunpack.i.h.bf16 %v18470_v31  ;;  %vm18538_vm13 = vmmov %vm18510_vm4 }
 0x5fe   : > { %6189 = vrot.lane.b32.xlu0 %v5965_v7, %s8835_s30  ;;  %v5988_v58 = vsel %vm5976_vm14, %v18521_v18, %v18520_v22  ;;  %18522 = vst [vmem:[#allocation8_spill] sm:$0xff] %v15755_v3  ;;  %18523 = vst [vmem:[#allocation14_spill] sm:$0xff] %v15757_v29  ;;  %v18526_v36 = vld [vmem:[#allocation330_spill] sm:$0xff]  ;;  %v18530_v22 = vld [vmem:[#allocation73_spill] sm:$0xff]  ;;  %v4146_v3 = vsel %vm18531_vm10, %v4113_v43, %v7746_v63  ;;  %vm18556_vm10 = vcmask 228352  }
 0x5ff   : > { %v6020_v14 = vsel %vm264_vm0, %v5988_v58, %v18526_v36  ;;  %v18527_v7 = vld [vmem:[#allocation318_spill] sm:$0xff]  ;;  %v7531_v18 = vunpack.i.l.bf16 %v18530_v22  ;;  %v4269_v58 = vsel %vm4265_vm15, %v4236_v51, %v18533_v61  ;;  %v4039_v36 = vsel %vm4034_vm11, %v4006_v45, %v7511_v35  ;;  %vm18542_vm4 = vmmov %vm18514_vm5 }
 0x600   : > { %v18528_v48 = vld [vmem:[#allocation234_spill] sm:$0xff]  ;;  %6151 = vrot.lane.b32.xlu1 %v6020_v14, %s8835_s30  ;;  %vm18544_vm5 = vmmov %vm18524_vm6 }
 0x601   : > { %v5989_v60 = vsel %vm5976_vm14, %v18528_v48, %v18527_v7  ;;  %v18529_v38 = vld [vmem:[#allocation62_spill] sm:$0xff]  ;;  %v7472_v48 = vunpack.i.h.bf16 %v18482_v9  ;;  %v4179_v7 = vsel %vm18495_vm8, %v4146_v3, %v7766_v50  ;;  %v15787_v43 = vpop.permute.xlu1 %6153  ;;  %v15789_v51 = vpop.permute.xlu0 %5381  ;;  %vm18553_vm2 = vmmov %vm18518_vm9  ;;  %vm18558_vm8 = vcmask 621568  }
 0x602   : > { %v6301_v20 = vsel %vm6233_vm7, %v18529_v38, %v15757_v29  ;;  %v6021_v12 = vsel %vm264_vm0, %v5989_v60, %v18532_v24  ;;  %v18534_v38 = vld [vmem:[#allocation325_spill] sm:$0xff]  ;;  %v18536_v24 = vld [vmem:[#allocation80_spill] sm:$0xff]  ;;  %v4212_v35 = vsel %vm4199_vm1, %v4179_v7, %v7796_v4  ;;  %v18539_v9 = vld [vmem:[#allocation258_spill] sm:$0xff] }
 0x603   : > { %6529 = vmatprep.mubr.f32.mxu0 %v6301_v20  ;;  %v18535_v29 = vld [vmem:[#allocation117_spill] sm:$0xff]  ;;  %6155 = vrot.lane.b32.xlu0 %v6021_v12, %s8835_s30  ;;  %v7551_v14 = vunpack.i.l.bf16 %v18536_v24  ;;  %v18537_v20 = vld [vmem:[#allocation311_spill] sm:$0xff]  ;;  %v18540_v3 = vld [vmem:[#allocation194_spill] sm:$0xff]  ;;  %v4245_v61 = vsel %vm18544_vm5, %v4212_v35, %v8131_v52 }
 0x604   : > { %v5900_v63 = vsel %vm5877_vm3, %v18535_v29, %v18534_v38  ;;  %6530 = vmatmul.mubr.f32.gmra.mxu0 %v4269_v58  ;;  %v5990_v45 = vsel %vm5976_vm14, %v18540_v3, %v18539_v9  ;;  %v18541_v50 = vld [vmem:[#allocation334_spill] sm:$0xff]  ;;  %v18543_v60 = vld [vmem:[#allocation189_spill] sm:$0xff]  ;;  %v4072_v58 = vsel %vm4067_vm12, %v4039_v36, %v7531_v18  ;;  %v18545_v38 = vld [vmem:[#allocation339_spill] sm:$0xff]  ;;  %v7492_v3 = vunpack.i.h.bf16 %v18501_v37 }
 0x605   : > { %v5933_v31 = vsel %vm18538_vm13, %v5900_v63, %v18537_v20  ;;  %v6310_v12 = vsel %vm6233_vm7, %v18543_v60, %v15787_v43  ;;  %v6022_v63 = vsel %vm264_vm0, %v5990_v45, %v18545_v38  ;;  %v18546_v4 = vld [vmem:[#allocation281_spill] sm:$0xff]  ;;  %v18548_v9 = vld [vmem:[#allocation12_spill] sm:$0xff]  ;;  %v7712_v60 = vunpack.i.h.bf16 %v18480_v0  ;;  %v18551_v45 = vld [vmem:[#allocation135_spill] sm:$0xff]  ;;  %v15823_v37 = vpop.permute.xlu0 %5595 }
 0x606   : > { %v5966_v29 = vsel %vm18542_vm4, %v5933_v31, %v18541_v50  ;;  %6574 = vmatprep.mubr.f32.mxu1 %v6310_v12  ;;  %v18547_v7 = vunpack.i.l.bf16 %v18546_v4  ;;  %v3974_v31 = vsel %vm264_vm0, %v18548_v9, %v7472_v48  ;;  %v18549_v52 = vld [vmem:[#allocation92_spill] sm:$0xff]  ;;  %v7732_v36 = vunpack.i.h.bf16 %v18484_v30  ;;  %v18552_v12 = vld [vmem:[#allocation239_spill] sm:$0xff]  ;;  %v15821_v48 = vpop.permute.xlu1 %5469  ;;  %vm18554_vm9 = vmmov %vm18538_vm13 }
 0x607   : > { %6193 = vrot.lane.b32.xlu1 %v5966_v29, %s8835_s30  ;;  %6159 = vrot.lane.b32.xlu0 %v6022_v63, %s8835_s30  ;;  %v7571_v18 = vunpack.i.l.bf16 %v18549_v52  ;;  %v18550_v35 = vld [vmem:[#allocation364_spill] sm:$0xff]  ;;  %v4105_v0 = vsel %vm18553_vm2, %v4072_v58, %v7551_v14  ;;  %v7737_v38 = vunpack.i.h.bf16 %v18487_v46  ;;  %vm18555_vm6 = vmmov %vm18542_vm4  ;;  %vm18564_vm4 = vcmask 719872  }
 0x608   : > { %v4278_v20 = vsel %vm4265_vm15, %v4245_v61, %v18547_v7  ;;  %v5901_v29 = vsel %vm5877_vm3, %v18551_v45, %v18550_v35  ;;  %v5991_v61 = vsel %vm5976_vm14, %v18552_v12, %v15197_v44  ;;  %v7512_v7 = vunpack.i.h.bf16 %v18516_v23  ;;  %v18557_v9 = vld [vmem:[#allocation20_spill] sm:$0xff]  ;;  %vm18560_vm13 = vmmov %vm18556_vm10  ;;  %v18561_v12 = vld [vmem:[#allocation107_spill] sm:$0xff] }
 0x609   : > { %6575 = vmatmul.mubr.f32.gmra.mxu1 %v4278_v20  ;;  %v5934_v63 = vsel %vm18554_vm9, %v5901_v29, %v15195_v34  ;;  %v6023_v30 = vsel %vm264_vm0, %v5991_v61, %v15257_v55  ;;  %v4007_v44 = vsel %vm18556_vm10, %v3974_v31, %v7492_v3  ;;  %v3982_v14 = vsel %vm264_vm0, %v18557_v9, %v7712_v60  ;;  %v18559_v34 = vld [vmem:[#allocation102_spill] sm:$0xff]  ;;  %v15847_v45 = vpop.permute.xlu0 %5191  ;;  %vm18565_vm5 = vmmov %vm18554_vm9 }
 0x60a   : > { %v5967_v20 = vsel %vm18555_vm6, %v5934_v63, %v15217_v21  ;;  %v4138_v46 = vsel %vm18558_vm8, %v4105_v0, %v7571_v18  ;;  %v7591_v58 = vunpack.i.l.bf16 %v18559_v34  ;;  %v4015_v55 = vsel %vm18560_vm13, %v3982_v14, %v7732_v36  ;;  %v15845_v35 = vpop.permute.xlu1 %5597  ;;  %v18562_v0 = vld [vmem:[#allocation259_spill] sm:$0xff]  ;;  %vm18567_vm9 = vmmov %vm18555_vm6  ;;  %v18569_v14 = vld [vmem:[#allocation149_spill] sm:$0xff] }
 0x60b   : > { %6163 = vrot.lane.b32.xlu1 %v6023_v30, %s8835_s30  ;;  %6197 = vrot.lane.b32.xlu0 %v5967_v20, %s8835_s30  ;;  %v5992_v23 = vsel %vm5976_vm14, %v14605_v17, %v15255_v32  ;;  %v4048_v31 = vsel %vm4034_vm11, %v4015_v55, %v7737_v38  ;;  %v7742_v3 = vunpack.i.h.bf16 %v18503_v6  ;;  %v5993_v18 = vsel %vm5976_vm14, %v18389_v40, %v15325_v16  ;;  %v18563_v38 = vld [vmem:[#allocation136_spill] sm:$0xff]  ;;  %vm18568_vm6 = vmmov %vm18558_vm8 }
 0x60c   : > { %v6024_v60 = vsel %vm264_vm0, %v5992_v23, %v15294_v25  ;;  %v4040_v36 = vsel %vm4034_vm11, %v4007_v44, %v7512_v7  ;;  %v7717_v29 = vunpack.i.h.bf16 %v18508_v47  ;;  %v7747_v17 = vunpack.i.h.bf16 %v18512_v57  ;;  %vm18570_vm10 = vmmov %vm18564_vm4 }
 0x60d   : > { %v6025_v32 = vsel %vm264_vm0, %v5993_v18, %v15431_v15  ;;  %v7532_v6 = vunpack.i.h.bf16 %v18530_v22  ;;  %v7611_v61 = vunpack.i.l.bf16 %v18561_v12  ;;  %v7767_v25 = vunpack.i.h.bf16 %v18517_v62  ;;  %v15876_v63 = vpop.permute.xlu0 %5471  ;;  %v18566_v62 = vld [vmem:[#allocation115_spill] sm:$0xff]  ;;  %vm18571_vm8 = vmmov %vm18565_vm5  ;;  %v18573_v18 = vld [vmem:[#allocation286_spill] sm:$0xff] }
 0x60e   : > { %v5902_v16 = vsel %vm5877_vm3, %v18563_v38, %v18562_v0  ;;  %v4171_v40 = vsel %vm18564_vm4, %v4138_v46, %v7591_v58  ;;  %v4081_v47 = vsel %vm4067_vm12, %v4048_v31, %v7717_v29  ;;  %v7797_v15 = vunpack.i.h.bf16 %v18519_v39  ;;  %v15874_v22 = vpop.permute.xlu1 %5287  ;;  %vm18574_vm13 = vmmov %vm18567_vm9  ;;  %v18577_v29 = vld [vmem:[#allocation51_spill] sm:$0xff] }
 0x60f   : > { %6167 = vrot.lane.b32.xlu1 %v6024_v60, %s8835_s30  ;;  %6171 = vrot.lane.b32.xlu0 %v6025_v32, %s8835_s30  ;;  %v5935_v57 = vsel %vm18565_vm5, %v5902_v16, %v15323_v28  ;;  %v7631_v30 = vunpack.i.l.bf16 %v18566_v62  ;;  %v4114_v7 = vsel %vm18553_vm2, %v4081_v47, %v7742_v3  ;;  %v5994_v20 = vsel %vm5976_vm14, %v18428_v26, %v15385_v5  ;;  %v18572_v60 = vld [vmem:[#allocation43_spill] sm:$0xff] }
 0x610   : > { %v5968_v44 = vsel %vm18567_vm9, %v5935_v57, %v15383_v11  ;;  %v4147_v39 = vsel %vm18568_vm6, %v4114_v7, %v7747_v17  ;;  %v8132_v9 = vunpack.i.h.bf16 %v18525_v49  ;;  %v6026_v28 = vsel %vm264_vm0, %v5994_v20, %v15433_v10  ;;  %v18578_v17 = vld [vmem:[#allocation158_spill] sm:$0xff]  ;;  %v18583_v20 = vld [vmem:[#allocation169_spill] sm:$0xff]  ;;  %vm18588_vm9 = vmmov %vm18568_vm6 }
 0x611   : > { %v5903_v46 = vsel %vm5877_vm3, %v18569_v14, %v15463_v8  ;;  %v4180_v58 = vsel %vm18570_vm10, %v4147_v39, %v7767_v25  ;;  %v4204_v5 = vsel %vm4199_vm1, %v4171_v40, %v7611_v61  ;;  %v4073_v26 = vsel %vm4067_vm12, %v4040_v36, %v7532_v6  ;;  %v15903_v23 = vpop.permute.xlu0 %6157  ;;  %v18579_v6 = vld [vmem:[#allocation277_spill] sm:$0xff]  ;;  %vm18591_vm10 = vmmov %vm18571_vm8 }
 0x612   : > { %v7552_v55 = vunpack.i.h.bf16 %v18536_v24  ;;  %v5995_v10 = vsel %vm5976_vm14, %v18451_v19, %v15488_v33  ;;  %v15901_v49 = vpop.permute.xlu1 %6121  ;;  %v4213_v8 = vsel %vm4199_vm1, %v4180_v58, %v7797_v15  ;;  %v5936_v31 = vsel %vm18571_vm8, %v5903_v46, %v15465_v56  ;;  %v18582_v40 = vld [vmem:[#allocation165_spill] sm:$0xff]  ;;  %v18587_v58 = vld [vmem:[#allocation162_spill] sm:$0xff]  ;;  %vm18594_vm8 = vmmov %vm18574_vm13 }
 0x613   : > { %6201 = vrot.lane.b32.xlu1 %v5968_v44, %s8835_s30  ;;  %6175 = vrot.lane.b32.xlu0 %v6026_v28, %s8835_s30  ;;  %v6027_v3 = vsel %vm264_vm0, %v5995_v10, %v15558_v42  ;;  %v6302_v24 = vsel %vm6233_vm7, %v18572_v60, %v15901_v49  ;;  %v6311_v33 = vsel %vm6233_vm7, %v18573_v18, %v15903_v23  ;;  %vm18575_vm4 = vcmask 916480   ;;  %v18586_v14 = vld [vmem:[#allocation21_spill] sm:$0xff]  ;;  %v18593_v60 = vld [vmem:[#allocation254_spill] sm:$0xff] }
 0x614   : > { %v5969_v19 = vsel %vm18574_vm13, %v5936_v31, %v15523_v54  ;;  %6534 = vmatprep.mubr.f32.mxu0 %v6302_v24  ;;  %v4237_v36 = vsel %vm18575_vm4, %v4204_v5, %v7631_v30  ;;  %vm18576_vm5 = vmmov %vm18575_vm4  ;;  %v7476_v42 = vunpack.i.l.bf16 %v18577_v29  ;;  %v7756_v32 = vunpack.i.l.bf16 %v18578_v17  ;;  %6579 = vmatprep.mubr.f32.mxu1 %v6311_v33  ;;  %v18590_v5 = vld [vmem:[#allocation171_spill] sm:$0xff]  ;;  %v18592_v31 = vld [vmem:[#allocation173_spill] sm:$0xff] }
 0x615   : > { %v4246_v56 = vsel %vm18576_vm5, %v4213_v8, %v8132_v9  ;;  %v18580_v61 = vunpack.i.l.bf16 %v18579_v6  ;;  %v18581_v0 = vunpack.i.h.bf16 %v18546_v4  ;;  %v7572_v16 = vunpack.i.h.bf16 %v18549_v52  ;;  %v15937_v30 = vpop.permute.xlu0 %5473  ;;  %v18585_v9 = vld [vmem:[#allocation57_spill] sm:$0xff]  ;;  %v18596_v18 = vld [vmem:[#allocation346_spill] sm:$0xff]  ;;  %vm18606_vm5 = vmmov %vm18553_vm2 }
 0x616   : > { %v7776_v47 = vunpack.i.l.bf16 %v18582_v40  ;;  %v5996_v15 = vsel %vm5976_vm14, %v18466_v2, %v15556_v1  ;;  %v15935_v57 = vpop.permute.xlu1 %5383  ;;  %v4106_v7 = vsel %vm18553_vm2, %v4073_v26, %v7552_v55  ;;  %v7781_v4 = vunpack.i.l.bf16 %v18583_v20  ;;  %v18584_v2 = vld [vmem:[#allocation13_spill] sm:$0xff]  ;;  %vm18608_vm2 = vmmov %vm18591_vm10 }
 0x617   : > { %6179 = vrot.lane.b32.xlu1 %v6027_v3, %s8835_s30  ;;  %6205 = vrot.lane.b32.xlu0 %v5969_v19, %s8835_s30  ;;  %v4270_v25 = vsel %vm4265_vm15, %v4237_v36, %v18580_v61  ;;  %v4279_v38 = vsel %vm4265_vm15, %v4246_v56, %v18581_v0  ;;  %v6028_v44 = vsel %vm264_vm0, %v5996_v15, %v15586_v27  ;;  %v7496_v28 = vunpack.i.l.bf16 %v18585_v9  ;;  %v18595_v24 = vld [vmem:[#allocation41_spill] sm:$0xff]  ;;  %v18597_v19 = vld [vmem:[#allocation160_spill] sm:$0xff] }
 0x618   : > { %6535 = vmatmul.mubr.f32.gmra.mxu0 %v4270_v25  ;;  %6580 = vmatmul.mubr.f32.gmra.mxu1 %v4279_v38  ;;  %v5997_v52 = vsel %vm5976_vm14, %v18493_v59, %v15620_v41  ;;  %v3975_v39 = vsel %vm264_vm0, %v18584_v2, %v7476_v42  ;;  %v3983_v46 = vsel %vm264_vm0, %v18586_v14, %v7756_v32  ;;  %vm18589_vm6 = vcmask 228352   ;;  %v18598_v36 = vld [vmem:[#allocation177_spill] sm:$0xff]  ;;  %v18600_v32 = vld [vmem:[#allocation7_spill] sm:$0xff]  ;;  %v18601_v61 = vld [vmem:[#allocation172_spill] sm:$0xff] }
 0x619   : > { %v6029_v1 = vsel %vm264_vm0, %v5997_v52, %v15701_v53  ;;  %v5904_v27 = vsel %vm5877_vm3, %v18587_v58, %v15588_v13  ;;  %v4139_v41 = vsel %vm18588_vm9, %v4106_v7, %v7572_v16  ;;  %v7592_v53 = vunpack.i.h.bf16 %v18559_v34  ;;  %v5602_v10 = vpop.permute.xlu0 %5601  ;;  %v18599_v29 = vld [vmem:[#allocation365_spill] sm:$0xff]  ;;  %v18604_v7 = vld [vmem:[#allocation8_spill] sm:$0xff]  ;;  %vm18605_vm4 = vmmov %vm18589_vm6 }
 0x61a   : > { %v4016_v59 = vsel %vm18589_vm6, %v3983_v46, %v7776_v47  ;;  %v5937_v26 = vsel %vm18591_vm10, %v5904_v27, %v18590_v5  ;;  %v5600_v55 = vpop.permute.xlu1 %5599  ;;  %v7786_v3 = vunpack.i.l.bf16 %v18592_v31  ;;  %v5998_v33 = vsel %vm5976_vm14, %v18596_v18, %v18595_v24  ;;  %v18602_v38 = vld [vmem:[#allocation65_spill] sm:$0xff]  ;;  %v18607_v2 = vld [vmem:[#allocation52_spill] sm:$0xff]  ;;  %vm18609_vm6 = vmmov %vm18594_vm8 }
 0x61b   : > { %6183 = vrot.lane.b32.xlu1 %v6028_v44, %s8835_s30  ;;  %6187 = vrot.lane.b32.xlu0 %v6029_v1, %s8835_s30  ;;  %v4049_v8 = vsel %vm4034_vm11, %v4016_v59, %v7781_v4  ;;  %v5970_v13 = vsel %vm18594_vm8, %v5937_v26, %v18593_v60  ;;  %v7761_v34 = vunpack.i.l.bf16 %v18597_v19  ;;  %v7791_v56 = vunpack.i.l.bf16 %v18598_v36  ;;  %v18612_v5 = vld [vmem:[#allocation266_spill] sm:$0xff]  ;;  %v18614_v18 = vld [vmem:[#allocation163_spill] sm:$0xff] }
 0x61c   : > { %v6030_v42 = vsel %vm264_vm0, %v5998_v33, %v18599_v29  ;;  %v5905_v25 = vsel %vm5877_vm3, %v18601_v61, %v18600_v32  ;;  %v7612_v0 = vunpack.i.h.bf16 %v18561_v12  ;;  %v7516_v16 = vunpack.i.l.bf16 %v18602_v38  ;;  %v18617_v29 = vld [vmem:[#allocation83_spill] sm:$0xff] }
 0x61d   : > { %vm18603_vm13 = vcmask 719872   ;;  %v4082_v15 = vsel %vm4067_vm12, %v4049_v8, %v7761_v34  ;;  %v5999_v4 = vsel %vm5976_vm14, %v18541_v50, %v18604_v7  ;;  %v4008_v52 = vsel %vm18605_vm4, %v3975_v39, %v7496_v28  ;;  %v5290_v14 = vpop.permute.xlu0 %5289  ;;  %v18610_v50 = vld [vmem:[#allocation74_spill] sm:$0xff]  ;;  %vm18621_vm4 = vmmov %vm18609_vm6 }
 0x61e   : > { %v4172_v47 = vsel %vm18603_vm13, %v4139_v41, %v7592_v53  ;;  %v5194_v44 = vpop.permute.xlu1 %5193  ;;  %v4115_v1 = vsel %vm18606_vm5, %v4082_v15, %v7786_v3  ;;  %v5938_v12 = vsel %vm18608_vm2, %v5905_v25, %v18607_v2  ;;  %v6031_v9 = vsel %vm264_vm0, %v5999_v4, %v15823_v37  ;;  %v18611_v28 = vld [vmem:[#allocation150_spill] sm:$0xff]  ;;  %vm18613_vm10 = vmmov %vm18603_vm13  ;;  %v18624_v4 = vld [vmem:[#allocation168_spill] sm:$0xff] }
 0x61f   : > { %6209 = vrot.lane.b32.xlu1 %v5970_v13, %s8835_s30  ;;  %6191 = vrot.lane.b32.xlu0 %v6030_v42, %s8835_s30  ;;  %v7632_v46 = vunpack.i.h.bf16 %v18566_v62  ;;  %v4148_v58 = vsel %vm18588_vm9, %v4115_v1, %v7791_v56  ;;  %v5971_v27 = vsel %vm18609_vm6, %v5938_v12, %v15789_v51  ;;  %v7536_v39 = vunpack.i.l.bf16 %v18610_v50  ;;  %vm18620_vm13 = vmmov %vm18608_vm2  ;;  %v18625_v1 = vld [vmem:[#allocation45_spill] sm:$0xff]  ;;  %v18627_v2 = vld [vmem:[#allocation95_spill] sm:$0xff] }
 0x620   : > { %v7726_v41 = vunpack.i.l.bf16 %v18611_v28  ;;  %v4205_v53 = vsel %vm4199_vm1, %v4172_v47, %v7612_v0  ;;  %v4041_v37 = vsel %vm4034_vm11, %v4008_v52, %v7516_v16  ;;  %v6000_v62 = vsel %vm5976_vm14, %v15217_v21, %v15821_v48  ;;  %v18615_v21 = vld [vmem:[#allocation42_spill] sm:$0xff]  ;;  %vm18631_vm6 = vmmov %vm18620_vm13 }
 0x621   : > { %v8136_v26 = vunpack.i.l.bf16 %v18612_v5  ;;  %v6032_v8 = vsel %vm264_vm0, %v6000_v62, %v15845_v35  ;;  %v6001_v3 = vsel %vm5976_vm14, %v15383_v11, %v15876_v63  ;;  %v16011_v13 = vpop.permute.xlu0 %6125  ;;  %v7771_v33 = vunpack.i.l.bf16 %v18614_v18  ;;  %v18618_v63 = vld [vmem:[#allocation175_spill] sm:$0xff] }
 0x622   : > { %v5476_v59 = vpop.permute.xlu1 %5475  ;;  %v4181_v24 = vsel %vm18613_vm10, %v4148_v58, %v7726_v41  ;;  %v6033_v34 = vsel %vm264_vm0, %v6001_v3, %v5600_v55  ;;  %v6303_v48 = vsel %vm6233_vm7, %v18615_v21, %v16011_v13  ;;  %vm18616_vm8 = vcmask 916480   ;;  %vm18632_vm10 = vmmov %vm18621_vm4  ;;  %v18633_v62 = vld [vmem:[#allocation103_spill] sm:$0xff] }
 0x623   : > { %6195 = vrot.lane.b32.xlu1 %v6031_v9, %s8835_s30  ;;  %6213 = vrot.lane.b32.xlu0 %v5971_v27, %s8835_s30  ;;  %v4238_v35 = vsel %vm18616_vm8, %v4205_v53, %v7632_v46  ;;  %v4074_v56 = vsel %vm4067_vm12, %v4041_v37, %v7536_v39  ;;  %v7556_v11 = vunpack.i.l.bf16 %v18617_v29  ;;  %v5906_v42 = vsel %vm5877_vm3, %v18618_v63, %v15847_v45  ;;  %vm18623_vm5 = vmmov %vm18616_vm8  ;;  %v18628_v9 = vld [vmem:[#allocation22_spill] sm:$0xff] }
 0x624   : > { %6539 = vmatprep.mubr.f32.mxu0 %v6303_v48  ;;  %v18619_v55 = vunpack.i.h.bf16 %v18579_v6  ;;  %v7757_v61 = vunpack.i.h.bf16 %v18578_v17  ;;  %v7777_v25 = vunpack.i.h.bf16 %v18582_v40  ;;  %v5939_v0 = vsel %vm18620_vm13, %v5906_v42, %v15874_v22  ;;  %v18622_v17 = vld [vmem:[#allocation287_spill] sm:$0xff] }
 0x625   : > { %v4214_v16 = vsel %vm4199_vm1, %v4181_v24, %v7771_v33  ;;  %v5972_v45 = vsel %vm18621_vm4, %v5939_v0, %v15935_v57  ;;  %v6002_v6 = vsel %vm5976_vm14, %v15523_v54, %v15937_v30  ;;  %v16042_v47 = vpop.permute.xlu0 %5385  ;;  %v7782_v15 = vunpack.i.h.bf16 %v18583_v20  ;;  %v18641_v0 = vld [vmem:[#allocation69_spill] sm:$0xff] }
 0x626   : > { %v4271_v32 = vsel %vm4265_vm15, %v4238_v35, %v18619_v55  ;;  %v16034_v38 = vpop.permute.xlu1 %6161  ;;  %v4247_v22 = vsel %vm18623_vm5, %v4214_v16, %v8136_v26  ;;  %v6034_v7 = vsel %vm264_vm0, %v6002_v6, %v5602_v10  ;;  %v5907_v52 = vsel %vm5877_vm3, %v18624_v4, %v5194_v44 }
 0x627   : > { %6199 = vrot.lane.b32.xlu1 %v6032_v8, %s8835_s30  ;;  %6203 = vrot.lane.b32.xlu0 %v6033_v34, %s8835_s30  ;;  %v6312_v40 = vsel %vm6233_vm7, %v18622_v17, %v16034_v38  ;;  %v18626_v54 = vunpack.i.l.bf16 %v18625_v1  ;;  %v7576_v12 = vunpack.i.l.bf16 %v18627_v2  ;;  %v3984_v20 = vsel %vm264_vm0, %v18628_v9, %v7757_v61  ;;  %v18635_v34 = vld [vmem:[#allocation109_spill] sm:$0xff]  ;;  %v18644_v17 = vld [vmem:[#allocation278_spill] sm:$0xff] }
 0x628   : > { %6540 = vmatmul.mubr.f32.gmra.mxu0 %v4271_v32  ;;  %6584 = vmatprep.mubr.f32.mxu1 %v6312_v40  ;;  %vm18629_vm2 = vcmask 523264   ;;  %vm18630_vm9 = vcmask 228352   ;;  %v5940_v58 = vsel %vm18631_vm6, %v5907_v52, %v5290_v14  ;;  %v6003_v27 = vsel %vm5976_vm14, %v18593_v60, %v5476_v59  ;;  %v18651_v9 = vld [vmem:[#allocation178_spill] sm:$0xff] }
 0x629   : > { %v4280_v30 = vsel %vm4265_vm15, %v4247_v22, %v18626_v54  ;;  %v4107_v10 = vsel %vm18629_vm2, %v4074_v56, %v7556_v11  ;;  %v4017_v44 = vsel %vm18630_vm9, %v3984_v20, %v7777_v25  ;;  %v5604_v50 = vpop.permute.xlu0 %5603  ;;  %v7787_v41 = vunpack.i.h.bf16 %v18592_v31  ;;  %vm18636_vm13 = vmmov %vm18629_vm2 }
 0x62a   : > { %6585 = vmatmul.mubr.f32.gmra.mxu1 %v4280_v30  ;;  %v5478_v46 = vpop.permute.xlu1 %5477  ;;  %v4050_v39 = vsel %vm4034_vm11, %v4017_v44, %v7782_v15  ;;  %v5973_v53 = vsel %vm18632_vm10, %v5940_v58, %v16042_v47  ;;  %v6035_v37 = vsel %vm264_vm0, %v6003_v27, %v5604_v50  ;;  %v7596_v26 = vunpack.i.l.bf16 %v18633_v62  ;;  %v18647_v15 = vld [vmem:[#allocation227_spill] sm:$0xff] }
 0x62b   : > { %6217 = vrot.lane.b32.xlu1 %v5972_v45, %s8835_s30  ;;  %6207 = vrot.lane.b32.xlu0 %v6034_v7, %s8835_s30  ;;  %v7762_v8 = vunpack.i.h.bf16 %v18597_v19  ;;  %v7792_v3 = vunpack.i.h.bf16 %v18598_v36  ;;  %vm18634_vm8 = vcmask 621568   ;;  %v6004_v31 = vsel %vm5976_vm14, %v15789_v51, %v5478_v46  ;;  %v18639_v51 = vld [vmem:[#allocation119_spill] sm:$0xff] }
 0x62c   : > { %v4140_v60 = vsel %vm18634_vm8, %v4107_v10, %v7576_v12  ;;  %v7616_v21 = vunpack.i.l.bf16 %v18635_v34  ;;  %vm18637_vm4 = vcmask 719872   ;;  %vm18638_vm5 = vmmov %vm18634_vm8  ;;  %v7727_v35 = vunpack.i.h.bf16 %v18611_v28  ;;  %v18652_v46 = vld [vmem:[#allocation183_spill] sm:$0xff]  ;;  %v18659_v34 = vld [vmem:[#allocation193_spill] sm:$0xff] }
 0x62d   : > { %v4083_v59 = vsel %vm4067_vm12, %v4050_v39, %v7762_v8  ;;  %v5196_v33 = vpop.permute.xlu0 %5195  ;;  %v4173_v36 = vsel %vm18637_vm4, %v4140_v60, %v7596_v26  ;;  %v7636_v29 = vunpack.i.l.bf16 %v18639_v51  ;;  %v8137_v63 = vunpack.i.h.bf16 %v18612_v5  ;;  %vm18640_vm2 = vmmov %vm18637_vm4  ;;  %v18643_v5 = vld [vmem:[#allocation288_spill] sm:$0xff] }
 0x62e   : > { %v5606_v14 = vpop.permute.xlu1 %5605  ;;  %v4116_v19 = vsel %vm18636_vm13, %v4083_v59, %v7787_v41  ;;  %v4206_v42 = vsel %vm4199_vm1, %v4173_v36, %v7616_v21  ;;  %v7772_v32 = vunpack.i.h.bf16 %v18614_v18  ;;  %vm18642_vm9 = vcmask 916480   ;;  %v18654_v41 = vld [vmem:[#allocation23_spill] sm:$0xff]  ;;  %v18660_v36 = vld [vmem:[#allocation196_spill] sm:$0xff] }
 0x62f   : > { %6221 = vrot.lane.b32.xlu0 %v5973_v53, %s8835_s30  ;;  %6211 = vrot.lane.b32.xlu1 %v6035_v37, %s8835_s30  ;;  %v6036_v24 = vsel %vm264_vm0, %v6004_v31, %v5606_v14  ;;  %v4149_v48 = vsel %vm18638_vm5, %v4116_v19, %v7792_v3  ;;  %v4239_v16 = vsel %vm18642_vm9, %v4206_v42, %v7636_v29  ;;  %v18645_v40 = vunpack.i.l.bf16 %v18644_v17  ;;  %vm18646_vm6 = vmmov %vm18642_vm9  ;;  %v18657_v14 = vld [vmem:[#allocation181_spill] sm:$0xff] }
 0x630   : > { %v4182_v55 = vsel %vm18640_vm2, %v4149_v48, %v7727_v35  ;;  %v5908_v7 = vsel %vm5877_vm3, %v18647_v15, %v5196_v33  ;;  %v18648_v4 = vunpack.i.h.bf16 %v18625_v1  ;;  %vm18649_vm10 = vcmask 883712   ;;  %v18653_v1 = vld [vmem:[#allocation186_spill] sm:$0xff] }
 0x631   : > { %v5480_v11 = vpop.permute.xlu0 %5479  ;;  %v4215_v45 = vsel %vm4199_vm1, %v4182_v55, %v7772_v32  ;;  %v4272_v18 = vsel %vm4265_vm15, %v4239_v16, %v18645_v40  ;;  %vm18650_vm8 = vcmask 982016   ;;  %v7801_v20 = vunpack.i.l.bf16 %v18651_v9  ;;  %v18664_v55 = vld [vmem:[#allocation319_spill] sm:$0xff]  ;;  %vm18665_vm9 = vmmov %vm18649_vm10  ;;  %v18666_v40 = vld [vmem:[#allocation289_spill] sm:$0xff] }
 0x632   : > { %v5292_v56 = vpop.permute.xlu1 %5291  ;;  %v4248_v22 = vsel %vm18646_vm6, %v4215_v45, %v8137_v63  ;;  %v7811_v10 = vunpack.i.l.bf16 %v18652_v46  ;;  %v6005_v44 = vsel %vm5976_vm14, %v15935_v57, %v5480_v11  ;;  %v7816_v27 = vunpack.i.l.bf16 %v18653_v1  ;;  %v18656_v57 = vld [vmem:[#allocation188_spill] sm:$0xff]  ;;  %v18663_v63 = vld [vmem:[#allocation359_spill] sm:$0xff] }
 0x633   : > { %6215 = vrot.lane.b32.xlu1 %v6036_v24, %s8835_s30  ;;  %v4281_v52 = vsel %vm4265_vm15, %v4248_v22, %v18648_v4  ;;  %v5941_v54 = vsel %vm18649_vm10, %v5908_v7, %v5292_v56  ;;  %v3985_v53 = vsel %vm264_vm0, %v18654_v41, %v7801_v20  ;;  %vm18655_vm13 = vcmask 228352   ;;  %v18658_v24 = vld [vmem:[#allocation191_spill] sm:$0xff]  ;;  %v18669_v4 = vld [vmem:[#allocation282_spill] sm:$0xff] }
 0x634   : > { %v4018_v37 = vsel %vm18655_vm13, %v3985_v53, %v7811_v10  ;;  %v7821_v3 = vunpack.i.l.bf16 %v18656_v57  ;;  %v7806_v59 = vunpack.i.l.bf16 %v18657_v14  ;;  %v7826_v33 = vunpack.i.l.bf16 %v18658_v24  ;;  %v18662_v56 = vld [vmem:[#allocation267_spill] sm:$0xff]  ;;  %vm18673_vm10 = vmmov %vm18655_vm13  ;;  %v18674_v53 = vld [vmem:[#allocation185_spill] sm:$0xff] }
 0x635   : > { %v16093_v25 = vpop.permute.xlu0 %6165  ;;  %v4051_v8 = vsel %vm4034_vm11, %v4018_v37, %v7816_v27  ;;  %v7841_v21 = vunpack.i.l.bf16 %v18659_v34  ;;  %vm18661_vm4 = vcmask 523264   ;;  %v8141_v51 = vunpack.i.l.bf16 %v18662_v56  ;;  %vm18681_vm13 = vmmov %vm18673_vm10 }
 0x636   : > { %v16091_v61 = vpop.permute.xlu1 %6129  ;;  %v6313_v6 = vsel %vm6233_vm7, %v18643_v5, %v16093_v25  ;;  %v4084_v19 = vsel %vm4067_vm12, %v4051_v8, %v7806_v59  ;;  %v7812_v5 = vunpack.i.h.bf16 %v18652_v46  ;;  %v7817_v15 = vunpack.i.h.bf16 %v18653_v1 }
 0x637   : > { %v6304_v28 = vsel %vm6233_vm7, %v18641_v0, %v16091_v61  ;;  %6589 = vmatprep.mubr.f32.mxu1 %v6313_v6  ;;  %v4117_v35 = vsel %vm18661_vm4, %v4084_v19, %v7821_v3  ;;  %v7807_v41 = vunpack.i.h.bf16 %v18657_v14  ;;  %v7847_v37 = vunpack.i.h.bf16 %v18674_v53  ;;  %v18676_v3 = vld [vmem:[#allocation187_spill] sm:$0xff]  ;;  %v18677_v19 = vld [vmem:[#allocation88_spill] sm:$0xff] }
 0x638   : > { %6544 = vmatprep.mubr.f32.mxu0 %v6304_v28  ;;  %6590 = vmatmul.mubr.f32.gmra.mxu1 %v4281_v52  ;;  %v4150_v11 = vsel %vm18638_vm5, %v4117_v35, %v7826_v33  ;;  %v7802_v28 = vunpack.i.h.bf16 %v18651_v9  ;;  %v18670_v52 = vunpack.i.l.bf16 %v18669_v4  ;;  %v18672_v9 = vld [vmem:[#allocation180_spill] sm:$0xff]  ;;  %v7867_v33 = vunpack.i.h.bf16 %v18660_v36 }
 0x639   : > { %6545 = vmatmul.mubr.f32.gmra.mxu0 %v4272_v18  ;;  %v5482_v12 = vpop.permute.xlu0 %5481  ;;  %v4183_v0 = vsel %vm18640_vm2, %v4150_v11, %v7841_v21  ;;  %v7832_v20 = vunpack.i.h.bf16 %v18672_v9  ;;  %v7831_v1 = vunpack.i.l.bf16 %v18672_v9  ;;  %v18680_v11 = vld [vmem:[#allocation182_spill] sm:$0xff] }
 0x63a   : > { %v5388_v30 = vpop.permute.xlu1 %5387  ;;  %v6006_v62 = vsel %vm5976_vm14, %v16042_v47, %v5482_v12  ;;  %v7866_v47 = vunpack.i.l.bf16 %v18660_v36 }
 0x63b   : > { %v5974_v2 = vsel %vm18650_vm8, %v5941_v54, %v5388_v30 }
 0x63c   : > { %6225 = vrot.lane.b32.xlu1 %v5974_v2, %s8835_s30  ;;  %v4216_v45 = vsel %vm4199_vm1, %v4183_v0, %v7866_v47  ;;  %v18671_v2 = vld [vmem:[#allocation24_spill] sm:$0xff] }
 0x63d   : > { %v5610_v39 = vpop.permute.xlu0 %5609  ;;  %v3986_v12 = vsel %vm264_vm0, %v18671_v2, %v7802_v28  ;;  %v18688_v2 = vld [vmem:[#allocation290_spill] sm:$0xff] }
 0x63e   : > { %v5608_v58 = vpop.permute.xlu1 %5607  ;;  %v6038_v60 = vsel %vm264_vm0, %v6006_v62, %v5610_v39  ;;  %v4019_v10 = vsel %vm18673_vm10, %v3986_v12, %v7812_v5  ;;  %v7846_v62 = vunpack.i.l.bf16 %v18674_v53  ;;  %v18685_v5 = vld [vmem:[#allocation190_spill] sm:$0xff] }
 0x63f   : > { %v6037_v50 = vsel %vm264_vm0, %v6005_v44, %v5608_v58  ;;  %v4052_v27 = vsel %vm4034_vm11, %v4019_v10, %v7817_v15 }
 0x640   : > { %6219 = vrot.lane.b32.xlu0 %v6037_v50, %s8835_s30  ;;  %v7822_v50 = vunpack.i.h.bf16 %v18656_v57  ;;  %v7842_v57 = vunpack.i.h.bf16 %v18659_v34  ;;  %v4085_v14 = vsel %vm4067_vm12, %v4052_v27, %v7807_v41 }
 0x641   : > { %v5294_v31 = vpop.permute.xlu0 %5293 }
 0x642   : > { %v5198_v26 = vpop.permute.xlu1 %5197 }
 0x643   : > { %v5909_v42 = vsel %vm5877_vm3, %v18663_v63, %v5198_v26  ;;  %vm18667_vm3 = vmmov %vm18646_vm6  ;;  %v7827_v26 = vunpack.i.h.bf16 %v18658_v24  ;;  %v7837_v63 = vunpack.i.h.bf16 %v18680_v11 }
 0x644   : > { %6223 = vrot.lane.b32.xlu0 %v6038_v60, %s8835_s30  ;;  %v5942_v6 = vsel %vm18665_vm9, %v5909_v42, %v5294_v31  ;;  %v4249_v22 = vsel %vm18667_vm3, %v4216_v45, %v8141_v51  ;;  %vm18668_vm6 = vmmov %vm18650_vm8  ;;  %v7852_v60 = vunpack.i.h.bf16 %v18676_v3  ;;  %v7851_v31 = vunpack.i.l.bf16 %v18676_v3 }
 0x645   : > { %v6108_v29 = vpop.permute.xlu0 %6107  ;;  %v4282_v54 = vsel %vm4265_vm15, %v4249_v22, %v18670_v52  ;;  %vm18679_vm8 = vmmov %vm18661_vm4 }
 0x646   : > { %v5484_v48 = vpop.permute.xlu1 %5483  ;;  %v6234_v32 = vsel %vm6233_vm7, %v18664_v55, %v6108_v29  ;;  %v4118_v51 = vsel %vm18679_vm8, %v4085_v14, %v7822_v50  ;;  %v8142_v29 = vunpack.i.h.bf16 %v18662_v56  ;;  %vm18683_vm4 = vmmov %vm18638_vm5  ;;  %v18692_v50 = vld [vmem:[#allocation200_spill] sm:$0xff] }
 0x647   : > { %7278 = vmatprep.mubr.msk.f32.mxu0 %vm4199_vm1, %v6234_v32  ;;  %v6007_v44 = vsel %vm5976_vm14, %v5388_v30, %v5484_v48  ;;  %v18675_v30 = vld [vmem:[#allocation26_spill] sm:$0xff]  ;;  %v18678_v48 = vld [vmem:[#allocation25_spill] sm:$0xff]  ;;  %v4151_v55 = vsel %vm18683_vm4, %v4118_v51, %v7827_v26  ;;  %v7836_v32 = vunpack.i.l.bf16 %v18680_v11  ;;  %vm18684_vm5 = vmmov %vm18640_vm2 }
 0x648   : > { %v3988_v8 = vsel %vm264_vm0, %v18675_v30, %v7832_v20  ;;  %v3987_v35 = vsel %vm264_vm0, %v18678_v48, %v7831_v1  ;;  %v4184_v28 = vsel %vm18684_vm5, %v4151_v55, %v7842_v57  ;;  %vm18689_vm2 = vmmov %vm18667_vm3  ;;  %v18690_v20 = vld [vmem:[#allocation195_spill] sm:$0xff]  ;;  %v18696_v30 = vld [vmem:[#allocation14_spill] sm:$0xff] }
 0x649   : > { %v5390_v17 = vpop.permute.xlu0 %5389  ;;  %v4020_v36 = vsel %vm18681_vm13, %v3987_v35, %v7846_v62  ;;  %v4217_v15 = vsel %vm4199_vm1, %v4184_v28, %v7867_v33  ;;  %v7881_v10 = vunpack.i.l.bf16 %v18690_v20  ;;  %vm18693_vm9 = vmmov %vm18679_vm8  ;;  %v18695_v62 = vld [vmem:[#allocation268_spill] sm:$0xff]  ;;  %v18703_v51 = vld [vmem:[#allocation205_spill] sm:$0xff] }
 0x64a   : > { %v16146_v16 = vpop.permute.xlu1 %6169  ;;  %v5975_v7 = vsel %vm18668_vm6, %v5942_v6, %v5390_v17  ;;  %v4053_v0 = vsel %vm4034_vm11, %v4020_v36, %v7851_v31  ;;  %v7857_v6 = vunpack.i.h.bf16 %v18685_v5  ;;  %v4250_v9 = vsel %vm18689_vm2, %v4217_v15, %v8142_v29  ;;  %vm18694_vm3 = vmmov %vm18679_vm8  ;;  %v18699_v31 = vld [vmem:[#allocation198_spill] sm:$0xff]  ;;  %v18706_v55 = vld [vmem:[#allocation28_spill] sm:$0xff] }
 0x64b   : > { %v6314_v18 = vsel %vm6233_vm7, %v18666_v40, %v16146_v16  ;;  %6229 = vrot.lane.b32.xlu0 %v5975_v7, %s8835_s30  ;;  %v18686_v40 = vld [vmem:[#allocation332_spill] sm:$0xff]  ;;  %v4086_v1 = vsel %vm4067_vm12, %v4053_v0, %v7836_v32  ;;  %v8146_v26 = vunpack.i.l.bf16 %v18695_v62  ;;  %vm18697_vm6 = vmmov %vm18683_vm4  ;;  %v7872_v57 = vunpack.i.h.bf16 %v18699_v31 }
 0x64c   : > { %6594 = vmatprep.mubr.f32.mxu1 %v6314_v18  ;;  %v18687_v7 = vld [vmem:[#allocation192_spill] sm:$0xff]  ;;  %vm18700_vm8 = vmmov %vm18684_vm5  ;;  %v7897_v29 = vunpack.i.h.bf16 %v18703_v51  ;;  %v8147_v0 = vunpack.i.h.bf16 %v18695_v62  ;;  %v18717_v62 = vld [vmem:[#allocation30_spill] sm:$0xff] }
 0x64d   : > { %6595 = vmatmul.mubr.f32.gmra.mxu1 %v4282_v54  ;;  %v5612_v58 = vpop.permute.xlu0 %5611  ;;  %v7862_v52 = vunpack.i.h.bf16 %v18687_v7  ;;  %v7861_v54 = vunpack.i.l.bf16 %v18687_v7  ;;  %vm18701_vm13 = vmmov %vm18684_vm5  ;;  %v3990_v32 = vsel %vm264_vm0, %v18706_v55, %v7872_v57  ;;  %v18707_v28 = vld [vmem:[#allocation48_spill] sm:$0xff]  ;;  %v18711_v7 = vld [vmem:[#allocation202_spill] sm:$0xff] }
 0x64e   : > { %v5486_v46 = vpop.permute.xlu1 %5485  ;;  %v6039_v39 = vsel %vm264_vm0, %v6007_v44, %v5612_v58  ;;  %v18691_v44 = vunpack.i.h.bf16 %v18669_v4 }
 0x64f   : > { %6227 = vrot.lane.b32.xlu1 %v6039_v39, %s8835_s30  ;;  %v6008_v21 = vsel %vm5976_vm14, %v5390_v17, %v5486_v46  ;;  %vm18682_vm14 = vmmov %vm18673_vm10  ;;  %v7856_v17 = vunpack.i.l.bf16 %v18685_v5  ;;  %v7882_v46 = vunpack.i.h.bf16 %v18690_v20  ;;  %v7911_v39 = vunpack.i.l.bf16 %v18692_v50 }
 0x650   : > { %v4021_v42 = vsel %vm18682_vm14, %v3988_v8, %v7847_v37  ;;  %v4283_v58 = vsel %vm4265_vm15, %v4250_v9, %v18691_v44  ;;  %vm18698_vm10 = vmmov %vm18683_vm4  ;;  %vm18712_vm4 = vcmask 228352  }
 0x651   : > { %v5614_v47 = vpop.permute.xlu0 %5613  ;;  %v4054_v56 = vsel %vm4034_vm11, %v4021_v42, %v7852_v60  ;;  %v4119_v53 = vsel %vm18693_vm9, %v4086_v1, %v7856_v17  ;;  %vm18705_vm14 = vmmov %vm18689_vm2 }
 0x652   : > { %v6112_v59 = vpop.permute.xlu1 %6111  ;;  %v6040_v34 = vsel %vm264_vm0, %v6008_v21, %v5614_v47  ;;  %v4087_v27 = vsel %vm4067_vm12, %v4054_v56, %v7837_v63  ;;  %v4152_v3 = vsel %vm18697_vm6, %v4119_v53, %v7861_v54  ;;  %v7871_v21 = vunpack.i.l.bf16 %v18699_v31  ;;  %v18704_v63 = vld [vmem:[#allocation291_spill] sm:$0xff]  ;;  %vm18713_vm5 = vmmov %vm18712_vm4  ;;  %v18721_v31 = vld [vmem:[#allocation29_spill] sm:$0xff] }
 0x653   : > { %v6235_v24 = vsel %vm6233_vm7, %v18677_v19, %v6112_v59  ;;  %6231 = vrot.lane.b32.xlu1 %v6040_v34, %s8835_s30  ;;  %v4120_v37 = vsel %vm18694_vm3, %v4087_v27, %v7857_v6  ;;  %v4185_v14 = vsel %vm18700_vm8, %v4152_v3, %v7881_v10  ;;  %v7912_v19 = vunpack.i.h.bf16 %v18692_v50  ;;  %v18709_v6 = vld [vmem:[#allocation27_spill] sm:$0xff]  ;;  %v18715_v50 = vld [vmem:[#allocation209_spill] sm:$0xff]  ;;  %vm18724_vm9 = vmmov %vm18694_vm3  ;;  %s215_s30 = sand.u32 1, %s8798_s19  }
 0x654   : > { %7279 = vmatmul.mubr.msk.f32.vlgmr.msra.gmra.mxu0 %vm4199_vm1, %v6235_v24  ;;  %v4153_v60 = vsel %vm18698_vm10, %v4120_v37, %v7862_v52  ;;  %v18702_v24 = vld [vmem:[#allocation203_spill] sm:$0xff]  ;;  %v7896_v34 = vunpack.i.l.bf16 %v18703_v51  ;;  %v3989_v17 = vsel %vm264_vm0, %v18709_v6, %v7871_v21  ;;  %v7917_v52 = vunpack.i.h.bf16 %v18711_v7  ;;  %v18723_v21 = vld [vmem:[#allocation213_spill] sm:$0xff]  ;;  %vm18729_vm10 = vmmov %vm18712_vm4  ;;  %s7044_s9 = sshll.u32 %s215_s30, 8  ;;  %s16789_s16 = scalar_lea.sflag [#allocation5], %s215_s30 }
 0x655   : > { %v4186_v33 = vsel %vm18701_vm13, %v4153_v60, %v7882_v46  ;;  %v7892_v47 = vunpack.i.h.bf16 %v18702_v24  ;;  %v7891_v48 = vunpack.i.l.bf16 %v18702_v24  ;;  %v7916_v54 = vunpack.i.l.bf16 %v18711_v7  ;;  %v18714_v10 = vld [vmem:[#allocation207_spill] sm:$0xff]  ;;  %v18730_v7 = vld [vmem:[#allocation212_spill] sm:$0xff]  ;;  %vm18732_vm13 = vmmov %vm18689_vm2  ;;  %s16688_s6 = scalar_lea.vmem [#allocation4], %s7044_s9 }
 0x656   : > { %v6116_v45 = vpop.permute.xlu1 %6115  ;;  %v4219_v9 = vsel %vm4199_vm1, %v4186_v33, %v7912_v19  ;;  %v7901_v44 = vunpack.i.l.bf16 %v18714_v10  ;;  %v7902_v27 = vunpack.i.h.bf16 %v18714_v10  ;;  %v18720_v3 = vunpack.i.h.bf16 %v18707_v28  ;;  %s6978_s12 = sshll.u32 %s16688_s6, 4  ;;  %s16784_s12 = int_to_ptr.vmem [resolvable:$true] %s6978_s12 }
 0x657   : > { %v6236_v18 = vsel %vm6233_vm7, %v18686_v40, %v6116_v45  ;;  %v18708_v45 = vunpack.i.l.bf16 %v18707_v28  ;;  %v18710_v40 = vld [vmem:[#allocation201_spill] sm:$0xff]  ;;  %v4252_v37 = vsel %vm18689_vm2, %v4219_v9, %v8147_v0  ;;  %v3991_v57 = vsel %vm264_vm0, %v18721_v31, %v7916_v54  ;;  %vm18740_vm2 = vmmov %vm18694_vm3  ;;  %s8746_s22 = scalar_lea.vmem %s16784_s12, 4096  ;;  %p8753_p0 = scmp.lt.s32.totalorder %s16784_s12, %s8751_s8 }
 0x658   : > { %v16204_v22 = vpop.permute.xlu0 %6173  ;;  %7281 = vmatprep.mubr.msk.f32.mxu0 %vm4199_vm1, %v6236_v18  ;;  %v7877_v18 = vunpack.i.h.bf16 %v18710_v40  ;;  %v7876_v15 = vunpack.i.l.bf16 %v18710_v40  ;;  %v4285_v60 = vsel %vm4265_vm15, %v4252_v37, %v18720_v3  ;;  %v7956_v19 = vunpack.i.l.bf16 %v18723_v21  ;;  %p8747_p11 = scmp.ne.s32.totalorder %s16784_s12, %s8746_s22  ;;  %p8754_p1 = scmp.lt.s32.totalorder %s8752_s17, %s8746_s22 }
 0x659   : > { %v6315_v12 = vsel %vm6233_vm7, %v18688_v2, %v16204_v22  ;;  %v4023_v2 = vsel %vm18713_vm5, %v3990_v32, %v7892_v47  ;;  %v18728_v32 = vld [vmem:[#allocation139_spill] sm:$0xff]  ;;  %v7957_v54 = vunpack.i.h.bf16 %v18723_v21  ;;  %vm18739_vm5 = vmmov %vm18700_vm8  ;;  %v7947_v3 = vunpack.i.h.bf16 %v18730_v7 }
 0x65a   : > { %6599 = vmatprep.mubr.f32.mxu1 %v6315_v12  ;;  %v6120_v41 = vpop.permute.xlu1 %6119  ;;  %v4056_v46 = vsel %vm4034_vm11, %v4023_v2, %v7897_v29  ;;  %v18726_v29 = vld [vmem:[#allocation329_spill] sm:$0xff]  ;;  %p8748_p12 = pnand %p8747_p11, %p8906_p5  ;;  %p8755_p2 = por %p8754_p1, %p8753_p0 }
 0x65b   : > { %6600 = vmatmul.mubr.f32.gmra.mxu1 %v4283_v58  ;;  %v6237_v8 = vsel %vm6233_vm7, %v18696_v30, %v6120_v41  ;;  %v18716_v41 = vld [vmem:[#allocation292_spill] sm:$0xff]  ;;  %v4089_v47 = vsel %vm4067_vm12, %v4056_v46, %v7877_v18  ;;  %v18731_v2 = vld [vmem:[#allocation293_spill] sm:$0xff] }
 0x65c   : > { %v6124_v4 = vpop.permute.xlu0 %6123  ;;  %7282 = vmatmul.mubr.msk.f32.gmra.mxu0 %vm4199_vm1, %v6237_v8  ;;  %v18718_v30 = vld [vmem:[#allocation208_spill] sm:$0xff]  ;;  %p8749_p13 = pneg %p8748_p12 }
 0x65d   : > { %v6238_v59 = vsel %vm6233_vm7, %v15901_v49, %v6124_v4  ;;  %v4218_v49 = vsel %vm4199_vm1, %v4185_v14, %v7911_v39  ;;  %v7906_v39 = vunpack.i.l.bf16 %v18715_v50  ;;  %v7936_v8 = vunpack.i.l.bf16 %v18718_v30  ;;  %v18722_v14 = vld [vmem:[#allocation210_spill] sm:$0xff] }
 0x65e   : > { %7284 = vmatprep.mubr.msk.f32.mxu0 %vm4199_vm1, %v6238_v59  ;;  %v16240_v35 = vpop.permute.xlu1 %6177  ;;  %v4251_v42 = vsel %vm18705_vm14, %v4218_v49, %v8146_v26  ;;  %v3992_v26 = vsel %vm264_vm0, %v18717_v62, %v7917_v52  ;;  %v7941_v33 = vunpack.i.l.bf16 %v18722_v14  ;;  %v18725_v49 = vld [vmem:[#allocation269_spill] sm:$0xff]  ;;  %v7942_v6 = vunpack.i.h.bf16 %v18722_v14  ;;  %vm18737_vm14 = vmmov %vm18712_vm4  ;;  %p8756_p3 = pnand %p8755_p2, %p8749_p13 }
 0x65f   : > { %v6316_v36 = vsel %vm6233_vm7, %v18704_v63, %v16240_v35  ;;  %v4284_v5 = vsel %vm4265_vm15, %v4251_v42, %v18708_v45  ;;  %v8151_v51 = vunpack.i.l.bf16 %v18725_v49  ;;  %v18727_v63 = vld [vmem:[#allocation204_spill] sm:$0xff]  ;;  %v4122_v42 = vsel %vm18694_vm3, %v4089_v47, %v7902_v27  ;;  %v18735_v27 = vld [vmem:[#allocation67_spill] sm:$0xff]  ;;  %vm18744_vm3 = vmmov %vm18732_vm13 }
 0x660   : > { %v6128_v11 = vpop.permute.xlu0 %6127  ;;  %6604 = vmatprep.mubr.f32.mxu1 %v6316_v36  ;;  %v7921_v36 = vunpack.i.l.bf16 %v18727_v63  ;;  %v4024_v28 = vsel %vm18729_vm10, %v3991_v57, %v7936_v8  ;;  %v7907_v45 = vunpack.i.h.bf16 %v18715_v50  ;;  %v7946_v52 = vunpack.i.l.bf16 %v18730_v7  ;;  %vm18750_vm10 = vmmov %vm18739_vm5  ;;  %v18754_v7 = vld [vmem:[#allocation219_spill] sm:$0xff] }
 0x661   : > { %v6239_v56 = vsel %vm6233_vm7, %v16011_v13, %v6128_v11  ;;  %6605 = vmatmul.mubr.f32.gmra.mxu1 %v4284_v5  ;;  %v4022_v13 = vsel %vm18712_vm4, %v3989_v17, %v7891_v48  ;;  %v4057_v17 = vsel %vm4034_vm11, %v4024_v28, %v7941_v33  ;;  %v8152_v10 = vunpack.i.h.bf16 %v18725_v49  ;;  %vm18738_vm4 = vmmov %vm18697_vm6  ;;  %v18751_v28 = vld [vmem:[#allocation206_spill] sm:$0xff] }
 0x662   : > { %7285 = vmatmul.mubr.msk.f32.gmra.mxu0 %vm4199_vm1, %v6239_v56  ;;  %v6132_v12 = vpop.permute.xlu1 %6131  ;;  %v4055_v20 = vsel %vm4034_vm11, %v4022_v13, %v7896_v34  ;;  %v7937_v56 = vunpack.i.h.bf16 %v18718_v30  ;;  %v18736_v50 = vunpack.i.l.bf16 %v18735_v27  ;;  %v7922_v62 = vunpack.i.h.bf16 %v18727_v63 }
 0x663   : > { %v6240_v58 = vsel %vm6233_vm7, %v16091_v61, %v6132_v12  ;;  %v18719_v61 = vld [vmem:[#allocation211_spill] sm:$0xff]  ;;  %v4088_v59 = vsel %vm4067_vm12, %v4055_v20, %v7876_v15  ;;  %v18733_v20 = vld [vmem:[#allocation214_spill] sm:$0xff] }
 0x664   : > { %v16272_v1 = vpop.permute.xlu0 %6181  ;;  %7287 = vmatprep.mubr.msk.f32.mxu0 %vm4199_vm1, %v6240_v58  ;;  %v7926_v4 = vunpack.i.l.bf16 %v18719_v61  ;;  %v4121_v48 = vsel %vm18724_vm9, %v4088_v59, %v7901_v44  ;;  %v7927_v40 = vunpack.i.h.bf16 %v18719_v61  ;;  %v7951_v46 = vunpack.i.l.bf16 %v18733_v20  ;;  %v18734_v44 = vld [vmem:[#allocation262_spill] sm:$0xff]  ;;  %vm18742_vm9 = vmmov %vm18738_vm4 }
 0x665   : > { %v6317_v53 = vsel %vm6233_vm7, %v18716_v41, %v16272_v1  ;;  %v4154_v55 = vsel %vm18697_vm6, %v4121_v48, %v7906_v39  ;;  %v4025_v41 = vsel %vm18737_vm14, %v3992_v26, %v7937_v56  ;;  %v4090_v61 = vsel %vm4067_vm12, %v4057_v17, %v7921_v36  ;;  %v18745_v48 = vld [vmem:[#allocation197_spill] sm:$0xff]  ;;  %vm18747_vm6 = vmmov %vm18740_vm2  ;;  %v18748_v36 = vld [vmem:[#allocation270_spill] sm:$0xff] }
 0x666   : > { %6609 = vmatprep.mubr.f32.mxu1 %v6317_v53  ;;  %v6136_v24 = vpop.permute.xlu1 %6135  ;;  %v4187_v5 = vsel %vm18700_vm8, %v4154_v55, %v7926_v4  ;;  %v4155_v53 = vsel %vm18738_vm4, %v4122_v42, %v7907_v45  ;;  %v4058_v30 = vsel %vm4034_vm11, %v4025_v41, %v7942_v6  ;;  %v4123_v26 = vsel %vm18740_vm2, %v4090_v61, %v7946_v52  ;;  %v18749_v55 = vld [vmem:[#allocation363_spill] sm:$0xff]  ;;  %vm18752_vm8 = vmmov %vm18738_vm4 }
 0x667   : > { %6610 = vmatmul.mubr.f32.gmra.mxu1 %v4285_v60  ;;  %v6241_v34 = vsel %vm6233_vm7, %v18726_v29, %v6136_v24  ;;  %v4220_v15 = vsel %vm4199_vm1, %v4187_v5, %v7956_v19  ;;  %v4188_v8 = vsel %vm18739_vm5, %v4155_v53, %v7927_v40  ;;  %v18741_v60 = vld [vmem:[#allocation314_spill] sm:$0xff]  ;;  %v7952_v33 = vunpack.i.h.bf16 %v18733_v20  ;;  %v18753_v40 = vld [vmem:[#allocation215_spill] sm:$0xff]  ;;  %vm18758_vm14 = vmmov %vm18739_vm5 }
 0x668   : > { %v6140_v11 = vpop.permute.xlu0 %6139  ;;  %7288 = vmatmul.mubr.msk.f32.gmra.mxu0 %vm4199_vm1, %v6241_v34  ;;  %v4253_v9 = vsel %vm18732_vm13, %v4220_v15, %v8151_v51  ;;  %v4221_v14 = vsel %vm4199_vm1, %v4188_v8, %v7957_v54  ;;  %v4156_v21 = vsel %vm18742_vm9, %v4123_v26, %v7951_v46  ;;  %v18743_v19 = vld [vmem:[#allocation294_spill] sm:$0xff]  ;;  %v7886_v49 = vunpack.i.l.bf16 %v18745_v48  ;;  %v18756_v20 = vld [vmem:[#allocation295_spill] sm:$0xff]  ;;  %vm18757_vm13 = vmmov %vm18744_vm3 }
 0x669   : > { %v6242_v0 = vsel %vm6233_vm7, %v18728_v32, %v6140_v11  ;;  %v4286_v39 = vsel %vm4265_vm15, %v4253_v9, %v18736_v50  ;;  %v4254_v47 = vsel %vm18744_vm3, %v4221_v14, %v8152_v10  ;;  %v18746_v51 = vunpack.i.h.bf16 %v18735_v27  ;;  %v18759_v50 = vld [vmem:[#allocation76_spill] sm:$0xff]  ;;  %vm18767_vm5 = vmmov %vm18744_vm3 }
 0x66a   : > { %7290 = vmatprep.mubr.msk.f32.mxu0 %vm4199_vm1, %v6242_v0  ;;  %v16312_v18 = vpop.permute.xlu1 %6185  ;;  %v16331_v37 = vpop.f32.mrf.mxu1  ;;  %v4091_v34 = vsel %vm4067_vm12, %v4058_v30, %v7922_v62  ;;  %v8156_v42 = vunpack.i.l.bf16 %v18748_v36  ;;  %v4189_v56 = vsel %vm18750_vm10, %v4156_v21, %v7886_v49  ;;  %v7931_v45 = vunpack.i.l.bf16 %v18751_v28  ;;  %v18761_v62 = vld [vmem:[#allocation31_spill] sm:$0xff]  ;;  %vm18773_vm9 = vmmov %vm18747_vm6 }
 0x66b   : > { %v6318_v12 = vsel %vm6233_vm7, %v18731_v2, %v16312_v18  ;;  %v4287_v29 = vsel %vm4265_vm15, %v4254_v47, %v18746_v51  ;;  %v4124_v63 = vsel %vm18747_vm6, %v4091_v34, %v7947_v3  ;;  %v7887_v17 = vunpack.i.h.bf16 %v18745_v48  ;;  %v18755_v2 = vld [vmem:[#allocation221_spill] sm:$0xff]  ;;  %v18766_v47 = vld [vmem:[#allocation296_spill] sm:$0xff]  ;;  %vm18775_vm3 = vmmov %vm18752_vm8 }
 0x66c   : > { %v6144_v13 = vpop.permute.xlu0 %6143  ;;  %6614 = vmatprep.mubr.f32.mxu1 %v6318_v12  ;;  %v6553_v59 = vpop.f32.mrf.mxu1  ;;  %v4157_v5 = vsel %vm18752_vm8, %v4124_v63, %v7952_v33  ;;  %v7961_v15 = vunpack.i.l.bf16 %v18753_v40  ;;  %v7971_v52 = vunpack.i.l.bf16 %v18754_v7  ;;  %v7976_v12 = vunpack.i.l.bf16 %v18755_v2  ;;  %v18764_v33 = vld [vmem:[#allocation217_spill] sm:$0xff]  ;;  %v18768_v51 = vld [vmem:[#allocation32_spill] sm:$0xff]  ;;  %vm18777_vm6 = vmmov %vm18750_vm10 }
 0x66d   : > { %v6243_v58 = vsel %vm6233_vm7, %v18734_v44, %v6144_v13  ;;  %6615 = vmatmul.mubr.f32.gmra.mxu1 %v4286_v39  ;;  %v4222_v13 = vsel %vm4199_vm1, %v4189_v56, %v7931_v45  ;;  %v4190_v10 = vsel %vm18758_vm14, %v4157_v5, %v7887_v17  ;;  %v7932_v44 = vunpack.i.h.bf16 %v18751_v28  ;;  %v18769_v34 = vld [vmem:[#allocation229_spill] sm:$0xff]  ;;  %v18774_v5 = vld [vmem:[#allocation271_spill] sm:$0xff]  ;;  %vm18781_vm10 = vmmov %vm18767_vm5 }
 0x66e   : > { %7291 = vmatmul.mubr.msk.f32.gmra.mxu0 %vm4199_vm1, %v6243_v58  ;;  %v6148_v4 = vpop.permute.xlu1 %6147  ;;  %v4255_v46 = vsel %vm18757_vm13, %v4222_v13, %v8156_v42  ;;  %v8157_v58 = vunpack.i.h.bf16 %v18748_v36  ;;  %v18760_v39 = vunpack.i.l.bf16 %v18759_v50  ;;  %v7962_v53 = vunpack.i.h.bf16 %v18753_v40  ;;  %vm18782_vm8 = vmmov %vm18773_vm9 }
 0x66f   : > { %v6244_v31 = vsel %vm6233_vm7, %v18741_v60, %v6148_v4  ;;  %v3993_v30 = vsel %vm264_vm0, %v18761_v62, %v7961_v15  ;;  %v7972_v8 = vunpack.i.h.bf16 %v18754_v7  ;;  %vm18762_vm4 = vcmask 228352   ;;  %v18763_v60 = vld [vmem:[#allocation223_spill] sm:$0xff]  ;;  %v18780_v62 = vld [vmem:[#allocation297_spill] sm:$0xff]  ;;  %vm18785_vm13 = vmmov %vm18775_vm3 }
 0x670   : > { %v16341_v57 = vpop.permute.xlu0 %6189  ;;  %7293 = vmatprep.mubr.msk.f32.mxu0 %vm4199_vm1, %v6244_v31  ;;  %v4288_v41 = vsel %vm4265_vm15, %v4255_v46, %v18760_v39  ;;  %v4026_v61 = vsel %vm18762_vm4, %v3993_v30, %v7971_v52  ;;  %v7977_v3 = vunpack.i.h.bf16 %v18755_v2  ;;  %v7981_v31 = vunpack.i.l.bf16 %v18763_v60  ;;  %vm18771_vm2 = vmmov %vm18762_vm4  ;;  %v18778_v46 = vld [vmem:[#allocation220_spill] sm:$0xff] }
 0x671   : > { %v6319_v24 = vsel %vm6233_vm7, %v18743_v19, %v16341_v57  ;;  %v4059_v26 = vsel %vm4034_vm11, %v4026_v61, %v7976_v12  ;;  %v7966_v21 = vunpack.i.l.bf16 %v18764_v33  ;;  %v18765_v19 = vld [vmem:[#allocation225_spill] sm:$0xff]  ;;  %v18770_v63 = vunpack.i.h.bf16 %v18759_v50  ;;  %v18776_v12 = vld [vmem:[#allocation216_spill] sm:$0xff]  ;;  %v18779_v50 = vld [vmem:[#allocation222_spill] sm:$0xff] }
 0x672   : > { %6619 = vmatprep.mubr.f32.mxu1 %v6319_v24  ;;  %v6152_v11 = vpop.permute.xlu1 %6151  ;;  %v7986_v24 = vunpack.i.l.bf16 %v18765_v19  ;;  %v7967_v7 = vunpack.i.h.bf16 %v18764_v33  ;;  %v7982_v52 = vunpack.i.h.bf16 %v18763_v60  ;;  %v8011_v39 = vunpack.i.l.bf16 %v18779_v50  ;;  %v18786_v33 = vld [vmem:[#allocation33_spill] sm:$0xff]  ;;  %vm18787_vm14 = vmmov %vm18777_vm6 }
 0x673   : > { %6620 = vmatmul.mubr.f32.gmra.mxu1 %v4287_v29  ;;  %v6245_v32 = vsel %vm6233_vm7, %v18749_v55, %v6152_v11  ;;  %v3994_v29 = vsel %vm264_vm0, %v18768_v51, %v7962_v53  ;;  %v8001_v11 = vunpack.i.l.bf16 %v18769_v34  ;;  %v4092_v55 = vsel %vm4067_vm12, %v4059_v26, %v7966_v21  ;;  %vm18789_vm4 = vmmov %vm18771_vm2 }
 0x674   : > { %7294 = vmatmul.mubr.msk.f32.gmra.mxu0 %vm4199_vm1, %v6245_v32  ;;  %v4027_v42 = vsel %vm18771_vm2, %v3994_v29, %v7972_v8  ;;  %v18772_v32 = vld [vmem:[#allocation231_spill] sm:$0xff]  ;;  %v4125_v45 = vsel %vm18773_vm9, %v4092_v55, %v7981_v31  ;;  %v8007_v31 = vunpack.i.h.bf16 %v18778_v46  ;;  %vm18797_vm9 = vmmov %vm18782_vm8 }
 0x675   : > { %v6156_v0 = vpop.permute.xlu0 %6155  ;;  %v4060_v28 = vsel %vm4034_vm11, %v4027_v42, %v7977_v3  ;;  %v4158_v13 = vsel %vm18775_vm3, %v4125_v45, %v7986_v24  ;;  %v18783_v3 = vld [vmem:[#allocation93_spill] sm:$0xff]  ;;  %v18791_v42 = vld [vmem:[#allocation298_spill] sm:$0xff] }
 0x676   : > { %v6246_v6 = vsel %vm6233_vm7, %v15787_v43, %v6156_v0  ;;  %v8026_v0 = vunpack.i.l.bf16 %v18772_v32  ;;  %v18784_v26 = vunpack.i.l.bf16 %v18783_v3 }
 0x677   : > { %7296 = vmatprep.mubr.msk.f32.mxu0 %vm4199_vm1, %v6246_v6  ;;  %v8161_v6 = vunpack.i.l.bf16 %v18774_v5 }
 0x679   : > { %v16370_v54 = vpop.permute.xlu1 %6193  ;;  %v6160_v9 = vpop.permute.xlu0 %6159 }
 0x67a   : > { %v6320_v43 = vsel %vm6233_vm7, %v18756_v20, %v16370_v54  ;;  %v6247_v27 = vsel %vm6233_vm7, %v15903_v23, %v6160_v9  ;;  %v4223_v23 = vsel %vm4199_vm1, %v4190_v10, %v7932_v44  ;;  %v7992_v9 = vunpack.i.h.bf16 %v18776_v12 }
 0x67b   : > { %6624 = vmatprep.mubr.f32.mxu1 %v6320_v43  ;;  %7297 = vmatmul.mubr.msk.f32.gmra.mxu0 %vm4199_vm1, %v6247_v27  ;;  %v4256_v49 = vsel %vm18767_vm5, %v4223_v23, %v8157_v58  ;;  %v7991_v20 = vunpack.i.l.bf16 %v18776_v12  ;;  %v7987_v43 = vunpack.i.h.bf16 %v18765_v19  ;;  %v8006_v10 = vunpack.i.l.bf16 %v18778_v46  ;;  %v18798_v46 = vld [vmem:[#allocation272_spill] sm:$0xff] }
 0x67c   : > { %6625 = vmatmul.mubr.f32.gmra.mxu1 %v4288_v41  ;;  %v4289_v36 = vsel %vm4265_vm15, %v4256_v49, %v18770_v63  ;;  %v4093_v44 = vsel %vm4067_vm12, %v4060_v28, %v7967_v7  ;;  %v8002_v58 = vunpack.i.h.bf16 %v18769_v34  ;;  %v8027_v41 = vunpack.i.h.bf16 %v18772_v32  ;;  %v18790_v63 = vld [vmem:[#allocation224_spill] sm:$0xff] }
 0x67d   : > { %v6164_v4 = vpop.permute.xlu1 %6163  ;;  %v16398_v14 = vpop.permute.xlu0 %6197  ;;  %v4126_v61 = vsel %vm18782_vm8, %v4093_v44, %v7982_v52  ;;  %v3995_v21 = vsel %vm264_vm0, %v18786_v33, %v7991_v20  ;;  %v8012_v19 = vunpack.i.h.bf16 %v18779_v50  ;;  %v18793_v28 = vld [vmem:[#allocation228_spill] sm:$0xff]  ;;  %v8017_v52 = vunpack.i.h.bf16 %v18790_v63  ;;  %v18799_v50 = vld [vmem:[#allocation237_spill] sm:$0xff] }
 0x67e   : > { %v6248_v59 = vsel %vm6233_vm7, %v16034_v38, %v6164_v4  ;;  %v6321_v48 = vsel %vm6233_vm7, %v18766_v47, %v16398_v14  ;;  %v16410_v38 = vpop.f32.mrf.mxu1  ;;  %v8162_v4 = vunpack.i.h.bf16 %v18774_v5  ;;  %v18788_v47 = vld [vmem:[#allocation34_spill] sm:$0xff]  ;;  %v4028_v49 = vsel %vm18789_vm4, %v3995_v21, %v8006_v10  ;;  %vm18810_vm4 = vmmov %vm18771_vm2 }
 0x67f   : > { %7299 = vmatprep.mubr.msk.f32.mxu0 %vm4199_vm1, %v6248_v59  ;;  %6629 = vmatprep.mubr.f32.mxu1 %v6321_v48  ;;  %v4159_v59 = vsel %vm18785_vm13, %v4126_v61, %v7987_v43  ;;  %v3996_v48 = vsel %vm264_vm0, %v18788_v47, %v7992_v9  ;;  %v8021_v45 = vunpack.i.l.bf16 %v18793_v28  ;;  %v18794_v5 = vunpack.i.h.bf16 %v18783_v3  ;;  %vm18805_vm13 = vmmov %vm18775_vm3 }
 0x680   : > { %6630 = vmatmul.mubr.f32.gmra.mxu1 %v4289_v36  ;;  %v6558_v15 = vpop.f32.mrf.mxu1  ;;  %v4192_v24 = vsel %vm18787_vm14, %v4159_v59, %v8002_v58  ;;  %v8016_v36 = vunpack.i.l.bf16 %v18790_v63  ;;  %v8166_v10 = vunpack.i.l.bf16 %v18798_v46  ;;  %v8022_v58 = vunpack.i.h.bf16 %v18793_v28  ;;  %vm18809_vm14 = vmmov %vm18777_vm6 }
 0x681   : > { %v6168_v56 = vpop.permute.xlu1 %6167  ;;  %v6172_v40 = vpop.permute.xlu0 %6171  ;;  %v4225_v34 = vsel %vm4199_vm1, %v4192_v24, %v8027_v41  ;;  %v8167_v59 = vunpack.i.h.bf16 %v18798_v46  ;;  %v18803_v24 = vld [vmem:[#allocation299_spill] sm:$0xff] }
 0x682   : > { %v6249_v17 = vsel %vm6233_vm7, %v16093_v25, %v6168_v56  ;;  %v6250_v2 = vsel %vm6233_vm7, %v16146_v16, %v6172_v40  ;;  %v4191_v25 = vsel %vm18777_vm6, %v4158_v13, %v8001_v11  ;;  %v4061_v11 = vsel %vm4034_vm11, %v4028_v49, %v8011_v39  ;;  %v18795_v40 = vld [vmem:[#allocation230_spill] sm:$0xff]  ;;  %v18817_v46 = vld [vmem:[#allocation251_spill] sm:$0xff] }
 0x683   : > { %7300 = vmatmul.mubr.msk.f32.gmra.mxu0 %vm4199_vm1, %v6249_v17  ;;  %v4224_v16 = vsel %vm4199_vm1, %v4191_v25, %v8026_v0  ;;  %v4258_v32 = vsel %vm18767_vm5, %v4225_v34, %v8162_v4  ;;  %v18792_v0 = vld [vmem:[#allocation218_spill] sm:$0xff]  ;;  %v8041_v15 = vunpack.i.l.bf16 %v18795_v40  ;;  %v8031_v39 = vunpack.i.l.bf16 %v18799_v50 }
 0x684   : > { %7302 = vmatprep.mubr.msk.f32.mxu0 %vm4199_vm1, %v6250_v2  ;;  %v4257_v8 = vsel %vm18781_vm10, %v4224_v16, %v8161_v6  ;;  %v7996_v56 = vunpack.i.l.bf16 %v18792_v0  ;;  %v4291_v6 = vsel %vm4265_vm15, %v4258_v32, %v18794_v5  ;;  %v18796_v2 = vld [vmem:[#allocation240_spill] sm:$0xff]  ;;  %v7997_v43 = vunpack.i.h.bf16 %v18792_v0  ;;  %vm18801_vm10 = vmmov %vm18782_vm8 }
 0x685   : > { %v16437_v27 = vpop.permute.xlu1 %6201  ;;  %v6176_v53 = vpop.permute.xlu0 %6175  ;;  %v4290_v60 = vsel %vm4265_vm15, %v4257_v8, %v18784_v26  ;;  %v8071_v12 = vunpack.i.l.bf16 %v18796_v2  ;;  %v8042_v41 = vunpack.i.h.bf16 %v18795_v40  ;;  %v8072_v4 = vunpack.i.h.bf16 %v18796_v2  ;;  %vm18804_vm8 = vmmov %vm18767_vm5 }
 0x686   : > { %v6322_v30 = vsel %vm6233_vm7, %v18780_v62, %v16437_v27  ;;  %v6251_v23 = vsel %vm6233_vm7, %v16204_v22, %v6176_v53  ;;  %v4094_v13 = vsel %vm4067_vm12, %v4061_v11, %v7996_v56  ;;  %v18800_v62 = vld [vmem:[#allocation243_spill] sm:$0xff]  ;;  %v8032_v49 = vunpack.i.h.bf16 %v18799_v50  ;;  %v18807_v11 = vld [vmem:[#allocation97_spill] sm:$0xff]  ;;  %v18818_v50 = vld [vmem:[#allocation256_spill] sm:$0xff] }
 0x687   : > { %6634 = vmatprep.mubr.f32.mxu1 %v6322_v30  ;;  %7303 = vmatmul.mubr.msk.f32.gmra.mxu0 %vm4199_vm1, %v6251_v23  ;;  %v4127_v25 = vsel %vm18797_vm9, %v4094_v13, %v8016_v36  ;;  %v8051_v30 = vunpack.i.l.bf16 %v18800_v62  ;;  %v18802_v23 = vld [vmem:[#allocation245_spill] sm:$0xff] }
 0x688   : > { %6635 = vmatmul.mubr.f32.gmra.mxu1 %v4290_v60  ;;  %v4160_v16 = vsel %vm18775_vm3, %v4127_v25, %v8021_v45  ;;  %v8056_v3 = vunpack.i.l.bf16 %v18802_v23  ;;  %v8057_v32 = vunpack.i.h.bf16 %v18802_v23  ;;  %v18811_v45 = vld [vmem:[#allocation247_spill] sm:$0xff]  ;;  %v18814_v13 = vld [vmem:[#allocation241_spill] sm:$0xff] }
 0x689   : > { %v6180_v22 = vpop.permute.xlu1 %6179  ;;  %v16465_v29 = vpop.permute.xlu0 %6205  ;;  %v4193_v53 = vsel %vm18777_vm6, %v4160_v16, %v8041_v15  ;;  %v8061_v5 = vunpack.i.l.bf16 %v18811_v45  ;;  %v8036_v2 = vunpack.i.l.bf16 %v18814_v13 }
 0x68a   : > { %v6252_v51 = vsel %vm6233_vm7, %v16240_v35, %v6180_v22  ;;  %v6323_v55 = vsel %vm6233_vm7, %v18791_v42, %v16465_v29  ;;  %v4029_v35 = vsel %vm18771_vm2, %v3996_v48, %v8007_v31  ;;  %v4226_v31 = vsel %vm4199_vm1, %v4193_v53, %v8071_v12  ;;  %v18815_v12 = vld [vmem:[#allocation249_spill] sm:$0xff] }
 0x68b   : > { %7305 = vmatprep.mubr.msk.f32.mxu0 %vm4199_vm1, %v6252_v51  ;;  %6639 = vmatprep.mubr.f32.mxu1 %v6323_v55  ;;  %v4062_v17 = vsel %vm4034_vm11, %v4029_v35, %v8012_v19  ;;  %v16502_v8 = vpop.f32.mrf.mxu0  ;;  %v4259_v47 = vsel %vm18804_vm8, %v4226_v31, %v8166_v10  ;;  %v18806_v51 = vld [vmem:[#allocation35_spill] sm:$0xff]  ;;  %v8052_v42 = vunpack.i.h.bf16 %v18800_v62  ;;  %v8086_v10 = vunpack.i.l.bf16 %v18817_v46  ;;  %v18819_v62 = vld [vmem:[#allocation273_spill] sm:$0xff]  ;;  %vm18822_vm8 = vmmov %vm18767_vm5 }
 0x68c   : > { %6640 = vmatmul.mubr.f32.gmra.mxu1 %v4291_v6  ;;  %v3997_v34 = vsel %vm264_vm0, %v18806_v51, %v8031_v39  ;;  %v8116_v39 = vunpack.i.l.bf16 %v18818_v50  ;;  %v8067_v23 = vunpack.i.h.bf16 %v18815_v12  ;;  %v8087_v31 = vunpack.i.h.bf16 %v18817_v46  ;;  %v18823_v51 = vld [vmem:[#allocation242_spill] sm:$0xff] }
 0x68d   : > { %v6184_v7 = vpop.permute.xlu1 %6183  ;;  %v6188_v20 = vpop.permute.xlu0 %6187  ;;  %v4030_v55 = vsel %vm18810_vm4, %v3997_v34, %v8051_v30  ;;  %v8171_v30 = vunpack.i.l.bf16 %v18819_v62  ;;  %v8076_v34 = vunpack.i.l.bf16 %v18823_v51  ;;  %vm18831_vm4 = vmmov %vm18767_vm5 }
 0x68e   : > { %v6253_v9 = vsel %vm6233_vm7, %v16272_v1, %v6184_v7  ;;  %v6254_v44 = vsel %vm6233_vm7, %v16312_v18, %v6188_v20  ;;  %v4095_v1 = vsel %vm4067_vm12, %v4062_v17, %v7997_v43  ;;  %v16504_v18 = vpop.f32.mrf.mxu1  ;;  %v6518_v21 = vpop.f32.mrf.mxu0  ;;  %v4063_v0 = vsel %vm4034_vm11, %v4030_v55, %v8056_v3  ;;  %v18812_v17 = vld [vmem:[#allocation300_spill] sm:$0xff] }
 0x68f   : > { %7306 = vmatmul.mubr.msk.f32.gmra.mxu0 %vm4199_vm1, %v6253_v9  ;;  %v4128_v61 = vsel %vm18801_vm10, %v4095_v1, %v8017_v52  ;;  %v18813_v7 = vld [vmem:[#allocation36_spill] sm:$0xff]  ;;  %v8066_v9 = vunpack.i.l.bf16 %v18815_v12  ;;  %v18816_v20 = vunpack.i.h.bf16 %v18807_v11  ;;  %v8037_v43 = vunpack.i.h.bf16 %v18814_v13  ;;  %vm18820_vm10 = vmmov %vm18797_vm9 }
 0x690   : > { %7308 = vmatprep.mubr.msk.f32.mxu0 %vm4199_vm1, %v6254_v44  ;;  %v6563_v19 = vpop.f32.mrf.mxu1  ;;  %v4161_v48 = vsel %vm18805_vm13, %v4128_v61, %v8022_v58  ;;  %v3998_v52 = vsel %vm264_vm0, %v18813_v7, %v8032_v49  ;;  %v8062_v58 = vunpack.i.h.bf16 %v18811_v45  ;;  %v4096_v16 = vsel %vm4067_vm12, %v4063_v0, %v8036_v2  ;;  %vm18824_vm13 = vmmov %vm18775_vm3  ;;  %v18829_v0 = vld [vmem:[#allocation250_spill] sm:$0xff] }
 0x691   : > { %v16509_v26 = vpop.permute.xlu1 %6209  ;;  %v6192_v60 = vpop.permute.xlu0 %6191  ;;  %v4194_v36 = vsel %vm18809_vm14, %v4161_v48, %v8042_v41  ;;  %v4031_v25 = vsel %vm18771_vm2, %v3998_v52, %v8052_v42  ;;  %v4129_v53 = vsel %vm18797_vm9, %v4096_v16, %v8061_v5  ;;  %vm18828_vm14 = vmmov %vm18777_vm6  ;;  %v18832_v52 = vld [vmem:[#allocation37_spill] sm:$0xff] }
 0x692   : > { %v6255_v33 = vsel %vm6233_vm7, %v16341_v57, %v6192_v60  ;;  %v6324_v22 = vsel %vm6233_vm7, %v18803_v24, %v16509_v26  ;;  %v18808_v57 = vunpack.i.l.bf16 %v18807_v11  ;;  %v4227_v28 = vsel %vm4199_vm1, %v4194_v36, %v8072_v4 }
 0x693   : > { %6644 = vmatprep.mubr.f32.mxu1 %v6324_v22  ;;  %7309 = vmatmul.mubr.msk.f32.gmra.mxu0 %vm4199_vm1, %v6255_v33  ;;  %v4260_v15 = vsel %vm18767_vm5, %v4227_v28, %v8167_v59  ;;  %v4064_v44 = vsel %vm4034_vm11, %v4031_v25, %v8057_v32  ;;  %v4162_v3 = vsel %vm18775_vm3, %v4129_v53, %v8066_v9  ;;  %v8172_v24 = vunpack.i.h.bf16 %v18819_v62  ;;  %vm18834_vm5 = vmmov %vm18771_vm2  ;;  %v18840_v53 = vld [vmem:[#allocation236_spill] sm:$0xff] }
 0x694   : > { %v4292_v63 = vsel %vm4265_vm15, %v4259_v47, %v18808_v57  ;;  %v4097_v60 = vsel %vm4067_vm12, %v4064_v44, %v8037_v43  ;;  %v4195_v59 = vsel %vm18777_vm6, %v4162_v3, %v8086_v10  ;;  %v18821_v47 = vld [vmem:[#allocation301_spill] sm:$0xff]  ;;  %v3999_v13 = vsel %vm264_vm0, %v18832_v52, %v8076_v34  ;;  %v18836_v10 = vld [vmem:[#allocation244_spill] sm:$0xff]  ;;  %vm18838_vm2 = vmmov %vm18797_vm9 }
 0x695   : > { %6645 = vmatmul.mubr.f32.gmra.mxu1 %v4292_v63  ;;  %v6196_v56 = vpop.permute.xlu1 %6195  ;;  %v16532_v35 = vpop.permute.xlu0 %6213  ;;  %v4130_v33 = vsel %vm18820_vm10, %v4097_v60, %v8062_v58  ;;  %v4228_v19 = vsel %vm4199_vm1, %v4195_v59, %v8116_v39  ;;  %v18825_v63 = vld [vmem:[#allocation116_spill] sm:$0xff]  ;;  %v8081_v44 = vunpack.i.l.bf16 %v18836_v10  ;;  %vm18839_vm9 = vmmov %vm18775_vm3  ;;  %v8046_v62 = vunpack.i.l.bf16 %v18840_v53 }
 0x696   : > { %v6256_v6 = vsel %vm6233_vm7, %v16370_v54, %v6196_v56  ;;  %v6325_v40 = vsel %vm6233_vm7, %v18812_v17, %v16532_v35  ;;  %v4293_v54 = vsel %vm4265_vm15, %v4260_v15, %v18816_v20  ;;  %v4261_v49 = vsel %vm18822_vm8, %v4228_v19, %v8171_v30  ;;  %v18837_v58 = vld [vmem:[#allocation260_spill] sm:$0xff]  ;;  %v18841_v30 = vld [vmem:[#allocation274_spill] sm:$0xff]  ;;  %vm18842_vm3 = vmmov %vm18777_vm6 }
 0x697   : > { %6649 = vmatprep.mubr.f32.mxu1 %v6325_v40  ;;  %7311 = vmatprep.mubr.msk.f32.mxu0 %vm4199_vm1, %v6256_v6  ;;  %v4163_v11 = vsel %vm18824_vm13, %v4130_v33, %v8067_v23  ;;  %v18826_v36 = vunpack.i.l.bf16 %v18825_v63  ;;  %v8101_v56 = vunpack.i.l.bf16 %v18829_v0  ;;  %v18830_v40 = vld [vmem:[#allocation303_spill] sm:$0xff]  ;;  %v18833_v12 = vunpack.i.h.bf16 %v18825_v63  ;;  %v18843_v23 = vld [vmem:[#allocation246_spill] sm:$0xff]  ;;  %v18844_v33 = vld [vmem:[#allocation304_spill] sm:$0xff] }
 0x698   : > { %v4196_v32 = vsel %vm18828_vm14, %v4163_v11, %v8087_v31  ;;  %v8111_v16 = vunpack.i.l.bf16 %v18837_v58  ;;  %v8091_v3 = vunpack.i.l.bf16 %v18843_v23  ;;  %v8077_v60 = vunpack.i.h.bf16 %v18823_v51  ;;  %vm18845_vm6 = vmmov %vm18831_vm4 }
 0x699   : > { %6650 = vmatmul.mubr.f32.gmra.mxu1 %v4293_v54  ;;  %v6200_v1 = vpop.permute.xlu1 %6199  ;;  %v6204_v41 = vpop.permute.xlu0 %6203  ;;  %v4294_v42 = vsel %vm4265_vm15, %v4261_v49, %v18826_v36  ;;  %v18835_v54 = vld [vmem:[#allocation255_spill] sm:$0xff]  ;;  %v8102_v19 = vunpack.i.h.bf16 %v18829_v0  ;;  %vm18849_vm10 = vmmov %vm18834_vm5  ;;  %v8082_v0 = vunpack.i.h.bf16 %v18836_v10  ;;  %v8092_v52 = vunpack.i.h.bf16 %v18843_v23 }
 0x69a   : > { %v6257_v61 = vsel %vm6233_vm7, %v16398_v14, %v6200_v1  ;;  %v6258_v4 = vsel %vm6233_vm7, %v16437_v27, %v6204_v41  ;;  %v8117_v14 = vunpack.i.h.bf16 %v18818_v50  ;;  %v8106_v43 = vunpack.i.l.bf16 %v18835_v54  ;;  %vm18852_vm8 = vmmov %vm18842_vm3 }
 0x69b   : > { %7312 = vmatmul.mubr.msk.f32.gmra.mxu0 %vm4199_vm1, %v6257_v61  ;;  %v8176_v61 = vunpack.i.l.bf16 %v18841_v30 }
 0x69c   : > { %7314 = vmatprep.mubr.msk.f32.mxu0 %vm4199_vm1, %v6258_v4  ;;  %v4229_v5 = vsel %vm4199_vm1, %v4196_v32, %v8117_v14 }
 0x69d   : > { %v16572_v21 = vpop.permute.xlu1 %6217  ;;  %v6208_v27 = vpop.permute.xlu0 %6207  ;;  %v4262_v7 = vsel %vm18831_vm4, %v4229_v5, %v8172_v24  ;;  %v18846_v24 = vld [vmem:[#allocation127_spill] sm:$0xff] }
 0x69e   : > { %v6259_v22 = vsel %vm6233_vm7, %v16465_v29, %v6208_v27  ;;  %v6326_v48 = vsel %vm6233_vm7, %v18821_v47, %v16572_v21  ;;  %v18827_v29 = vld [vmem:[#allocation248_spill] sm:$0xff]  ;;  %v4295_v9 = vsel %vm4265_vm15, %v4262_v7, %v18833_v12 }
 0x69f   : > { %6654 = vmatprep.mubr.f32.mxu1 %v6326_v48  ;;  %7315 = vmatmul.mubr.msk.f32.gmra.mxu0 %vm4199_vm1, %v6259_v22  ;;  %v16585_v57 = vpop.f32.mrf.mxu0  ;;  %v8096_v55 = vunpack.i.l.bf16 %v18827_v29  ;;  %v8097_v59 = vunpack.i.h.bf16 %v18827_v29  ;;  %v18847_v22 = vunpack.i.l.bf16 %v18846_v24  ;;  %v18848_v48 = vld [vmem:[#allocation38_spill] sm:$0xff] }
 0x6a0   : > { %6655 = vmatmul.mubr.f32.gmra.mxu1 %v4294_v42  ;;  %v4000_v49 = vsel %vm264_vm0, %v18848_v48, %v8077_v60  ;;  %v8107_v42 = vunpack.i.h.bf16 %v18835_v54  ;;  %vm18850_vm0 = vmmov %vm18838_vm2  ;;  %v18855_v54 = vunpack.i.h.bf16 %v18846_v24 }
 0x6a1   : > { %v6212_v28 = vpop.permute.xlu1 %6211  ;;  %v6222_v45 = vpop.permute.xlu0 %6221  ;;  %v4033_v11 = vsel %vm18849_vm10, %v4000_v49, %v8097_v59 }
 0x6a2   : > { %v6260_v6 = vsel %vm6233_vm7, %v16509_v26, %v6212_v28  ;;  %v6523_v17 = vpop.f32.mrf.mxu0  ;;  %v6327_v15 = vsel %vm6233_vm7, %v18830_v40, %v6222_v45  ;;  %v16602_v2 = vpop.f32.mrf.mxu1  ;;  %v4032_v26 = vsel %vm18834_vm5, %v3999_v13, %v8096_v55  ;;  %v4066_v36 = vsel %vm4034_vm11, %v4033_v11, %v8102_v19 }
 0x6a3   : > { %6659 = vmatprep.mubr.f32.mxu1 %v6327_v15  ;;  %7317 = vmatprep.mubr.msk.f32.mxu0 %vm4199_vm1, %v6260_v6  ;;  %v4065_v20 = vsel %vm4034_vm11, %v4032_v26, %v8101_v56  ;;  %v8112_v56 = vunpack.i.h.bf16 %v18837_v58  ;;  %v4099_v28 = vsel %vm4067_vm12, %v4066_v36, %v8082_v0  ;;  %vm18851_vm11 = vmmov %vm18839_vm9  ;;  %v8177_v15 = vunpack.i.h.bf16 %v18841_v30 }
 0x6a4   : > { %6660 = vmatmul.mubr.f32.gmra.mxu1 %v4295_v9  ;;  %v6568_v46 = vpop.f32.mrf.mxu1  ;;  %v4098_v39 = vsel %vm4067_vm12, %v4065_v20, %v8081_v44  ;;  %v4132_v6 = vsel %vm18850_vm0, %v4099_v28, %v8107_v42  ;;  %v18853_v9 = vld [vmem:[#allocation305_spill] sm:$0xff]  ;;  %vm18854_vm12 = vmmov %vm18831_vm4 }
 0x6a5   : > { %v6216_v25 = vpop.permute.xlu1 %6215  ;;  %v4131_v1 = vsel %vm18838_vm2, %v4098_v39, %v8106_v43  ;;  %v4165_v40 = vsel %vm18851_vm11, %v4132_v6, %v8112_v56 }
 0x6a6   : > { %v6261_v50 = vsel %vm6233_vm7, %v16532_v35, %v6216_v25  ;;  %v4164_v41 = vsel %vm18839_vm9, %v4131_v1, %v8111_v16 }
 0x6a7   : > { %7318 = vmatmul.mubr.msk.f32.gmra.mxu0 %vm4199_vm1, %v6261_v50  ;;  %v4197_v4 = vsel %vm18842_vm3, %v4164_v41, %v8046_v62 }
 0x6a8   : > { %v4230_v35 = vsel %vm4199_vm1, %v4197_v4, %v8091_v3 }
 0x6a9   : > { %v4263_v27 = vsel %vm18845_vm6, %v4230_v35, %v8176_v61 }
 0x6aa   : > { %v4296_v47 = vsel %vm4265_vm15, %v4263_v27, %v18847_v22 }
 0x6ae   : > { %v6226_v31 = vpop.permute.xlu1 %6225 }
 0x6af   : > { %v6328_v14 = vsel %vm6233_vm7, %v18844_v33, %v6226_v31  ;;  %v16680_v33 = vld [vmem:[%s16834_s4] ss:$0 sm:$0xff] }
 0x6b0   : > { %6664 = vmatprep.mubr.f32.mxu1 %v6328_v14  ;;  %v6522_v14 = vadd.f32 %v16680_v33, %v16585_v57  ;;  %v6517_v19 = vadd.f32 %v16680_v33, %v16502_v8 }
 0x6b1   : > { %6665 = vmatmul.mubr.f32.gmra.mxu1 %v4296_v47 }
 0x6b2   : > { %v6220_v63 = vpop.permute.xlu0 %6219 }
 0x6b3   : > { %v16634_v51 = vpop.f32.mrf.mxu0  ;;  %v16636_v34 = vpop.f32.mrf.mxu1  ;;  %v6262_v29 = vsel %vm6233_vm7, %v16572_v21, %v6220_v63  ;;  %v8047_v21 = vunpack.i.h.bf16 %v18840_v53 }
 0x6b4   : > { %7320 = vmatprep.mubr.msk.f32.mxu0 %vm4199_vm1, %v6262_v29  ;;  %v6527_v8 = vadd.f32 %v16680_v33, %v16634_v51 }
 0x6b5   : > { %v6528_v55 = vpop.f32.mrf.mxu0  ;;  %v6573_v32 = vpop.f32.mrf.mxu1  ;;  %v4198_v7 = vsel %vm18852_vm8, %v4165_v40, %v8047_v21 }
 0x6b6   : > { %v6224_v5 = vpop.permute.xlu0 %6223  ;;  %v4231_v12 = vsel %vm4199_vm1, %v4198_v7, %v8092_v52 }
 0x6b7   : > { %v6263_v17 = vsel %vm6233_vm7, %v6222_v45, %v6224_v5  ;;  %v4264_v45 = vsel %vm18854_vm12, %v4231_v12, %v8177_v15 }
 0x6b8   : > { %7321 = vmatmul.mubr.msk.f32.gmra.mxu0 %vm4199_vm1, %v6263_v17  ;;  %v4297_v43 = vsel %vm4265_vm15, %v4264_v45, %v18855_v54 }
 0x6bd   : > { %v6230_v13 = vpop.permute.xlu0 %6229 }
 0x6be   : > { %v6329_v26 = vsel %vm6233_vm7, %v18853_v9, %v6230_v13 }
 0x6bf   : > { %6669 = vmatprep.mubr.f32.mxu1 %v6329_v26 }
 0x6c0   : > { %6670 = vmatmul.mubr.f32.gmra.mxu1 %v4297_v43 }
 0x6c1   : > { %v6228_v25 = vpop.permute.xlu1 %6227 }
 0x6c2   : > { %v6264_v10 = vsel %vm6233_vm7, %v6226_v31, %v6228_v25  ;;  %v6562_v25 = vadd.f32 %v16680_v33, %v16504_v18  ;;  %v6572_v18 = vadd.f32 %v16680_v33, %v16636_v34 }
 0x6c3   : > { %7323 = vmatprep.mubr.msk.f32.mxu0 %vm4199_vm1, %v6264_v10 }
 0x6c4   : > { %v6531_v20 = vpop.f32.mrf.mxu0 }
 0x6c5   : > { %v6232_v58 = vpop.permute.xlu1 %6231  ;;  %v6532_v57 = vadd.f32 %v16680_v33, %v6531_v20 }
 0x6c6   : > { %v6533_v46 = vpop.f32.mrf.mxu0  ;;  %v6265_v50 = vsel %vm6233_vm7, %v6230_v13, %v6232_v58  ;;  %v6552_v13 = vadd.f32 %v16680_v33, %v16331_v37  ;;  %v6557_v37 = vadd.f32 %v16680_v33, %v16410_v38  ;;  %v6567_v38 = vadd.f32 %v16680_v33, %v16602_v2 }
 0x6c7   : > { %7324 = vmatmul.mubr.msk.f32.gmra.mxu0 %vm4199_vm1, %v6265_v50 }
 0x6c9   : > { %v16664_v44 = vpop.f32.mrf.mxu1 }
 0x6cb   : > { %v6578_v16 = vpop.f32.mrf.mxu1 }
 0x6d8   : > { %v6536_v39 = vpop.f32.mrf.mxu0  ;;  %v16668_v1 = vpop.f32.mrf.mxu1 }
 0x6d9   : > { %v6537_v6 = vadd.f32 %v16680_v33, %v6536_v39 }
 0x6da   : > { %v6538_v41 = vpop.f32.mrf.mxu0  ;;  %v6583_v53 = vpop.f32.mrf.mxu1 }
 0x6e8   : > { %v6541_v62 = vpop.f32.mrf.mxu0 }
 0x6e9   : > { %v6542_v0 = vadd.f32 %v16680_v33, %v6541_v62 }
 0x6ea   : > { %v6543_v30 = vpop.f32.mrf.mxu0  ;;  %v16670_v61 = vpop.f32.mrf.mxu1 }
 0x6ec   : > { %v6588_v4 = vpop.f32.mrf.mxu1 }
 0x6f8   : > { %v16672_v3 = vpop.f32.mrf.mxu1 }
 0x6f9   : > { %v6546_v23 = vpop.f32.mrf.mxu0 }
 0x6fa   : > { %v6593_v31 = vpop.f32.mrf.mxu1  ;;  %v6547_v26 = vadd.f32 %v16680_v33, %v6546_v23 }
 0x6fb   : > { %v6548_v60 = vpop.f32.mrf.mxu0 }
 0x70d   : > { %v16674_v35 = vpop.f32.mrf.mxu1 }
 0x70f   : > { %v6598_v59 = vpop.f32.mrf.mxu1 }
 0x714   : > { %v7280_v27 = vpop.f32.mrf.mxu0 }
 0x715   : > { %v6747_v24 = vadd.f32 %v7280_v27, %v6522_v14  ;;  %v6582_v27 = vadd.f32 %v16680_v33, %v16668_v1  ;;  %v6592_v1 = vadd.f32 %v16680_v33, %v16672_v3 }
 0x716   : > { %v6741_v22 = vpop.f32.mrf.mxu0 }
 0x717   : > { %v6901_v47 = vmax.f32 %v6747_v24, 0.0  ;;  %v6742_v48 = vadd.f32 %v6741_v22, %v6517_v19  ;;  %v6577_v22 = vadd.f32 %v16680_v33, %v16664_v44  ;;  %v6587_v44 = vadd.f32 %v16680_v33, %v16670_v61 }
 0x719   : > { %6933 = vst [vmem:[%s16688_s6 + $0x8] sm:$0xff] %v6901_v47  ;;  %v6900_v49 = vmax.f32 %v6742_v48, 0.0 }
 0x71b   : > { %v16691_v11 = vpop.f32.mrf.mxu1  ;;  %6932 = vst [vmem:[%s16688_s6] sm:$0xff] %v6900_v49 }
 0x71c   : > { %v7283_v36 = vpop.f32.mrf.mxu0 }
 0x71d   : > { %v6603_v63 = vpop.f32.mrf.mxu1  ;;  %v6757_v42 = vadd.f32 %v7283_v36, %v6532_v57 }
 0x71e   : > { %v6751_v29 = vpop.f32.mrf.mxu0 }
 0x71f   : > { %v6903_v55 = vmax.f32 %v6757_v42, 0.0  ;;  %v6752_v32 = vadd.f32 %v6751_v29, %v6527_v8 }
 0x721   : > { %6935 = vst [vmem:[%s16688_s6 + $0x18] sm:$0xff] %v6903_v55  ;;  %v6902_v56 = vmax.f32 %v6752_v32, 0.0  ;;  %v16699_v5 = vpop.f32.mrf.mxu1 }
 0x722   : > { %v7286_v28 = vpop.f32.mrf.mxu0 }
 0x723   : > { %v6767_v17 = vadd.f32 %v7286_v28, %v6542_v0  ;;  %6934 = vst [vmem:[%s16688_s6 + $0x10] sm:$0xff] %v6902_v56  ;;  %v6608_v21 = vpop.f32.mrf.mxu1  ;;  %v6602_v56 = vadd.f32 %v16680_v33, %v16691_v11 }
 0x724   : > { %v6761_v40 = vpop.f32.mrf.mxu0 }
 0x725   : > { %v6905_v51 = vmax.f32 %v6767_v17, 0.0  ;;  %v6762_v15 = vadd.f32 %v6761_v40, %v6537_v6  ;;  %v6597_v17 = vadd.f32 %v16680_v33, %v16674_v35  ;;  %v6607_v35 = vadd.f32 %v16680_v33, %v16699_v5 }
 0x727   : > { %6937 = vst [vmem:[%s16688_s6 + $0x28] sm:$0xff] %v6905_v51  ;;  %v6904_v7 = vmax.f32 %v6762_v15, 0.0  ;;  %v16704_v52 = vpop.f32.mrf.mxu1 }
 0x728   : > { %v7289_v9 = vpop.f32.mrf.mxu0  ;;  %v6612_v11 = vadd.f32 %v16680_v33, %v16704_v52 }
 0x729   : > { %6936 = vst [vmem:[%s16688_s6 + $0x20] sm:$0xff] %v6904_v7  ;;  %v6613_v12 = vpop.f32.mrf.mxu1  ;;  %v6777_v45 = vadd.f32 %v7289_v9, %v6552_v13 }
 0x72a   : > { %v6771_v20 = vpop.f32.mrf.mxu0 }
 0x72b   : > { %v6907_v54 = vmax.f32 %v6777_v45, 0.0  ;;  %v6772_v43 = vadd.f32 %v6771_v20, %v6547_v26 }
 0x72d   : > { %6939 = vst [vmem:[%s16688_s6 + $0x38] sm:$0xff] %v6907_v54  ;;  %v6906_v46 = vmax.f32 %v6772_v43, 0.0  ;;  %v16713_v58 = vpop.f32.mrf.mxu1 }
 0x72e   : > { %v7292_v10 = vpop.f32.mrf.mxu0  ;;  %v6617_v52 = vadd.f32 %v16680_v33, %v16713_v58 }
 0x72f   : > { %v6787_v16 = vadd.f32 %v7292_v10, %v6562_v25  ;;  %6938 = vst [vmem:[%s16688_s6 + $0x30] sm:$0xff] %v6906_v46  ;;  %v6618_v39 = vpop.f32.mrf.mxu1 }
 0x730   : > { %v6781_v50 = vpop.f32.mrf.mxu0 }
 0x731   : > { %v6909_v41 = vmax.f32 %v6787_v16, 0.0  ;;  %v6782_v53 = vadd.f32 %v6781_v50, %v6557_v37 }
 0x733   : > { %6941 = vst [vmem:[%s16688_s6 + $0x48] sm:$0xff] %v6909_v41  ;;  %v6908_v62 = vmax.f32 %v6782_v53, 0.0  ;;  %v6621_v30 = vpop.f32.mrf.mxu1 }
 0x734   : > { %v7295_v23 = vpop.f32.mrf.mxu0  ;;  %v6622_v43 = vadd.f32 %v16680_v33, %v6621_v30 }
 0x735   : > { %6940 = vst [vmem:[%s16688_s6 + $0x40] sm:$0xff] %v6908_v62  ;;  %v6623_v4 = vpop.f32.mrf.mxu1  ;;  %v6797_v60 = vadd.f32 %v7295_v23, %v6572_v18 }
 0x736   : > { %v6791_v31 = vpop.f32.mrf.mxu0 }
 0x737   : > { %v6911_v59 = vmax.f32 %v6797_v60, 0.0  ;;  %v6792_v14 = vadd.f32 %v6791_v31, %v6567_v38 }
 0x739   : > { %6943 = vst [vmem:[%s16688_s6 + $0x58] sm:$0xff] %v6911_v59  ;;  %v6910_v19 = vmax.f32 %v6792_v14, 0.0 }
 0x73b   : > { %v7298_v24 = vpop.f32.mrf.mxu0  ;;  %6942 = vst [vmem:[%s16688_s6 + $0x50] sm:$0xff] %v6910_v19 }
 0x73c   : > { %v16727_v34 = vpop.f32.mrf.mxu1  ;;  %v6807_v47 = vadd.f32 %v7298_v24, %v6582_v27 }
 0x73d   : > { %v6801_v2 = vpop.f32.mrf.mxu0  ;;  %v6627_v58 = vadd.f32 %v16680_v33, %v16727_v34 }
 0x73e   : > { %v6628_v48 = vpop.f32.mrf.mxu1  ;;  %v6913_v49 = vmax.f32 %v6807_v47, 0.0  ;;  %v6802_v57 = vadd.f32 %v6801_v2, %v6577_v22 }
 0x740   : > { %6945 = vst [vmem:[%s16688_s6 + $0x68] sm:$0xff] %v6913_v49  ;;  %v6912_v63 = vmax.f32 %v6802_v57, 0.0  ;;  %v6631_v36 = vpop.f32.mrf.mxu1 }
 0x741   : > { %v6632_v62 = vadd.f32 %v16680_v33, %v6631_v36 }
 0x742   : > { %6944 = vst [vmem:[%s16688_s6 + $0x60] sm:$0xff] %v6912_v63  ;;  %v6633_v8 = vpop.f32.mrf.mxu1 }
 0x743   : > { %v7301_v42 = vpop.f32.mrf.mxu0 }
 0x744   : > { %v6817_v29 = vadd.f32 %v7301_v42, %v6592_v1 }
 0x745   : > { %v6811_v55 = vpop.f32.mrf.mxu0 }
 0x746   : > { %v6915_v32 = vmax.f32 %v6817_v29, 0.0  ;;  %v6812_v0 = vadd.f32 %v6811_v55, %v6587_v44 }
 0x747   : > { %v7304_v6 = vpop.f32.mrf.mxu0 }
 0x748   : > { %6947 = vst [vmem:[%s16688_s6 + $0x78] sm:$0xff] %v6915_v32  ;;  %v6914_v28 = vmax.f32 %v6812_v0, 0.0  ;;  %v6636_v3 = vpop.f32.mrf.mxu1  ;;  %v6827_v40 = vadd.f32 %v7304_v6, %v6602_v56 }
 0x749   : > { %v6821_v21 = vpop.f32.mrf.mxu0  ;;  %v6637_v14 = vadd.f32 %v16680_v33, %v6636_v3 }
 0x74a   : > { %6946 = vst [vmem:[%s16688_s6 + $0x70] sm:$0xff] %v6914_v28  ;;  %v6638_v61 = vpop.f32.mrf.mxu1  ;;  %v6917_v51 = vmax.f32 %v6827_v40, 0.0  ;;  %v6822_v15 = vadd.f32 %v6821_v21, %v6597_v17 }
 0x74c   : > { %6949 = vst [vmem:[%s16688_s6 + $0x88] sm:$0xff] %v6917_v51  ;;  %v6916_v7 = vmax.f32 %v6822_v15, 0.0  ;;  %v6641_v13 = vpop.f32.mrf.mxu1 }
 0x74d   : > { %v6642_v38 = vadd.f32 %v16680_v33, %v6641_v13 }
 0x74e   : > { %6948 = vst [vmem:[%s16688_s6 + $0x80] sm:$0xff] %v6916_v7  ;;  %v6643_v12 = vpop.f32.mrf.mxu1 }
 0x74f   : > { %v7307_v9 = vpop.f32.mrf.mxu0 }
 0x750   : > { %v6837_v26 = vadd.f32 %v7307_v9, %v6612_v11 }
 0x751   : > { %v6831_v45 = vpop.f32.mrf.mxu0 }
 0x752   : > { %v6919_v20 = vmax.f32 %v6837_v26, 0.0  ;;  %v6832_v54 = vadd.f32 %v6831_v45, %v6607_v35 }
 0x753   : > { %v7310_v46 = vpop.f32.mrf.mxu0 }
 0x754   : > { %6951 = vst [vmem:[%s16688_s6 + $0x98] sm:$0xff] %v6919_v20  ;;  %v6918_v25 = vmax.f32 %v6832_v54, 0.0  ;;  %v6847_v10 = vadd.f32 %v7310_v46, %v6622_v43 }
 0x755   : > { %v6646_v37 = vpop.f32.mrf.mxu1  ;;  %v6841_v16 = vpop.f32.mrf.mxu0 }
 0x756   : > { %6950 = vst [vmem:[%s16688_s6 + $0x90] sm:$0xff] %v6918_v25  ;;  %v6921_v50 = vmax.f32 %v6847_v10, 0.0  ;;  %v6842_v5 = vadd.f32 %v6841_v16, %v6617_v52  ;;  %v6647_v1 = vadd.f32 %v16680_v33, %v6646_v37 }
 0x757   : > { %v6648_v39 = vpop.f32.mrf.mxu1 }
 0x758   : > { %6953 = vst [vmem:[%s16688_s6 + $0xa8] sm:$0xff] %v6921_v50  ;;  %v6920_v41 = vmax.f32 %v6842_v5, 0.0 }
 0x759   : > { %v6651_v53 = vpop.f32.mrf.mxu1 }
 0x75a   : > { %6952 = vst [vmem:[%s16688_s6 + $0xa0] sm:$0xff] %v6920_v41  ;;  %v6652_v57 = vadd.f32 %v16680_v33, %v6651_v53 }
 0x75b   : > { %v6653_v30 = vpop.f32.mrf.mxu1  ;;  %v7313_v18 = vpop.f32.mrf.mxu0 }
 0x75c   : > { %v6857_v4 = vadd.f32 %v7313_v18, %v6632_v62 }
 0x75d   : > { %v6851_v23 = vpop.f32.mrf.mxu0 }
 0x75e   : > { %v6923_v60 = vmax.f32 %v6857_v4, 0.0  ;;  %v6852_v31 = vadd.f32 %v6851_v23, %v6627_v58 }
 0x75f   : > { %v7316_v59 = vpop.f32.mrf.mxu0 }
 0x760   : > { %6955 = vst [vmem:[%s16688_s6 + $0xb8] sm:$0xff] %v6923_v60  ;;  %v6922_v27 = vmax.f32 %v6852_v31, 0.0  ;;  %v6867_v19 = vadd.f32 %v7316_v59, %v6642_v38  ;;  %v6656_v24 = vpop.f32.mrf.mxu1 }
 0x761   : > { %v6861_v22 = vpop.f32.mrf.mxu0  ;;  %v6657_v6 = vadd.f32 %v16680_v33, %v6656_v24 }
 0x762   : > { %6954 = vst [vmem:[%s16688_s6 + $0xb0] sm:$0xff] %v6922_v27  ;;  %v6925_v47 = vmax.f32 %v6867_v19, 0.0  ;;  %v6862_v34 = vadd.f32 %v6861_v22, %v6637_v14  ;;  %v6658_v2 = vpop.f32.mrf.mxu1 }
 0x764   : > { %6957 = vst [vmem:[%s16688_s6 + $0xc8] sm:$0xff] %v6925_v47  ;;  %v6924_v48 = vmax.f32 %v6862_v34, 0.0  ;;  %v6661_v49 = vpop.f32.mrf.mxu1 }
 0x765   : > { %v6662_v56 = vadd.f32 %v16680_v33, %v6661_v49 }
 0x766   : > { %6956 = vst [vmem:[%s16688_s6 + $0xc0] sm:$0xff] %v6924_v48  ;;  %v6663_v63 = vpop.f32.mrf.mxu1 }
 0x767   : > { %v7319_v36 = vpop.f32.mrf.mxu0 }
 0x768   : > { %v6877_v8 = vadd.f32 %v7319_v36, %v6652_v57 }
 0x769   : > { %v6871_v42 = vpop.f32.mrf.mxu0 }
 0x76a   : > { %v6927_v44 = vmax.f32 %v6877_v8, 0.0  ;;  %v6872_v29 = vadd.f32 %v6871_v42, %v6647_v1 }
 0x76c   : > { %6959 = vst [vmem:[%s16688_s6 + $0xd8] sm:$0xff] %v6927_v44  ;;  %v6926_v55 = vmax.f32 %v6872_v29, 0.0 }
 0x76e   : > { %6958 = vst [vmem:[%s16688_s6 + $0xd0] sm:$0xff] %v6926_v55 }
 0x771   : > { %v6666_v32 = vpop.f32.mrf.mxu1 }
 0x772   : > { %v6667_v11 = vadd.f32 %v16680_v33, %v6666_v32 }
 0x773   : > { %v6668_v0 = vpop.f32.mrf.mxu1 }
 0x778   : > { %v7322_v28 = vpop.f32.mrf.mxu0 }
 0x779   : > { %v6887_v3 = vadd.f32 %v7322_v28, %v6662_v56 }
 0x77a   : > { %v6881_v17 = vpop.f32.mrf.mxu0 }
 0x77b   : > { %v6929_v40 = vmax.f32 %v6887_v3, 0.0  ;;  %v6882_v21 = vadd.f32 %v6881_v17, %v6657_v6 }
 0x77d   : > { %6961 = vst [vmem:[%s16688_s6 + $0xe8] sm:$0xff] %v6929_v40  ;;  %v6928_v61 = vmax.f32 %v6882_v21, 0.0 }
 0x77f   : > { %6960 = vst [vmem:[%s16688_s6 + $0xe0] sm:$0xff] %v6928_v61 }
 0x780   : > { %v6671_v51 = vpop.f32.mrf.mxu1 }
 0x781   : > { %v6672_v7 = vadd.f32 %v16680_v33, %v6671_v51 }
 0x782   : > { %v6673_v15 = vpop.f32.mrf.mxu1 }
 0x787   : > { %v7325_v13 = vpop.f32.mrf.mxu0 }
 0x788   : > { %v6897_v12 = vadd.f32 %v7325_v13, %v6672_v7 }
 0x789   : > { %v6891_v9 = vpop.f32.mrf.mxu0 }
 0x78a   : > { %v6931_v35 = vmax.f32 %v6897_v12, 0.0  ;;  %v6892_v26 = vadd.f32 %v6891_v9, %v6667_v11 }
 0x78c   : > { %6963 = vst [vmem:[%s16688_s6 + $0xf8] sm:$0xff] %v6931_v35  ;;  %v6930_v45 = vmax.f32 %v6892_v26, 0.0 }
 0x78e   : > { %6962 = vst [vmem:[%s16688_s6 + $0xf0] sm:$0xff] %v6930_v45 }
 0x78f   : > { %8759 = shalt.err (!%p8756_p3)
}
 0x790   : > { %s8760_s23 = scalar_lea.hbm %s16781_s14, 4096  ;;  %s8764_s26 = scalar_lea.hbm %s16835_s5, 8192 }
 0x791   : > { %p8761_p4 = scmp.ne.s32.totalorder %s16781_s14, %s8760_s23  ;;  %p8765_p9 = scmp.lt.s32.totalorder %s16781_s14, %s16835_s5 }
 0x792   : > { %p8766_p10 = scmp.lt.s32.totalorder %s8764_s26, %s8760_s23 }
 0x793   : > { %p8762_p7 = pnand %p8761_p4, %p8906_p5 }
 0x794   : > { %p8767_p11 = por %p8766_p10, %p8765_p9 }
 0x795   : > { %p8763_p8 = pneg %p8762_p7 }
 0x797   : > { %p8768_p12 = pnand %p8767_p11, %p8763_p8 }
 0x799   : > { %8771 = shalt.err (!%p8768_p12)
}
 0x79a   : > { %s8837_s11 = smov 128  }
 0x79b   : > { %7390 = dma.vmem_to_hbm [thread:$0]  (%p8906_p5), %s16784_s12, 4096, %s16781_s14, %s16789_s16, %s8837_s11, %s8837_s11, %s8819_s10  }
 0x79c PF: > { %p7396_p13 = scmp.ge.s32.totalorder %s8806_s21, 2  ;;  %s6993_s13 = sand.u32 1, %s8794_s18  }
 0x79d   : > { %s6994_s15 = scalar_lea.sflag [#allocation5], %s6993_s13 }
 0x79e   : > { %p7393_p0 = pnand %p7396_p13, %p8910_p6 }
 0x7a0   : > { %p7394_p1 = pneg %p7393_p0 }
 0x7a2   : > { %8789 = dma.done.wait (%p7394_p1), %s6994_s15, 4096  }
 0x7a3   : > { %8791 = vsyncadd (%p7394_p1), %s6994_s15, 4294963200  ;;  %p15_p2 = scmp.ge.s32.totalorder %s8893_s24, 4   ;;  %s18856_s18 = smov %s8798_s19 }
 0x7a4   : > { %s18857_s19 = smov %s8802_s20  ;;  %s18858_s20 = smov %s8904_s27 }
 0x7a5   : > { %s18859_s21 = smov %s8893_s24  ;;  %17 = sbr.rel (!%p15_p2) target bundleno = 3 (0x3), region = 77 }
 0x7aa   :  { %6999 = vsyncpa [#allocation5], 1 }
 0x7ab   :  { %7001 = vsyncpa [#allocation5 + $0x1], 1 }

</bundles_post_ra>
